<compile_context>
chip_gen: v7x
topology: tpu7x:2x2x1
jax: 0.10.0
libtpu: 0.0.40
codegen_flags: <defaults>
</compile_context>

<pallas_src>
import functools

import numpy as np

import jax
import jax.numpy as jnp
from jax.experimental import pallas as pl
from jax.experimental.pallas import tpu as pltpu


KSZ = 5   # conv kernel size (module's conv_size)
PAD = 2   # conv padding


# --------------------------------------------------------------------------
# Host-side constant builders (grid-invariant, passed as VMEM inputs).
# --------------------------------------------------------------------------
def _build_conv_lhs(wgt, th):
    """Banded LHS: L[(co,rr),(ci,kx,ri)] = W[co,ci,ri-rr,kx] for 0 <= ri-rr < KSZ."""
    wgt = np.asarray(wgt, np.float32)
    cout, cin, kh, kw = wgt.shape
    blk = th + 8                       # th+4 real rows, padded to a multiple of 8
    lhs = np.zeros((cout, th, cin, kw, blk), np.float32)
    for rr in range(th):
        for ky in range(kh):
            lhs[:, rr, :, :, rr + ky] = wgt[:, :, ky, :]
    return jnp.asarray(lhs.reshape(cout * th, cin * kw * blk))


def _col_selectors(w):
    """(w, w//2) 0/1 matrices picking even / odd columns (exact strided select)."""
    e = np.zeros((w, w // 2), np.float32)
    o = np.zeros((w, w // 2), np.float32)
    idx = np.arange(w // 2)
    e[2 * idx, idx] = 1.0
    o[2 * idx + 1, idx] = 1.0
    return jnp.asarray(e), jnp.asarray(o)


def _row_selectors(m):
    """(m//2, m) 0/1 matrices picking even / odd rows (exact strided select)."""
    e = np.zeros((m // 2, m), np.float32)
    o = np.zeros((m // 2, m), np.float32)
    idx = np.arange(m // 2)
    e[idx, 2 * idx] = 1.0
    o[idx, 2 * idx + 1] = 1.0
    return jnp.asarray(e), jnp.asarray(o)


# --------------------------------------------------------------------------
# Conv(5x5, pad=2) + bias + ReLU + MaxPool(2x2, stride 2), fused, all cout
# channels per program.  Grid = (batch, row_band).
# --------------------------------------------------------------------------
def _conv_relu_pool_kernel(l_ref, b_ref, swe_ref, swo_ref, sre_ref, sro_ref,
                           x_ref, o_ref, s_ref, *, cin, cout, th, w):
    # l_ref   : VMEM (cout*th, cin*KSZ*(th+8))  banded weights (host-built)
    # b_ref   : VMEM (cout*th, 1)               per-row bias
    # swe/swo : VMEM (w, w//2)                  even/odd column selectors
    # sre/sro : VMEM (cout*th//2, cout*th)      even/odd row selectors
    # x_ref   : VMEM (1, cin, H+8, w+4)         zero-padded input image
    # o_ref   : VMEM (1, cout, th//2, w//2)     pooled output band
    # s_ref   : VMEM (cin*KSZ*(th+8), w)        shifted-row slab scratch
    blk = th + 8
    th2 = th // 2
    r0 = pl.multiple_of(pl.program_id(1) * th, 8)

    # Build S[(ci,kx,ri), x] = Xpad[ci, r0+ri, x+kx]  (lane-dense block stores).
    for ci in range(cin):
        band = x_ref[0, ci, pl.ds(r0, blk), :]            # (blk, w+4)
        for kx in range(KSZ):
            base = (ci * KSZ + kx) * blk
            s_ref[base:base + blk, :] = band[:, kx:kx + w]

    # Convolution for every output channel at once, on the MXU.
    y = jnp.dot(l_ref[...], s_ref[...], preferred_element_type=jnp.float32)
    y = jnp.maximum(y + b_ref[...], 0.0)                  # (cout*th, w)

    # 2x2 max-pool (stride 2) via exact 0/1 selector matmuls (still MXU work).
    pe = jnp.dot(y, swe_ref[...], preferred_element_type=jnp.float32)
    po = jnp.dot(y, swo_ref[...], preferred_element_type=jnp.float32)
    pw = jnp.maximum(pe, po)                              # (cout*th, w//2)
    re = jnp.dot(sre_ref[...], pw, preferred_element_type=jnp.float32)
    ro = jnp.dot(sro_ref[...], pw, preferred_element_type=jnp.float32)
    pooled = jnp.maximum(re, ro)                          # (cout*th//2, w//2)

    for co in range(cout):
        o_ref[0, co] = pooled[co * th2:(co + 1) * th2, :]


def conv_relu_pool(x, wgt, bias, *, th, vmem_mb):
    # x: (B, Cin, H, W) f32, wgt: (Cout, Cin, 5, 5), bias: (Cout,)
    bsz, cin, h, w = x.shape
    cout = wgt.shape[0]
    assert h % th == 0 and th % 16 == 0 and w % 2 == 0
    h2, w2, th2 = h // 2, w // 2, th // 2
    m = cout * th
    k = cin * KSZ * (th + 8)

    # Rows padded (2, 6) so every band reads th+8 sublane-aligned rows; the
    # extra bottom rows only ever meet zero weight columns.  Cols padded (2, 2).
    # TODO(synk): this jnp.pad is a small standalone XLA op that could be
    # folded into the kernel with in-kernel edge handling.
    xp = jnp.pad(x, ((0, 0), (0, 0), (PAD, PAD + 4), (PAD, PAD)))
    hp, wp = h + 8, w + 4

    lhs = _build_conv_lhs(wgt, th)
    bias_e = jnp.asarray(np.repeat(np.asarray(bias, np.float32), th)[:, None])
    swe, swo = _col_selectors(w)
    sre, sro = _row_selectors(m)

    kernel = functools.partial(_conv_relu_pool_kernel,
                               cin=cin, cout=cout, th=th, w=w)
    return pl.pallas_call(
        kernel,
        out_shape=jax.ShapeDtypeStruct((bsz, cout, h2, w2), jnp.float32),
        grid_spec=pltpu.PrefetchScalarGridSpec(
            num_scalar_prefetch=0,
            grid=(bsz, h // th),
            in_specs=[
                pl.BlockSpec((m, k), lambda b, t: (0, 0)),          # banded weights
                pl.BlockSpec((m, 1), lambda b, t: (0, 0)),          # bias
                pl.BlockSpec((w, w2), lambda b, t: (0, 0)),         # col selectors
                pl.BlockSpec((w, w2), lambda b, t: (0, 0)),
                pl.BlockSpec((m // 2, m), lambda b, t: (0, 0)),     # row selectors
                pl.BlockSpec((m // 2, m), lambda b, t: (0, 0)),
                pl.BlockSpec((1, cin, hp, wp), lambda b, t: (b, 0, 0, 0)),
            ],
            out_specs=pl.BlockSpec((1, cout, th2, w2), lambda b, t: (b, 0, t, 0)),
            scratch_shapes=[pltpu.VMEM((k, w), jnp.float32)],
        ),
        compiler_params=pltpu.CompilerParams(
            dimension_semantics=("parallel", "parallel"),
            vmem_limit_bytes=vmem_mb * 1024 * 1024),
    )(lhs, bias_e, swe, swo, sre, sro, xp)


# --------------------------------------------------------------------------
# fc1 (K-tiled, accumulating) + ReLU, with fc2 + ReLU + fc3 fused into the
# final grid step.  Grid = (K1 // tk,).
# --------------------------------------------------------------------------
def _fc_head_kernel(x_ref, w1_ref, b1_ref, w2_ref, b2_ref, w3_ref, b3_ref,
                    o_ref, acc_ref):
    @pl.when(pl.program_id(0) == 0)
    def _():
        acc_ref[...] = jnp.zeros_like(acc_ref)

    acc_ref[...] += jnp.dot(x_ref[...], w1_ref[...],
                            preferred_element_type=jnp.float32)

    @pl.when(pl.program_id(0) == pl.num_programs(0) - 1)
    def _():
        h1 = jnp.maximum(acc_ref[...] + b1_ref[...], 0.0)
        h2 = jnp.maximum(
            jnp.dot(h1, w2_ref[...], preferred_element_type=jnp.float32)
            + b2_ref[...], 0.0)
        o_ref[...] = jnp.dot(h2, w3_ref[...],
                             preferred_element_type=jnp.float32) + b3_ref[...]


def fc_head(x, w1, b1, w2, b2, w3, b3, *, tk):
    m, k = x.shape
    n1 = w1.shape[1]
    n2 = w2.shape[1]
    n3 = w3.shape[1]
    assert k % tk == 0 and tk % 128 == 0
    return pl.pallas_call(
        _fc_head_kernel,
        out_shape=jax.ShapeDtypeStruct((m, n3), jnp.float32),
        grid_spec=pltpu.PrefetchScalarGridSpec(
            num_scalar_prefetch=0,
            grid=(k // tk,),
            in_specs=[
                pl.BlockSpec((m, tk), lambda ki: (0, ki)),
                pl.BlockSpec((tk, n1), lambda ki: (ki, 0)),
                pl.BlockSpec((1, n1), lambda ki: (0, 0)),
                pl.BlockSpec((n1, n2), lambda ki: (0, 0)),
                pl.BlockSpec((1, n2), lambda ki: (0, 0)),
                pl.BlockSpec((n2, n3), lambda ki: (0, 0)),
                pl.BlockSpec((1, n3), lambda ki: (0, 0)),
            ],
            out_specs=pl.BlockSpec((m, n3), lambda ki: (0, 0)),
            scratch_shapes=[pltpu.VMEM((m, n1), jnp.float32)],
        ),
        compiler_params=pltpu.CompilerParams(
            dimension_semantics=("arbitrary",),
            vmem_limit_bytes=24 * 1024 * 1024),
    )(x, w1, b1.reshape(1, n1), w2, b2.reshape(1, n2), w3, b3.reshape(1, n3))


# --------------------------------------------------------------------------
# Full forward pass (use_batch_norm=False path of LeNet5.forward)
# --------------------------------------------------------------------------
def lenet5_forward(x, params):
    p1 = conv_relu_pool(x, params["conv1_w"], params["conv1_b"],
                        th=48, vmem_mb=24)                     # (B, 6, 144, 216)
    p2 = conv_relu_pool(p1, params["conv2_w"], params["conv2_b"],
                        th=16, vmem_mb=16)                     # (B, 16, 72, 108)
    flat = p2.reshape(p2.shape[0], -1)     # matches torch x.view(B, C*H*W) on NCHW
    return fc_head(flat, params["fc1_w"], params["fc1_b"],
                   params["fc2_w"], params["fc2_b"],
                   params["fc3_w"], params["fc3_b"], tk=13824)  # (B, 10)


def init_params(key):
    def uinit(k, shape, fan_in):
        bound = 1.0 / float(fan_in) ** 0.5
        return jax.random.uniform(k, shape, jnp.float32, -bound, bound)

    ks = jax.random.split(key, 10)
    return {
        "conv1_w": uinit(ks[0], (6, 3, 5, 5), 3 * 25),
        "conv1_b": uinit(ks[1], (6,), 3 * 25),
        "conv2_w": uinit(ks[2], (16, 6, 5, 5), 6 * 25),
        "conv2_b": uinit(ks[3], (16,), 6 * 25),
        # torch stores fc weights as (out, in); we generate (in, out) directly.
        "fc1_w": uinit(ks[4], (72 * 108 * 16, 120), 72 * 108 * 16),
        "fc1_b": uinit(ks[5], (120,), 72 * 108 * 16),
        "fc2_w": uinit(ks[6], (120, 84), 120),
        "fc2_b": uinit(ks[7], (84,), 120),
        "fc3_w": uinit(ks[8], (84, 10), 84),
        "fc3_b": uinit(ks[9], (10,), 84),
    }


if __name__ == "__main__":
    key = jax.random.PRNGKey(0)
    pkey, xkey = jax.random.split(key)
    params = init_params(pkey)

    # Input spatial size implied by fc1 (72*108*16 features after two 2x2
    # max-pools) -> (B, 3, 288, 432).  Batch = 2.
    x = jax.random.normal(xkey, (2, 3, 288, 432), jnp.float32)

    out = lenet5_forward(x, params)
    out = jax.block_until_ready(out)

    assert out.shape == (2, 10), out.shape
    assert bool(jnp.all(jnp.isfinite(out)))
    print("KERNEL_OK")
</pallas_src>

<mosaic_0001>
module attributes {stable_mosaic.version = 11 : i64} {
  func.func @_conv_relu_pool_kernel(%arg0: i32, %arg1: i32, %arg2: memref<288x840xf32, #tpu.memory_space<vmem>>, %arg3: memref<288x1xf32, #tpu.memory_space<vmem>>, %arg4: memref<432x216xf32, #tpu.memory_space<vmem>>, %arg5: memref<432x216xf32, #tpu.memory_space<vmem>>, %arg6: memref<144x288xf32, #tpu.memory_space<vmem>>, %arg7: memref<144x288xf32, #tpu.memory_space<vmem>>, %arg8: memref<1x3x296x436xf32, #tpu.memory_space<vmem>>, %arg9: memref<1x6x24x216xf32, #tpu.memory_space<vmem>>, %arg10: memref<840x432xf32, #tpu.memory_space<vmem>>) attributes {dimension_semantics = [#tpu.dimension_semantics<parallel>, #tpu.dimension_semantics<parallel>], iteration_bounds = array<i64: 2, 6>, scalar_prefetch = 0 : i64, scratch_operands = 1 : i64, tpu.core_type = #tpu.core_type<tc>, window_params = [{pipeline_mode = #tpu.pipeline_mode<synchronous>, transform_indices = @transform_0, window_bounds = array<i64: 288, 840>}, {pipeline_mode = #tpu.pipeline_mode<synchronous>, transform_indices = @transform_1, window_bounds = array<i64: 288, 1>}, {pipeline_mode = #tpu.pipeline_mode<synchronous>, transform_indices = @transform_2, window_bounds = array<i64: 432, 216>}, {pipeline_mode = #tpu.pipeline_mode<synchronous>, transform_indices = @transform_3, window_bounds = array<i64: 432, 216>}, {pipeline_mode = #tpu.pipeline_mode<synchronous>, transform_indices = @transform_4, window_bounds = array<i64: 144, 288>}, {pipeline_mode = #tpu.pipeline_mode<synchronous>, transform_indices = @transform_5, window_bounds = array<i64: 144, 288>}, {transform_indices = @transform_6, window_bounds = array<i64: 1, 3, 296, 436>}, {transform_indices = @transform_7, window_bounds = array<i64: 1, 6, 24, 216>}]} {
    %c48_i32 = arith.constant 48 : i32
    %0 = arith.muli %arg1, %c48_i32 : i32
    %1 = tpu.assume_multiple %0, 8 : i32
    %c0 = arith.constant 0 : index
    %c0_0 = arith.constant 0 : index
    %2 = arith.index_cast %1 : i32 to index
    %c0_1 = arith.constant 0 : index
    %3 = vector.load %arg8[%c0, %c0_0, %2, %c0_1] : memref<1x3x296x436xf32, #tpu.memory_space<vmem>>, vector<1x1x56x436xf32>
    %4 = vector.shape_cast %3 : vector<1x1x56x436xf32> to vector<56x436xf32>
    %5 = vector.extract_strided_slice %4 {offsets = [0, 0], sizes = [56, 432], strides = [1, 1]} : vector<56x436xf32> to vector<56x432xf32>
    %c0_2 = arith.constant 0 : index
    %c0_3 = arith.constant 0 : index
    %6 = vector.load %arg10[%c0_2, %c0_3] : memref<840x432xf32, #tpu.memory_space<vmem>>, vector<56x432xf32>
    tpu.vector_store %arg10[%c0_2, %c0_3], %5 {strides = array<i32>} : memref<840x432xf32, #tpu.memory_space<vmem>>, vector<56x432xf32>,
    %7 = vector.extract_strided_slice %4 {offsets = [0, 1], sizes = [56, 432], strides = [1, 1]} : vector<56x436xf32> to vector<56x432xf32>
    %c56 = arith.constant 56 : index
    %c0_4 = arith.constant 0 : index
    %8 = vector.load %arg10[%c56, %c0_4] : memref<840x432xf32, #tpu.memory_space<vmem>>, vector<56x432xf32>
    tpu.vector_store %arg10[%c56, %c0_4], %7 {strides = array<i32>} : memref<840x432xf32, #tpu.memory_space<vmem>>, vector<56x432xf32>,
    %9 = vector.extract_strided_slice %4 {offsets = [0, 2], sizes = [56, 432], strides = [1, 1]} : vector<56x436xf32> to vector<56x432xf32>
    %c112 = arith.constant 112 : index
    %c0_5 = arith.constant 0 : index
    %10 = vector.load %arg10[%c112, %c0_5] : memref<840x432xf32, #tpu.memory_space<vmem>>, vector<56x432xf32>
    tpu.vector_store %arg10[%c112, %c0_5], %9 {strides = array<i32>} : memref<840x432xf32, #tpu.memory_space<vmem>>, vector<56x432xf32>,
    %11 = vector.extract_strided_slice %4 {offsets = [0, 3], sizes = [56, 432], strides = [1, 1]} : vector<56x436xf32> to vector<56x432xf32>
    %c168 = arith.constant 168 : index
    %c0_6 = arith.constant 0 : index
    %12 = vector.load %arg10[%c168, %c0_6] : memref<840x432xf32, #tpu.memory_space<vmem>>, vector<56x432xf32>
    tpu.vector_store %arg10[%c168, %c0_6], %11 {strides = array<i32>} : memref<840x432xf32, #tpu.memory_space<vmem>>, vector<56x432xf32>,
    %13 = vector.extract_strided_slice %4 {offsets = [0, 4], sizes = [56, 432], strides = [1, 1]} : vector<56x436xf32> to vector<56x432xf32>
    %c224 = arith.constant 224 : index
    %c0_7 = arith.constant 0 : index
    %14 = vector.load %arg10[%c224, %c0_7] : memref<840x432xf32, #tpu.memory_space<vmem>>, vector<56x432xf32>
    tpu.vector_store %arg10[%c224, %c0_7], %13 {strides = array<i32>} : memref<840x432xf32, #tpu.memory_space<vmem>>, vector<56x432xf32>,
    %c0_8 = arith.constant 0 : index
    %c1 = arith.constant 1 : index
    %15 = arith.index_cast %1 : i32 to index
    %c0_9 = arith.constant 0 : index
    %16 = vector.load %arg8[%c0_8, %c1, %15, %c0_9] : memref<1x3x296x436xf32, #tpu.memory_space<vmem>>, vector<1x1x56x436xf32>
    %17 = vector.shape_cast %16 : vector<1x1x56x436xf32> to vector<56x436xf32>
    %18 = vector.extract_strided_slice %17 {offsets = [0, 0], sizes = [56, 432], strides = [1, 1]} : vector<56x436xf32> to vector<56x432xf32>
    %c280 = arith.constant 280 : index
    %c0_10 = arith.constant 0 : index
    %19 = vector.load %arg10[%c280, %c0_10] : memref<840x432xf32, #tpu.memory_space<vmem>>, vector<56x432xf32>
    tpu.vector_store %arg10[%c280, %c0_10], %18 {strides = array<i32>} : memref<840x432xf32, #tpu.memory_space<vmem>>, vector<56x432xf32>,
    %20 = vector.extract_strided_slice %17 {offsets = [0, 1], sizes = [56, 432], strides = [1, 1]} : vector<56x436xf32> to vector<56x432xf32>
    %c336 = arith.constant 336 : index
    %c0_11 = arith.constant 0 : index
    %21 = vector.load %arg10[%c336, %c0_11] : memref<840x432xf32, #tpu.memory_space<vmem>>, vector<56x432xf32>
    tpu.vector_store %arg10[%c336, %c0_11], %20 {strides = array<i32>} : memref<840x432xf32, #tpu.memory_space<vmem>>, vector<56x432xf32>,
    %22 = vector.extract_strided_slice %17 {offsets = [0, 2], sizes = [56, 432], strides = [1, 1]} : vector<56x436xf32> to vector<56x432xf32>
    %c392 = arith.constant 392 : index
    %c0_12 = arith.constant 0 : index
    %23 = vector.load %arg10[%c392, %c0_12] : memref<840x432xf32, #tpu.memory_space<vmem>>, vector<56x432xf32>
    tpu.vector_store %arg10[%c392, %c0_12], %22 {strides = array<i32>} : memref<840x432xf32, #tpu.memory_space<vmem>>, vector<56x432xf32>,
    %24 = vector.extract_strided_slice %17 {offsets = [0, 3], sizes = [56, 432], strides = [1, 1]} : vector<56x436xf32> to vector<56x432xf32>
    %c448 = arith.constant 448 : index
    %c0_13 = arith.constant 0 : index
    %25 = vector.load %arg10[%c448, %c0_13] : memref<840x432xf32, #tpu.memory_space<vmem>>, vector<56x432xf32>
    tpu.vector_store %arg10[%c448, %c0_13], %24 {strides = array<i32>} : memref<840x432xf32, #tpu.memory_space<vmem>>, vector<56x432xf32>,
    %26 = vector.extract_strided_slice %17 {offsets = [0, 4], sizes = [56, 432], strides = [1, 1]} : vector<56x436xf32> to vector<56x432xf32>
    %c504 = arith.constant 504 : index
    %c0_14 = arith.constant 0 : index
    %27 = vector.load %arg10[%c504, %c0_14] : memref<840x432xf32, #tpu.memory_space<vmem>>, vector<56x432xf32>
    tpu.vector_store %arg10[%c504, %c0_14], %26 {strides = array<i32>} : memref<840x432xf32, #tpu.memory_space<vmem>>, vector<56x432xf32>,
    %c0_15 = arith.constant 0 : index
    %c2 = arith.constant 2 : index
    %28 = arith.index_cast %1 : i32 to index
    %c0_16 = arith.constant 0 : index
    %29 = vector.load %arg8[%c0_15, %c2, %28, %c0_16] : memref<1x3x296x436xf32, #tpu.memory_space<vmem>>, vector<1x1x56x436xf32>
    %30 = vector.shape_cast %29 : vector<1x1x56x436xf32> to vector<56x436xf32>
    %31 = vector.extract_strided_slice %30 {offsets = [0, 0], sizes = [56, 432], strides = [1, 1]} : vector<56x436xf32> to vector<56x432xf32>
    %c560 = arith.constant 560 : index
    %c0_17 = arith.constant 0 : index
    %32 = vector.load %arg10[%c560, %c0_17] : memref<840x432xf32, #tpu.memory_space<vmem>>, vector<56x432xf32>
    tpu.vector_store %arg10[%c560, %c0_17], %31 {strides = array<i32>} : memref<840x432xf32, #tpu.memory_space<vmem>>, vector<56x432xf32>,
    %33 = vector.extract_strided_slice %30 {offsets = [0, 1], sizes = [56, 432], strides = [1, 1]} : vector<56x436xf32> to vector<56x432xf32>
    %c616 = arith.constant 616 : index
    %c0_18 = arith.constant 0 : index
    %34 = vector.load %arg10[%c616, %c0_18] : memref<840x432xf32, #tpu.memory_space<vmem>>, vector<56x432xf32>
    tpu.vector_store %arg10[%c616, %c0_18], %33 {strides = array<i32>} : memref<840x432xf32, #tpu.memory_space<vmem>>, vector<56x432xf32>,
    %35 = vector.extract_strided_slice %30 {offsets = [0, 2], sizes = [56, 432], strides = [1, 1]} : vector<56x436xf32> to vector<56x432xf32>
    %c672 = arith.constant 672 : index
    %c0_19 = arith.constant 0 : index
    %36 = vector.load %arg10[%c672, %c0_19] : memref<840x432xf32, #tpu.memory_space<vmem>>, vector<56x432xf32>
    tpu.vector_store %arg10[%c672, %c0_19], %35 {strides = array<i32>} : memref<840x432xf32, #tpu.memory_space<vmem>>, vector<56x432xf32>,
    %37 = vector.extract_strided_slice %30 {offsets = [0, 3], sizes = [56, 432], strides = [1, 1]} : vector<56x436xf32> to vector<56x432xf32>
    %c728 = arith.constant 728 : index
    %c0_20 = arith.constant 0 : index
    %38 = vector.load %arg10[%c728, %c0_20] : memref<840x432xf32, #tpu.memory_space<vmem>>, vector<56x432xf32>
    tpu.vector_store %arg10[%c728, %c0_20], %37 {strides = array<i32>} : memref<840x432xf32, #tpu.memory_space<vmem>>, vector<56x432xf32>,
    %39 = vector.extract_strided_slice %30 {offsets = [0, 4], sizes = [56, 432], strides = [1, 1]} : vector<56x436xf32> to vector<56x432xf32>
    %c784 = arith.constant 784 : index
    %c0_21 = arith.constant 0 : index
    %40 = vector.load %arg10[%c784, %c0_21] : memref<840x432xf32, #tpu.memory_space<vmem>>, vector<56x432xf32>
    tpu.vector_store %arg10[%c784, %c0_21], %39 {strides = array<i32>} : memref<840x432xf32, #tpu.memory_space<vmem>>, vector<56x432xf32>,
    %c0_22 = arith.constant 0 : index
    %c0_23 = arith.constant 0 : index
    %41 = vector.load %arg2[%c0_22, %c0_23] : memref<288x840xf32, #tpu.memory_space<vmem>>, vector<288x840xf32>
    %c0_24 = arith.constant 0 : index
    %c0_25 = arith.constant 0 : index
    %42 = vector.load %arg10[%c0_24, %c0_25] : memref<840x432xf32, #tpu.memory_space<vmem>>, vector<840x432xf32>
    %cst = arith.constant dense<0.000000e+00> : vector<288x432xf32>
    %43 = tpu.matmul %41, %42, %cst {dimension_numbers = #tpu.dot_dimension_numbers<[1], [0], [0], [1], [0, 0, 1, 1], [], []>} : vector<288x840xf32>, vector<840x432xf32>, vector<288x432xf32> -> vector<288x432xf32>
    %c0_26 = arith.constant 0 : index
    %c0_27 = arith.constant 0 : index
    %44 = vector.load %arg3[%c0_26, %c0_27] : memref<288x1xf32, #tpu.memory_space<vmem>>, vector<288x1xf32>
    %45 = vector.broadcast %44 : vector<288x1xf32> to vector<288x432xf32>
    %46 = arith.addf %43, %45 : vector<288x432xf32>
    %cst_28 = arith.constant 0.000000e+00 : f32
    %47 = vector.broadcast %cst_28 : f32 to vector<288x432xf32>
    %48 = arith.maximumf %46, %47 : vector<288x432xf32>
    %c0_29 = arith.constant 0 : index
    %c0_30 = arith.constant 0 : index
    %49 = vector.load %arg4[%c0_29, %c0_30] : memref<432x216xf32, #tpu.memory_space<vmem>>, vector<432x216xf32>
    %cst_31 = arith.constant dense<0.000000e+00> : vector<288x216xf32>
    %50 = tpu.matmul %48, %49, %cst_31 {dimension_numbers = #tpu.dot_dimension_numbers<[1], [0], [0], [1], [0, 0, 1, 1], [], []>} : vector<288x432xf32>, vector<432x216xf32>, vector<288x216xf32> -> vector<288x216xf32>
    %c0_32 = arith.constant 0 : index
    %c0_33 = arith.constant 0 : index
    %51 = vector.load %arg5[%c0_32, %c0_33] : memref<432x216xf32, #tpu.memory_space<vmem>>, vector<432x216xf32>
    %cst_34 = arith.constant dense<0.000000e+00> : vector<288x216xf32>
    %52 = tpu.matmul %48, %51, %cst_34 {dimension_numbers = #tpu.dot_dimension_numbers<[1], [0], [0], [1], [0, 0, 1, 1], [], []>} : vector<288x432xf32>, vector<432x216xf32>, vector<288x216xf32> -> vector<288x216xf32>
    %53 = arith.maximumf %50, %52 : vector<288x216xf32>
    %c0_35 = arith.constant 0 : index
    %c0_36 = arith.constant 0 : index
    %54 = vector.load %arg6[%c0_35, %c0_36] : memref<144x288xf32, #tpu.memory_space<vmem>>, vector<144x288xf32>
    %cst_37 = arith.constant dense<0.000000e+00> : vector<144x216xf32>
    %55 = tpu.matmul %54, %53, %cst_37 {dimension_numbers = #tpu.dot_dimension_numbers<[1], [0], [0], [1], [0, 0, 1, 1], [], []>} : vector<144x288xf32>, vector<288x216xf32>, vector<144x216xf32> -> vector<144x216xf32>
    %c0_38 = arith.constant 0 : index
    %c0_39 = arith.constant 0 : index
    %56 = vector.load %arg7[%c0_38, %c0_39] : memref<144x288xf32, #tpu.memory_space<vmem>>, vector<144x288xf32>
    %cst_40 = arith.constant dense<0.000000e+00> : vector<144x216xf32>
    %57 = tpu.matmul %56, %53, %cst_40 {dimension_numbers = #tpu.dot_dimension_numbers<[1], [0], [0], [1], [0, 0, 1, 1], [], []>} : vector<144x288xf32>, vector<288x216xf32>, vector<144x216xf32> -> vector<144x216xf32>
    %58 = arith.maximumf %55, %57 : vector<144x216xf32>
    %59 = vector.extract_strided_slice %58 {offsets = [0, 0], sizes = [24, 216], strides = [1, 1]} : vector<144x216xf32> to vector<24x216xf32>
    %c0_41 = arith.constant 0 : index
    %c0_42 = arith.constant 0 : index
    %c0_43 = arith.constant 0 : index
    %c0_44 = arith.constant 0 : index
    %60 = vector.load %arg9[%c0_41, %c0_42, %c0_43, %c0_44] : memref<1x6x24x216xf32, #tpu.memory_space<vmem>>, vector<1x1x24x216xf32>
    %61 = vector.shape_cast %60 : vector<1x1x24x216xf32> to vector<24x216xf32>
    %62 = vector.shape_cast %59 : vector<24x216xf32> to vector<1x1x24x216xf32>
    tpu.vector_store %arg9[%c0_41, %c0_42, %c0_43, %c0_44], %62 {strides = array<i32>} : memref<1x6x24x216xf32, #tpu.memory_space<vmem>>, vector<1x1x24x216xf32>,
    %63 = vector.extract_strided_slice %58 {offsets = [24, 0], sizes = [24, 216], strides = [1, 1]} : vector<144x216xf32> to vector<24x216xf32>
    %c0_45 = arith.constant 0 : index
    %c1_46 = arith.constant 1 : index
    %c0_47 = arith.constant 0 : index
    %c0_48 = arith.constant 0 : index
    %64 = vector.load %arg9[%c0_45, %c1_46, %c0_47, %c0_48] : memref<1x6x24x216xf32, #tpu.memory_space<vmem>>, vector<1x1x24x216xf32>
    %65 = vector.shape_cast %64 : vector<1x1x24x216xf32> to vector<24x216xf32>
    %66 = vector.shape_cast %63 : vector<24x216xf32> to vector<1x1x24x216xf32>
    tpu.vector_store %arg9[%c0_45, %c1_46, %c0_47, %c0_48], %66 {strides = array<i32>} : memref<1x6x24x216xf32, #tpu.memory_space<vmem>>, vector<1x1x24x216xf32>,
    %67 = vector.extract_strided_slice %58 {offsets = [48, 0], sizes = [24, 216], strides = [1, 1]} : vector<144x216xf32> to vector<24x216xf32>
    %c0_49 = arith.constant 0 : index
    %c2_50 = arith.constant 2 : index
    %c0_51 = arith.constant 0 : index
    %c0_52 = arith.constant 0 : index
    %68 = vector.load %arg9[%c0_49, %c2_50, %c0_51, %c0_52] : memref<1x6x24x216xf32, #tpu.memory_space<vmem>>, vector<1x1x24x216xf32>
    %69 = vector.shape_cast %68 : vector<1x1x24x216xf32> to vector<24x216xf32>
    %70 = vector.shape_cast %67 : vector<24x216xf32> to vector<1x1x24x216xf32>
    tpu.vector_store %arg9[%c0_49, %c2_50, %c0_51, %c0_52], %70 {strides = array<i32>} : memref<1x6x24x216xf32, #tpu.memory_space<vmem>>, vector<1x1x24x216xf32>,
    %71 = vector.extract_strided_slice %58 {offsets = [72, 0], sizes = [24, 216], strides = [1, 1]} : vector<144x216xf32> to vector<24x216xf32>
    %c0_53 = arith.constant 0 : index
    %c3 = arith.constant 3 : index
    %c0_54 = arith.constant 0 : index
    %c0_55 = arith.constant 0 : index
    %72 = vector.load %arg9[%c0_53, %c3, %c0_54, %c0_55] : memref<1x6x24x216xf32, #tpu.memory_space<vmem>>, vector<1x1x24x216xf32>
    %73 = vector.shape_cast %72 : vector<1x1x24x216xf32> to vector<24x216xf32>
    %74 = vector.shape_cast %71 : vector<24x216xf32> to vector<1x1x24x216xf32>
    tpu.vector_store %arg9[%c0_53, %c3, %c0_54, %c0_55], %74 {strides = array<i32>} : memref<1x6x24x216xf32, #tpu.memory_space<vmem>>, vector<1x1x24x216xf32>,
    %75 = vector.extract_strided_slice %58 {offsets = [96, 0], sizes = [24, 216], strides = [1, 1]} : vector<144x216xf32> to vector<24x216xf32>
    %c0_56 = arith.constant 0 : index
    %c4 = arith.constant 4 : index
    %c0_57 = arith.constant 0 : index
    %c0_58 = arith.constant 0 : index
    %76 = vector.load %arg9[%c0_56, %c4, %c0_57, %c0_58] : memref<1x6x24x216xf32, #tpu.memory_space<vmem>>, vector<1x1x24x216xf32>
    %77 = vector.shape_cast %76 : vector<1x1x24x216xf32> to vector<24x216xf32>
    %78 = vector.shape_cast %75 : vector<24x216xf32> to vector<1x1x24x216xf32>
    tpu.vector_store %arg9[%c0_56, %c4, %c0_57, %c0_58], %78 {strides = array<i32>} : memref<1x6x24x216xf32, #tpu.memory_space<vmem>>, vector<1x1x24x216xf32>,
    %79 = vector.extract_strided_slice %58 {offsets = [120, 0], sizes = [24, 216], strides = [1, 1]} : vector<144x216xf32> to vector<24x216xf32>
    %c0_59 = arith.constant 0 : index
    %c5 = arith.constant 5 : index
    %c0_60 = arith.constant 0 : index
    %c0_61 = arith.constant 0 : index
    %80 = vector.load %arg9[%c0_59, %c5, %c0_60, %c0_61] : memref<1x6x24x216xf32, #tpu.memory_space<vmem>>, vector<1x1x24x216xf32>
    %81 = vector.shape_cast %80 : vector<1x1x24x216xf32> to vector<24x216xf32>
    %82 = vector.shape_cast %79 : vector<24x216xf32> to vector<1x1x24x216xf32>
    tpu.vector_store %arg9[%c0_59, %c5, %c0_60, %c0_61], %82 {strides = array<i32>} : memref<1x6x24x216xf32, #tpu.memory_space<vmem>>, vector<1x1x24x216xf32>,
    return
  }
  func.func @transform_0(%arg0: i32, %arg1: i32) -> (i32, i32) {
    %c0_i32 = arith.constant 0 : i32
    %c0_i32_0 = arith.constant 0 : i32
    %c0_i32_1 = arith.constant 0 : i32
    return %c0_i32, %c0_i32_0 : i32, i32
  }
  func.func @transform_1(%arg0: i32, %arg1: i32) -> (i32, i32) {
    %c0_i32 = arith.constant 0 : i32
    %c0_i32_0 = arith.constant 0 : i32
    %c0_i32_1 = arith.constant 0 : i32
    return %c0_i32, %c0_i32_0 : i32, i32
  }
  func.func @transform_2(%arg0: i32, %arg1: i32) -> (i32, i32) {
    %c0_i32 = arith.constant 0 : i32
    %c0_i32_0 = arith.constant 0 : i32
    %c0_i32_1 = arith.constant 0 : i32
    return %c0_i32, %c0_i32_0 : i32, i32
  }
  func.func @transform_3(%arg0: i32, %arg1: i32) -> (i32, i32) {
    %c0_i32 = arith.constant 0 : i32
    %c0_i32_0 = arith.constant 0 : i32
    %c0_i32_1 = arith.constant 0 : i32
    return %c0_i32, %c0_i32_0 : i32, i32
  }
  func.func @transform_4(%arg0: i32, %arg1: i32) -> (i32, i32) {
    %c0_i32 = arith.constant 0 : i32
    %c0_i32_0 = arith.constant 0 : i32
    %c0_i32_1 = arith.constant 0 : i32
    return %c0_i32, %c0_i32_0 : i32, i32
  }
  func.func @transform_5(%arg0: i32, %arg1: i32) -> (i32, i32) {
    %c0_i32 = arith.constant 0 : i32
    %c0_i32_0 = arith.constant 0 : i32
    %c0_i32_1 = arith.constant 0 : i32
    return %c0_i32, %c0_i32_0 : i32, i32
  }
  func.func @transform_6(%arg0: i32, %arg1: i32) -> (i32, i32, i32, i32) {
    %c0_i32 = arith.constant 0 : i32
    %c0_i32_0 = arith.constant 0 : i32
    %c0_i32_1 = arith.constant 0 : i32
    %c0_i32_2 = arith.constant 0 : i32
    return %arg0, %c0_i32, %c0_i32_0, %c0_i32_1 : i32, i32, i32, i32
  }
  func.func @transform_7(%arg0: i32, %arg1: i32) -> (i32, i32, i32, i32) {
    %c0_i32 = arith.constant 0 : i32
    %c0_i32_0 = arith.constant 0 : i32
    %c0_i32_1 = arith.constant 0 : i32
    return %arg0, %c0_i32, %arg1, %c0_i32_0 : i32, i32, i32, i32
  }
}

</mosaic_0001>

<bundles_post_ra>
// kernel: tpu_custom_call.1
= control target key start
LH: loop header
LB: loop body
LE: loop exit
PB: predicated region body
PF: predicated region fallthrough
CT: control target
= control target key end

     0   :  { %s14967_s0 = inlined_call_operand.hbm [shape: f32[288,840], index: 0, kind: input, shape index: {}]   ;;  %s14968_s1 = inlined_call_operand.vmem [shape: f32[288,1], index: 1, kind: input, shape index: {}]   ;;  %s14969_s2 = inlined_call_operand.hbm [shape: f32[432,216], index: 2, kind: input, shape index: {}]   ;;  %s14970_s3 = inlined_call_operand.hbm [shape: f32[432,216], index: 3, kind: input, shape index: {}]   ;;  %s14971_s4 = inlined_call_operand.hbm [shape: f32[144,288], index: 4, kind: input, shape index: {}]   ;;  %s14972_s5 = inlined_call_operand.hbm [shape: f32[144,288], index: 5, kind: input, shape index: {}]   ;;  %s14973_s6 = inlined_call_operand.hbm [shape: f32[2,3,296,436], index: 6, kind: input, shape index: {}]   ;;  %s14974_s7 = inlined_call_operand.hbm [shape: f32[2,6,144,216], index: 7, kind: output, shape index: {}]  }
   0x1   :  { %15114 = sst [smem:[#allocation61_spill]] %s14967_s0 }
   0x2   :  { %15115 = sst [smem:[#allocation62_spill]] %s14968_s1 }
   0x3   :  { %15116 = sst [smem:[#allocation63_spill]] %s14969_s2 }
   0x4   :  { %15117 = sst [smem:[#allocation64_spill]] %s14970_s3 }
   0x5   :  { %15118 = sst [smem:[#allocation65_spill]] %s14971_s4 }
   0x6   :  { %15119 = sst [smem:[#allocation66_spill]] %s14972_s5 }
   0x7   :  { %15120 = sst [smem:[#allocation67_spill]] %s14973_s6 }
   0x8   :  { %15121 = sst [smem:[#allocation68_spill]] %s14974_s7 }
   0x9   :  { %12 = vsyncpa [#allocation4], 0 }
   0xa   :  { %13 = vsyncpa [#allocation7], 0 }
   0xb   :  { %14 = vsyncpa [#allocation10], 0 }
   0xc   :  { %15 = vsyncpa [#allocation13], 0 }
   0xd   :  { %17 = vsyncpa [#allocation13 + $0x1], 0 }
   0xe   :  { %18 = vsyncpa [#allocation5], 0 }
   0xf   :  { %20 = vsyncpa [#allocation5 + $0x1], 0  ;;  %s10789_s24 = smov 0   ;;  %s10791_s25 = smov 0  }
  0x10   :  { %s10793_s26 = smov 0   ;;  %s10795_s27 = smov 0  }
  0x11   :  { %s10797_s28 = smov 0   ;;  %s10799_s29 = smov 0  }
  0x12   :  { %s10801_s30 = smov 0   ;;  %s10803_s8 = smov 0  }
  0x13   :  { %s10805_s9 = smov 0   ;;  %s10807_s10 = smov 0  }
  0x14   :  { %s10809_s11 = smov 0  }
  0x15 LB: > { %15122 = sst [smem:[#allocation22_spill]] %s10704_s30  ;;  %s10722_s12 = smov [#allocation6]   ;;  %s10720_s11 = sphi %s10809_s11, %s26_s11   ;;  %s10716_s10 = sphi %s10807_s10, %s15360_s10   ;;  %s10712_s9 = sphi %s10805_s9, %s15359_s9   ;;  %s10708_s8 = sphi %s10803_s8, %s15358_s8   ;;  %s10704_s30 = sphi %s10801_s30, %s15357_s30   ;;  %s10700_s29 = sphi %s10799_s29, %s15356_s29   ;;  %s10696_s28 = sphi %s10797_s28, %s15355_s28   ;;  %s10692_s27 = sphi %s10795_s27, %s15354_s27   ;;  %s10688_s26 = sphi %s10793_s26, %s15353_s26   ;;  %s10684_s25 = sphi %s10791_s25, %s15352_s25   ;;  %s10680_s24 = sphi %s10789_s24, %s15351_s24  }
  0x16   : > { %15123 = sst [smem:[#allocation23_spill]] %s10708_s8  ;;  %s251_s13 = sshll.u32 %s10722_s12, 4  ;;  %s10855_s13 = int_to_ptr.vmem [resolvable:$true] %s251_s13 }
  0x17   : > { %s8339_s14 = sadd.s32 4294967295, %s10720_s11   ;;  %p8341_p0 = scmp.ge.s32.totalorder %s10720_s11, 1 }
  0x18   : > { %p10846_p1 = scmp.eq.s32.totalorder %s8339_s14, 0  ;;  %p10850_p2 = scmp.eq.s32.totalorder %s8339_s14, 11 }
  0x19   : > { %p223_p3 = scmp.lt.s32.totalorder %s10720_s11, 13  ;;  %s10723_s18 = smov [#allocation9]  }
  0x1a   : > { %s15124_s15 = scalar_select %p10846_p1, 1, 0 }
  0x1b   : > { %s15125_s16 = scalar_select %p10850_p2, 1, 0 }
  0x1c   : > { %p10857_p4 = pnand %p8341_p0, %p223_p3  ;;  %s277_s19 = sshll.u32 %s10723_s18, 4  ;;  %s10863_s19 = int_to_ptr.vmem [resolvable:$true] %s277_s19 }
  0x1d   : > { %s15129_s2 = sld [smem:[#allocation63_spill]] }
  0x1e   : > { %s15126_s17 = scalar_select %p10857_p4, 1, 0 }
  0x1f   : > { %p10238_p5 = pneg %p10857_p4 }
  0x20   : > { %15127 = sst [smem:[#allocation24_spill]] %s15126_s17 }
  0x21   : > { %p10867_p6 = pnand %p10238_p5, %p10846_p1 }
  0x23   : > { %s10444_s23 = scalar_lea.hbm %s15129_s2, 13824  ;;  %p10879_p8 = pneg %p10867_p6 }
  0x24   : > { %p10445_p7 = scmp.ne.s32.totalorder %s15129_s2, %s10444_s23  ;;  %p10451_p11 = scmp.lt.u32.totalorder %s10444_s23, %s15129_s2 }
  0x26   : > { %p10447_p9 = pnand %p10879_p8, %p10445_p7 }
  0x28   : > { %p10448_p10 = pneg %p10447_p9 }
  0x2a   : > { %p10453_p12 = pnand %p10451_p11, %p10448_p10 }
  0x2c   : > { %10456 = shalt.err (!%p10453_p12)
}
  0x2d   : > { %s10457_s21 = scalar_lea.vmem %s10855_s13, 13824  ;;  %p10465_p5 = scmp.lt.s32.totalorder %s10855_s13, %s10855_s13 }
  0x2e   : > { %p10458_p13 = scmp.ne.s32.totalorder %s10855_s13, %s10457_s21  ;;  %p10466_p4 = scmp.lt.s32.totalorder %s10457_s21, %s10457_s21 }
  0x30   : > { %p10460_p0 = pnand %p10458_p13, %p10879_p8  ;;  %p10467_p7 = por %p10466_p4, %p10465_p5 }
  0x32   : > { %p10461_p3 = pneg %p10460_p0 }
  0x34   : > { %p10468_p9 = pnand %p10467_p7, %p10461_p3 }
  0x36   : > { %10471 = shalt.err (!%p10468_p9)
}
  0x37   : > { %s14980_s22 = smov 256   ;;  %s14981_s8 = smov 16  }
  0x38   : > { %10244 = dma.hbm_to_vmem [thread:$0]  (!%p10867_p6), %s15129_s2, 13824, %s10855_s13, [#allocation7], %s14980_s22, %s14980_s22, %s14981_s8  }
  0x39   : > { %s15131_s4 = sld [smem:[#allocation65_spill]] }
  0x3f   : > { %s10472_s21 = scalar_lea.hbm %s15131_s4, 6912 }
  0x40   : > { %p10473_p4 = scmp.ne.s32.totalorder %s15131_s4, %s10472_s21  ;;  %p10479_p12 = scmp.lt.u32.totalorder %s10472_s21, %s15131_s4 }
  0x42   : > { %p10475_p10 = pnand %p10473_p4, %p10879_p8 }
  0x44   : > { %p10476_p11 = pneg %p10475_p10 }
  0x46   : > { %p10481_p13 = pnand %p10479_p12, %p10476_p11 }
  0x48   : > { %10484 = shalt.err (!%p10481_p13)
}
  0x49   : > { %s10485_s13 = scalar_lea.vmem %s10863_s19, 6912  ;;  %p10493_p7 = scmp.lt.s32.totalorder %s10863_s19, %s10863_s19 }
  0x4a   : > { %p10486_p0 = scmp.ne.s32.totalorder %s10863_s19, %s10485_s13  ;;  %p10494_p9 = scmp.lt.s32.totalorder %s10485_s13, %s10485_s13 }
  0x4c   : > { %p10488_p3 = pnand %p10486_p0, %p10879_p8  ;;  %p10495_p4 = por %p10494_p9, %p10493_p7 }
  0x4e   : > { %p10489_p5 = pneg %p10488_p3 }
  0x50   : > { %p10496_p10 = pnand %p10495_p4, %p10489_p5 }
  0x52   : > { %10499 = shalt.err (!%p10496_p10)
}
  0x53   : > { %s14984_s1 = smov 384   ;;  %s14985_s6 = smov 24  }
  0x54   : > { %10250 = dma.hbm_to_vmem [thread:$0]  (!%p10867_p6), %s15131_s4, 6912, %s10863_s19, [#allocation10], %s14984_s1, %s14984_s1, %s14985_s6  }
  0x55   : > { %s10728_s23 = smov [#allocation3]   ;;  %s15132_s0 = sld [smem:[#allocation61_spill]] }
  0x56   : > { %s235_s12 = sshll.u32 %s10728_s23, 4  ;;  %s236_s12 = int_to_ptr.vmem [resolvable:$true] %s235_s12 }
  0x5b   : > { %s10500_s21 = scalar_lea.hbm %s15132_s0, 32256 }
  0x5c   : > { %p10501_p11 = scmp.ne.s32.totalorder %s15132_s0, %s10500_s21  ;;  %p10507_p0 = scmp.lt.u32.totalorder %s10500_s21, %s15132_s0 }
  0x5e   : > { %p10503_p12 = pnand %p10501_p11, %p10879_p8 }
  0x60   : > { %p10504_p13 = pneg %p10503_p12 }
  0x62   : > { %p10509_p3 = pnand %p10507_p0, %p10504_p13 }
  0x64   : > { %10512 = shalt.err (!%p10509_p3)
}
  0x65   : > { %s10513_s19 = scalar_lea.vmem %s236_s12, 32256  ;;  %p10521_p4 = scmp.lt.s32.totalorder %s236_s12, %s236_s12 }
  0x66   : > { %p10514_p5 = scmp.ne.s32.totalorder %s236_s12, %s10513_s19  ;;  %p10522_p10 = scmp.lt.s32.totalorder %s10513_s19, %s10513_s19 }
  0x68   : > { %p10516_p7 = pnand %p10514_p5, %p10879_p8  ;;  %p10523_p2 = por %p10522_p10, %p10521_p4 }
  0x6a   : > { %p10517_p9 = pneg %p10516_p7 }
  0x6c   : > { %p10524_p1 = pnand %p10523_p2, %p10517_p9 }
  0x6e   : > { %10527 = shalt.err (!%p10524_p1)
}
  0x6f   : > { %s10729_s22 = smov 896   ;;  %s10730_s30 = smov 56  }
  0x70   : > { %10241 = dma.hbm_to_vmem [thread:$0]  (!%p10867_p6), %s15132_s0, 32256, %s236_s12, [#allocation4], %s10729_s22, %s10729_s22, %s10730_s30  }
  0x71   : > { %s10731_s17 = smov [#allocation8]   ;;  %s10732_s14 = smov [#allocation11]  }
  0x72   : > { %s264_s23 = sshll.u32 %s10731_s17, 4  ;;  %s290_s18 = sshll.u32 %s10732_s14, 4  ;;  %s265_s23 = int_to_ptr.vmem [resolvable:$true] %s264_s23  ;;  %s10947_s18 = int_to_ptr.vmem [resolvable:$true] %s290_s18 }
  0x73   : > { %s15133_s3 = sld [smem:[#allocation64_spill]] }
  0x79   : > { %s10528_s19 = scalar_lea.hbm %s15133_s3, 13824 }
  0x7a   : > { %p10529_p1 = scmp.ne.s32.totalorder %s15133_s3, %s10528_s19  ;;  %p10535_p12 = scmp.lt.u32.totalorder %s10528_s19, %s15133_s3 }
  0x7c   : > { %p10531_p2 = pnand %p10529_p1, %p10879_p8 }
  0x7e   : > { %p10532_p11 = pneg %p10531_p2 }
  0x80   : > { %p10537_p13 = pnand %p10535_p12, %p10532_p11 }
  0x82   : > { %10540 = shalt.err (!%p10537_p13)
}
  0x83   : > { %s10541_s22 = scalar_lea.vmem %s265_s23, 13824  ;;  %p10549_p7 = scmp.lt.s32.totalorder %s265_s23, %s265_s23 }
  0x84   : > { %p10542_p0 = scmp.ne.s32.totalorder %s265_s23, %s10541_s22  ;;  %p10550_p9 = scmp.lt.s32.totalorder %s10541_s22, %s10541_s22 }
  0x86   : > { %p10544_p3 = pnand %p10542_p0, %p10879_p8  ;;  %p10551_p4 = por %p10550_p9, %p10549_p7 }
  0x88   : > { %p10545_p5 = pneg %p10544_p3 }
  0x8a   : > { %p10552_p10 = pnand %p10551_p4, %p10545_p5 }
  0x8c   : > { %10555 = shalt.err (!%p10552_p10)
}
  0x8d   : > { %s15134_s1 = smov 16   ;;  %s15135_s6 = smov 256  }
  0x8e   : > { %10247 = dma.hbm_to_vmem [thread:$0]  (!%p10867_p6), %s15133_s3, 13824, %s265_s23, [#allocation7], %s15135_s6, %s15135_s6, %s15134_s1  }
  0x8f   : > { %s15136_s5 = sld [smem:[#allocation66_spill]] }
  0x95   : > { %s10556_s21 = scalar_lea.hbm %s15136_s5, 6912 }
  0x96   : > { %p10557_p1 = scmp.ne.s32.totalorder %s15136_s5, %s10556_s21  ;;  %p10563_p12 = scmp.lt.u32.totalorder %s10556_s21, %s15136_s5 }
  0x98   : > { %p10559_p2 = pnand %p10557_p1, %p10879_p8 }
  0x9a   : > { %p10560_p11 = pneg %p10559_p2 }
  0x9c   : > { %p10565_p13 = pnand %p10563_p12, %p10560_p11 }
  0x9e   : > { %10568 = shalt.err (!%p10565_p13)
}
  0x9f   : > { %s10569_s23 = scalar_lea.vmem %s10947_s18, 6912  ;;  %p10577_p7 = scmp.lt.s32.totalorder %s10947_s18, %s10947_s18 }
  0xa0   : > { %p10570_p0 = scmp.ne.s32.totalorder %s10947_s18, %s10569_s23  ;;  %p10578_p9 = scmp.lt.s32.totalorder %s10569_s23, %s10569_s23 }
  0xa2   : > { %p10572_p3 = pnand %p10570_p0, %p10879_p8  ;;  %p10579_p4 = por %p10578_p9, %p10577_p7 }
  0xa4   : > { %p10573_p5 = pneg %p10572_p3 }
  0xa6   : > { %p10580_p10 = pnand %p10579_p4, %p10573_p5 }
  0xa8   : > { %10583 = shalt.err (!%p10580_p10)
}
  0xa9   : > { %s15137_s22 = smov 24   ;;  %s15138_s1 = smov 384  }
  0xaa   : > { %10253 = dma.hbm_to_vmem [thread:$0]  (!%p10867_p6), %s15136_s5, 6912, %s10947_s18, [#allocation10], %s15138_s1, %s15138_s1, %s15137_s22  }
  0xab   : > { %s8340_s7 = sadd.s32 4294967294, %s10720_s11   ;;  %s35_s20 = sadd.s32 1, %s10712_s9 }
  0xac   : > { %p36_p8 = scmp.ge.s32.totalorder %s35_s20, 6  ;;  %s38_s8 = sadd.s32 1, %s10716_s10 }
  0xad   : > { %s171_s17 = sadd.s32 1, %s10700_s29  ;;  %p178_p1 = scmp.ne.s32.totalorder %s10700_s29, %s10696_s28 }
  0xae   : > { %s15362_s20 = smov (%p36_p8, %s35_s20), 0  ;;  %s15364_s8 = smov (!%p36_p8, %s38_s8), %s10716_s10 }
  0xaf   : > { %p179_p2 = scmp.eq.s32.totalorder %s10720_s11, 0  ;;  %p184_p6 = scmp.ne.s32.totalorder %s10696_s28, %s10692_s27 }
  0xb0   : > { %p40_p11 = scmp.ge.s32.totalorder %s15364_s8, 2  ;;  %s195_s18 = ssub.s32 %s10712_s9, %s15362_s20 }
  0xb1   : > { %p11010_p12 = por %p179_p2, %p178_p1  ;;  %p15140_p13 = scmp.ne.s32.totalorder %s15124_s15, 0 }
  0xb2   : > { %s15366_s8 = smov (%p40_p11, %s15364_s8), 0  ;;  %s199_s13 = sadd.s32 1, %s10688_s26 }
  0xb3   : > { %p11016_p0 = por %p15140_p13, %p184_p6  ;;  %p209_p3 = scmp.ne.s32.totalorder %s10688_s26, %s10684_s25 }
  0xb4   : > { %s168_s27 = ssub.s32 %s10716_s10, %s15366_s8  ;;  %p215_p5 = scmp.ne.s32.totalorder %s10684_s25, %s10680_s24 }
  0xb5   : > { %p169_p7 = scmp.eq.s32.totalorder %s168_s27, 0  ;;  %s196_s19 = sor.u32 %s195_s18, %s168_s27 }
  0xb6   : > { %p197_p9 = scmp.eq.s32.totalorder %s196_s19, 0  ;;  %p15142_p4 = scmp.ne.s32.totalorder %s15125_s16, 0 }
  0xb7   : > { %s11036_s12 = scalar_select %p169_p7, %s10700_s29, %s171_s17  }
  0xb8   : > { %p11031_p10 = por %p15142_p4, %p209_p3  ;;  %p216_p8 = scmp.eq.s32.totalorder %s8340_s7, 11 }
  0xb9   : > { %s11039_s23 = scalar_select %p197_p9, %s10688_s26, %s199_s13  }
  0xba   : > { %s15143_s2 = scalar_select %p11031_p10, 1, 0 }
  0xbb   : > { %p10267_p1 = scmp.lt.s32.totalorder %s10720_s11, 12  ;;  %s304_s22 = sand.u32 1, %s10700_s29  }
  0xbc   : > { %s10204_s1 = smul.u32 56832, %s10716_s10  ;;  %p11044_p2 = por %p216_p8, %p215_p5 }
  0xbd   : > { %s10203_s30 = smul.u32 3552, %s304_s22  ;;  %s15145_s16 = sld [smem:[#allocation67_spill]] }
  0xbe   : > { %s15144_s6 = scalar_select %p11044_p2, 1, 0 }
  0xbf   : > { %p11055_p6 = pnand %p10267_p1, %p11010_p12  ;;  %s308_s17 = scalar_lea.vmem [#allocation12], %s10203_s30 }
  0xc0   : > { %s315_s13 = sshll.u32 %s308_s17, 4  ;;  %s11061_s0 = scalar_lea.sflag [#allocation13], %s304_s22  ;;  %s11059_s13 = int_to_ptr.vmem [resolvable:$true] %s315_s13 }
  0xc1   : > { %p10586_p13 = pneg %p11055_p6 }
  0xc3   : > { %s11051_s19 = scalar_lea.hbm %s15145_s16, %s10204_s1  ;;  %s10589_s27 = scalar_lea.hbm %s15145_s16, 113664 }
  0xc4   : > { %s10584_s18 = scalar_lea.hbm %s11051_s19, 56832  ;;  %p10590_p12 = scmp.lt.u32.totalorder %s11051_s19, %s15145_s16 }
  0xc5   : > { %p10585_p11 = scmp.ne.s32.totalorder %s11051_s19, %s10584_s18  ;;  %p10591_p7 = scmp.lt.u32.totalorder %s10589_s27, %s10584_s18 }
  0xc6   : > { %p10593_p4 = scmp.lt.u32.totalorder %s10584_s18, %s11051_s19 }
  0xc7   : > { %p10587_p3 = pnand %p10586_p13, %p10585_p11  ;;  %p10592_p9 = por %p10591_p7, %p10590_p12 }
  0xc9   : > { %p10588_p5 = pneg %p10587_p3  ;;  %p10594_p8 = por %p10593_p4, %p10592_p9 }
  0xcb   : > { %p10595_p1 = pnand %p10594_p8, %p10588_p5 }
  0xcd   : > { %10598 = shalt.err (!%p10595_p1)
}
  0xce   : > { %s10599_s22 = scalar_lea.vmem %s11059_s13, 56832  ;;  %s10733_s30 = smov [#allocation12]  }
  0xcf   : > { %p10600_p11 = scmp.ne.s32.totalorder %s11059_s13, %s10599_s22  ;;  %s10604_s17 = sshll.u32 %s10733_s30, 4  ;;  %s10605_s17 = int_to_ptr.vmem [resolvable:$false] %s10604_s17 }
  0xd0   : > { %s10606_s3 = scalar_lea.vmem %s10605_s17, 113664  ;;  %p10607_p10 = scmp.lt.s32.totalorder %s11059_s13, %s10605_s17 }
  0xd1   : > { %p10602_p3 = pnand %p10600_p11, %p10586_p13  ;;  %p10608_p12 = scmp.lt.s32.totalorder %s10606_s3, %s10599_s22 }
  0xd3   : > { %p10603_p2 = pneg %p10602_p3  ;;  %p10609_p7 = por %p10608_p12, %p10607_p10 }
  0xd5   : > { %p10610_p9 = pnand %p10609_p7, %p10603_p2 }
  0xd7   : > { %10613 = shalt.err (!%p10610_p9)
}
  0xd8   : > { %s10734_s4 = smov 512   ;;  %s10735_s18 = smov 32  }
  0xd9   : > { %10257 = dma.hbm_to_vmem [thread:$0]  (!%p11055_p6), %s11051_s19, 56832, %s11059_s13, %s11061_s0, %s10734_s4, %s10734_s4, %s10735_s18  }
  0xda   : > { %s15147_s14 = sld [smem:[#allocation24_spill]] }
  0xe0   : > { %p15148_p13 = scmp.ne.s32.totalorder %s15147_s14, 0 }
  0xe2   : > { %327 = sbr.rel (%p15148_p13) target bundleno = 2148 (0x864), region = 48 }
  0xe9   : > { %p15149_p5 = scmp.ne.s32.totalorder %s15124_s15, 0 }
  0xeb   : > { %10659 = dma.done.wait (%p15149_p5), [#allocation4], 32256  }
  0xec   : > { %10661 = vsyncadd (%p15149_p5), [#allocation4], 4294935040 }
  0xed   : > { %10663 = dma.done.wait (%p15149_p5), [#allocation7], 27648  }
  0xee   : > { %10665 = vsyncadd (%p15149_p5), [#allocation7], 4294939648 }
  0xef   : > { %10667 = dma.done.wait (%p15149_p5), [#allocation10], 13824  }
  0xf0   : > { %10669 = vsyncadd (%p15149_p5), [#allocation10], 4294953472  ;;  %s349_s0 = sand.u32 1, %s10696_s28  }
  0xf1   : > { %s10205_s19 = smul.u32 3552, %s349_s0  ;;  %s350_s7 = scalar_lea.sflag [#allocation13], %s349_s0 }
  0xf3   : > { %s353_s13 = scalar_lea.vmem [#allocation12], %s10205_s19 }
  0xf4   : > { %10671 = dma.done.wait (%p11016_p0), %s350_s7, 56832  }
  0xf5   : > { %10673 = vsyncadd (%p11016_p0), %s350_s7, 4294910464  ;;  %s15150_s1 = sld [smem:[#allocation22_spill]]  ;;  %s10736_s15 = smov 127   ;;  %vm422_vm0 = vcmask 392192   ;;  %vm532_vm1 = vcmask 1039360   ;;  %vm666_vm2 = vcmask 1031168  }
  0xf6   : > { %s10737_s21 = smov 126   ;;  %s10738_s3 = smov 125   ;;  %vm800_vm3 = vcmask 1022976   ;;  %vm934_vm4 = vcmask 1014784   ;;  %vm3138_vm5 = vcmask 588800   ;;  %vm7213_vm6 = vcmask 261120  }
  0xf7   : > { %s10739_s4 = smov 124   ;;  %s15302_s0 = sld [smem:[#allocation62_spill]]  ;;  %vm8105_vm7 = vcmask 719872  }
  0xfb   : > { %s385_s27 = smul.u32 48, %s15150_s1 }
  0xfd   : > { %s386_s22 = sshra.s32 %s385_s27, 3 }
  0xfe   : > { %s8631_s30 = sshll.u32 %s386_s22, 5 }
  0xff   : > { %s11109_s17 = scalar_lea.vmem %s353_s13, %s8631_s30 [#allocation12]  ;;  %s381_s30 = sand.u32 1, %s10684_s25  }
 0x100   : > { %v11112_v0 = vld [vmem:[%s11109_s17 + $0x8] sm:$0xff]  ;;  %v11115_v1 = vld [vmem:[%s11109_s17] sm:$0xff]  ;;  %v11118_v2 = vld [vmem:[%s11109_s17 + $0x10] sm:$0xff] }
 0x101   : > { %478 = vrot.lane.b32.xlu0 %v11112_v0, %s10736_s15  ;;  %476 = vrot.lane.b32.xlu1 %v11115_v1, %s10736_s15  ;;  %421 = vst [vmem:[#allocation2 + $0x10] sm:$0xff] %v11118_v2  ;;  %v11126_v3 = vld [vmem:[%s11109_s17 + $0x28] sm:$0xff]  ;;  %v11129_v4 = vld [vmem:[%s11109_s17 + $0x30] sm:$0xff] }
 0x102   : > { %426 = vst [vmem:[#allocation2 + $0x30] sm:$0xff] %v11129_v4  ;;  %v11133_v5 = vld [vmem:[%s11109_s17 + $0x48] sm:$0xff]  ;;  %v11136_v6 = vld [vmem:[%s11109_s17 + $0x50] sm:$0xff]  ;;  %v11139_v7 = vld [vmem:[%s11109_s17 + $0x20] sm:$0xff]  ;;  %v8635_v8 = vpack.c.bf16 %v11126_v3, %v11112_v0 }
 0x103   : > { %430 = vst [vmem:[#allocation2 + $0x50] sm:$0xff] %v11136_v6  ;;  %v11145_v9 = vld [vmem:[%s11109_s17 + $0x40] sm:$0xff]  ;;  %v11148_v10 = vld [vmem:[%s11109_s17 + $0x68] sm:$0xff]  ;;  %v11151_v11 = vld [vmem:[%s11109_s17 + $0x70] sm:$0xff]  ;;  %v8637_v12 = vpack.c.bf16 %v11139_v7, %v11115_v1 }
 0x104   : > { %434 = vst [vmem:[#allocation2 + $0x70] sm:$0xff] %v11151_v11  ;;  %v11157_v13 = vld [vmem:[%s11109_s17 + $0x88] sm:$0xff]  ;;  %v11160_v14 = vld [vmem:[%s11109_s17 + $0x90] sm:$0xff]  ;;  %v11163_v15 = vld [vmem:[%s11109_s17 + $0x60] sm:$0xff]  ;;  %8636 = vmatprep.subr.bf16.mxu0 %v8635_v8  ;;  %v8639_v16 = vpack.c.bf16 %v11148_v10, %v11133_v5 }
 0x105   : > { %480 = vrot.lane.b32.xlu0 %v11118_v2, %s10736_s15  ;;  %486 = vrot.lane.b32.xlu1 %v11126_v3, %s10736_s15  ;;  %438 = vst [vmem:[#allocation2 + $0x90] sm:$0xff] %v11160_v14  ;;  %v11173_v17 = vld [vmem:[%s11109_s17 + $0x80] sm:$0xff]  ;;  %v11176_v18 = vld [vmem:[%s11109_s17 + $0xa8] sm:$0xff]  ;;  %v8641_v22 = vpack.c.bf16 %v11163_v15, %v11145_v9 }
 0x106   : > { %v11179_v19 = vld [vmem:[%s11109_s17 + $0xb0] sm:$0xff]  ;;  %v11182_v20 = vld [vmem:[%s11109_s17 + $0xc8] sm:$0xff]  ;;  %8638 = vmatpush1.bf16.msra.mxu0 %v8637_v12  ;;  %v11192_v23 = vld [vmem:[%s11109_s17 + $0xa0] sm:$0xff]  ;;  %v8643_v25 = vpack.c.bf16 %v11176_v18, %v11157_v13 }
 0x107   : > { %v11185_v21 = vld [vmem:[%s11109_s17 + $0xd0] sm:$0xff]  ;;  %442 = vst [vmem:[#allocation2 + $0xb0] sm:$0xff] %v11179_v19  ;;  %v11195_v24 = vld [vmem:[%s11109_s17 + $0xc0] sm:$0xff]  ;;  %8640 = vmatprep.subr.bf16.mxu0 %v8639_v16  ;;  %v8645_v26 = vpack.c.bf16 %v11192_v23, %v11173_v17  ;;  %v11218_v27 = vld [vmem:[%s11109_s17 + $0x18] sm:$0xff] }
 0x108   : > { %446 = vst [vmem:[#allocation2 + $0xd0] sm:$0xff] %v11185_v21  ;;  %423 = vst.msk [vmem:[#allocation2 + $0x18] sm:$0xff] %vm422_vm0, %v11218_v27  ;;  %v11223_v28 = vld [vmem:[%s11109_s17 + $0x38] sm:$0xff]  ;;  %v11317_v34 = vld [vmem:[%s11109_s17 + $0x4a8] sm:$0xff] }
 0x109   : > { %488 = vrot.lane.b32.xlu0 %v11129_v4, %s10736_s15  ;;  %494 = vrot.lane.b32.xlu1 %v11133_v5, %s10736_s15  ;;  %v11226_v29 = vld [vmem:[%s11109_s17 + $0x58] sm:$0xff]  ;;  %427 = vst.msk [vmem:[#allocation2 + $0x38] sm:$0xff] %vm422_vm0, %v11223_v28  ;;  %1044 = vst [vmem:[#allocation2 + $0x468] sm:$0xff] %v11317_v34  ;;  %v11325_v35 = vld [vmem:[%s11109_s17 + $0x4b0] sm:$0xff] }
 0x10a   : > { %8642 = vmatpush1.bf16.msra.mxu0 %v8641_v22  ;;  %431 = vst.msk [vmem:[#allocation2 + $0x58] sm:$0xff] %vm422_vm0, %v11226_v29  ;;  %v11237_v30 = vld [vmem:[%s11109_s17 + $0x78] sm:$0xff]  ;;  %v11328_v36 = vld [vmem:[%s11109_s17 + $0x4c8] sm:$0xff]  ;;  %1045 = vst [vmem:[#allocation2 + $0x470] sm:$0xff] %v11325_v35 }
 0x10b   : > { %8644 = vmatprep.subr.bf16.mxu0 %v8643_v25  ;;  %v11240_v31 = vld [vmem:[%s11109_s17 + $0x98] sm:$0xff]  ;;  %435 = vst.msk [vmem:[#allocation2 + $0x78] sm:$0xff] %vm422_vm0, %v11237_v30  ;;  %1048 = vst [vmem:[#allocation2 + $0x488] sm:$0xff] %v11328_v36  ;;  %v11337_v37 = vld [vmem:[%s11109_s17 + $0x4d0] sm:$0xff] }
 0x10c   : > { %439 = vst.msk [vmem:[#allocation2 + $0x98] sm:$0xff] %vm422_vm0, %v11240_v31  ;;  %v11251_v32 = vld [vmem:[%s11109_s17 + $0xb8] sm:$0xff]  ;;  %v11340_v38 = vld [vmem:[%s11109_s17 + $0x4a0] sm:$0xff]  ;;  %1049 = vst [vmem:[#allocation2 + $0x490] sm:$0xff] %v11337_v37 }
 0x10d   : > { %496 = vrot.lane.b32.xlu0 %v11136_v6, %s10736_s15  ;;  %484 = vrot.lane.b32.xlu1 %v11139_v7, %s10736_s15  ;;  %v11254_v33 = vld [vmem:[%s11109_s17 + $0xd8] sm:$0xff]  ;;  %443 = vst.msk [vmem:[#allocation2 + $0xb8] sm:$0xff] %vm422_vm0, %v11251_v32  ;;  %1043 = vst [vmem:[#allocation2 + $0x460] sm:$0xff] %v11340_v38  ;;  %v11349_v39 = vld [vmem:[%s11109_s17 + $0x4c0] sm:$0xff] }
 0x10e   : > { %8646 = vmatpush1.bf16.msra.mxu0 %v8645_v26  ;;  %447 = vst.msk [vmem:[#allocation2 + $0xd8] sm:$0xff] %vm422_vm0, %v11254_v33  ;;  %v11352_v40 = vld [vmem:[%s11109_s17 + $0x4e8] sm:$0xff]  ;;  %1047 = vst [vmem:[#allocation2 + $0x480] sm:$0xff] %v11349_v39  ;;  %v11361_v41 = vld [vmem:[%s11109_s17 + $0x4f0] sm:$0xff] }
 0x10f   : > { %1052 = vst [vmem:[#allocation2 + $0x4a8] sm:$0xff] %v11352_v40  ;;  %v11364_v42 = vld [vmem:[%s11109_s17 + $0x508] sm:$0xff]  ;;  %1053 = vst [vmem:[#allocation2 + $0x4b0] sm:$0xff] %v11361_v41  ;;  %v11373_v43 = vld [vmem:[%s11109_s17 + $0x510] sm:$0xff] }
 0x110   : > { %1056 = vst [vmem:[#allocation2 + $0x4c8] sm:$0xff] %v11364_v42  ;;  %v11376_v44 = vld [vmem:[%s11109_s17 + $0x4e0] sm:$0xff]  ;;  %1057 = vst [vmem:[#allocation2 + $0x4d0] sm:$0xff] %v11373_v43  ;;  %v11388_v46 = vld [vmem:[%s11109_s17 + $0x528] sm:$0xff] }
 0x111   : > { %492 = vrot.lane.b32.xlu0 %v11145_v9, %s10736_s15  ;;  %502 = vrot.lane.b32.xlu1 %v11148_v10, %s10736_s15  ;;  %1051 = vst [vmem:[#allocation2 + $0x4a0] sm:$0xff] %v11376_v44  ;;  %v11385_v45 = vld [vmem:[%s11109_s17 + $0x500] sm:$0xff]  ;;  %1060 = vst [vmem:[#allocation2 + $0x4e8] sm:$0xff] %v11388_v46  ;;  %v11398_v50 = vld [vmem:[%s11109_s17 + $0x530] sm:$0xff] }
 0x112   : > { %1055 = vst [vmem:[#allocation2 + $0x4c0] sm:$0xff] %v11385_v45  ;;  %v11401_v51 = vld [vmem:[%s11109_s17 + $0x548] sm:$0xff]  ;;  %1061 = vst [vmem:[#allocation2 + $0x4f0] sm:$0xff] %v11398_v50  ;;  %v11414_v55 = vld [vmem:[%s11109_s17 + $0x550] sm:$0xff] }
 0x113   : > { %1064 = vst [vmem:[#allocation2 + $0x508] sm:$0xff] %v11401_v51  ;;  %v11417_v56 = vld [vmem:[%s11109_s17 + $0x520] sm:$0xff]  ;;  %1065 = vst [vmem:[#allocation2 + $0x510] sm:$0xff] %v11414_v55  ;;  %v11435_v63 = vld [vmem:[%s11109_s17 + $0x568] sm:$0xff] }
 0x114   : > { %1059 = vst [vmem:[#allocation2 + $0x4e0] sm:$0xff] %v11417_v56  ;;  %v11432_v62 = vld [vmem:[%s11109_s17 + $0x540] sm:$0xff]  ;;  %1068 = vst [vmem:[#allocation2 + $0x528] sm:$0xff] %v11435_v63  ;;  %v11449_v25 = vld [vmem:[%s11109_s17 + $0x570] sm:$0xff] }
 0x115   : > { %504 = vrot.lane.b32.xlu0 %v11151_v11, %s10736_s15  ;;  %510 = vrot.lane.b32.xlu1 %v11157_v13, %s10736_s15  ;;  %1063 = vst [vmem:[#allocation2 + $0x500] sm:$0xff] %v11432_v62  ;;  %1069 = vst [vmem:[#allocation2 + $0x530] sm:$0xff] %v11449_v25 }
 0x119   : > { %512 = vrot.lane.b32.xlu0 %v11160_v14, %s10736_s15  ;;  %500 = vrot.lane.b32.xlu1 %v11163_v15, %s10736_s15 }
 0x11d   : > { %508 = vrot.lane.b32.xlu0 %v11173_v17, %s10736_s15  ;;  %518 = vrot.lane.b32.xlu1 %v11176_v18, %s10736_s15 }
 0x121   : > { %520 = vrot.lane.b32.xlu0 %v11179_v19, %s10736_s15  ;;  %526 = vrot.lane.b32.xlu1 %v11182_v20, %s10736_s15 }
 0x125   : > { %528 = vrot.lane.b32.xlu0 %v11185_v21, %s10736_s15  ;;  %516 = vrot.lane.b32.xlu1 %v11192_v23, %s10736_s15 }
 0x129   : > { %524 = vrot.lane.b32.xlu0 %v11195_v24, %s10736_s15  ;;  %612 = vrot.lane.b32.xlu1 %v11112_v0, %s10737_s21 }
 0x12d   : > { %614 = vrot.lane.b32.xlu0 %v11118_v2, %s10737_s21  ;;  %620 = vrot.lane.b32.xlu1 %v11126_v3, %s10737_s21 }
 0x131   : > { %622 = vrot.lane.b32.xlu0 %v11129_v4, %s10737_s21  ;;  %610 = vrot.lane.b32.xlu1 %v11115_v1, %s10737_s21 }
 0x135   : > { %618 = vrot.lane.b32.xlu0 %v11139_v7, %s10737_s21  ;;  %628 = vrot.lane.b32.xlu1 %v11133_v5, %s10737_s21 }
 0x139   : > { %630 = vrot.lane.b32.xlu0 %v11136_v6, %s10737_s21  ;;  %636 = vrot.lane.b32.xlu1 %v11148_v10, %s10737_s21 }
 0x13d   : > { %638 = vrot.lane.b32.xlu0 %v11151_v11, %s10737_s21  ;;  %626 = vrot.lane.b32.xlu1 %v11145_v9, %s10737_s21 }
 0x141   : > { %634 = vrot.lane.b32.xlu0 %v11163_v15, %s10737_s21  ;;  %644 = vrot.lane.b32.xlu1 %v11157_v13, %s10737_s21 }
 0x145   : > { %646 = vrot.lane.b32.xlu0 %v11160_v14, %s10737_s21  ;;  %652 = vrot.lane.b32.xlu1 %v11176_v18, %s10737_s21 }
 0x149   : > { %654 = vrot.lane.b32.xlu0 %v11179_v19, %s10737_s21  ;;  %642 = vrot.lane.b32.xlu1 %v11173_v17, %s10737_s21 }
 0x14d   : > { %650 = vrot.lane.b32.xlu0 %v11192_v23, %s10737_s21  ;;  %660 = vrot.lane.b32.xlu1 %v11182_v20, %s10737_s21 }
 0x151   : > { %662 = vrot.lane.b32.xlu0 %v11185_v21, %s10737_s21  ;;  %746 = vrot.lane.b32.xlu1 %v11112_v0, %s10738_s3 }
 0x155   : > { %748 = vrot.lane.b32.xlu0 %v11118_v2, %s10738_s3  ;;  %658 = vrot.lane.b32.xlu1 %v11195_v24, %s10737_s21 }
 0x159   : > { %744 = vrot.lane.b32.xlu0 %v11115_v1, %s10738_s3  ;;  %754 = vrot.lane.b32.xlu1 %v11126_v3, %s10738_s3 }
 0x15d   : > { %756 = vrot.lane.b32.xlu0 %v11129_v4, %s10738_s3  ;;  %762 = vrot.lane.b32.xlu1 %v11133_v5, %s10738_s3 }
 0x161   : > { %764 = vrot.lane.b32.xlu0 %v11136_v6, %s10738_s3  ;;  %752 = vrot.lane.b32.xlu1 %v11139_v7, %s10738_s3 }
 0x165   : > { %760 = vrot.lane.b32.xlu0 %v11145_v9, %s10738_s3  ;;  %770 = vrot.lane.b32.xlu1 %v11148_v10, %s10738_s3 }
 0x169   : > { %772 = vrot.lane.b32.xlu0 %v11151_v11, %s10738_s3  ;;  %778 = vrot.lane.b32.xlu1 %v11157_v13, %s10738_s3 }
 0x16d   : > { %780 = vrot.lane.b32.xlu0 %v11160_v14, %s10738_s3  ;;  %768 = vrot.lane.b32.xlu1 %v11163_v15, %s10738_s3 }
 0x171   : > { %776 = vrot.lane.b32.xlu0 %v11173_v17, %s10738_s3  ;;  %786 = vrot.lane.b32.xlu1 %v11176_v18, %s10738_s3 }
 0x173   : > { %v479_v47 = vpop.permute.xlu0 %478  ;;  %v477_v48 = vpop.permute.xlu1 %476 }
 0x174   : > { %v533_v49 = vsel %vm532_vm1, %v477_v48, %v479_v47  ;;  %v2505_v48 = vld [vmem:[#allocation2 + $0x18] sm:$0xff] }
 0x175   : > { %788 = vrot.lane.b32.xlu0 %v11179_v19, %s10738_s3  ;;  %794 = vrot.lane.b32.xlu1 %v11182_v20, %s10738_s3  ;;  %v8649_v58 = vpack.c.bf16 %v533_v49, %v11195_v24  ;;  %v2509_v49 = vld [vmem:[#allocation2 + $0x38] sm:$0xff] }
 0x177   : > { %v11409_v52 = vpop.permute.xlu0 %480  ;;  %v487_v53 = vpop.permute.xlu1 %486 }
 0x178   : > { %v534_v54 = vsel %vm532_vm1, %v479_v47, %v11409_v52 }
 0x179   : > { %796 = vrot.lane.b32.xlu0 %v11185_v21, %s10738_s3  ;;  %784 = vrot.lane.b32.xlu1 %v11192_v23, %s10738_s3  ;;  %v8647_v57 = vpack.c.bf16 %v534_v54, %v11182_v20 }
 0x17b   : > { %v11427_v59 = vpop.permute.xlu0 %488  ;;  %v495_v60 = vpop.permute.xlu1 %494  ;;  %8648 = vmatprep.subr.bf16.mxu0 %v8647_v57  ;;  %v11458_v57 = vld [vmem:[%s11109_s17 + $0x560] sm:$0xff] }
 0x17c   : > { %v537_v61 = vsel %vm532_vm1, %v487_v53, %v11427_v59  ;;  %8650 = vmatpush1.bf16.msra.mxu0 %v8649_v58  ;;  %v2504_v58 = vld [vmem:[#allocation2 + $0x10] sm:$0xff]  ;;  %1067 = vst [vmem:[#allocation2 + $0x520] sm:$0xff] %v11458_v57 }
 0x17d   : > { %792 = vrot.lane.b32.xlu0 %v11195_v24, %s10738_s3  ;;  %880 = vrot.lane.b32.xlu1 %v11112_v0, %s10739_s4 }
 0x17f   : > { %v11443_v8 = vpop.permute.xlu0 %496  ;;  %v485_v12 = vpop.permute.xlu1 %484 }
 0x180   : > { %v540_v16 = vsel %vm532_vm1, %v495_v60, %v11443_v8  ;;  %v536_v22 = vsel %vm532_vm1, %v485_v12, %v487_v53  ;;  %v8843_v53 = vpack.c.bf16 %v2509_v49, %v2505_v48  ;;  %v2508_v12 = vld [vmem:[#allocation2 + $0x30] sm:$0xff] }
 0x181   : > { %882 = vrot.lane.b32.xlu0 %v11118_v2, %s10739_s4  ;;  %888 = vrot.lane.b32.xlu1 %v11126_v3, %s10739_s4  ;;  %v8651_v0 = vpack.c.bf16 %v540_v16, %v537_v61  ;;  %v8845_v3 = vpack.c.bf16 %v2508_v12, %v2504_v58  ;;  %v2516_v49 = vld [vmem:[#allocation2 + $0x70] sm:$0xff]  ;;  %v2525_v58 = vld [vmem:[#allocation2 + $0xb8] sm:$0xff] }
 0x182   : > { %8844 = vmatprep.subr.bf16.mxu1 %v8843_v53  ;;  %v2521_v53 = vld [vmem:[#allocation2 + $0x98] sm:$0xff] }
 0x183   : > { %v493_v26 = vpop.permute.xlu0 %492  ;;  %v503_v47 = vpop.permute.xlu1 %502  ;;  %8652 = vmatprep.subr.bf16.mxu0 %v8651_v0  ;;  %8846 = vmatpush1.bf16.msra.mxu1 %v8845_v3  ;;  %v2517_v0 = vld [vmem:[#allocation2 + $0x78] sm:$0xff]  ;;  %v8851_v3 = vpack.c.bf16 %v2525_v58, %v2521_v53 }
 0x184   : > { %v539_v54 = vsel %vm532_vm1, %v493_v26, %v495_v60  ;;  %v2513_v60 = vld [vmem:[#allocation2 + $0x58] sm:$0xff] }
 0x185   : > { %890 = vrot.lane.b32.xlu0 %v11129_v4, %s10739_s4  ;;  %878 = vrot.lane.b32.xlu1 %v11115_v1, %s10739_s4  ;;  %v8653_v2 = vpack.c.bf16 %v539_v54, %v536_v22  ;;  %v8847_v48 = vpack.c.bf16 %v2517_v0, %v2513_v60  ;;  %v2512_v4 = vld [vmem:[#allocation2 + $0x50] sm:$0xff] }
 0x186   : > { %v8849_v1 = vpack.c.bf16 %v2516_v49, %v2512_v4  ;;  %v2520_v60 = vld [vmem:[#allocation2 + $0x90] sm:$0xff] }
 0x187   : > { %v11465_v61 = vpop.permute.xlu0 %504  ;;  %v511_v16 = vpop.permute.xlu1 %510  ;;  %8654 = vmatpush1.bf16.msra.mxu0 %v8653_v2  ;;  %8848 = vmatprep.subr.bf16.mxu1 %v8847_v48  ;;  %v2524_v0 = vld [vmem:[#allocation2 + $0xb0] sm:$0xff] }
 0x188   : > { %v543_v26 = vsel %vm532_vm1, %v503_v47, %v11465_v61  ;;  %8850 = vmatpush1.bf16.msra.mxu1 %v8849_v1 }
 0x189   : > { %886 = vrot.lane.b32.xlu0 %v11139_v7, %s10739_s4  ;;  %896 = vrot.lane.b32.xlu1 %v11133_v5, %s10739_s4  ;;  %v8853_v7 = vpack.c.bf16 %v2524_v0, %v2520_v60 }
 0x18a   : > { %8852 = vmatprep.subr.bf16.mxu1 %v8851_v3 }
 0x18b   : > { %v11473_v22 = vpop.permute.xlu0 %512  ;;  %v501_v54 = vpop.permute.xlu1 %500 }
 0x18c   : > { %v546_v12 = vsel %vm532_vm1, %v511_v16, %v11473_v22  ;;  %v542_v2 = vsel %vm532_vm1, %v501_v54, %v503_v47  ;;  %8854 = vmatpush1.bf16.msra.mxu1 %v8853_v7 }
 0x18d   : > { %898 = vrot.lane.b32.xlu0 %v11136_v6, %s10739_s4  ;;  %904 = vrot.lane.b32.xlu1 %v11148_v10, %s10739_s4  ;;  %v8655_v5 = vpack.c.bf16 %v546_v12, %v543_v26 }
 0x18f   : > { %v509_v48 = vpop.permute.xlu0 %508  ;;  %v519_v4 = vpop.permute.xlu1 %518  ;;  %8656 = vmatprep.subr.bf16.mxu0 %v8655_v5 }
 0x190   : > { %v545_v49 = vsel %vm532_vm1, %v509_v48, %v511_v16 }
 0x191   : > { %906 = vrot.lane.b32.xlu0 %v11151_v11, %s10739_s4  ;;  %894 = vrot.lane.b32.xlu1 %v11145_v9, %s10739_s4  ;;  %v8657_v47 = vpack.c.bf16 %v545_v49, %v542_v2 }
 0x193   : > { %v11487_v6 = vpop.permute.xlu0 %520  ;;  %v527_v1 = vpop.permute.xlu1 %526  ;;  %8658 = vmatpush1.bf16.msra.mxu0 %v8657_v47 }
 0x194   : > { %v549_v10 = vsel %vm532_vm1, %v519_v4, %v11487_v6 }
 0x195   : > { %902 = vrot.lane.b32.xlu0 %v11163_v15, %s10739_s4  ;;  %482 = vrot.lane.b32.xlu1 %v11218_v27, %s10736_s15 }
 0x197   : > { %v11495_v16 = vpop.permute.xlu0 %528  ;;  %v517_v11 = vpop.permute.xlu1 %516 }
 0x198   : > { %v552_v9 = vsel %vm532_vm1, %v527_v1, %v11495_v16  ;;  %v548_v26 = vsel %vm532_vm1, %v517_v11, %v519_v4 }
 0x199   : > { %490 = vrot.lane.b32.xlu0 %v11223_v28, %s10736_s15  ;;  %498 = vrot.lane.b32.xlu1 %v11226_v29, %s10736_s15  ;;  %v8659_v54 = vpack.c.bf16 %v552_v9, %v549_v10 }
 0x19b   : > { %v525_v53 = vpop.permute.xlu0 %524  ;;  %v613_v15 = vpop.permute.xlu1 %612  ;;  %8660 = vmatprep.subr.bf16.mxu0 %v8659_v54 }
 0x19c   : > { %v551_v58 = vsel %vm532_vm1, %v525_v53, %v527_v1 }
 0x19d   : > { %506 = vrot.lane.b32.xlu0 %v11237_v30, %s10736_s15  ;;  %514 = vrot.lane.b32.xlu1 %v11240_v31, %s10736_s15  ;;  %v8661_v12 = vpack.c.bf16 %v551_v58, %v548_v26 }
 0x19f   : > { %v11509_v2 = vpop.permute.xlu0 %614  ;;  %v621_v3 = vpop.permute.xlu1 %620  ;;  %8662 = vmatpush1.bf16.msra.mxu0 %v8661_v12 }
 0x1a0   : > { %v668_v60 = vsel %vm666_vm2, %v613_v15, %v11509_v2 }
 0x1a1   : > { %522 = vrot.lane.b32.xlu0 %v11251_v32, %s10736_s15  ;;  %530 = vrot.lane.b32.xlu1 %v11254_v33, %s10736_s15 }
 0x1a3   : > { %v11517_v0 = vpop.permute.xlu0 %622  ;;  %v611_v5 = vpop.permute.xlu1 %610 }
 0x1a4   : > { %v671_v7 = vsel %vm666_vm2, %v621_v3, %v11517_v0  ;;  %v667_v48 = vsel %vm666_vm2, %v611_v5, %v613_v15 }
 0x1a5   : > { %616 = vrot.lane.b32.xlu0 %v11218_v27, %s10737_s21  ;;  %624 = vrot.lane.b32.xlu1 %v11223_v28, %s10737_s21  ;;  %v8663_v4 = vpack.c.bf16 %v671_v7, %v668_v60 }
 0x1a7   : > { %v619_v49 = vpop.permute.xlu0 %618  ;;  %v629_v47 = vpop.permute.xlu1 %628  ;;  %8664 = vmatprep.subr.bf16.mxu0 %v8663_v4 }
 0x1a8   : > { %v670_v1 = vsel %vm666_vm2, %v619_v49, %v621_v3 }
 0x1a9   : > { %632 = vrot.lane.b32.xlu0 %v11226_v29, %s10737_s21  ;;  %640 = vrot.lane.b32.xlu1 %v11237_v30, %s10737_s21  ;;  %v8665_v10 = vpack.c.bf16 %v670_v1, %v667_v48 }
 0x1ab   : > { %v11531_v11 = vpop.permute.xlu0 %630  ;;  %v637_v9 = vpop.permute.xlu1 %636  ;;  %8666 = vmatpush1.bf16.msra.mxu0 %v8665_v10 }
 0x1ac   : > { %v674_v26 = vsel %vm666_vm2, %v629_v47, %v11531_v11 }
 0x1ad   : > { %648 = vrot.lane.b32.xlu0 %v11240_v31, %s10737_s21  ;;  %656 = vrot.lane.b32.xlu1 %v11251_v32, %s10737_s21 }
 0x1af   : > { %v11539_v54 = vpop.permute.xlu0 %638  ;;  %v627_v53 = vpop.permute.xlu1 %626 }
 0x1b0   : > { %v677_v15 = vsel %vm666_vm2, %v637_v9, %v11539_v54  ;;  %v673_v58 = vsel %vm666_vm2, %v627_v53, %v629_v47 }
 0x1b1   : > { %664 = vrot.lane.b32.xlu0 %v11254_v33, %s10737_s21  ;;  %750 = vrot.lane.b32.xlu1 %v11218_v27, %s10738_s3  ;;  %v8667_v12 = vpack.c.bf16 %v677_v15, %v674_v26 }
 0x1b3   : > { %v635_v3 = vpop.permute.xlu0 %634  ;;  %v645_v60 = vpop.permute.xlu1 %644  ;;  %8668 = vmatprep.subr.bf16.mxu0 %v8667_v12 }
 0x1b4   : > { %v676_v5 = vsel %vm666_vm2, %v635_v3, %v637_v9 }
 0x1b5   : > { %758 = vrot.lane.b32.xlu0 %v11223_v28, %s10738_s3  ;;  %766 = vrot.lane.b32.xlu1 %v11226_v29, %s10738_s3  ;;  %v8669_v7 = vpack.c.bf16 %v676_v5, %v673_v58 }
 0x1b7   : > { %v11553_v48 = vpop.permute.xlu0 %646  ;;  %v653_v4 = vpop.permute.xlu1 %652  ;;  %8670 = vmatpush1.bf16.msra.mxu0 %v8669_v7  ;;  %v2251_v7 = vld [vmem:[#allocation3 + $0x8] sm:$0xff] }
 0x1b8   : > { %v680_v49 = vsel %vm666_vm2, %v645_v60, %v11553_v48  ;;  %3311 = vmatprep.mubr.f32.mxu0 %v2251_v7  ;;  %4435 = vmatprep.mubr.f32.mxu1 %v2251_v7 }
 0x1b9   : > { %774 = vrot.lane.b32.xlu0 %v11237_v30, %s10738_s3  ;;  %782 = vrot.lane.b32.xlu1 %v11240_v31, %s10738_s3 }
 0x1bb   : > { %v11561_v47 = vpop.permute.xlu0 %654  ;;  %v643_v1 = vpop.permute.xlu1 %642 }
 0x1bc   : > { %v683_v10 = vsel %vm666_vm2, %v653_v4, %v11561_v47  ;;  %v679_v9 = vsel %vm666_vm2, %v643_v1, %v645_v60 }
 0x1bd   : > { %790 = vrot.lane.b32.xlu0 %v11251_v32, %s10738_s3  ;;  %798 = vrot.lane.b32.xlu1 %v11254_v33, %s10738_s3  ;;  %v8671_v26 = vpack.c.bf16 %v683_v10, %v680_v49 }
 0x1bf   : > { %v651_v53 = vpop.permute.xlu0 %650  ;;  %v661_v15 = vpop.permute.xlu1 %660  ;;  %8672 = vmatprep.subr.bf16.mxu0 %v8671_v26 }
 0x1c0   : > { %v682_v58 = vsel %vm666_vm2, %v651_v53, %v653_v4 }
 0x1c1   : > { %884 = vrot.lane.b32.xlu0 %v11218_v27, %s10739_s4  ;;  %892 = vrot.lane.b32.xlu1 %v11223_v28, %s10739_s4  ;;  %v8673_v12 = vpack.c.bf16 %v682_v58, %v679_v9 }
 0x1c3   : > { %v11575_v3 = vpop.permute.xlu0 %662  ;;  %v747_v60 = vpop.permute.xlu1 %746  ;;  %8674 = vmatpush1.bf16.msra.mxu0 %v8673_v12 }
 0x1c4   : > { %v686_v5 = vsel %vm666_vm2, %v661_v15, %v11575_v3 }
 0x1c5   : > { %900 = vrot.lane.b32.xlu0 %v11226_v29, %s10739_s4  ;;  %908 = vrot.lane.b32.xlu1 %v11237_v30, %s10739_s4 }
 0x1c7   : > { %v11583_v27 = vpop.permute.xlu0 %748  ;;  %v659_v28 = vpop.permute.xlu1 %658 }
 0x1c8   : > { %v802_v4 = vsel %vm800_vm3, %v747_v60, %v11583_v27  ;;  %v685_v49 = vsel %vm666_vm2, %v659_v28, %v661_v15 }
 0x1c9   : > { %912 = vrot.lane.b32.xlu0 %v11157_v13, %s10739_s4  ;;  %914 = vrot.lane.b32.xlu1 %v11160_v14, %s10739_s4  ;;  %v8675_v29 = vpack.c.bf16 %v802_v4, %v686_v5 }
 0x1cb   : > { %v745_v30 = vpop.permute.xlu0 %744  ;;  %v755_v1 = vpop.permute.xlu1 %754  ;;  %8676 = vmatprep.subr.bf16.mxu0 %v8675_v29 }
 0x1cc   : > { %v801_v10 = vsel %vm800_vm3, %v745_v30, %v747_v60 }
 0x1cd   : > { %920 = vrot.lane.b32.xlu0 %v11176_v18, %s10739_s4  ;;  %922 = vrot.lane.b32.xlu1 %v11179_v19, %s10739_s4  ;;  %v8677_v9 = vpack.c.bf16 %v801_v10, %v685_v49  ;;  %v11638_v10 = vld [vmem:[%s11109_s17 + $0x4b8] sm:$0xff] }
 0x1ce   : > { %1046 = vst.msk [vmem:[#allocation2 + $0x478] sm:$0xff] %vm422_vm0, %v11638_v10 }
 0x1cf   : > { %v11597_v26 = vpop.permute.xlu0 %756  ;;  %v763_v53 = vpop.permute.xlu1 %762  ;;  %8678 = vmatpush1.bf16.msra.mxu0 %v8677_v9  ;;  %v11641_v9 = vld [vmem:[%s11109_s17 + $0x4d8] sm:$0xff] }
 0x1d0   : > { %v805_v13 = vsel %vm800_vm3, %v755_v1, %v11597_v26  ;;  %15151 = vst [vmem:[#allocation25_spill] sm:$0xff] %v11641_v9  ;;  %1050 = vst.msk [vmem:[#allocation2 + $0x498] sm:$0xff] %vm422_vm0, %v11641_v9 }
 0x1d1   : > { %910 = vrot.lane.b32.xlu0 %v11173_v17, %s10739_s4  ;;  %918 = vrot.lane.b32.xlu1 %v11192_v23, %s10739_s4 }
 0x1d3   : > { %v11605_v14 = vpop.permute.xlu0 %764  ;;  %v753_v18 = vpop.permute.xlu1 %752 }
 0x1d4   : > { %v808_v19 = vsel %vm800_vm3, %v763_v53, %v11605_v14  ;;  %v804_v15 = vsel %vm800_vm3, %v753_v18, %v755_v1 }
 0x1d5   : > { %928 = vrot.lane.b32.xlu0 %v11182_v20, %s10739_s4  ;;  %930 = vrot.lane.b32.xlu1 %v11185_v21, %s10739_s4  ;;  %v8679_v58 = vpack.c.bf16 %v808_v19, %v805_v13 }
 0x1d7   : > { %v761_v12 = vpop.permute.xlu0 %760  ;;  %v771_v17 = vpop.permute.xlu1 %770  ;;  %8680 = vmatprep.subr.bf16.mxu0 %v8679_v58  ;;  %v11659_v58 = vld [vmem:[%s11109_s17 + $0x518] sm:$0xff] }
 0x1d8   : > { %v807_v23 = vsel %vm800_vm3, %v761_v12, %v763_v53  ;;  %1058 = vst.msk [vmem:[#allocation2 + $0x4d8] sm:$0xff] %vm422_vm0, %v11659_v58 }
 0x1d9   : > { %926 = vrot.lane.b32.xlu0 %v11195_v24, %s10739_s4  ;;  %1101 = vrot.lane.b32.xlu1 %v11317_v34, %s10736_s15  ;;  %v8681_v60 = vpack.c.bf16 %v807_v23, %v804_v15  ;;  %v11656_v15 = vld [vmem:[%s11109_s17 + $0x4f8] sm:$0xff] }
 0x1da   : > { %1054 = vst.msk [vmem:[#allocation2 + $0x4b8] sm:$0xff] %vm422_vm0, %v11656_v15 }
 0x1db   : > { %v11619_v5 = vpop.permute.xlu0 %772  ;;  %v779_v7 = vpop.permute.xlu1 %778  ;;  %8682 = vmatpush1.bf16.msra.mxu0 %v8681_v60 }
 0x1dc   : > { %v811_v20 = vsel %vm800_vm3, %v771_v17, %v11619_v5 }
 0x1dd   : > { %1103 = vrot.lane.b32.xlu0 %v11325_v35, %s10736_s15  ;;  %1109 = vrot.lane.b32.xlu1 %v11328_v36, %s10736_s15 }
 0x1df   : > { %v11627_v21 = vpop.permute.xlu0 %780  ;;  %v769_v24 = vpop.permute.xlu1 %768 }
 0x1e0   : > { %v814_v28 = vsel %vm800_vm3, %v779_v7, %v11627_v21  ;;  %v810_v4 = vsel %vm800_vm3, %v769_v24, %v771_v17 }
 0x1e1   : > { %1111 = vrot.lane.b32.xlu0 %v11337_v37, %s10736_s15  ;;  %1099 = vrot.lane.b32.xlu1 %v11340_v38, %s10736_s15  ;;  %v8683_v49 = vpack.c.bf16 %v814_v28, %v811_v20  ;;  %v11678_v20 = vld [vmem:[%s11109_s17 + $0x558] sm:$0xff] }
 0x1e2   : > { %15152 = vst [vmem:[#allocation26_spill] sm:$0xff] %v11678_v20  ;;  %1066 = vst.msk [vmem:[#allocation2 + $0x518] sm:$0xff] %vm422_vm0, %v11678_v20 }
 0x1e3   : > { %v777_v29 = vpop.permute.xlu0 %776  ;;  %v787_v30 = vpop.permute.xlu1 %786  ;;  %8684 = vmatprep.subr.bf16.mxu0 %v8683_v49 }
 0x1e4   : > { %v813_v1 = vsel %vm800_vm3, %v777_v29, %v779_v7  ;;  %v11675_v7 = vld [vmem:[%s11109_s17 + $0x538] sm:$0xff] }
 0x1e5   : > { %1107 = vrot.lane.b32.xlu0 %v11349_v39, %s10736_s15  ;;  %1117 = vrot.lane.b32.xlu1 %v11352_v40, %s10736_s15  ;;  %v8685_v53 = vpack.c.bf16 %v813_v1, %v810_v4  ;;  %1062 = vst.msk [vmem:[#allocation2 + $0x4f8] sm:$0xff] %vm422_vm0, %v11675_v7  ;;  %v11690_v29 = vld [vmem:[%s11109_s17 + $0x578] sm:$0xff] }
 0x1e6   : > { %15153 = vst [vmem:[#allocation27_spill] sm:$0xff] %v11690_v29  ;;  %1070 = vst.msk [vmem:[#allocation2 + $0x538] sm:$0xff] %vm422_vm0, %v11690_v29 }
 0x1e7   : > { %v11651_v13 = vpop.permute.xlu0 %788  ;;  %v795_v18 = vpop.permute.xlu1 %794  ;;  %8686 = vmatpush1.bf16.msra.mxu0 %v8685_v53 }
 0x1e8   : > { %v817_v19 = vsel %vm800_vm3, %v787_v30, %v11651_v13 }
 0x1e9   : > { %1119 = vrot.lane.b32.xlu0 %v11361_v41, %s10736_s15  ;;  %1125 = vrot.lane.b32.xlu1 %v11364_v42, %s10736_s15 }
 0x1eb   : > { %v11669_v12 = vpop.permute.xlu0 %796  ;;  %v785_v17 = vpop.permute.xlu1 %784 }
 0x1ec   : > { %v820_v23 = vsel %vm800_vm3, %v795_v18, %v11669_v12  ;;  %v816_v60 = vsel %vm800_vm3, %v785_v17, %v787_v30 }
 0x1ed   : > { %1127 = vrot.lane.b32.xlu0 %v11373_v43, %s10736_s15  ;;  %1115 = vrot.lane.b32.xlu1 %v11376_v44, %s10736_s15  ;;  %v8687_v24 = vpack.c.bf16 %v820_v23, %v817_v19 }
 0x1ef   : > { %v793_v28 = vpop.permute.xlu0 %792  ;;  %v881_v4 = vpop.permute.xlu1 %880  ;;  %8688 = vmatprep.subr.bf16.mxu0 %v8687_v24 }
 0x1f0   : > { %v819_v49 = vsel %vm800_vm3, %v793_v28, %v795_v18 }
 0x1f1   : > { %1123 = vrot.lane.b32.xlu0 %v11385_v45, %s10736_s15  ;;  %1133 = vrot.lane.b32.xlu1 %v11388_v46, %s10736_s15  ;;  %v8689_v30 = vpack.c.bf16 %v819_v49, %v816_v60 }
 0x1f3   : > { %v11698_v1 = vpop.permute.xlu0 %882  ;;  %v889_v53 = vpop.permute.xlu1 %888  ;;  %8690 = vmatpush1.bf16.msra.mxu0 %v8689_v30 }
 0x1f4   : > { %v936_v18 = vsel %vm934_vm4, %v881_v4, %v11698_v1 }
 0x1f5   : > { %1135 = vrot.lane.b32.xlu0 %v11398_v50, %s10736_s15  ;;  %1141 = vrot.lane.b32.xlu1 %v11401_v51, %s10736_s15 }
 0x1f7   : > { %v11706_v19 = vpop.permute.xlu0 %890  ;;  %v879_v17 = vpop.permute.xlu1 %878 }
 0x1f8   : > { %v939_v23 = vsel %vm934_vm4, %v889_v53, %v11706_v19  ;;  %v935_v60 = vsel %vm934_vm4, %v879_v17, %v881_v4 }
 0x1f9   : > { %1143 = vrot.lane.b32.xlu0 %v11414_v55, %s10736_s15  ;;  %1131 = vrot.lane.b32.xlu1 %v11417_v56, %s10736_s15  ;;  %v8691_v24 = vpack.c.bf16 %v939_v23, %v936_v18 }
 0x1fb   : > { %v887_v28 = vpop.permute.xlu0 %886  ;;  %v897_v49 = vpop.permute.xlu1 %896  ;;  %8692 = vmatprep.subr.bf16.mxu0 %v8691_v24 }
 0x1fc   : > { %v938_v30 = vsel %vm934_vm4, %v887_v28, %v889_v53 }
 0x1fd   : > { %1139 = vrot.lane.b32.xlu0 %v11432_v62, %s10736_s15  ;;  %1149 = vrot.lane.b32.xlu1 %v11435_v63, %s10736_s15  ;;  %v8693_v29 = vpack.c.bf16 %v938_v30, %v935_v60 }
 0x1ff   : > { %v11720_v4 = vpop.permute.xlu0 %898  ;;  %v905_v17 = vpop.permute.xlu1 %904  ;;  %8694 = vmatpush1.bf16.msra.mxu0 %v8693_v29 }
 0x200   : > { %v942_v20 = vsel %vm934_vm4, %v897_v49, %v11720_v4 }
 0x201   : > { %1151 = vrot.lane.b32.xlu0 %v11449_v25, %s10736_s15  ;;  %1234 = vrot.lane.b32.xlu1 %v11317_v34, %s10737_s21 }
 0x203   : > { %v11728_v53 = vpop.permute.xlu0 %906  ;;  %v895_v18 = vpop.permute.xlu1 %894 }
 0x204   : > { %v945_v23 = vsel %vm934_vm4, %v905_v17, %v11728_v53  ;;  %v941_v60 = vsel %vm934_vm4, %v895_v18, %v897_v49 }
 0x205   : > { %1236 = vrot.lane.b32.xlu0 %v11325_v35, %s10737_s21  ;;  %1147 = vrot.lane.b32.xlu1 %v11458_v57, %s10736_s15  ;;  %v8695_v29 = vpack.c.bf16 %v945_v23, %v942_v20  ;;  %v11745_v20 = vld [vmem:[#allocation3] sm:$0xff]  ;;  %v2528_v23 = vld [vmem:[#allocation2 + $0xd0] sm:$0xff] }
 0x207   : > { %v903_v24 = vpop.permute.xlu0 %902  ;;  %v483_v28 = vpop.permute.xlu1 %482  ;;  %8696 = vmatprep.subr.bf16.mxu0 %v8695_v29 }
 0x208   : > { %v944_v34 = vsel %vm934_vm4, %v903_v24, %v905_v17  ;;  %v535_v30 = vsel %vm532_vm1, %v11409_v52, %v483_v28  ;;  %585 = vst.msk [vmem:[#allocation2 + $0xf8] sm:$0xff] %vm422_vm0, %v483_v28  ;;  %v11769_v28 = vld [vmem:[#allocation3 + $0x78] sm:$0xff] }
 0x209   : > { %1232 = vrot.lane.b32.xlu0 %v11340_v38, %s10737_s21  ;;  %1242 = vrot.lane.b32.xlu1 %v11328_v36, %s10737_s21  ;;  %v8697_v35 = vpack.c.bf16 %v944_v34, %v941_v60  ;;  %v11753_v38 = vld [vmem:[#allocation3 + $0x40] sm:$0xff]  ;;  %v2529_v36 = vld [vmem:[#allocation2 + $0xd8] sm:$0xff]  ;;  %v8857_v34 = vpack.c.bf16 %v535_v30, %v2528_v23  ;;  %v11785_v30 = vld [vmem:[#allocation3 + $0xb0] sm:$0xff] }
 0x20b   : > { %v491_v49 = vpop.permute.xlu0 %490  ;;  %v499_v18 = vpop.permute.xlu1 %498  ;;  %8698 = vmatpush1.bf16.msra.mxu0 %v8697_v35 }
 0x20c   : > { %v538_v17 = vsel %vm532_vm1, %v11427_v59, %v491_v49  ;;  %589 = vst.msk [vmem:[#allocation2 + $0x118] sm:$0xff] %vm422_vm0, %v491_v49  ;;  %v541_v52 = vsel %vm532_vm1, %v11443_v8, %v499_v18  ;;  %593 = vst.msk [vmem:[#allocation2 + $0x138] sm:$0xff] %vm422_vm0, %v499_v18  ;;  %v11761_v8 = vld [vmem:[#allocation3 + $0x38] sm:$0xff]  ;;  %v11777_v18 = vld [vmem:[#allocation3 + $0x70] sm:$0xff] }
 0x20d   : > { %1244 = vrot.lane.b32.xlu0 %v11337_v37, %s10737_s21  ;;  %1250 = vrot.lane.b32.xlu1 %v11352_v40, %s10737_s21  ;;  %v8861_v23 = vpack.c.bf16 %v541_v52, %v538_v17  ;;  %v11801_v17 = vld [vmem:[#allocation3 + $0xe8] sm:$0xff] }
 0x20e   : > { %3312 = vmatmul.mubr.f32.vlgmr.msra.gmra.mrb[0].mxu0 %v11745_v20 }
 0x20f   : > { %v507_v59 = vpop.permute.xlu0 %506  ;;  %v515_v60 = vpop.permute.xlu1 %514  ;;  %v2533_v29 = vld [vmem:[#allocation2 + $0xf8] sm:$0xff]  ;;  %3317 = vmatprep.mubr.f32.mxu0 %v11753_v38 }
 0x210   : > { %v544_v24 = vsel %vm532_vm1, %v11465_v61, %v507_v59  ;;  %597 = vst.msk [vmem:[#allocation2 + $0x158] sm:$0xff] %vm422_vm0, %v507_v59  ;;  %v547_v37 = vsel %vm532_vm1, %v11473_v22, %v515_v60  ;;  %601 = vst.msk [vmem:[#allocation2 + $0x178] sm:$0xff] %vm422_vm0, %v515_v60  ;;  %v8855_v40 = vpack.c.bf16 %v2533_v29, %v2529_v36  ;;  %v11793_v29 = vld [vmem:[#allocation3 + $0xa8] sm:$0xff] }
 0x211   : > { %1252 = vrot.lane.b32.xlu0 %v11361_v41, %s10737_s21  ;;  %1240 = vrot.lane.b32.xlu1 %v11349_v39, %s10737_s21  ;;  %v8865_v52 = vpack.c.bf16 %v547_v37, %v544_v24  ;;  %v11817_v24 = vld [vmem:[#allocation3 + $0x120] sm:$0xff] }
 0x212   : > { %8856 = vmatprep.subr.bf16.mxu1 %v8855_v40  ;;  %3318 = vmatmul.mubr.f32.gmra.mrb[2].mxu0 %v11761_v8 }
 0x213   : > { %v523_v61 = vpop.permute.xlu0 %522  ;;  %8858 = vmatpush1.bf16.msra.mxu1 %v8857_v34  ;;  %v531_v35 = vpop.permute.xlu1 %530  ;;  %v2537_v49 = vld [vmem:[#allocation2 + $0x118] sm:$0xff]  ;;  %3323 = vmatprep.mubr.f32.mxu0 %v11769_v28 }
 0x214   : > { %v2541_v22 = vld [vmem:[#allocation2 + $0x138] sm:$0xff]  ;;  %v550_v36 = vsel %vm532_vm1, %v11487_v6, %v523_v61  ;;  %605 = vst.msk [vmem:[#allocation2 + $0x198] sm:$0xff] %vm422_vm0, %v523_v61  ;;  %v553_v39 = vsel %vm532_vm1, %v11495_v16, %v531_v35  ;;  %609 = vst.msk [vmem:[#allocation2 + $0x1b8] sm:$0xff] %vm422_vm0, %v531_v35  ;;  %v11809_v35 = vld [vmem:[#allocation3 + $0xe0] sm:$0xff] }
 0x215   : > { %v8859_v41 = vpack.c.bf16 %v2541_v22, %v2537_v49  ;;  %1248 = vrot.lane.b32.xlu0 %v11376_v44, %s10737_s21  ;;  %1258 = vrot.lane.b32.xlu1 %v11364_v42, %s10737_s21  ;;  %v8869_v37 = vpack.c.bf16 %v553_v39, %v550_v36  ;;  %v11833_v36 = vld [vmem:[#allocation3 + $0x158] sm:$0xff] }
 0x216   : > { %3324 = vmatmul.mubr.f32.gmra.mrb[4].mxu0 %v11777_v18 }
 0x217   : > { %8860 = vmatprep.subr.bf16.mxu1 %v8859_v41  ;;  %v617_v6 = vpop.permute.xlu0 %616  ;;  %v625_v59 = vpop.permute.xlu1 %624  ;;  %v2545_v60 = vld [vmem:[#allocation2 + $0x158] sm:$0xff]  ;;  %3329 = vmatprep.mubr.f32.mxu0 %v11785_v30 }
 0x218   : > { %8862 = vmatpush1.bf16.msra.mxu1 %v8861_v23  ;;  %v2549_v16 = vld [vmem:[#allocation2 + $0x178] sm:$0xff]  ;;  %v669_v40 = vsel %vm666_vm2, %v11509_v2, %v617_v6  ;;  %719 = vst.msk [vmem:[#allocation2 + $0x1d8] sm:$0xff] %vm422_vm0, %v617_v6  ;;  %v672_v42 = vsel %vm666_vm2, %v11517_v0, %v625_v59  ;;  %723 = vst.msk [vmem:[#allocation2 + $0x1f8] sm:$0xff] %vm422_vm0, %v625_v59 }
 0x219   : > { %v8863_v44 = vpack.c.bf16 %v2549_v16, %v2545_v60  ;;  %1260 = vrot.lane.b32.xlu0 %v11373_v43, %s10737_s21  ;;  %1266 = vrot.lane.b32.xlu1 %v11388_v46, %s10737_s21  ;;  %v11825_v23 = vld [vmem:[#allocation3 + $0x118] sm:$0xff]  ;;  %v8873_v39 = vpack.c.bf16 %v672_v42, %v669_v40  ;;  %v11841_v16 = vld [vmem:[#allocation3 + $0x150] sm:$0xff] }
 0x21a   : > { %3330 = vmatmul.mubr.f32.gmra.mrb[6].mxu0 %v11793_v29  ;;  %v11849_v40 = vld [vmem:[#allocation3 + $0x190] sm:$0xff] }
 0x21b   : > { %8864 = vmatprep.subr.bf16.mxu1 %v8863_v44  ;;  %v633_v2 = vpop.permute.xlu0 %632  ;;  %v641_v34 = vpop.permute.xlu1 %640  ;;  %v2553_v61 = vld [vmem:[#allocation2 + $0x198] sm:$0xff]  ;;  %3335 = vmatprep.mubr.f32.mxu0 %v11801_v17 }
 0x21c   : > { %8866 = vmatpush1.bf16.msra.mxu1 %v8865_v52  ;;  %v2557_v0 = vld [vmem:[#allocation2 + $0x1b8] sm:$0xff]  ;;  %v675_v49 = vsel %vm666_vm2, %v11531_v11, %v633_v2  ;;  %727 = vst.msk [vmem:[#allocation2 + $0x218] sm:$0xff] %vm422_vm0, %v633_v2  ;;  %v678_v43 = vsel %vm666_vm2, %v11539_v54, %v641_v34  ;;  %731 = vst.msk [vmem:[#allocation2 + $0x238] sm:$0xff] %vm422_vm0, %v641_v34  ;;  %v11857_v34 = vld [vmem:[#allocation3 + $0x188] sm:$0xff] }
 0x21d   : > { %v8867_v46 = vpack.c.bf16 %v2557_v0, %v2553_v61  ;;  %1268 = vrot.lane.b32.xlu0 %v11398_v50, %s10737_s21  ;;  %1256 = vrot.lane.b32.xlu1 %v11385_v45, %s10737_s21  ;;  %v8877_v42 = vpack.c.bf16 %v678_v43, %v675_v49  ;;  %v11865_v0 = vld [vmem:[#allocation3 + $0x1c8] sm:$0xff] }
 0x21e   : > { %3336 = vmatmul.mubr.f32.gmra.mrb[8].mxu0 %v11809_v35 }
 0x21f   : > { %8868 = vmatprep.subr.bf16.mxu1 %v8867_v46  ;;  %v649_v11 = vpop.permute.xlu0 %648  ;;  %v657_v22 = vpop.permute.xlu1 %656  ;;  %v2561_v41 = vld [vmem:[#allocation2 + $0x1d8] sm:$0xff]  ;;  %3341 = vmatprep.mubr.f32.mxu0 %v11817_v24 }
 0x220   : > { %8870 = vmatpush1.bf16.msra.mxu1 %v8869_v37  ;;  %v2565_v54 = vld [vmem:[#allocation2 + $0x1f8] sm:$0xff]  ;;  %v681_v6 = vsel %vm666_vm2, %v11553_v48, %v649_v11  ;;  %735 = vst.msk [vmem:[#allocation2 + $0x258] sm:$0xff] %vm422_vm0, %v649_v11  ;;  %v684_v45 = vsel %vm666_vm2, %v11561_v47, %v657_v22  ;;  %739 = vst.msk [vmem:[#allocation2 + $0x278] sm:$0xff] %vm422_vm0, %v657_v22  ;;  %v11873_v37 = vld [vmem:[#allocation3 + $0x1c0] sm:$0xff] }
 0x221   : > { %v8871_v50 = vpack.c.bf16 %v2565_v54, %v2561_v41  ;;  %1264 = vrot.lane.b32.xlu0 %v11417_v56, %s10737_s21  ;;  %1274 = vrot.lane.b32.xlu1 %v11401_v51, %s10737_s21  ;;  %v8881_v49 = vpack.c.bf16 %v684_v45, %v681_v6  ;;  %v11881_v22 = vld [vmem:[#allocation3 + $0x200] sm:$0xff]  ;;  %v11885_v41 = vld [vmem:[#allocation2 + $0x468] sm:$0xff] }
 0x222   : > { %3342 = vmatmul.mubr.f32.gmra.mrb[10].mxu0 %v11825_v23 }
 0x223   : > { %8872 = vmatprep.subr.bf16.mxu1 %v8871_v50  ;;  %v665_v48 = vpop.permute.xlu0 %664  ;;  %v751_v59 = vpop.permute.xlu1 %750  ;;  %v2569_v60 = vld [vmem:[#allocation2 + $0x218] sm:$0xff]  ;;  %3347 = vmatprep.mubr.f32.mxu0 %v11833_v36 }
 0x224   : > { %8874 = vmatpush1.bf16.msra.mxu1 %v8873_v39  ;;  %v2573_v47 = vld [vmem:[#allocation2 + $0x238] sm:$0xff]  ;;  %v687_v44 = vsel %vm666_vm2, %v11575_v3, %v665_v48  ;;  %743 = vst.msk [vmem:[#allocation2 + $0x298] sm:$0xff] %vm422_vm0, %v665_v48  ;;  %v803_v51 = vsel %vm800_vm3, %v11583_v27, %v751_v59  ;;  %853 = vst.msk [vmem:[#allocation2 + $0x2b8] sm:$0xff] %vm422_vm0, %v751_v59 }
 0x225   : > { %v8875_v56 = vpack.c.bf16 %v2573_v47, %v2569_v60  ;;  %1276 = vrot.lane.b32.xlu0 %v11414_v55, %s10737_s21  ;;  %1282 = vrot.lane.b32.xlu1 %v11435_v63, %s10737_s21  ;;  %v8885_v54 = vpack.c.bf16 %v803_v51, %v687_v44  ;;  %v11891_v50 = vld [vmem:[#allocation3 + $0x1f8] sm:$0xff]  ;;  %v11901_v60 = vld [vmem:[#allocation2 + $0x470] sm:$0xff]  ;;  %v11905_v47 = vld [vmem:[#allocation2 + $0x488] sm:$0xff] }
 0x226   : > { %3348 = vmatmul.mubr.f32.gmra.mrb[12].mxu0 %v11841_v16  ;;  %v11899_v59 = vld [vmem:[#allocation3 + $0x238] sm:$0xff] }
 0x227   : > { %8876 = vmatprep.subr.bf16.mxu1 %v8875_v56  ;;  %v759_v3 = vpop.permute.xlu0 %758  ;;  %v767_v52 = vpop.permute.xlu1 %766  ;;  %v2577_v2 = vld [vmem:[#allocation2 + $0x258] sm:$0xff]  ;;  %3353 = vmatprep.mubr.f32.mxu0 %v11849_v40 }
 0x228   : > { %8878 = vmatpush1.bf16.msra.mxu1 %v8877_v42  ;;  %v2581_v27 = vld [vmem:[#allocation2 + $0x278] sm:$0xff]  ;;  %v806_v61 = vsel %vm800_vm3, %v11597_v26, %v759_v3  ;;  %857 = vst.msk [vmem:[#allocation2 + $0x2d8] sm:$0xff] %vm422_vm0, %v759_v3  ;;  %v809_v55 = vsel %vm800_vm3, %v11605_v14, %v767_v52  ;;  %861 = vst.msk [vmem:[#allocation2 + $0x2f8] sm:$0xff] %vm422_vm0, %v767_v52  ;;  %v11911_v42 = vld [vmem:[#allocation3 + $0x230] sm:$0xff] }
 0x229   : > { %v8879_v63 = vpack.c.bf16 %v2581_v27, %v2577_v2  ;;  %1284 = vrot.lane.b32.xlu0 %v11449_v25, %s10737_s21  ;;  %1272 = vrot.lane.b32.xlu1 %v11432_v62, %s10737_s21  ;;  %v11921_v27 = vld [vmem:[#allocation3 + $0x270] sm:$0xff] }
 0x22a   : > { %3354 = vmatmul.mubr.f32.gmra.mrb[14].mxu0 %v11857_v34 }
 0x22b   : > { %8880 = vmatprep.subr.bf16.mxu1 %v8879_v63  ;;  %v775_v26 = vpop.permute.xlu0 %774  ;;  %v783_v43 = vpop.permute.xlu1 %782  ;;  %v2585_v46 = vld [vmem:[#allocation2 + $0x298] sm:$0xff]  ;;  %3359 = vmatprep.mubr.f32.mxu0 %v11865_v0  ;;  %v11929_v63 = vld [vmem:[#allocation2 + $0x490] sm:$0xff] }
 0x22c   : > { %8882 = vmatpush1.bf16.msra.mxu1 %v8881_v49  ;;  %v2589_v14 = vld [vmem:[#allocation2 + $0x2b8] sm:$0xff]  ;;  %v812_v11 = vsel %vm800_vm3, %v11619_v5, %v775_v26  ;;  %865 = vst.msk [vmem:[#allocation2 + $0x318] sm:$0xff] %vm422_vm0, %v775_v26  ;;  %v815_v62 = vsel %vm800_vm3, %v11627_v21, %v783_v43  ;;  %869 = vst.msk [vmem:[#allocation2 + $0x338] sm:$0xff] %vm422_vm0, %v783_v43 }
 0x22d   : > { %v8883_v25 = vpack.c.bf16 %v2589_v14, %v2585_v46  ;;  %1280 = vrot.lane.b32.xlu0 %v11458_v57, %s10737_s21  ;;  %1367 = vrot.lane.b32.xlu1 %v11885_v41, %s10738_s3  ;;  %v11941_v14 = vld [vmem:[#allocation3 + $0x268] sm:$0xff] }
 0x22e   : > { %3360 = vmatmul.mubr.f32.gmra.mrb[16].mxu0 %v11873_v37 }
 0x22f   : > { %8884 = vmatprep.subr.bf16.mxu1 %v8883_v25  ;;  %v791_v5 = vpop.permute.xlu0 %790  ;;  %v799_v21 = vpop.permute.xlu1 %798  ;;  %v2593_v6 = vld [vmem:[#allocation2 + $0x2d8] sm:$0xff]  ;;  %3365 = vmatprep.mubr.f32.mxu0 %v11881_v22 }
 0x230   : > { %8886 = vmatpush1.bf16.msra.mxu1 %v8885_v54  ;;  %v2597_v45 = vld [vmem:[#allocation2 + $0x2f8] sm:$0xff]  ;;  %v818_v57 = vsel %vm800_vm3, %v11651_v13, %v791_v5  ;;  %873 = vst.msk [vmem:[#allocation2 + $0x358] sm:$0xff] %vm422_vm0, %v791_v5  ;;  %v821_v39 = vsel %vm800_vm3, %v11669_v12, %v799_v21  ;;  %877 = vst.msk [vmem:[#allocation2 + $0x378] sm:$0xff] %vm422_vm0, %v799_v21  ;;  %v8889_v13 = vpack.c.bf16 %v809_v55, %v806_v61  ;;  %v11924_v61 = vld [vmem:[%s11109_s17 + $0x948] sm:$0xff] }
 0x231   : > { %v8887_v48 = vpack.c.bf16 %v2597_v45, %v2593_v6  ;;  %1369 = vrot.lane.b32.xlu0 %v11901_v60, %s10738_s3  ;;  %1375 = vrot.lane.b32.xlu1 %v11905_v47, %s10738_s3  ;;  %15154 = vst [vmem:[#allocation28_spill] sm:$0xff] %v11924_v61  ;;  %v11927_v55 = vld [vmem:[%s11109_s17 + $0x950] sm:$0xff]  ;;  %1663 = vst [vmem:[#allocation2 + $0x8c8] sm:$0xff] %v11924_v61  ;;  %v11949_v54 = vld [vmem:[#allocation3 + $0x2a8] sm:$0xff] }
 0x232   : > { %3366 = vmatmul.mubr.f32.gmra.mrb[18].mxu0 %v11891_v50  ;;  %15155 = vst [vmem:[#allocation29_spill] sm:$0xff] %v11927_v55  ;;  %1664 = vst [vmem:[#allocation2 + $0x8d0] sm:$0xff] %v11927_v55  ;;  %v11952_v5 = vld [vmem:[%s11109_s17 + $0x940] sm:$0xff]  ;;  %v11955_v21 = vld [vmem:[%s11109_s17 + $0x968] sm:$0xff] }
 0x233   : > { %8888 = vmatprep.subr.bf16.mxu1 %v8887_v48  ;;  %v885_v12 = vpop.permute.xlu0 %884  ;;  %v893_v44 = vpop.permute.xlu1 %892  ;;  %v2601_v51 = vld [vmem:[#allocation2 + $0x318] sm:$0xff]  ;;  %3371 = vmatprep.mubr.f32.mxu0 %v11899_v59  ;;  %15156 = vst [vmem:[#allocation30_spill] sm:$0xff] %v11952_v5  ;;  %15157 = vst [vmem:[#allocation31_spill] sm:$0xff] %v11955_v21  ;;  %v11957_v6 = vld [vmem:[#allocation2 + $0x480] sm:$0xff] }
 0x234   : > { %8890 = vmatpush1.bf16.msra.mxu1 %v8889_v13  ;;  %v2605_v56 = vld [vmem:[#allocation2 + $0x338] sm:$0xff]  ;;  %v11915_v3 = vsel %vm934_vm4, %v11698_v1, %v885_v12  ;;  %987 = vst.msk [vmem:[#allocation2 + $0x398] sm:$0xff] %vm422_vm0, %v885_v12  ;;  %v940_v52 = vsel %vm934_vm4, %v11706_v19, %v893_v44  ;;  %991 = vst.msk [vmem:[#allocation2 + $0x3b8] sm:$0xff] %vm422_vm0, %v893_v44  ;;  %v11933_v1 = vld [vmem:[#allocation2 + $0x460] sm:$0xff]  ;;  %v8893_v19 = vpack.c.bf16 %v815_v62, %v812_v11 }
 0x235   : > { %v8891_v2 = vpack.c.bf16 %v2605_v56, %v2601_v51  ;;  %1377 = vrot.lane.b32.xlu0 %v11929_v63, %s10738_s3  ;;  %1365 = vrot.lane.b32.xlu1 %v11933_v1, %s10738_s3  ;;  %1662 = vst [vmem:[#allocation2 + $0x8c0] sm:$0xff] %v11952_v5  ;;  %1667 = vst [vmem:[#allocation2 + $0x8e8] sm:$0xff] %v11955_v21  ;;  %v11971_v44 = vld [vmem:[#allocation3 + $0x2a0] sm:$0xff]  ;;  %v11978_v56 = vld [vmem:[%s11109_s17 + $0x970] sm:$0xff] }
 0x236   : > { %3372 = vmatmul.mubr.f32.gmra.mrb[20].mxu0 %v11911_v42  ;;  %v11975_v51 = vld [vmem:[#allocation3 + $0x2e0] sm:$0xff]  ;;  %15159 = vst [vmem:[#allocation33_spill] sm:$0xff] %v11978_v56  ;;  %1668 = vst [vmem:[#allocation2 + $0x8f0] sm:$0xff] %v11978_v56  ;;  %v12021_v21 = vld [vmem:[#allocation3 + $0x310] sm:$0xff] }
 0x237   : > { %8892 = vmatprep.subr.bf16.mxu1 %v8891_v2  ;;  %v901_v49 = vpop.permute.xlu0 %900  ;;  %v909_v26 = vpop.permute.xlu1 %908  ;;  %v2609_v43 = vld [vmem:[#allocation2 + $0x358] sm:$0xff]  ;;  %3377 = vmatprep.mubr.f32.mxu0 %v11921_v27  ;;  %v11981_v2 = vld [vmem:[%s11109_s17 + $0x988] sm:$0xff]  ;;  %v12081_v55 = vld [vmem:[#allocation3 + $0x3c0] sm:$0xff] }
 0x238   : > { %8894 = vmatpush1.bf16.msra.mxu1 %v8893_v19  ;;  %v2613_v46 = vld [vmem:[#allocation2 + $0x378] sm:$0xff]  ;;  %v943_v11 = vsel %vm934_vm4, %v11720_v4, %v901_v49  ;;  %995 = vst.msk [vmem:[#allocation2 + $0x3d8] sm:$0xff] %vm422_vm0, %v901_v49  ;;  %v946_v62 = vsel %vm934_vm4, %v11728_v53, %v909_v26  ;;  %999 = vst.msk [vmem:[#allocation2 + $0x3f8] sm:$0xff] %vm422_vm0, %v909_v26  ;;  %v11961_v4 = vld [vmem:[#allocation2 + $0x4a8] sm:$0xff]  ;;  %v8897_v53 = vpack.c.bf16 %v821_v39, %v818_v57 }
 0x239   : > { %v8895_v25 = vpack.c.bf16 %v2613_v46, %v2609_v43  ;;  %1373 = vrot.lane.b32.xlu0 %v11957_v6, %s10738_s3  ;;  %1383 = vrot.lane.b32.xlu1 %v11961_v4, %s10738_s3  ;;  %15160 = vst [vmem:[#allocation34_spill] sm:$0xff] %v11981_v2  ;;  %v11983_v19 = vld [vmem:[#allocation2 + $0x4b0] sm:$0xff]  ;;  %v11987_v49 = vld [vmem:[#allocation2 + $0x4c8] sm:$0xff]  ;;  %v8901_v26 = vpack.c.bf16 %v940_v52, %v11915_v3  ;;  %1671 = vst [vmem:[#allocation2 + $0x908] sm:$0xff] %v11981_v2 }
 0x23a   : > { %3378 = vmatmul.mubr.f32.gmra.mrb[22].mxu0 %v11941_v14  ;;  %15161 = vst [vmem:[#allocation35_spill] sm:$0xff] %v11987_v49  ;;  %v8905_v2 = vpack.c.bf16 %v946_v62, %v943_v11 }
 0x23b   : > { %8896 = vmatprep.subr.bf16.mxu1 %v8895_v25  ;;  %v913_v45 = vpop.permute.xlu0 %912  ;;  %v11968_v48 = vpop.permute.xlu1 %914  ;;  %v2617_v13 = vld [vmem:[#allocation2 + $0x398] sm:$0xff]  ;;  %3383 = vmatprep.mubr.f32.mxu0 %v11949_v54 }
 0x23c   : > { %8898 = vmatpush1.bf16.msra.mxu1 %v8897_v53  ;;  %15158 = vst [vmem:[#allocation32_spill] sm:$0xff] %v11968_v48  ;;  %v2621_v12 = vld [vmem:[#allocation2 + $0x3b8] sm:$0xff]  ;;  %v948_v57 = vsel %vm934_vm4, %v913_v45, %v11968_v48  ;;  %v12006_v48 = vld [vmem:[%s11109_s17 + $0x960] sm:$0xff] }
 0x23d   : > { %v8899_v39 = vpack.c.bf16 %v2621_v12, %v2617_v13  ;;  %1385 = vrot.lane.b32.xlu0 %v11983_v19, %s10738_s3  ;;  %1391 = vrot.lane.b32.xlu1 %v11987_v49, %s10738_s3  ;;  %v11998_v13 = vld [vmem:[#allocation3 + $0x2d8] sm:$0xff]  ;;  %v12003_v12 = vld [vmem:[%s11109_s17 + $0x990] sm:$0xff]  ;;  %15164 = vst [vmem:[#allocation38_spill] sm:$0xff] %v12006_v48  ;;  %1666 = vst [vmem:[#allocation2 + $0x8e0] sm:$0xff] %v12006_v48 }
 0x23e   : > { %3384 = vmatmul.mubr.f32.gmra.mrb[24].mxu0 %v11971_v44  ;;  %15163 = vst [vmem:[#allocation37_spill] sm:$0xff] %v12003_v12  ;;  %1672 = vst [vmem:[#allocation2 + $0x910] sm:$0xff] %v12003_v12  ;;  %v12032_v48 = vld [vmem:[%s11109_s17 + $0x9a8] sm:$0xff]  ;;  %v12076_v12 = vld [vmem:[#allocation3 + $0x380] sm:$0xff] }
 0x23f   : > { %8900 = vmatprep.subr.bf16.mxu1 %v8899_v39  ;;  %v921_v43 = vpop.permute.xlu0 %920  ;;  %v11995_v46 = vpop.permute.xlu1 %922  ;;  %v2625_v25 = vld [vmem:[#allocation2 + $0x3d8] sm:$0xff]  ;;  %3389 = vmatprep.mubr.f32.mxu0 %v11975_v51  ;;  %v12008_v39 = vld [vmem:[#allocation2 + $0x4d0] sm:$0xff]  ;;  %15168 = vst [vmem:[#allocation42_spill] sm:$0xff] %v12032_v48  ;;  %1675 = vst [vmem:[#allocation2 + $0x928] sm:$0xff] %v12032_v48 }
 0x240   : > { %8902 = vmatpush1.bf16.msra.mxu1 %v8901_v26  ;;  %15162 = vst [vmem:[#allocation36_spill] sm:$0xff] %v11995_v46  ;;  %v2629_v53 = vld [vmem:[#allocation2 + $0x3f8] sm:$0xff]  ;;  %v951_v3 = vsel %vm934_vm4, %v921_v43, %v11995_v46  ;;  %15165 = vst [vmem:[#allocation39_spill] sm:$0xff] %v12008_v39  ;;  %v12012_v26 = vld [vmem:[#allocation2 + $0x4a0] sm:$0xff] }
 0x241   : > { %v8903_v52 = vpack.c.bf16 %v2629_v53, %v2625_v25  ;;  %1393 = vrot.lane.b32.xlu0 %v12008_v39, %s10738_s3  ;;  %15166 = vst [vmem:[#allocation40_spill] sm:$0xff] %v12012_v26  ;;  %1381 = vrot.lane.b32.xlu1 %v12012_v26, %s10738_s3  ;;  %v8699_v56 = vpack.c.bf16 %v951_v3, %v948_v57  ;;  %v12016_v46 = vld [vmem:[#allocation3 + $0x318] sm:$0xff]  ;;  %v12026_v57 = vld [vmem:[#allocation3 + $0x350] sm:$0xff]  ;;  %v12029_v3 = vld [vmem:[%s11109_s17 + $0x980] sm:$0xff] }
 0x242   : > { %3390 = vmatmul.mubr.f32.gmra.mrb[26].mxu0 %v11998_v13  ;;  %15167 = vst [vmem:[#allocation41_spill] sm:$0xff] %v12029_v3  ;;  %1670 = vst [vmem:[#allocation2 + $0x900] sm:$0xff] %v12029_v3  ;;  %v12060_v48 = vld [vmem:[%s11109_s17 + $0x9c8] sm:$0xff]  ;;  %v8709_v61 = vpack.c.bf16 %v12012_v26, %v11957_v6  ;;  %v12152_v26 = vld [vmem:[%s11109_s17 + $0x9f0] sm:$0xff] }
 0x243   : > { %8904 = vmatprep.subr.bf16.mxu1 %v8903_v52  ;;  %v911_v25 = vpop.permute.xlu0 %910  ;;  %v919_v53 = vpop.permute.xlu1 %918  ;;  %8700 = vmatprep.subr.bf16.mxu0 %v8699_v56  ;;  %v12034_v52 = vld [vmem:[#allocation2 + $0x4c0] sm:$0xff]  ;;  %v12038_v56 = vld [vmem:[#allocation2 + $0x4e8] sm:$0xff]  ;;  %15172 = vst [vmem:[#allocation46_spill] sm:$0xff] %v12060_v48  ;;  %1679 = vst [vmem:[#allocation2 + $0x948] sm:$0xff] %v12060_v48 }
 0x244   : > { %8906 = vmatpush1.bf16.msra.mxu1 %v8905_v2  ;;  %v947_v11 = vsel %vm934_vm4, %v911_v25, %v913_v45  ;;  %v950_v62 = vsel %vm934_vm4, %v919_v53, %v921_v43  ;;  %3395 = vmatprep.mubr.f32.mxu0 %v12016_v46  ;;  %15169 = vst [vmem:[#allocation43_spill] sm:$0xff] %v12038_v56  ;;  %v12049_v25 = vld [vmem:[#allocation3 + $0x348] sm:$0xff]  ;;  %v12088_v48 = vld [vmem:[%s11109_s17 + $0x9a0] sm:$0xff]  ;;  %15182 = vst [vmem:[#allocation56_spill] sm:$0xff] %v12152_v26 }
 0x245   : > { %1389 = vrot.lane.b32.xlu0 %v12034_v52, %s10738_s3  ;;  %1399 = vrot.lane.b32.xlu1 %v12038_v56, %s10738_s3  ;;  %v8701_v45 = vpack.c.bf16 %v950_v62, %v947_v11  ;;  %v12053_v11 = vld [vmem:[#allocation3 + $0x388] sm:$0xff]  ;;  %v12056_v62 = vld [vmem:[%s11109_s17 + $0x9b0] sm:$0xff]  ;;  %15175 = vst [vmem:[#allocation49_spill] sm:$0xff] %v12088_v48  ;;  %1674 = vst [vmem:[#allocation2 + $0x920] sm:$0xff] %v12088_v48  ;;  %v8711_v48 = vpack.c.bf16 %v12038_v56, %v11987_v49 }
 0x246   : > { %3396 = vmatmul.mubr.f32.gmra.mrb[28].mxu0 %v12021_v21  ;;  %15171 = vst [vmem:[#allocation45_spill] sm:$0xff] %v12056_v62  ;;  %1676 = vst [vmem:[#allocation2 + $0x930] sm:$0xff] %v12056_v62  ;;  %v12084_v62 = vld [vmem:[%s11109_s17 + $0x9d0] sm:$0xff]  ;;  %v12129_v39 = vld [vmem:[#allocation2 + $0x528] sm:$0xff] }
 0x247   : > { %4436 = vmatmul.mubr.f32.vlgmr.msra.gmra.mrb[0].mxu1 %v11745_v20  ;;  %v929_v2 = vpop.permute.xlu0 %928  ;;  %v12046_v43 = vpop.permute.xlu1 %930  ;;  %8702 = vmatpush1.bf16.msra.mxu0 %v8701_v45  ;;  %v12062_v20 = vld [vmem:[#allocation2 + $0x4f0] sm:$0xff]  ;;  %v12066_v45 = vld [vmem:[#allocation2 + $0x508] sm:$0xff]  ;;  %15174 = vst [vmem:[#allocation48_spill] sm:$0xff] %v12084_v62  ;;  %1680 = vst [vmem:[#allocation2 + $0x950] sm:$0xff] %v12084_v62 }
 0x248   : > { %15170 = vst [vmem:[#allocation44_spill] sm:$0xff] %v12046_v43  ;;  %3401 = vmatprep.mubr.f32.mxu0 %v12026_v57  ;;  %v954_v53 = vsel %vm934_vm4, %v929_v2, %v12046_v43  ;;  %4441 = vmatprep.mubr.f32.mxu1 %v11753_v38  ;;  %15173 = vst [vmem:[#allocation47_spill] sm:$0xff] %v12062_v20  ;;  %v12119_v62 = vld [vmem:[%s11109_s17 + $0x9c0] sm:$0xff]  ;;  %v12142_v56 = vld [vmem:[#allocation3 + $0x3f0] sm:$0xff] }
 0x249   : > { %1401 = vrot.lane.b32.xlu0 %v12062_v20, %s10738_s3  ;;  %1407 = vrot.lane.b32.xlu1 %v12066_v45, %s10738_s3  ;;  %v8703_v43 = vpack.c.bf16 %v11885_v41, %v954_v53  ;;  %v8707_v53 = vpack.c.bf16 %v11961_v4, %v11905_v47  ;;  %15179 = vst [vmem:[#allocation53_spill] sm:$0xff] %v12119_v62  ;;  %v12125_v20 = vld [vmem:[#allocation2 + $0x500] sm:$0xff]  ;;  %1678 = vst [vmem:[#allocation2 + $0x940] sm:$0xff] %v12119_v62  ;;  %v12149_v49 = vld [vmem:[#allocation3 + $0x430] sm:$0xff] }
 0x24a   : > { %3402 = vmatmul.mubr.f32.gmra.mrb[30].mxu0 %v12049_v25  ;;  %1684 = vst [vmem:[#allocation2 + $0x970] sm:$0xff] %v12152_v26  ;;  %v12179_v26 = vld [vmem:[%s11109_s17 + $0xa10] sm:$0xff] }
 0x24b   : > { %4442 = vmatmul.mubr.f32.gmra.mrb[2].mxu1 %v11761_v8  ;;  %v927_v38 = vpop.permute.xlu0 %926  ;;  %v1102_v3 = vpop.permute.xlu1 %1101  ;;  %8704 = vmatprep.subr.bf16.mxu0 %v8703_v43  ;;  %v12090_v8 = vld [vmem:[#allocation2 + $0x510] sm:$0xff]  ;;  %v12094_v43 = vld [vmem:[#allocation2 + $0x4e0] sm:$0xff]  ;;  %1688 = vst [vmem:[#allocation2 + $0x990] sm:$0xff] %v12179_v26 }
 0x24c   : > { %3407 = vmatprep.mubr.f32.mxu0 %v12053_v11  ;;  %v953_v5 = vsel %vm934_vm4, %v927_v38, %v929_v2  ;;  %4447 = vmatprep.mubr.f32.mxu1 %v11769_v28  ;;  %15176 = vst [vmem:[#allocation50_spill] sm:$0xff] %v12090_v8  ;;  %15177 = vst [vmem:[#allocation51_spill] sm:$0xff] %v12094_v43 }
 0x24d   : > { %1409 = vrot.lane.b32.xlu0 %v12090_v8, %s10738_s3  ;;  %1397 = vrot.lane.b32.xlu1 %v12094_v43, %s10738_s3  ;;  %v8705_v2 = vpack.c.bf16 %v11933_v1, %v953_v5  ;;  %v12108_v8 = vld [vmem:[#allocation3 + $0x3b8] sm:$0xff] }
 0x24e   : > { %3408 = vmatmul.mubr.f32.gmra.mrb[32].mxu0 %v12076_v12 }
 0x24f   : > { %4448 = vmatmul.mubr.f32.gmra.mrb[4].mxu1 %v11777_v18  ;;  %v12103_v28 = vpop.permute.xlu0 %1103  ;;  %v1110_v38 = vpop.permute.xlu1 %1109  ;;  %8706 = vmatpush1.bf16.msra.mxu0 %v8705_v2  ;;  %v12116_v18 = vld [vmem:[#allocation3 + $0x3f8] sm:$0xff]  ;;  %v12123_v2 = vld [vmem:[%s11109_s17 + $0x9e8] sm:$0xff] }
 0x250   : > { %15178 = vst [vmem:[#allocation52_spill] sm:$0xff] %v12103_v28  ;;  %3413 = vmatprep.mubr.f32.mxu0 %v12081_v55  ;;  %v12112_v5 = vsel %vm532_vm1, %v1102_v3, %v12103_v28  ;;  %8708 = vmatprep.subr.bf16.mxu0 %v8707_v53  ;;  %15180 = vst [vmem:[#allocation54_spill] sm:$0xff] %v12123_v2  ;;  %v8713_v28 = vpack.c.bf16 %v12094_v43, %v12034_v52  ;;  %v12158_v43 = vld [vmem:[#allocation2 + $0x530] sm:$0xff] }
 0x251   : > { %4453 = vmatprep.mubr.f32.mxu1 %v11785_v30  ;;  %1405 = vrot.lane.b32.xlu0 %v12125_v20, %s10738_s3  ;;  %1683 = vst [vmem:[#allocation2 + $0x968] sm:$0xff] %v12123_v2 }
 0x252   : > { %1415 = vrot.lane.b32.xlu1 %v12129_v39, %s10738_s3  ;;  %3414 = vmatmul.mubr.f32.gmra.mrb[34].mxu0 %v12108_v8 }
 0x253   : > { %4454 = vmatmul.mubr.f32.gmra.mrb[6].mxu1 %v11793_v29  ;;  %v12137_v30 = vpop.permute.xlu0 %1111  ;;  %v1100_v53 = vpop.permute.xlu1 %1099  ;;  %8710 = vmatpush1.bf16.msra.mxu0 %v8709_v61  ;;  %v8715_v29 = vpack.c.bf16 %v12129_v39, %v12066_v45  ;;  %v12156_v61 = vld [vmem:[%s11109_s17 + $0xa08] sm:$0xff] }
 0x254   : > { %15181 = vst [vmem:[#allocation55_spill] sm:$0xff] %v12137_v30  ;;  %3419 = vmatprep.mubr.f32.mxu0 %v12116_v18  ;;  %v1159_v62 = vsel %vm532_vm1, %v1110_v38, %v12137_v30  ;;  %v1155_v2 = vsel %vm532_vm1, %v1100_v53, %v1102_v3  ;;  %8712 = vmatprep.subr.bf16.mxu0 %v8711_v48  ;;  %15183 = vst [vmem:[#allocation57_spill] sm:$0xff] %v12156_v61  ;;  %v12168_v3 = vld [vmem:[#allocation2 + $0x520] sm:$0xff] }
 0x255   : > { %4459 = vmatprep.mubr.f32.mxu1 %v11801_v17  ;;  %1417 = vrot.lane.b32.xlu0 %v12158_v43, %s10738_s3  ;;  %1687 = vst [vmem:[#allocation2 + $0x988] sm:$0xff] %v12156_v61  ;;  %v8717_v53 = vpack.c.bf16 %v12168_v3, %v12125_v20  ;;  %v12176_v61 = vld [vmem:[#allocation3 + $0x468] sm:$0xff] }
 0x256   : > { %1500 = vrot.lane.b32.xlu1 %v11885_v41, %s10739_s4  ;;  %3420 = vmatmul.mubr.f32.gmra.mrb[36].mxu0 %v12142_v56  ;;  %v12173_v41 = vld [vmem:[#allocation3 + $0x428] sm:$0xff] }
 0x257   : > { %4460 = vmatmul.mubr.f32.gmra.mrb[8].mxu1 %v11809_v35  ;;  %v1108_v17 = vpop.permute.xlu0 %1107  ;;  %v1118_v48 = vpop.permute.xlu1 %1117  ;;  %8714 = vmatpush1.bf16.msra.mxu0 %v8713_v28  ;;  %v12183_v35 = vld [vmem:[%s11109_s17 + $0x9e0] sm:$0xff]  ;;  %v8719_v28 = vpack.c.bf16 %v1159_v62, %v12112_v5 }
 0x258   : > { %3425 = vmatprep.mubr.f32.mxu0 %v12149_v49  ;;  %v1158_v30 = vsel %vm532_vm1, %v1108_v17, %v1110_v38  ;;  %8716 = vmatprep.subr.bf16.mxu0 %v8715_v29  ;;  %15184 = vst [vmem:[#allocation58_spill] sm:$0xff] %v12183_v35  ;;  %1682 = vst [vmem:[#allocation2 + $0x960] sm:$0xff] %v12183_v35  ;;  %v12201_v17 = vld [vmem:[#allocation3 + $0x4a0] sm:$0xff] }
 0x259   : > { %4465 = vmatprep.mubr.f32.mxu1 %v11817_v24  ;;  %1502 = vrot.lane.b32.xlu0 %v11901_v60, %s10739_s4  ;;  %v12197_v60 = vld [vmem:[#allocation3 + $0x460] sm:$0xff] }
 0x25a   : > { %1413 = vrot.lane.b32.xlu1 %v12168_v3, %s10738_s3  ;;  %3426 = vmatmul.mubr.f32.gmra.mrb[38].mxu0 %v12173_v41  ;;  %v12204_v35 = vld [vmem:[%s11109_s17 + $0xa00] sm:$0xff] }
 0x25b   : > { %4466 = vmatmul.mubr.f32.gmra.mrb[10].mxu1 %v11825_v23  ;;  %v12194_v24 = vpop.permute.xlu0 %1119  ;;  %v1126_v38 = vpop.permute.xlu1 %1125  ;;  %8718 = vmatpush1.bf16.msra.mxu0 %v8717_v53  ;;  %v8721_v23 = vpack.c.bf16 %v1158_v30, %v1155_v2  ;;  %1686 = vst [vmem:[#allocation2 + $0x980] sm:$0xff] %v12204_v35  ;;  %v12222_v2 = vld [vmem:[#allocation3 + $0x4d8] sm:$0xff] }
 0x25c   : > { %3431 = vmatprep.mubr.f32.mxu0 %v12176_v61  ;;  %v1162_v29 = vsel %vm532_vm1, %v1118_v48, %v12194_v24  ;;  %8720 = vmatprep.subr.bf16.mxu0 %v8719_v28  ;;  %v12235_v28 = vld [vmem:[#allocation3 + $0x510] sm:$0xff] }
 0x25d   : > { %4471 = vmatprep.mubr.f32.mxu1 %v11833_v36  ;;  %1498 = vrot.lane.b32.xlu0 %v11933_v1, %s10739_s4  ;;  %v12217_v36 = vld [vmem:[#allocation3 + $0x498] sm:$0xff] }
 0x25e   : > { %916 = vrot.lane.b32.xlu1 %v11240_v31, %s10739_s4  ;;  %3432 = vmatmul.mubr.f32.gmra.mrb[40].mxu0 %v12197_v60 }
 0x25f   : > { %4472 = vmatmul.mubr.f32.gmra.mrb[12].mxu1 %v11841_v16  ;;  %v12214_v62 = vpop.permute.xlu0 %1127  ;;  %v1116_v5 = vpop.permute.xlu1 %1115  ;;  %8722 = vmatpush1.bf16.msra.mxu0 %v8721_v23 }
 0x260   : > { %3437 = vmatprep.mubr.f32.mxu0 %v12201_v17  ;;  %v1165_v1 = vsel %vm532_vm1, %v1126_v38, %v12214_v62  ;;  %v1161_v31 = vsel %vm532_vm1, %v1116_v5, %v1118_v48  ;;  %4477 = vmatprep.mubr.f32.mxu1 %v11849_v40  ;;  %v12232_v48 = vld [vmem:[#allocation3 + $0x4d0] sm:$0xff]  ;;  %v12263_v5 = vld [vmem:[#allocation3 + $0x540] sm:$0xff] }
 0x261   : > { %924 = vrot.lane.b32.xlu0 %v11251_v32, %s10739_s4  ;;  %v8723_v16 = vpack.c.bf16 %v1165_v1, %v1162_v29  ;;  %v12251_v29 = vld [vmem:[#allocation3 + $0x548] sm:$0xff] }
 0x262   : > { %932 = vrot.lane.b32.xlu1 %v11254_v33, %s10739_s4  ;;  %3438 = vmatmul.mubr.f32.gmra.mrb[42].mxu0 %v12217_v36 }
 0x263   : > { %4478 = vmatmul.mubr.f32.gmra.mrb[14].mxu1 %v11857_v34  ;;  %v1124_v30 = vpop.permute.xlu0 %1123  ;;  %v1134_v53 = vpop.permute.xlu1 %1133  ;;  %8724 = vmatprep.subr.bf16.mxu0 %v8723_v16 }
 0x264   : > { %3443 = vmatprep.mubr.f32.mxu0 %v12222_v2  ;;  %v1164_v40 = vsel %vm532_vm1, %v1124_v30, %v1126_v38  ;;  %4483 = vmatprep.mubr.f32.mxu1 %v11865_v0  ;;  %v12247_v38 = vld [vmem:[#allocation3 + $0x508] sm:$0xff] }
 0x265   : > { %1105 = vrot.lane.b32.xlu0 %v11638_v10, %s10736_s15  ;;  %v8725_v32 = vpack.c.bf16 %v1164_v40, %v1161_v31  ;;  %v12269_v31 = vld [vmem:[#allocation3 + $0x580] sm:$0xff]  ;;  %v12278_v40 = vld [vmem:[#allocation3 + $0x578] sm:$0xff] }
 0x266   : > { %1113 = vrot.lane.b32.xlu1 %v11641_v9, %s10736_s15  ;;  %3444 = vmatmul.mubr.f32.gmra.mrb[44].mxu0 %v12232_v48 }
 0x267   : > { %4484 = vmatmul.mubr.f32.gmra.mrb[16].mxu1 %v11873_v37  ;;  %v12244_v33 = vpop.permute.xlu0 %1135  ;;  %v1142_v34 = vpop.permute.xlu1 %1141  ;;  %8726 = vmatpush1.bf16.msra.mxu0 %v8725_v32  ;;  %v12281_v32 = vld [vmem:[#allocation3 + $0x5b8] sm:$0xff] }
 0x268   : > { %3449 = vmatprep.mubr.f32.mxu0 %v12235_v28  ;;  %v1168_v0 = vsel %vm532_vm1, %v1134_v53, %v12244_v33  ;;  %4489 = vmatprep.mubr.f32.mxu1 %v11881_v22 }
 0x269   : > { %1121 = vrot.lane.b32.xlu0 %v11656_v15, %s10736_s15 }
 0x26a   : > { %1129 = vrot.lane.b32.xlu1 %v11659_v58, %s10736_s15  ;;  %3450 = vmatmul.mubr.f32.gmra.mrb[46].mxu0 %v12247_v38 }
 0x26b   : > { %4490 = vmatmul.mubr.f32.gmra.mrb[18].mxu1 %v11891_v50  ;;  %v12260_v37 = vpop.permute.xlu0 %1143  ;;  %v1132_v23 = vpop.permute.xlu1 %1131  ;;  %3455 = vmatprep.mubr.f32.mxu0 %v12251_v29  ;;  %v15185_v50 = vld [vmem:[#allocation26_spill] sm:$0xff] }
 0x26c   : > { %4495 = vmatprep.mubr.f32.mxu1 %v11899_v59  ;;  %v1171_v22 = vsel %vm532_vm1, %v1142_v34, %v12260_v37  ;;  %v1167_v1 = vsel %vm532_vm1, %v1132_v23, %v1134_v53  ;;  %v15186_v23 = vld [vmem:[#allocation27_spill] sm:$0xff] }
 0x26d   : > { %1137 = vrot.lane.b32.xlu0 %v11675_v7, %s10736_s15  ;;  %v8727_v16 = vpack.c.bf16 %v1171_v22, %v1168_v0 }
 0x26e   : > { %1145 = vrot.lane.b32.xlu1 %v15185_v50, %s10736_s15  ;;  %3456 = vmatmul.mubr.f32.gmra.mrb[48].mxu0 %v12263_v5 }
 0x26f   : > { %4496 = vmatmul.mubr.f32.gmra.mrb[20].mxu1 %v11911_v42  ;;  %v1140_v30 = vpop.permute.xlu0 %1139  ;;  %v1150_v59 = vpop.permute.xlu1 %1149  ;;  %8728 = vmatprep.subr.bf16.mxu0 %v8727_v16  ;;  %v12297_v16 = vld [vmem:[#allocation3 + $0x5f0] sm:$0xff] }
 0x270   : > { %3461 = vmatprep.mubr.f32.mxu0 %v12269_v31  ;;  %v1170_v53 = vsel %vm532_vm1, %v1140_v30, %v1142_v34  ;;  %4501 = vmatprep.mubr.f32.mxu1 %v11921_v27  ;;  %v12293_v34 = vld [vmem:[#allocation3 + $0x5b0] sm:$0xff]  ;;  %v12309_v30 = vld [vmem:[#allocation3 + $0x5e8] sm:$0xff] }
 0x271   : > { %1153 = vrot.lane.b32.xlu0 %v15186_v23, %s10736_s15  ;;  %v8729_v42 = vpack.c.bf16 %v1170_v53, %v1167_v1 }
 0x272   : > { %1238 = vrot.lane.b32.xlu1 %v11638_v10, %s10737_s21  ;;  %3462 = vmatmul.mubr.f32.gmra.mrb[50].mxu0 %v12278_v40 }
 0x273   : > { %4502 = vmatmul.mubr.f32.gmra.mrb[22].mxu1 %v11941_v14  ;;  %v12290_v0 = vpop.permute.xlu0 %1151  ;;  %v1235_v22 = vpop.permute.xlu1 %1234  ;;  %8730 = vmatpush1.bf16.msra.mxu0 %v8729_v42  ;;  %v12315_v42 = vld [vmem:[#allocation3 + $0x628] sm:$0xff] }
 0x274   : > { %15187 = vst [vmem:[#allocation26_spill] sm:$0xff] %v12290_v0  ;;  %3467 = vmatprep.mubr.f32.mxu0 %v12281_v32  ;;  %v1174_v27 = vsel %vm532_vm1, %v1150_v59, %v12290_v0  ;;  %4507 = vmatprep.mubr.f32.mxu1 %v11949_v54 }
 0x275   : > { %1246 = vrot.lane.b32.xlu0 %v11641_v9, %s10737_s21 }
 0x276   : > { %1254 = vrot.lane.b32.xlu1 %v11656_v15, %s10737_s21  ;;  %3468 = vmatmul.mubr.f32.gmra.mrb[52].mxu0 %v12293_v34 }
 0x277   : > { %4508 = vmatmul.mubr.f32.gmra.mrb[24].mxu1 %v11971_v44  ;;  %v12306_v14 = vpop.permute.xlu0 %1236  ;;  %v1148_v1 = vpop.permute.xlu1 %1147  ;;  %3473 = vmatprep.mubr.f32.mxu0 %v12297_v16 }
 0x278   : > { %15188 = vst [vmem:[#allocation59_spill] sm:$0xff] %v12306_v14  ;;  %4513 = vmatprep.mubr.f32.mxu1 %v11975_v51  ;;  %v1289_v54 = vsel %vm666_vm2, %v1235_v22, %v12306_v14  ;;  %v1173_v53 = vsel %vm532_vm1, %v1148_v1, %v1150_v59  ;;  %v12324_v14 = vld [vmem:[#allocation3 + $0x620] sm:$0xff] }
 0x279   : > { %1262 = vrot.lane.b32.xlu0 %v11659_v58, %s10737_s21  ;;  %v8731_v44 = vpack.c.bf16 %v1289_v54, %v1174_v27  ;;  %v12327_v1 = vld [vmem:[#allocation3 + $0x660] sm:$0xff] }
 0x27a   : > { %1270 = vrot.lane.b32.xlu1 %v11675_v7, %s10737_s21  ;;  %3474 = vmatmul.mubr.f32.gmra.mrb[54].mxu0 %v12309_v30 }
 0x27b   : > { %4514 = vmatmul.mubr.f32.gmra.mrb[26].mxu1 %v11998_v13  ;;  %v1233_v0 = vpop.permute.xlu0 %1232  ;;  %v1243_v51 = vpop.permute.xlu1 %1242  ;;  %8732 = vmatprep.subr.bf16.mxu0 %v8731_v44  ;;  %v12355_v44 = vld [vmem:[#allocation3 + $0x690] sm:$0xff] }
 0x27c   : > { %3479 = vmatprep.mubr.f32.mxu0 %v12315_v42  ;;  %v1288_v59 = vsel %vm666_vm2, %v1233_v0, %v1235_v22  ;;  %4519 = vmatprep.mubr.f32.mxu1 %v12016_v46  ;;  %v12339_v0 = vld [vmem:[#allocation3 + $0x658] sm:$0xff] }
 0x27d   : > { %1278 = vrot.lane.b32.xlu0 %v15185_v50, %s10737_s21  ;;  %v8733_v13 = vpack.c.bf16 %v1288_v59, %v1173_v53  ;;  %v12343_v22 = vld [vmem:[#allocation3 + $0x698] sm:$0xff] }
 0x27e   : > { %1286 = vrot.lane.b32.xlu1 %v15186_v23, %s10737_s21  ;;  %3480 = vmatmul.mubr.f32.gmra.mrb[56].mxu0 %v12324_v14 }
 0x27f   : > { %4520 = vmatmul.mubr.f32.gmra.mrb[28].mxu1 %v12021_v21  ;;  %v12336_v27 = vpop.permute.xlu0 %1244  ;;  %v1251_v54 = vpop.permute.xlu1 %1250  ;;  %8734 = vmatpush1.bf16.msra.mxu0 %v8733_v13  ;;  %v12361_v13 = vld [vmem:[#allocation3 + $0x6d0] sm:$0xff] }
 0x280   : > { %3485 = vmatprep.mubr.f32.mxu0 %v12327_v1  ;;  %v1292_v46 = vsel %vm666_vm2, %v1243_v51, %v12336_v27  ;;  %4525 = vmatprep.mubr.f32.mxu1 %v12026_v57 }
 0x281   : > { %1371 = vrot.lane.b32.xlu0 %v11638_v10, %s10738_s3 }
 0x282   : > { %1379 = vrot.lane.b32.xlu1 %v11641_v9, %s10738_s3  ;;  %3486 = vmatmul.mubr.f32.gmra.mrb[58].mxu0 %v12339_v0 }
 0x283   : > { %4526 = vmatmul.mubr.f32.gmra.mrb[30].mxu1 %v12049_v25  ;;  %v12352_v21 = vpop.permute.xlu0 %1252  ;;  %v1241_v53 = vpop.permute.xlu1 %1240  ;;  %3491 = vmatprep.mubr.f32.mxu0 %v12343_v22 }
 0x284   : > { %15189 = vst [vmem:[#allocation60_spill] sm:$0xff] %v12352_v21  ;;  %4531 = vmatprep.mubr.f32.mxu1 %v12053_v11  ;;  %v1295_v57 = vsel %vm666_vm2, %v1251_v54, %v12352_v21  ;;  %v1291_v59 = vsel %vm666_vm2, %v1241_v53, %v1243_v51  ;;  %v12370_v21 = vld [vmem:[#allocation3 + $0x6c8] sm:$0xff] }
 0x285   : > { %1387 = vrot.lane.b32.xlu0 %v11656_v15, %s10738_s3  ;;  %v8735_v25 = vpack.c.bf16 %v1295_v57, %v1292_v46  ;;  %v12373_v53 = vld [vmem:[#allocation3 + $0x708] sm:$0xff] }
 0x286   : > { %1395 = vrot.lane.b32.xlu1 %v11659_v58, %s10738_s3  ;;  %3492 = vmatmul.mubr.f32.gmra.mrb[60].mxu0 %v12355_v44 }
 0x287   : > { %4532 = vmatmul.mubr.f32.gmra.mrb[32].mxu1 %v12076_v12  ;;  %v1249_v9 = vpop.permute.xlu0 %1248  ;;  %v1259_v11 = vpop.permute.xlu1 %1258  ;;  %8736 = vmatprep.subr.bf16.mxu0 %v8735_v25  ;;  %v12401_v25 = vld [vmem:[#allocation3 + $0x738] sm:$0xff] }
 0x288   : > { %3497 = vmatprep.mubr.f32.mxu0 %v12361_v13  ;;  %v1294_v51 = vsel %vm666_vm2, %v1249_v9, %v1251_v54  ;;  %4537 = vmatprep.mubr.f32.mxu1 %v12081_v55  ;;  %v12385_v9 = vld [vmem:[#allocation3 + $0x700] sm:$0xff] }
 0x289   : > { %1403 = vrot.lane.b32.xlu0 %v11675_v7, %s10738_s3  ;;  %v8737_v12 = vpack.c.bf16 %v1294_v51, %v1291_v59  ;;  %v12389_v54 = vld [vmem:[#allocation3 + $0x740] sm:$0xff] }
 0x28a   : > { %1411 = vrot.lane.b32.xlu1 %v15185_v50, %s10738_s3  ;;  %3498 = vmatmul.mubr.f32.gmra.mrb[62].mxu0 %v12370_v21 }
 0x28b   : > { %4538 = vmatmul.mubr.f32.gmra.mrb[34].mxu1 %v12108_v8  ;;  %v12382_v46 = vpop.permute.xlu0 %1260  ;;  %v1267_v57 = vpop.permute.xlu1 %1266  ;;  %8738 = vmatpush1.bf16.msra.mxu0 %v8737_v12  ;;  %v12407_v12 = vld [vmem:[#allocation3 + $0x778] sm:$0xff] }
 0x28c   : > { %3503 = vmatprep.mubr.f32.mxu0 %v12373_v53  ;;  %v1298_v55 = vsel %vm666_vm2, %v1259_v11, %v12382_v46  ;;  %4543 = vmatprep.mubr.f32.mxu1 %v12116_v18 }
 0x28d   : > { %1419 = vrot.lane.b32.xlu0 %v15186_v23, %s10738_s3  ;;  %v12416_v23 = vld [vmem:[#allocation3 + $0x770] sm:$0xff] }
 0x28e   : > { %1504 = vrot.lane.b32.xlu1 %v11638_v10, %s10739_s4  ;;  %3504 = vmatmul.mubr.f32.gmra.mrb[64].mxu0 %v12385_v9 }
 0x28f   : > { %4544 = vmatmul.mubr.f32.gmra.mrb[36].mxu1 %v12142_v56  ;;  %v12398_v8 = vpop.permute.xlu0 %1268  ;;  %v1257_v59 = vpop.permute.xlu1 %1256  ;;  %3509 = vmatprep.mubr.f32.mxu0 %v12389_v54 }
 0x290   : > { %4549 = vmatprep.mubr.f32.mxu1 %v12149_v49  ;;  %v1301_v18 = vsel %vm666_vm2, %v1267_v57, %v12398_v8  ;;  %v1297_v51 = vsel %vm666_vm2, %v1257_v59, %v1259_v11  ;;  %v12419_v59 = vld [vmem:[#allocation3 + $0x7b0] sm:$0xff] }
 0x291   : > { %1508 = vrot.lane.b32.xlu0 %v11905_v47, %s10739_s4  ;;  %v8739_v10 = vpack.c.bf16 %v1301_v18, %v1298_v55 }
 0x292   : > { %1510 = vrot.lane.b32.xlu1 %v11929_v63, %s10739_s4  ;;  %3510 = vmatmul.mubr.f32.gmra.mrb[66].mxu0 %v12401_v25 }
 0x293   : > { %4550 = vmatmul.mubr.f32.gmra.mrb[38].mxu1 %v12173_v41  ;;  %v1265_v56 = vpop.permute.xlu0 %1264  ;;  %v1275_v49 = vpop.permute.xlu1 %1274  ;;  %8740 = vmatprep.subr.bf16.mxu0 %v8739_v10 }
 0x294   : > { %3515 = vmatprep.mubr.f32.mxu0 %v12407_v12  ;;  %v1300_v11 = vsel %vm666_vm2, %v1265_v56, %v1267_v57  ;;  %4555 = vmatprep.mubr.f32.mxu1 %v12176_v61  ;;  %v12431_v57 = vld [vmem:[#allocation3 + $0x7a8] sm:$0xff] }
 0x295   : > { %1516 = vrot.lane.b32.xlu0 %v11961_v4, %s10739_s4  ;;  %v8741_v47 = vpack.c.bf16 %v1300_v11, %v1297_v51  ;;  %v12435_v4 = vld [vmem:[#allocation3 + $0x18] sm:$0xff]  ;;  %v15192_v51 = vld [vmem:[#allocation39_spill] sm:$0xff] }
 0x296   : > { %1518 = vrot.lane.b32.xlu1 %v11983_v19, %s10739_s4  ;;  %3516 = vmatmul.mubr.f32.gmra.mrb[68].mxu0 %v12416_v23  ;;  %v15190_v19 = vld [vmem:[#allocation40_spill] sm:$0xff]  ;;  %v15193_v11 = vld [vmem:[#allocation43_spill] sm:$0xff] }
 0x297   : > { %4556 = vmatmul.mubr.f32.gmra.mrb[40].mxu1 %v12197_v60  ;;  %v12428_v63 = vpop.permute.xlu0 %1276  ;;  %v1283_v41 = vpop.permute.xlu1 %1282  ;;  %8742 = vmatpush1.bf16.msra.mxu0 %v8741_v47 }
 0x298   : > { %3521 = vmatprep.mubr.f32.mxu0 %v12419_v59  ;;  %v1304_v61 = vsel %vm666_vm2, %v1275_v49, %v12428_v63  ;;  %4561 = vmatprep.mubr.f32.mxu1 %v12201_v17 }
 0x299   : > { %1506 = vrot.lane.b32.xlu0 %v11957_v6, %s10739_s4  ;;  %v15191_v6 = vld [vmem:[#allocation35_spill] sm:$0xff] }
 0x29a   : > { %1514 = vrot.lane.b32.xlu1 %v15190_v19, %s10739_s4  ;;  %3522 = vmatmul.mubr.f32.gmra.mrb[70].mxu0 %v12431_v57 }
 0x29b   : > { %4562 = vmatmul.mubr.f32.gmra.mrb[42].mxu1 %v12217_v36  ;;  %v12444_v60 = vpop.permute.xlu0 %1284  ;;  %v1273_v55 = vpop.permute.xlu1 %1272  ;;  %3592 = vmatprep.mubr.f32.mxu0 %v12435_v4 }
 0x29c   : > { %4567 = vmatprep.mubr.f32.mxu1 %v12222_v2  ;;  %v1307_v17 = vsel %vm666_vm2, %v1283_v41, %v12444_v60  ;;  %v1303_v18 = vsel %vm666_vm2, %v1273_v55, %v1275_v49  ;;  %v15194_v49 = vld [vmem:[#allocation47_spill] sm:$0xff] }
 0x29d   : > { %1524 = vrot.lane.b32.xlu0 %v15191_v6, %s10739_s4  ;;  %v8743_v10 = vpack.c.bf16 %v1307_v17, %v1304_v61 }
 0x29e   : > { %1526 = vrot.lane.b32.xlu1 %v15192_v51, %s10739_s4  ;;  %v12497_v51 = vld [vmem:[%s11109_s17 + $0x958] sm:$0xff] }
 0x29f   : > { %4568 = vmatmul.mubr.f32.gmra.mrb[44].mxu1 %v12232_v48  ;;  %v1281_v36 = vpop.permute.xlu0 %1280  ;;  %v1368_v56 = vpop.permute.xlu1 %1367  ;;  %8744 = vmatprep.subr.bf16.mxu0 %v8743_v10  ;;  %1665 = vst.msk [vmem:[#allocation2 + $0x8d8] sm:$0xff] %vm422_vm0, %v12497_v51  ;;  %v15197_v10 = vld [vmem:[#allocation28_spill] sm:$0xff] }
 0x2a0   : > { %4573 = vmatprep.mubr.f32.mxu1 %v12235_v28  ;;  %v1306_v2 = vsel %vm666_vm2, %v1281_v36, %v1283_v41  ;;  %v15195_v28 = vld [vmem:[#allocation51_spill] sm:$0xff] }
 0x2a1   : > { %1532 = vrot.lane.b32.xlu0 %v15193_v11, %s10739_s4  ;;  %v8745_v47 = vpack.c.bf16 %v1306_v2, %v1303_v18  ;;  %v12530_v11 = vld [vmem:[%s11109_s17 + $0x9b8] sm:$0xff] }
 0x2a2   : > { %1534 = vrot.lane.b32.xlu1 %v15194_v49, %s10739_s4  ;;  %15199 = vst [vmem:[#allocation40_spill] sm:$0xff] %v12530_v11  ;;  %v12533_v49 = vld [vmem:[%s11109_s17 + $0x9d8] sm:$0xff]  ;;  %1677 = vst.msk [vmem:[#allocation2 + $0x938] sm:$0xff] %vm422_vm0, %v12530_v11 }
 0x2a3   : > { %4574 = vmatmul.mubr.f32.gmra.mrb[46].mxu1 %v12247_v38  ;;  %v12463_v19 = vpop.permute.xlu0 %1369  ;;  %v1376_v61 = vpop.permute.xlu1 %1375  ;;  %8746 = vmatpush1.bf16.msra.mxu0 %v8745_v47  ;;  %15200 = vst [vmem:[#allocation35_spill] sm:$0xff] %v12533_v49  ;;  %v15201_v47 = vld [vmem:[#allocation30_spill] sm:$0xff]  ;;  %1681 = vst.msk [vmem:[#allocation2 + $0x958] sm:$0xff] %vm422_vm0, %v12533_v49  ;;  %v12789_v49 = vld [vmem:[#allocation2 + $0x900] sm:$0xff] }
 0x2a4   : > { %4579 = vmatprep.mubr.f32.mxu1 %v12251_v29  ;;  %v1422_v48 = vsel %vm800_vm3, %v1368_v56, %v12463_v19 }
 0x2a5   : > { %1522 = vrot.lane.b32.xlu0 %v12034_v52, %s10739_s4  ;;  %v15196_v52 = vld [vmem:[#allocation50_spill] sm:$0xff] }
 0x2a6   : > { %1530 = vrot.lane.b32.xlu1 %v15195_v28, %s10739_s4 }
 0x2a7   : > { %4580 = vmatmul.mubr.f32.gmra.mrb[48].mxu1 %v12263_v5  ;;  %v12473_v41 = vpop.permute.xlu0 %1377  ;;  %v1366_v38 = vpop.permute.xlu1 %1365 }
 0x2a8   : > { %4585 = vmatprep.mubr.f32.mxu1 %v12269_v31  ;;  %v1425_v55 = vsel %vm800_vm3, %v1376_v61, %v12473_v41  ;;  %v1421_v29 = vsel %vm800_vm3, %v1366_v38, %v1368_v56  ;;  %v12550_v38 = vld [vmem:[%s11109_s17 + $0x9f8] sm:$0xff] }
 0x2a9   : > { %1540 = vrot.lane.b32.xlu0 %v12066_v45, %s10739_s4  ;;  %v8747_v17 = vpack.c.bf16 %v1425_v55, %v1422_v48  ;;  %15203 = vst [vmem:[#allocation39_spill] sm:$0xff] %v12550_v38  ;;  %v12553_v55 = vld [vmem:[%s11109_s17 + $0xa18] sm:$0xff]  ;;  %1685 = vst.msk [vmem:[#allocation2 + $0x978] sm:$0xff] %vm422_vm0, %v12550_v38 }
 0x2aa   : > { %1542 = vrot.lane.b32.xlu1 %v15196_v52, %s10739_s4  ;;  %15204 = vst [vmem:[#allocation43_spill] sm:$0xff] %v12553_v55  ;;  %v15206_v52 = vld [vmem:[#allocation34_spill] sm:$0xff]  ;;  %1689 = vst.msk [vmem:[#allocation2 + $0x998] sm:$0xff] %vm422_vm0, %v12553_v55  ;;  %v12771_v55 = vld [vmem:[#allocation3 + $0x198] sm:$0xff] }
 0x2ab   : > { %4586 = vmatmul.mubr.f32.gmra.mrb[50].mxu1 %v12278_v40  ;;  %v1374_v5 = vpop.permute.xlu0 %1373  ;;  %v1384_v18 = vpop.permute.xlu1 %1383  ;;  %8748 = vmatprep.subr.bf16.mxu0 %v8747_v17  ;;  %15230 = vst [vmem:[#allocation50_spill] sm:$0xff] %v12771_v55 }
 0x2ac   : > { %4591 = vmatprep.mubr.f32.mxu1 %v12281_v32  ;;  %v1424_v31 = vsel %vm800_vm3, %v1374_v5, %v1376_v61  ;;  %v15202_v61 = vld [vmem:[#allocation31_spill] sm:$0xff] }
 0x2ad   : > { %1548 = vrot.lane.b32.xlu0 %v12129_v39, %s10739_s4  ;;  %v8749_v45 = vpack.c.bf16 %v1424_v31, %v1421_v29  ;;  %v15205_v29 = vld [vmem:[#allocation33_spill] sm:$0xff]  ;;  %v15208_v31 = vld [vmem:[#allocation38_spill] sm:$0xff] }
 0x2ae   : > { %1550 = vrot.lane.b32.xlu1 %v12158_v43, %s10739_s4 }
 0x2af   : > { %4592 = vmatmul.mubr.f32.gmra.mrb[52].mxu1 %v12293_v34  ;;  %v12491_v6 = vpop.permute.xlu0 %1385  ;;  %v1392_v40 = vpop.permute.xlu1 %1391  ;;  %8750 = vmatpush1.bf16.msra.mxu0 %v8749_v45 }
 0x2b0   : > { %4597 = vmatprep.mubr.f32.mxu1 %v12297_v16  ;;  %v1428_v32 = vsel %vm800_vm3, %v1384_v18, %v12491_v6  ;;  %v12513_v16 = vld [vmem:[%s11109_s17 + $0x978] sm:$0xff] }
 0x2b1   : > { %1538 = vrot.lane.b32.xlu0 %v12125_v20, %s10739_s4  ;;  %1669 = vst.msk [vmem:[#allocation2 + $0x8f8] sm:$0xff] %vm422_vm0, %v12513_v16 }
 0x2b2   : > { %1546 = vrot.lane.b32.xlu1 %v12168_v3, %s10739_s4  ;;  %v12516_v3 = vld [vmem:[%s11109_s17 + $0x998] sm:$0xff]  ;;  %s10206_s17 = smul.u32 288, %s381_s30 }
 0x2b3   : > { %4598 = vmatmul.mubr.f32.gmra.mrb[54].mxu1 %v12309_v30  ;;  %v12506_v39 = vpop.permute.xlu0 %1393  ;;  %v1382_v43 = vpop.permute.xlu1 %1381  ;;  %v15198_v30 = vld [vmem:[#allocation29_spill] sm:$0xff]  ;;  %1673 = vst.msk [vmem:[#allocation2 + $0x918] sm:$0xff] %vm422_vm0, %v12516_v3 }
 0x2b4   : > { %4603 = vmatprep.mubr.f32.mxu1 %v12315_v42  ;;  %v1431_v34 = vsel %vm800_vm3, %v1392_v40, %v12506_v39  ;;  %v1427_v20 = vsel %vm800_vm3, %v1382_v43, %v1384_v18  ;;  %v15207_v18 = vld [vmem:[#allocation37_spill] sm:$0xff]  ;;  %v15210_v43 = vld [vmem:[#allocation42_spill] sm:$0xff] }
 0x2b5   : > { %1720 = vrot.lane.b32.xlu0 %v15197_v10, %s10736_s15  ;;  %v8751_v36 = vpack.c.bf16 %v1431_v34, %v1428_v32  ;;  %v15209_v32 = vld [vmem:[#allocation41_spill] sm:$0xff] }
 0x2b6   : > { %1722 = vrot.lane.b32.xlu1 %v15198_v30, %s10736_s15  ;;  %v15212_v30 = vld [vmem:[#allocation46_spill] sm:$0xff] }
 0x2b7   : > { %4604 = vmatmul.mubr.f32.gmra.mrb[56].mxu1 %v12324_v14  ;;  %v1390_v42 = vpop.permute.xlu0 %1389  ;;  %v1400_v56 = vpop.permute.xlu1 %1399  ;;  %8752 = vmatprep.subr.bf16.mxu0 %v8751_v36 }
 0x2b8   : > { %4609 = vmatprep.mubr.f32.mxu1 %v12327_v1  ;;  %v1430_v2 = vsel %vm800_vm3, %v1390_v42, %v1392_v40 }
 0x2b9   : > { %1718 = vrot.lane.b32.xlu0 %v15201_v47, %s10736_s15  ;;  %v8753_v14 = vpack.c.bf16 %v1430_v2, %v1427_v20  ;;  %v15214_v2 = vld [vmem:[#allocation49_spill] sm:$0xff] }
 0x2ba   : > { %1728 = vrot.lane.b32.xlu1 %v15202_v61, %s10736_s15 }
 0x2bb   : > { %4610 = vmatmul.mubr.f32.gmra.mrb[58].mxu1 %v12339_v0  ;;  %v12544_v1 = vpop.permute.xlu0 %1401  ;;  %v1408_v48 = vpop.permute.xlu1 %1407  ;;  %8754 = vmatpush1.bf16.msra.mxu0 %v8753_v14  ;;  %v15215_v14 = vld [vmem:[#allocation32_spill] sm:$0xff] }
 0x2bc   : > { %4615 = vmatprep.mubr.f32.mxu1 %v12343_v22  ;;  %v1434_v28 = vsel %vm800_vm3, %v1400_v56, %v12544_v1 }
 0x2bd   : > { %1730 = vrot.lane.b32.xlu0 %v15205_v29, %s10736_s15  ;;  %v15217_v29 = vld [vmem:[#allocation54_spill] sm:$0xff] }
 0x2be   : > { %1736 = vrot.lane.b32.xlu1 %v15206_v52, %s10736_s15 }
 0x2bf   : > { %4616 = vmatmul.mubr.f32.gmra.mrb[60].mxu1 %v12355_v44  ;;  %v12564_v0 = vpop.permute.xlu0 %1409  ;;  %v1398_v22 = vpop.permute.xlu1 %1397 }
 0x2c0   : > { %4621 = vmatprep.mubr.f32.mxu1 %v12361_v13  ;;  %v1437_v17 = vsel %vm800_vm3, %v1408_v48, %v12564_v0  ;;  %v1433_v5 = vsel %vm800_vm3, %v1398_v22, %v1400_v56  ;;  %v15213_v56 = vld [vmem:[#allocation48_spill] sm:$0xff] }
 0x2c1   : > { %1738 = vrot.lane.b32.xlu0 %v15207_v18, %s10736_s15  ;;  %v8755_v45 = vpack.c.bf16 %v1437_v17, %v1434_v28  ;;  %v15216_v28 = vld [vmem:[#allocation53_spill] sm:$0xff]  ;;  %v15218_v17 = vld [vmem:[#allocation36_spill] sm:$0xff] }
 0x2c2   : > { %1726 = vrot.lane.b32.xlu1 %v15208_v31, %s10736_s15  ;;  %v15219_v18 = vld [vmem:[#allocation44_spill] sm:$0xff] }
 0x2c3   : > { %4622 = vmatmul.mubr.f32.gmra.mrb[62].mxu1 %v12370_v21  ;;  %v1406_v44 = vpop.permute.xlu0 %1405  ;;  %8756 = vmatprep.subr.bf16.mxu0 %v8755_v45  ;;  %v12624_v45 = vld [vmem:[#allocation3 + $0x50] sm:$0xff] }
 0x2c4   : > { %v1416_v40 = vpop.permute.xlu1 %1415  ;;  %4627 = vmatprep.mubr.f32.mxu1 %v12373_v53  ;;  %v1436_v13 = vsel %vm800_vm3, %v1406_v44, %v1408_v48  ;;  %v15211_v53 = vld [vmem:[#allocation45_spill] sm:$0xff] }
 0x2c5   : > { %1734 = vrot.lane.b32.xlu0 %v15209_v32, %s10736_s15  ;;  %v8757_v34 = vpack.c.bf16 %v1436_v13, %v1433_v5  ;;  %v15221_v44 = vld [vmem:[#allocation57_spill] sm:$0xff]  ;;  %v12632_v13 = vld [vmem:[#allocation3 + $0x48] sm:$0xff]  ;;  %v15222_v32 = vld [vmem:[#allocation52_spill] sm:$0xff] }
 0x2c6   : > { %1744 = vrot.lane.b32.xlu1 %v15210_v43, %s10736_s15 }
 0x2c7   : > { %4628 = vmatmul.mubr.f32.gmra.mrb[64].mxu1 %v12385_v9  ;;  %v12582_v20 = vpop.permute.xlu0 %1417  ;;  %8758 = vmatpush1.bf16.msra.mxu0 %v8757_v34  ;;  %v15223_v34 = vld [vmem:[#allocation55_spill] sm:$0xff] }
 0x2c8   : > { %v1501_v10 = vpop.permute.xlu1 %1500  ;;  %4633 = vmatprep.mubr.f32.mxu1 %v12389_v54  ;;  %v1440_v21 = vsel %vm800_vm3, %v1416_v40, %v12582_v20 }
 0x2c9   : > { %1746 = vrot.lane.b32.xlu0 %v15211_v53, %s10736_s15  ;;  %v15224_v53 = vld [vmem:[#allocation58_spill] sm:$0xff] }
 0x2ca   : > { %1752 = vrot.lane.b32.xlu1 %v15212_v30, %s10736_s15 }
 0x2cb   : > { %4634 = vmatmul.mubr.f32.gmra.mrb[66].mxu1 %v12401_v25  ;;  %v12592_v36 = vpop.permute.xlu0 %1502 }
 0x2cc   : > { %v1414_v9 = vpop.permute.xlu1 %1413  ;;  %4639 = vmatprep.mubr.f32.mxu1 %v12407_v12  ;;  %v1555_v42 = vsel %vm934_vm4, %v1501_v10, %v12592_v36 }
 0x2cd   : > { %v1439_v54 = vsel %vm800_vm3, %v1414_v9, %v1416_v40  ;;  %1754 = vrot.lane.b32.xlu0 %v15213_v56, %s10736_s15  ;;  %v8759_v47 = vpack.c.bf16 %v1555_v42, %v1440_v21  ;;  %v12644_v21 = vld [vmem:[#allocation3 + $0x88] sm:$0xff]  ;;  %v2645_v9 = vld [vmem:[#allocation2 + $0x478] sm:$0xff] }
 0x2ce   : > { %1742 = vrot.lane.b32.xlu1 %v15214_v2, %s10736_s15 }
 0x2cf   : > { %4640 = vmatmul.mubr.f32.gmra.mrb[68].mxu1 %v12416_v23  ;;  %v1499_v25 = vpop.permute.xlu0 %1498  ;;  %8760 = vmatprep.subr.bf16.mxu0 %v8759_v47  ;;  %v12652_v47 = vld [vmem:[#allocation3 + $0x80] sm:$0xff] }
 0x2d0   : > { %v917_v61 = vpop.permute.xlu1 %916  ;;  %4645 = vmatprep.mubr.f32.mxu1 %v12419_v59  ;;  %v1554_v12 = vsel %vm934_vm4, %v1499_v25, %v1501_v10  ;;  %v12613_v59 = vld [vmem:[#allocation3 + $0x10] sm:$0xff] }
 0x2d1   : > { %v949_v48 = vsel %vm934_vm4, %v15215_v14, %v917_v61  ;;  %1003 = vst.msk [vmem:[#allocation2 + $0x418] sm:$0xff] %vm422_vm0, %v917_v61  ;;  %1750 = vrot.lane.b32.xlu0 %v15216_v28, %s10736_s15  ;;  %v8761_v52 = vpack.c.bf16 %v1554_v12, %v1439_v54  ;;  %v12664_v14 = vld [vmem:[#allocation3 + $0xc0] sm:$0xff]  ;;  %v12668_v28 = vld [vmem:[#allocation2 + $0x8c8] sm:$0xff] }
 0x2d2   : > { %1760 = vrot.lane.b32.xlu1 %v15217_v29, %s10736_s15  ;;  %v2649_v29 = vld [vmem:[#allocation2 + $0x498] sm:$0xff] }
 0x2d3   : > { %4646 = vmatmul.mubr.f32.gmra.mrb[70].mxu1 %v12431_v57  ;;  %v925_v23 = vpop.permute.xlu0 %924  ;;  %8762 = vmatpush1.bf16.msra.mxu0 %v8761_v52  ;;  %v15220_v57 = vld [vmem:[#allocation56_spill] sm:$0xff] }
 0x2d4   : > { %v933_v22 = vpop.permute.xlu1 %932  ;;  %4716 = vmatprep.mubr.f32.mxu1 %v12435_v4  ;;  %v952_v5 = vsel %vm934_vm4, %v15218_v17, %v925_v23  ;;  %1007 = vst.msk [vmem:[#allocation2 + $0x438] sm:$0xff] %vm422_vm0, %v925_v23  ;;  %v2653_v52 = vld [vmem:[#allocation2 + $0x4b8] sm:$0xff] }
 0x2d5   : > { %v12621_v31 = vsel %vm934_vm4, %v15219_v18, %v933_v22  ;;  %1011 = vst.msk [vmem:[#allocation2 + $0x458] sm:$0xff] %vm422_vm0, %v933_v22  ;;  %1762 = vrot.lane.b32.xlu0 %v15220_v57, %s10736_s15  ;;  %v12674_v17 = vld [vmem:[#allocation3 + $0xb8] sm:$0xff]  ;;  %v2648_v18 = vld [vmem:[#allocation2 + $0x490] sm:$0xff] }
 0x2d6   : > { %1768 = vrot.lane.b32.xlu1 %v15221_v44, %s10736_s15  ;;  %3593 = vmatmul.mubr.f32.vlgmr.msra.gmra.mrb[0].mxu0 %v12613_v59  ;;  %v2652_v57 = vld [vmem:[#allocation2 + $0x4b0] sm:$0xff]  ;;  %v12686_v44 = vld [vmem:[#allocation3 + $0xf8] sm:$0xff] }
 0x2d7   : > { %v1106_v4 = vpop.permute.xlu0 %1105  ;;  %3598 = vmatprep.mubr.f32.mxu0 %v12624_v45 }
 0x2d8   : > { %v1114_v40 = vpop.permute.xlu1 %1113  ;;  %v12636_v43 = vsel %vm532_vm1, %v15222_v32, %v1106_v4  ;;  %1207 = vst.msk [vmem:[#allocation2 + $0x558] sm:$0xff] %vm422_vm0, %v1106_v4  ;;  %v2633_v30 = vld [vmem:[#allocation2 + $0x418] sm:$0xff]  ;;  %v12688_v4 = vld [vmem:[#allocation2 + $0x8d0] sm:$0xff] }
 0x2d9   : > { %v12641_v10 = vsel %vm532_vm1, %v15223_v34, %v1114_v40  ;;  %1211 = vst.msk [vmem:[#allocation2 + $0x578] sm:$0xff] %vm422_vm0, %v1114_v40  ;;  %1770 = vrot.lane.b32.xlu0 %v12179_v26, %s10736_s15  ;;  %v2657_v40 = vld [vmem:[#allocation2 + $0x4d8] sm:$0xff] }
 0x2da   : > { %1758 = vrot.lane.b32.xlu1 %v15224_v53, %s10736_s15  ;;  %3599 = vmatmul.mubr.f32.gmra.mrb[2].mxu0 %v12632_v13  ;;  %v2661_v32 = vld [vmem:[#allocation2 + $0x4f8] sm:$0xff] }
 0x2db   : > { %v1122_v42 = vpop.permute.xlu0 %1121  ;;  %v2637_v56 = vld [vmem:[#allocation2 + $0x438] sm:$0xff]  ;;  %3604 = vmatprep.mubr.f32.mxu0 %v12644_v21 }
 0x2dc   : > { %v1130_v54 = vpop.permute.xlu1 %1129  ;;  %v2641_v2 = vld [vmem:[#allocation2 + $0x458] sm:$0xff]  ;;  %v12656_v25 = vsel %vm532_vm1, %v12194_v24, %v1122_v42  ;;  %1215 = vst.msk [vmem:[#allocation2 + $0x598] sm:$0xff] %vm422_vm0, %v1122_v42  ;;  %v8907_v61 = vpack.c.bf16 %v2637_v56, %v2633_v30  ;;  %v8909_v24 = vpack.c.bf16 %v952_v5, %v949_v48  ;;  %v8915_v5 = vpack.c.bf16 %v2653_v52, %v2649_v29  ;;  %v15225_v42 = vld [vmem:[#allocation26_spill] sm:$0xff]  ;;  %v15226_v56 = vld [vmem:[#allocation59_spill] sm:$0xff] }
 0x2dd   : > { %v12661_v26 = vsel %vm532_vm1, %v12214_v62, %v1130_v54  ;;  %1219 = vst.msk [vmem:[#allocation2 + $0x5b8] sm:$0xff] %vm422_vm0, %v1130_v54  ;;  %v8911_v12 = vpack.c.bf16 %v2645_v9, %v2641_v2  ;;  %1766 = vrot.lane.b32.xlu0 %v12204_v35, %s10736_s15  ;;  %v2644_v62 = vld [vmem:[#allocation2 + $0x470] sm:$0xff]  ;;  %v8917_v30 = vpack.c.bf16 %v2652_v57, %v2648_v18  ;;  %v12717_v52 = vld [vmem:[#allocation2 + $0x8c0] sm:$0xff]  ;;  %v12723_v57 = vld [vmem:[#allocation3 + $0x128] sm:$0xff] }
 0x2de   : > { %1853 = vrot.lane.b32.xlu1 %v12668_v28, %s10737_s21  ;;  %8908 = vmatprep.subr.bf16.mxu1 %v8907_v61  ;;  %v12699_v9 = vld [vmem:[#allocation3 + $0xf0] sm:$0xff]  ;;  %v8919_v2 = vpack.c.bf16 %v2661_v32, %v2657_v40  ;;  %v15227_v40 = vld [vmem:[#allocation60_spill] sm:$0xff] }
 0x2df   : > { %3605 = vmatmul.mubr.f32.gmra.mrb[4].mxu0 %v12652_v47  ;;  %v1138_v23 = vpop.permute.xlu0 %1137  ;;  %8910 = vmatpush1.bf16.msra.mxu1 %v8909_v24  ;;  %v2656_v61 = vld [vmem:[#allocation2 + $0x4d0] sm:$0xff] }
 0x2e0   : > { %v1146_v22 = vpop.permute.xlu1 %1145  ;;  %3610 = vmatprep.mubr.f32.mxu0 %v12664_v14  ;;  %v12678_v35 = vsel %vm532_vm1, %v12244_v33, %v1138_v23  ;;  %1223 = vst.msk [vmem:[#allocation2 + $0x5d8] sm:$0xff] %vm422_vm0, %v1138_v23  ;;  %8912 = vmatprep.subr.bf16.mxu1 %v8911_v12  ;;  %v12692_v33 = vld [vmem:[#allocation2 + $0x8e8] sm:$0xff]  ;;  %v2660_v12 = vld [vmem:[#allocation2 + $0x4f0] sm:$0xff]  ;;  %v2669_v23 = vld [vmem:[#allocation2 + $0x538] sm:$0xff] }
 0x2e1   : > { %v12683_v48 = vsel %vm532_vm1, %v12260_v37, %v1146_v22  ;;  %1227 = vst.msk [vmem:[#allocation2 + $0x5f8] sm:$0xff] %vm422_vm0, %v1146_v22  ;;  %1855 = vrot.lane.b32.xlu0 %v12688_v4, %s10737_s21  ;;  %v8913_v37 = vpack.c.bf16 %v2644_v62, %v12621_v31  ;;  %v12711_v24 = vld [vmem:[#allocation3 + $0x130] sm:$0xff]  ;;  %v2665_v62 = vld [vmem:[#allocation2 + $0x518] sm:$0xff]  ;;  %v8921_v18 = vpack.c.bf16 %v2660_v12, %v2656_v61 }
 0x2e2   : > { %1861 = vrot.lane.b32.xlu1 %v12692_v33, %s10737_s21  ;;  %v12713_v29 = vld [vmem:[#allocation2 + $0x8f0] sm:$0xff] }
 0x2e3   : > { %3611 = vmatmul.mubr.f32.gmra.mrb[6].mxu0 %v12674_v17  ;;  %v1154_v34 = vpop.permute.xlu0 %1153  ;;  %8914 = vmatpush1.bf16.msra.mxu1 %v8913_v37 }
 0x2e4   : > { %v1239_v53 = vpop.permute.xlu1 %1238  ;;  %3616 = vmatprep.mubr.f32.mxu0 %v12686_v44  ;;  %v12703_v54 = vsel %vm532_vm1, %v15225_v42, %v1154_v34  ;;  %1231 = vst.msk [vmem:[#allocation2 + $0x618] sm:$0xff] %vm422_vm0, %v1154_v34  ;;  %8916 = vmatprep.subr.bf16.mxu1 %v8915_v5  ;;  %v8923_v34 = vpack.c.bf16 %v2669_v23, %v2665_v62  ;;  %v12735_v42 = vld [vmem:[#allocation3 + $0x168] sm:$0xff]  ;;  %v2673_v62 = vld [vmem:[#allocation2 + $0x558] sm:$0xff] }
 0x2e5   : > { %v12708_v31 = vsel %vm666_vm2, %v15226_v56, %v1239_v53  ;;  %1340 = vst.msk [vmem:[#allocation2 + $0x638] sm:$0xff] %vm422_vm0, %v1239_v53  ;;  %1863 = vrot.lane.b32.xlu0 %v12713_v29, %s10737_s21  ;;  %v2664_v53 = vld [vmem:[#allocation2 + $0x510] sm:$0xff]  ;;  %v12737_v56 = vld [vmem:[#allocation2 + $0x8e0] sm:$0xff]  ;;  %v2677_v23 = vld [vmem:[#allocation2 + $0x578] sm:$0xff] }
 0x2e6   : > { %1851 = vrot.lane.b32.xlu1 %v12717_v52, %s10737_s21 }
 0x2e7   : > { %3617 = vmatmul.mubr.f32.gmra.mrb[8].mxu0 %v12699_v9  ;;  %v1247_v22 = vpop.permute.xlu0 %1246  ;;  %8918 = vmatpush1.bf16.msra.mxu1 %v8917_v30  ;;  %v2668_v30 = vld [vmem:[#allocation2 + $0x530] sm:$0xff] }
 0x2e8   : > { %v1255_v5 = vpop.permute.xlu1 %1254  ;;  %3622 = vmatprep.mubr.f32.mxu0 %v12711_v24  ;;  %v12727_v37 = vsel %vm666_vm2, %v12336_v27, %v1247_v22  ;;  %1344 = vst.msk [vmem:[#allocation2 + $0x658] sm:$0xff] %vm422_vm0, %v1247_v22  ;;  %8920 = vmatprep.subr.bf16.mxu1 %v8919_v2  ;;  %v12741_v27 = vld [vmem:[#allocation2 + $0x908] sm:$0xff]  ;;  %v8925_v12 = vpack.c.bf16 %v2668_v30, %v2664_v53  ;;  %v12747_v22 = vld [vmem:[#allocation3 + $0x160] sm:$0xff]  ;;  %v12761_v53 = vld [vmem:[#allocation2 + $0x910] sm:$0xff] }
 0x2e9   : > { %v12732_v32 = vsel %vm666_vm2, %v15227_v40, %v1255_v5  ;;  %1348 = vst.msk [vmem:[#allocation2 + $0x678] sm:$0xff] %vm422_vm0, %v1255_v5  ;;  %1859 = vrot.lane.b32.xlu0 %v12737_v56, %s10737_s21  ;;  %15228 = vst [vmem:[#allocation47_spill] sm:$0xff] %v12747_v22  ;;  %v12765_v30 = vld [vmem:[#allocation2 + $0x928] sm:$0xff]  ;;  %v2693_v11 = vld [vmem:[#allocation2 + $0x5f8] sm:$0xff] }
 0x2ea   : > { %1869 = vrot.lane.b32.xlu1 %v12741_v27, %s10737_s21 }
 0x2eb   : > { %3623 = vmatmul.mubr.f32.gmra.mrb[10].mxu0 %v12723_v57  ;;  %v1263_v61 = vpop.permute.xlu0 %1262  ;;  %8922 = vmatpush1.bf16.msra.mxu1 %v8921_v18  ;;  %v12759_v18 = vld [vmem:[#allocation3 + $0x1a0] sm:$0xff] }
 0x2ec   : > { %v1271_v2 = vpop.permute.xlu1 %1270  ;;  %3628 = vmatprep.mubr.f32.mxu0 %v12735_v42  ;;  %v12751_v5 = vsel %vm666_vm2, %v12382_v46, %v1263_v61  ;;  %1352 = vst.msk [vmem:[#allocation2 + $0x698] sm:$0xff] %vm422_vm0, %v1263_v61  ;;  %8924 = vmatprep.subr.bf16.mxu1 %v8923_v34  ;;  %15229 = vst [vmem:[#allocation51_spill] sm:$0xff] %v12759_v18  ;;  %v8927_v46 = vpack.c.bf16 %v2677_v23, %v2673_v62  ;;  %v2685_v34 = vld [vmem:[#allocation2 + $0x5b8] sm:$0xff]  ;;  %v12785_v23 = vld [vmem:[#allocation2 + $0x930] sm:$0xff] }
 0x2ed   : > { %v12756_v40 = vsel %vm666_vm2, %v12398_v8, %v1271_v2  ;;  %1356 = vst.msk [vmem:[#allocation2 + $0x6b8] sm:$0xff] %vm422_vm0, %v1271_v2  ;;  %1871 = vrot.lane.b32.xlu0 %v12761_v53, %s10737_s21  ;;  %v2681_v2 = vld [vmem:[#allocation2 + $0x598] sm:$0xff] }
 0x2ee   : > { %1877 = vrot.lane.b32.xlu1 %v12765_v30, %s10737_s21 }
 0x2ef   : > { %3629 = vmatmul.mubr.f32.gmra.mrb[12].mxu0 %v12747_v22  ;;  %v1279_v8 = vpop.permute.xlu0 %1278  ;;  %8926 = vmatpush1.bf16.msra.mxu1 %v8925_v12  ;;  %v12783_v12 = vld [vmem:[#allocation3 + $0x1d8] sm:$0xff] }
 0x2f0   : > { %v1287_v61 = vpop.permute.xlu1 %1286  ;;  %3634 = vmatprep.mubr.f32.mxu0 %v12759_v18  ;;  %v12775_v38 = vsel %vm666_vm2, %v12428_v63, %v1279_v8  ;;  %1360 = vst.msk [vmem:[#allocation2 + $0x6d8] sm:$0xff] %vm422_vm0, %v1279_v8  ;;  %8928 = vmatprep.subr.bf16.mxu1 %v8927_v46  ;;  %15231 = vst [vmem:[#allocation28_spill] sm:$0xff] %v12783_v12  ;;  %v8929_v63 = vpack.c.bf16 %v12641_v10, %v12636_v43  ;;  %v12797_v18 = vld [vmem:[#allocation3 + $0x1d0] sm:$0xff] }
 0x2f1   : > { %v12780_v62 = vsel %vm666_vm2, %v12444_v60, %v1287_v61  ;;  %1364 = vst.msk [vmem:[#allocation2 + $0x6f8] sm:$0xff] %vm422_vm0, %v1287_v61  ;;  %1879 = vrot.lane.b32.xlu0 %v12785_v23, %s10737_s21  ;;  %v8931_v60 = vpack.c.bf16 %v2685_v34, %v2681_v2  ;;  %v2689_v61 = vld [vmem:[#allocation2 + $0x5d8] sm:$0xff]  ;;  %15232 = vst [vmem:[#allocation29_spill] sm:$0xff] %v12797_v18  ;;  %v12809_v10 = vld [vmem:[#allocation3 + $0x210] sm:$0xff] }
 0x2f2   : > { %1867 = vrot.lane.b32.xlu1 %v12789_v49, %s10737_s21  ;;  %15233 = vst [vmem:[#allocation30_spill] sm:$0xff] %v12809_v10  ;;  %v12811_v2 = vld [vmem:[#allocation2 + $0x920] sm:$0xff]  ;;  %v12815_v34 = vld [vmem:[#allocation2 + $0x948] sm:$0xff] }
 0x2f3   : > { %3635 = vmatmul.mubr.f32.gmra.mrb[14].mxu0 %v12771_v55  ;;  %v1372_v8 = vpop.permute.xlu0 %1371  ;;  %8930 = vmatpush1.bf16.msra.mxu1 %v8929_v63 }
 0x2f4   : > { %v1380_v46 = vpop.permute.xlu1 %1379  ;;  %3640 = vmatprep.mubr.f32.mxu0 %v12783_v12  ;;  %v12801_v22 = vsel %vm800_vm3, %v12463_v19, %v1372_v8  ;;  %1473 = vst.msk [vmem:[#allocation2 + $0x718] sm:$0xff] %vm422_vm0, %v1372_v8  ;;  %8932 = vmatprep.subr.bf16.mxu1 %v8931_v60  ;;  %v8933_v19 = vpack.c.bf16 %v12661_v26, %v12656_v25  ;;  %v2697_v8 = vld [vmem:[#allocation2 + $0x618] sm:$0xff]  ;;  %v12823_v12 = vld [vmem:[#allocation3 + $0x208] sm:$0xff]  ;;  %v12837_v26 = vld [vmem:[#allocation2 + $0x950] sm:$0xff] }
 0x2f5   : > { %v12806_v43 = vsel %vm800_vm3, %v12473_v41, %v1380_v46  ;;  %1477 = vst.msk [vmem:[#allocation2 + $0x738] sm:$0xff] %vm422_vm0, %v1380_v46  ;;  %1875 = vrot.lane.b32.xlu0 %v12811_v2, %s10737_s21  ;;  %v8935_v41 = vpack.c.bf16 %v2693_v11, %v2689_v61  ;;  %v2701_v46 = vld [vmem:[#allocation2 + $0x638] sm:$0xff]  ;;  %v12835_v25 = vld [vmem:[#allocation3 + $0x248] sm:$0xff] }
 0x2f6   : > { %1885 = vrot.lane.b32.xlu1 %v12815_v34, %s10737_s21  ;;  %v12841_v61 = vld [vmem:[#allocation2 + $0x968] sm:$0xff] }
 0x2f7   : > { %3641 = vmatmul.mubr.f32.gmra.mrb[16].mxu0 %v12797_v18  ;;  %v1388_v63 = vpop.permute.xlu0 %1387  ;;  %8934 = vmatpush1.bf16.msra.mxu1 %v8933_v19  ;;  %15234 = vst [vmem:[#allocation31_spill] sm:$0xff] %v12841_v61 }
 0x2f8   : > { %v1396_v60 = vpop.permute.xlu1 %1395  ;;  %3646 = vmatprep.mubr.f32.mxu0 %v12809_v10  ;;  %v12827_v55 = vsel %vm800_vm3, %v12491_v6, %v1388_v63  ;;  %1481 = vst.msk [vmem:[#allocation2 + $0x758] sm:$0xff] %vm422_vm0, %v1388_v63  ;;  %8936 = vmatprep.subr.bf16.mxu1 %v8935_v41  ;;  %v8937_v6 = vpack.c.bf16 %v12683_v48, %v12678_v35  ;;  %v2705_v63 = vld [vmem:[#allocation2 + $0x658] sm:$0xff]  ;;  %v12849_v10 = vld [vmem:[#allocation3 + $0x240] sm:$0xff] }
 0x2f9   : > { %v12832_v11 = vsel %vm800_vm3, %v12506_v39, %v1396_v60  ;;  %1485 = vst.msk [vmem:[#allocation2 + $0x778] sm:$0xff] %vm422_vm0, %v1396_v60  ;;  %1887 = vrot.lane.b32.xlu0 %v12837_v26, %s10737_s21  ;;  %v8939_v39 = vpack.c.bf16 %v2701_v46, %v2697_v8  ;;  %v2709_v60 = vld [vmem:[#allocation2 + $0x678] sm:$0xff]  ;;  %v12861_v48 = vld [vmem:[#allocation3 + $0x280] sm:$0xff]  ;;  %v12863_v8 = vld [vmem:[#allocation2 + $0x970] sm:$0xff] }
 0x2fa   : > { %1893 = vrot.lane.b32.xlu1 %v12841_v61, %s10737_s21  ;;  %15235 = vst [vmem:[#allocation33_spill] sm:$0xff] %v12861_v48  ;;  %15236 = vst [vmem:[#allocation34_spill] sm:$0xff] %v12863_v8  ;;  %v12867_v46 = vld [vmem:[#allocation2 + $0x940] sm:$0xff]  ;;  %v12875_v61 = vld [vmem:[#allocation3 + $0x278] sm:$0xff] }
 0x2fb   : > { %3647 = vmatmul.mubr.f32.gmra.mrb[18].mxu0 %v12823_v12  ;;  %v1404_v19 = vpop.permute.xlu0 %1403  ;;  %8938 = vmatpush1.bf16.msra.mxu1 %v8937_v6 }
 0x2fc   : > { %v1412_v41 = vpop.permute.xlu1 %1411  ;;  %3652 = vmatprep.mubr.f32.mxu0 %v12835_v25  ;;  %v12853_v18 = vsel %vm800_vm3, %v12544_v1, %v1404_v19  ;;  %1489 = vst.msk [vmem:[#allocation2 + $0x798] sm:$0xff] %vm422_vm0, %v1404_v19  ;;  %8940 = vmatprep.subr.bf16.mxu1 %v8939_v39  ;;  %v8941_v1 = vpack.c.bf16 %v12708_v31, %v12703_v54  ;;  %v2713_v19 = vld [vmem:[#allocation2 + $0x698] sm:$0xff] }
 0x2fd   : > { %v12858_v35 = vsel %vm800_vm3, %v12564_v0, %v1412_v41  ;;  %1493 = vst.msk [vmem:[#allocation2 + $0x7b8] sm:$0xff] %vm422_vm0, %v1412_v41  ;;  %1895 = vrot.lane.b32.xlu0 %v12863_v8, %s10737_s21  ;;  %v8943_v0 = vpack.c.bf16 %v2709_v60, %v2705_v63  ;;  %v2717_v41 = vld [vmem:[#allocation2 + $0x6b8] sm:$0xff]  ;;  %v12889_v63 = vld [vmem:[#allocation2 + $0x960] sm:$0xff]  ;;  %v12893_v60 = vld [vmem:[#allocation2 + $0x988] sm:$0xff] }
 0x2fe   : > { %1883 = vrot.lane.b32.xlu1 %v12867_v46, %s10737_s21  ;;  %v12887_v31 = vld [vmem:[#allocation3 + $0x2b8] sm:$0xff]  ;;  %15238 = vst [vmem:[#allocation38_spill] sm:$0xff] %v12889_v63  ;;  %15239 = vst [vmem:[#allocation41_spill] sm:$0xff] %v12893_v60 }
 0x2ff   : > { %3653 = vmatmul.mubr.f32.gmra.mrb[20].mxu0 %v12849_v10  ;;  %v1420_v6 = vpop.permute.xlu0 %1419  ;;  %8942 = vmatpush1.bf16.msra.mxu1 %v8941_v1  ;;  %15237 = vst [vmem:[#allocation37_spill] sm:$0xff] %v12887_v31 }
 0x300   : > { %v1505_v39 = vpop.permute.xlu1 %1504  ;;  %3658 = vmatprep.mubr.f32.mxu0 %v12861_v48  ;;  %v12879_v8 = vsel %vm800_vm3, %v12582_v20, %v1420_v6  ;;  %1497 = vst.msk [vmem:[#allocation2 + $0x7d8] sm:$0xff] %vm422_vm0, %v1420_v6  ;;  %8944 = vmatprep.subr.bf16.mxu1 %v8943_v0  ;;  %v8945_v20 = vpack.c.bf16 %v12732_v32, %v12727_v37  ;;  %v2721_v6 = vld [vmem:[#allocation2 + $0x6d8] sm:$0xff]  ;;  %v12909_v37 = vld [vmem:[#allocation2 + $0x990] sm:$0xff] }
 0x301   : > { %v12884_v54 = vsel %vm934_vm4, %v12592_v36, %v1505_v39  ;;  %1606 = vst.msk [vmem:[#allocation2 + $0x7f8] sm:$0xff] %vm422_vm0, %v1505_v39  ;;  %1891 = vrot.lane.b32.xlu0 %v12889_v63, %s10737_s21  ;;  %v8947_v36 = vpack.c.bf16 %v2717_v41, %v2713_v19  ;;  %v2725_v39 = vld [vmem:[#allocation2 + $0x6f8] sm:$0xff]  ;;  %v12903_v63 = vld [vmem:[#allocation3 + $0x2b0] sm:$0xff]  ;;  %15243 = vst [vmem:[#allocation48_spill] sm:$0xff] %v12909_v37  ;;  %v8949_v32 = vpack.c.bf16 %v12756_v40, %v12751_v5 }
 0x302   : > { %1901 = vrot.lane.b32.xlu1 %v12893_v60, %s10737_s21  ;;  %15241 = vst [vmem:[#allocation45_spill] sm:$0xff] %v12903_v63  ;;  %v12907_v60 = vld [vmem:[#allocation3 + $0x2f0] sm:$0xff]  ;;  %v8951_v19 = vpack.c.bf16 %v2725_v39, %v2721_v6  ;;  %v8953_v5 = vpack.c.bf16 %v12780_v62, %v12775_v38  ;;  %v12933_v6 = vld [vmem:[#allocation3 + $0x328] sm:$0xff]  ;;  %v8957_v38 = vpack.c.bf16 %v12806_v43, %v12801_v22  ;;  %v12957_v22 = vld [vmem:[#allocation3 + $0x398] sm:$0xff] }
 0x303   : > { %3659 = vmatmul.mubr.f32.gmra.mrb[22].mxu0 %v12875_v61  ;;  %v1509_v1 = vpop.permute.xlu0 %1508  ;;  %8946 = vmatpush1.bf16.msra.mxu1 %v8945_v20  ;;  %15242 = vst [vmem:[#allocation46_spill] sm:$0xff] %v12907_v60  ;;  %v8961_v43 = vpack.c.bf16 %v12832_v11, %v12827_v55  ;;  %v8965_v55 = vpack.c.bf16 %v12858_v35, %v12853_v18  ;;  %v12979_v11 = vld [vmem:[#allocation3 + $0x3d0] sm:$0xff]  ;;  %v12993_v35 = vld [vmem:[#allocation3 + $0x408] sm:$0xff] }
 0x304   : > { %v12900_v0 = vpop.permute.xlu1 %1510  ;;  %3664 = vmatprep.mubr.f32.mxu0 %v12887_v31  ;;  %8948 = vmatprep.subr.bf16.mxu1 %v8947_v36  ;;  %v2729_v36 = vld [vmem:[#allocation2 + $0x718] sm:$0xff]  ;;  %v12921_v31 = vld [vmem:[#allocation3 + $0x2e8] sm:$0xff] }
 0x305   : > { %15240 = vst [vmem:[#allocation42_spill] sm:$0xff] %v12900_v0  ;;  %v1558_v48 = vsel %vm934_vm4, %v1509_v1, %v12900_v0  ;;  %1903 = vrot.lane.b32.xlu0 %v12909_v37, %s10737_s21  ;;  %v2733_v0 = vld [vmem:[#allocation2 + $0x738] sm:$0xff] }
 0x306   : > { %1986 = vrot.lane.b32.xlu1 %v12668_v28, %s10738_s3  ;;  %v12927_v28 = vld [vmem:[#allocation2 + $0x980] sm:$0xff]  ;;  %v8955_v39 = vpack.c.bf16 %v2733_v0, %v2729_v36  ;;  %v2749_v36 = vld [vmem:[#allocation2 + $0x7b8] sm:$0xff] }
 0x307   : > { %3665 = vmatmul.mubr.f32.gmra.mrb[24].mxu0 %v12903_v63  ;;  %v1517_v41 = vpop.permute.xlu0 %1516  ;;  %8950 = vmatpush1.bf16.msra.mxu1 %v8949_v32  ;;  %15245 = vst [vmem:[#allocation32_spill] sm:$0xff] %v12927_v28 }
 0x308   : > { %v12918_v20 = vpop.permute.xlu1 %1518  ;;  %3670 = vmatprep.mubr.f32.mxu0 %v12907_v60  ;;  %8952 = vmatprep.subr.bf16.mxu1 %v8951_v19  ;;  %v2741_v60 = vld [vmem:[#allocation2 + $0x778] sm:$0xff] }
 0x309   : > { %15244 = vst [vmem:[#allocation49_spill] sm:$0xff] %v12918_v20  ;;  %v1561_v37 = vsel %vm934_vm4, %v1517_v41, %v12918_v20  ;;  %1988 = vrot.lane.b32.xlu0 %v12688_v4, %s10738_s3  ;;  %v2737_v20 = vld [vmem:[#allocation2 + $0x758] sm:$0xff]  ;;  %v12936_v4 = vld [vmem:[#allocation3 + $0x320] sm:$0xff] }
 0x30a   : > { %1899 = vrot.lane.b32.xlu1 %v12927_v28, %s10737_s21  ;;  %v8763_v40 = vpack.c.bf16 %v1561_v37, %v1558_v48  ;;  %v12947_v48 = vld [vmem:[#allocation3 + $0x360] sm:$0xff]  ;;  %v8959_v0 = vpack.c.bf16 %v2741_v60, %v2737_v20 }
 0x30b   : > { %3671 = vmatmul.mubr.f32.gmra.mrb[26].mxu0 %v12921_v31  ;;  %v1507_v32 = vpop.permute.xlu0 %1506  ;;  %8954 = vmatpush1.bf16.msra.mxu1 %v8953_v5  ;;  %v2757_v5 = vld [vmem:[#allocation2 + $0x7f8] sm:$0xff] }
 0x30c   : > { %v1515_v19 = vpop.permute.xlu1 %1514  ;;  %8764 = vmatprep.subr.bf16.mxu0 %v8763_v40  ;;  %v1557_v63 = vsel %vm934_vm4, %v1507_v32, %v1509_v1  ;;  %8956 = vmatprep.subr.bf16.mxu1 %v8955_v39  ;;  %v12969_v40 = vld [vmem:[#allocation3 + $0x390] sm:$0xff] }
 0x30d   : > { %v1560_v28 = vsel %vm934_vm4, %v1515_v19, %v1517_v41  ;;  %3676 = vmatprep.mubr.f32.mxu0 %v12933_v6  ;;  %1984 = vrot.lane.b32.xlu0 %v12717_v52, %s10738_s3  ;;  %v2745_v41 = vld [vmem:[#allocation2 + $0x798] sm:$0xff] }
 0x30e   : > { %1994 = vrot.lane.b32.xlu1 %v12692_v33, %s10738_s3  ;;  %v8765_v62 = vpack.c.bf16 %v1560_v28, %v1557_v63  ;;  %v12952_v52 = vld [vmem:[#allocation3 + $0x358] sm:$0xff]  ;;  %v8963_v63 = vpack.c.bf16 %v2749_v36, %v2745_v41  ;;  %v12998_v41 = vld [vmem:[#allocation3 + $0x400] sm:$0xff] }
 0x30f   : > { %3677 = vmatmul.mubr.f32.gmra.mrb[28].mxu0 %v12936_v4  ;;  %v1525_v1 = vpop.permute.xlu0 %1524  ;;  %8958 = vmatpush1.bf16.msra.mxu1 %v8957_v38  ;;  %v2753_v28 = vld [vmem:[#allocation2 + $0x7d8] sm:$0xff]  ;;  %v12982_v38 = vld [vmem:[#allocation3 + $0x3c8] sm:$0xff] }
 0x310   : > { %v12950_v37 = vpop.permute.xlu1 %1526  ;;  %8766 = vmatpush1.bf16.msra.mxu0 %v8765_v62  ;;  %8960 = vmatprep.subr.bf16.mxu1 %v8959_v0  ;;  %v8967_v39 = vpack.c.bf16 %v2757_v5, %v2753_v28  ;;  %v13015_v36 = vld [vmem:[#allocation3 + $0x438] sm:$0xff] }
 0x311   : > { %v1564_v33 = vsel %vm934_vm4, %v1525_v1, %v12950_v37  ;;  %3682 = vmatprep.mubr.f32.mxu0 %v12947_v48  ;;  %1996 = vrot.lane.b32.xlu0 %v12713_v29, %s10738_s3 }
 0x312   : > { %2002 = vrot.lane.b32.xlu1 %v12741_v27, %s10738_s3 }
 0x313   : > { %3683 = vmatmul.mubr.f32.gmra.mrb[30].mxu0 %v12952_v52  ;;  %v1533_v60 = vpop.permute.xlu0 %1532  ;;  %8962 = vmatpush1.bf16.msra.mxu1 %v8961_v43  ;;  %v13023_v43 = vld [vmem:[#allocation3 + $0x478] sm:$0xff] }
 0x314   : > { %v12966_v20 = vpop.permute.xlu1 %1534  ;;  %3688 = vmatprep.mubr.f32.mxu0 %v12957_v22  ;;  %8964 = vmatprep.subr.bf16.mxu1 %v8963_v63 }
 0x315   : > { %v1567_v29 = vsel %vm934_vm4, %v1533_v60, %v12966_v20  ;;  %2004 = vrot.lane.b32.xlu0 %v12761_v53, %s10738_s3 }
 0x316   : > { %1992 = vrot.lane.b32.xlu1 %v12737_v56, %s10738_s3  ;;  %v8767_v27 = vpack.c.bf16 %v1567_v29, %v1564_v33  ;;  %v8969_v56 = vpack.c.bf16 %v12884_v54, %v12879_v8 }
 0x317   : > { %3689 = vmatmul.mubr.f32.gmra.mrb[32].mxu0 %v12969_v40  ;;  %v1523_v32 = vpop.permute.xlu0 %1522  ;;  %8966 = vmatpush1.bf16.msra.mxu1 %v8965_v55  ;;  %v2782_v55 = vld [vmem:[#allocation2 + $0x8c0] sm:$0xff] }
 0x318   : > { %v1531_v19 = vpop.permute.xlu1 %1530  ;;  %8768 = vmatprep.subr.bf16.mxu0 %v8767_v27  ;;  %v1563_v53 = vsel %vm934_vm4, %v1523_v32, %v1525_v1  ;;  %8968 = vmatprep.subr.bf16.mxu1 %v8967_v39  ;;  %v2786_v27 = vld [vmem:[#allocation2 + $0x8e0] sm:$0xff]  ;;  %v2791_v32 = vld [vmem:[#allocation2 + $0x908] sm:$0xff] }
 0x319   : > { %v1566_v62 = vsel %vm934_vm4, %v1531_v19, %v1533_v60  ;;  %3694 = vmatprep.mubr.f32.mxu0 %v12979_v11  ;;  %2000 = vrot.lane.b32.xlu0 %v12789_v49, %s10738_s3  ;;  %v13028_v60 = vld [vmem:[#allocation3 + $0x470] sm:$0xff] }
 0x31a   : > { %2010 = vrot.lane.b32.xlu1 %v12765_v30, %s10738_s3  ;;  %v8769_v18 = vpack.c.bf16 %v1566_v62, %v1563_v53  ;;  %v13003_v30 = vld [vmem:[#allocation3 + $0x440] sm:$0xff]  ;;  %v13037_v19 = vld [vmem:[#allocation3 + $0x4b0] sm:$0xff] }
 0x31b   : > { %3695 = vmatmul.mubr.f32.gmra.mrb[34].mxu0 %v12982_v38  ;;  %v1541_v0 = vpop.permute.xlu0 %1540  ;;  %8970 = vmatpush1.bf16.msra.mxu1 %v8969_v56  ;;  %v8777_v56 = vpack.c.bf16 %v2786_v27, %v2782_v55  ;;  %v2807_v27 = vld [vmem:[#allocation2 + $0x988] sm:$0xff] }
 0x31c   : > { %v12996_v1 = vpop.permute.xlu1 %1542  ;;  %8770 = vmatpush1.bf16.msra.mxu0 %v8769_v18  ;;  %3700 = vmatprep.mubr.f32.mxu0 %v12993_v35  ;;  %v13044_v18 = vld [vmem:[#allocation3 + $0x4a8] sm:$0xff] }
 0x31d   : > { %v1570_v49 = vsel %vm934_vm4, %v1541_v0, %v12996_v1  ;;  %2012 = vrot.lane.b32.xlu0 %v12785_v23, %s10738_s3  ;;  %v2783_v23 = vld [vmem:[#allocation2 + $0x8c8] sm:$0xff] }
 0x31e   : > { %2018 = vrot.lane.b32.xlu1 %v12815_v34, %s10738_s3  ;;  %4717 = vmatmul.mubr.f32.vlgmr.msra.gmra.mrb[0].mxu1 %v12613_v59  ;;  %v2787_v34 = vld [vmem:[#allocation2 + $0x8e8] sm:$0xff] }
 0x31f   : > { %3701 = vmatmul.mubr.f32.gmra.mrb[36].mxu0 %v12998_v41  ;;  %v1549_v8 = vpop.permute.xlu0 %1548  ;;  %4722 = vmatprep.mubr.f32.mxu1 %v12624_v45  ;;  %v8775_v29 = vpack.c.bf16 %v2787_v34, %v2783_v23 }
 0x320   : > { %v13011_v54 = vpop.permute.xlu1 %1550  ;;  %3706 = vmatprep.mubr.f32.mxu0 %v13003_v30 }
 0x321   : > { %15246 = vst [vmem:[#allocation53_spill] sm:$0xff] %v13011_v54  ;;  %v1573_v33 = vsel %vm934_vm4, %v1549_v8, %v13011_v54  ;;  %2020 = vrot.lane.b32.xlu0 %v12837_v26, %s10738_s3  ;;  %v10433_v54 = vld [vmem:[#allocation2 + $0x8d0] sm:$0xff] }
 0x322   : > { %2008 = vrot.lane.b32.xlu1 %v12811_v2, %s10738_s3  ;;  %v8771_v59 = vpack.c.bf16 %v1573_v33, %v1570_v49  ;;  %4723 = vmatmul.mubr.f32.gmra.mrb[2].mxu1 %v12632_v13  ;;  %v15247_v13 = vld [vmem:[#allocation25_spill] sm:$0xff] }
 0x323   : > { %3707 = vmatmul.mubr.f32.gmra.mrb[38].mxu0 %v13015_v36  ;;  %v1539_v45 = vpop.permute.xlu0 %1538  ;;  %4728 = vmatprep.mubr.f32.mxu1 %v12644_v21  ;;  %v2795_v21 = vld [vmem:[#allocation2 + $0x928] sm:$0xff]  ;;  %v2794_v33 = vld [vmem:[#allocation2 + $0x920] sm:$0xff] }
 0x324   : > { %v1547_v63 = vpop.permute.xlu1 %1546  ;;  %8772 = vmatprep.subr.bf16.mxu0 %v8771_v59  ;;  %v1569_v28 = vsel %vm934_vm4, %v1539_v45, %v1541_v0  ;;  %3712 = vmatprep.mubr.f32.mxu0 %v13023_v43  ;;  %v8779_v49 = vpack.c.bf16 %v2795_v21, %v2791_v32  ;;  %v2803_v59 = vld [vmem:[#allocation2 + $0x968] sm:$0xff]  ;;  %v2806_v32 = vld [vmem:[#allocation2 + $0x980] sm:$0xff] }
 0x325   : > { %v1572_v5 = vsel %vm934_vm4, %v1547_v63, %v1549_v8  ;;  %2016 = vrot.lane.b32.xlu0 %v12867_v46, %s10738_s3  ;;  %v2790_v8 = vld [vmem:[#allocation2 + $0x900] sm:$0xff] }
 0x326   : > { %1512 = vrot.lane.b32.xlu1 %v15247_v13, %s10739_s4  ;;  %v8773_v39 = vpack.c.bf16 %v1572_v5, %v1569_v28  ;;  %4729 = vmatmul.mubr.f32.gmra.mrb[4].mxu1 %v12652_v47  ;;  %v2799_v47 = vld [vmem:[#allocation2 + $0x948] sm:$0xff]  ;;  %v8781_v45 = vpack.c.bf16 %v2794_v33, %v2790_v8  ;;  %v13058_v63 = vld [vmem:[#allocation3 + $0x4e0] sm:$0xff]  ;;  %v13073_v13 = vld [vmem:[#allocation3 + $0x518] sm:$0xff] }
 0x327   : > { %3713 = vmatmul.mubr.f32.gmra.mrb[40].mxu0 %v13028_v60  ;;  %v1721_v53 = vpop.permute.xlu0 %1720  ;;  %4734 = vmatprep.mubr.f32.mxu1 %v12664_v14  ;;  %v13053_v14 = vld [vmem:[#allocation3 + $0x4e8] sm:$0xff]  ;;  %v2798_v28 = vld [vmem:[#allocation2 + $0x940] sm:$0xff]  ;;  %v13099_v8 = vld [vmem:[#allocation3 + $0x590] sm:$0xff] }
 0x328   : > { %v13041_v62 = vpop.permute.xlu1 %1722  ;;  %8774 = vmatpush1.bf16.msra.mxu0 %v8773_v39  ;;  %3718 = vmatprep.mubr.f32.mxu0 %v13037_v19  ;;  %v2802_v5 = vld [vmem:[#allocation2 + $0x960] sm:$0xff] }
 0x329   : > { %15248 = vst [vmem:[#allocation54_spill] sm:$0xff] %v13041_v62  ;;  %v1775_v0 = vsel %vm532_vm1, %v1721_v53, %v13041_v62  ;;  %8776 = vmatprep.subr.bf16.mxu0 %v8775_v29  ;;  %1520 = vrot.lane.b32.xlu0 %v11656_v15, %s10739_s4  ;;  %v8785_v55 = vpack.c.bf16 %v2802_v5, %v2798_v28  ;;  %v13112_v28 = vld [vmem:[#allocation3 + $0x5c8] sm:$0xff] }
 0x32a   : > { %1528 = vrot.lane.b32.xlu1 %v11659_v58, %s10739_s4  ;;  %4735 = vmatmul.mubr.f32.gmra.mrb[6].mxu1 %v12674_v17  ;;  %v8783_v58 = vpack.c.bf16 %v2803_v59, %v2799_v47  ;;  %v13066_v17 = vld [vmem:[#allocation3 + $0x520] sm:$0xff]  ;;  %v8787_v39 = vpack.c.bf16 %v1775_v0, %v2807_v27  ;;  %v15253_v59 = vld [vmem:[#allocation51_spill] sm:$0xff]  ;;  %v15256_v5 = vld [vmem:[#allocation50_spill] sm:$0xff] }
 0x32b   : > { %3719 = vmatmul.mubr.f32.gmra.mrb[42].mxu0 %v13044_v18  ;;  %v1719_v23 = vpop.permute.xlu0 %1718  ;;  %4740 = vmatprep.mubr.f32.mxu1 %v12686_v44 }
 0x32c   : > { %v1729_v34 = vpop.permute.xlu1 %1728  ;;  %8778 = vmatpush1.bf16.msra.mxu0 %v8777_v56  ;;  %v1774_v15 = vsel %vm532_vm1, %v1719_v23, %v1721_v53  ;;  %3724 = vmatprep.mubr.f32.mxu0 %v13053_v14  ;;  %v13089_v53 = vld [vmem:[#allocation3 + $0x550] sm:$0xff]  ;;  %v13104_v23 = vld [vmem:[#allocation3 + $0x588] sm:$0xff] }
 0x32d   : > { %8780 = vmatprep.subr.bf16.mxu0 %v8779_v49  ;;  %1536 = vrot.lane.b32.xlu0 %v11675_v7, %s10739_s4 }
 0x32e   : > { %1544 = vrot.lane.b32.xlu1 %v15185_v50, %s10739_s4  ;;  %4741 = vmatmul.mubr.f32.gmra.mrb[8].mxu1 %v12699_v9  ;;  %v15250_v50 = vld [vmem:[#allocation27_spill] sm:$0xff]  ;;  %v13082_v9 = vld [vmem:[#allocation3 + $0x558] sm:$0xff] }
 0x32f   : > { %3725 = vmatmul.mubr.f32.gmra.mrb[44].mxu0 %v13058_v63  ;;  %v13070_v44 = vpop.permute.xlu0 %1730  ;;  %4746 = vmatprep.mubr.f32.mxu1 %v12711_v24 }
 0x330   : > { %15249 = vst [vmem:[#allocation36_spill] sm:$0xff] %v13070_v44  ;;  %v1737_v29 = vpop.permute.xlu1 %1736  ;;  %8782 = vmatpush1.bf16.msra.mxu0 %v8781_v45  ;;  %v1778_v7 = vsel %vm532_vm1, %v1729_v34, %v13070_v44  ;;  %3730 = vmatprep.mubr.f32.mxu0 %v13066_v17  ;;  %v15254_v45 = vld [vmem:[#allocation40_spill] sm:$0xff]  ;;  %v13237_v44 = vld [vmem:[#allocation3 + $0x788] sm:$0xff] }
 0x331   : > { %8784 = vmatprep.subr.bf16.mxu0 %v8783_v58  ;;  %1552 = vrot.lane.b32.xlu0 %v15250_v50, %s10739_s4  ;;  %15274 = vst [vmem:[#allocation59_spill] sm:$0xff] %v13237_v44 }
 0x332   : > { %1724 = vrot.lane.b32.xlu1 %v12497_v51, %s10736_s15  ;;  %4747 = vmatmul.mubr.f32.gmra.mrb[10].mxu1 %v12723_v57  ;;  %v8789_v57 = vpack.c.bf16 %v1774_v15, %v2806_v32  ;;  %v15255_v15 = vld [vmem:[#allocation35_spill] sm:$0xff] }
 0x333   : > { %3731 = vmatmul.mubr.f32.gmra.mrb[46].mxu0 %v13073_v13  ;;  %v13086_v24 = vpop.permute.xlu0 %1738  ;;  %4752 = vmatprep.mubr.f32.mxu1 %v12735_v42  ;;  %v15252_v42 = vld [vmem:[#allocation47_spill] sm:$0xff] }
 0x334   : > { %15251 = vst [vmem:[#allocation44_spill] sm:$0xff] %v13086_v24  ;;  %v1727_v21 = vpop.permute.xlu1 %1726  ;;  %8786 = vmatpush1.bf16.msra.mxu0 %v8785_v55  ;;  %v1781_v56 = vsel %vm532_vm1, %v1737_v29, %v13086_v24  ;;  %3736 = vmatprep.mubr.f32.mxu0 %v13082_v9  ;;  %v15259_v32 = vld [vmem:[#allocation39_spill] sm:$0xff]  ;;  %v15269_v24 = vld [vmem:[#allocation46_spill] sm:$0xff] }
 0x335   : > { %v1777_v49 = vsel %vm532_vm1, %v1727_v21, %v1729_v34  ;;  %8788 = vmatprep.subr.bf16.mxu0 %v8787_v39  ;;  %1732 = vrot.lane.b32.xlu0 %v12513_v16, %s10736_s15  ;;  %v8791_v0 = vpack.c.bf16 %v1781_v56, %v1778_v7  ;;  %v13119_v7 = vld [vmem:[#allocation3 + $0x5c0] sm:$0xff]  ;;  %v15260_v21 = vld [vmem:[#allocation43_spill] sm:$0xff] }
 0x336   : > { %1740 = vrot.lane.b32.xlu1 %v12516_v3, %s10736_s15  ;;  %4753 = vmatmul.mubr.f32.gmra.mrb[12].mxu1 %v15252_v42  ;;  %v13124_v39 = vld [vmem:[#allocation3 + $0x600] sm:$0xff]  ;;  %v13136_v42 = vld [vmem:[#allocation3 + $0x5f8] sm:$0xff] }
 0x337   : > { %3737 = vmatmul.mubr.f32.gmra.mrb[48].mxu0 %v13089_v53  ;;  %v1735_v33 = vpop.permute.xlu0 %1734  ;;  %4758 = vmatprep.mubr.f32.mxu1 %v15253_v59  ;;  %v15261_v56 = vld [vmem:[#allocation29_spill] sm:$0xff] }
 0x338   : > { %v1745_v47 = vpop.permute.xlu1 %1744  ;;  %8790 = vmatpush1.bf16.msra.mxu0 %v8789_v57  ;;  %v1780_v34 = vsel %vm532_vm1, %v1735_v33, %v1737_v29  ;;  %3742 = vmatprep.mubr.f32.mxu0 %v13099_v8  ;;  %v15258_v29 = vld [vmem:[#allocation28_spill] sm:$0xff] }
 0x339   : > { %8792 = vmatprep.subr.bf16.mxu0 %v8791_v0  ;;  %1748 = vrot.lane.b32.xlu0 %v15254_v45, %s10736_s15  ;;  %v8793_v58 = vpack.c.bf16 %v1780_v34, %v1777_v49  ;;  %v15263_v0 = vld [vmem:[#allocation30_spill] sm:$0xff] }
 0x33a   : > { %1756 = vrot.lane.b32.xlu1 %v15255_v15, %s10736_s15  ;;  %4759 = vmatmul.mubr.f32.gmra.mrb[14].mxu1 %v15256_v5 }
 0x33b   : > { %3743 = vmatmul.mubr.f32.gmra.mrb[50].mxu0 %v13104_v23  ;;  %v13116_v55 = vpop.permute.xlu0 %1746  ;;  %4764 = vmatprep.mubr.f32.mxu1 %v15258_v29 }
 0x33c   : > { %15257 = vst [vmem:[#allocation56_spill] sm:$0xff] %v13116_v55  ;;  %v1753_v27 = vpop.permute.xlu1 %1752  ;;  %8794 = vmatpush1.bf16.msra.mxu0 %v8793_v58  ;;  %v1784_v50 = vsel %vm532_vm1, %v1745_v47, %v13116_v55  ;;  %3748 = vmatprep.mubr.f32.mxu0 %v13112_v28  ;;  %v13145_v58 = vld [vmem:[#allocation3 + $0x638] sm:$0xff] }
 0x33d   : > { %1764 = vrot.lane.b32.xlu0 %v15259_v32, %s10736_s15 }
 0x33e   : > { %1772 = vrot.lane.b32.xlu1 %v15260_v21, %s10736_s15  ;;  %4765 = vmatmul.mubr.f32.gmra.mrb[16].mxu1 %v15261_v56  ;;  %v13150_v56 = vld [vmem:[#allocation3 + $0x630] sm:$0xff]  ;;  %s14852_s15 = scalar_lea.vmem [#allocation14], %s10206_s17 }
 0x33f   : > { %3749 = vmatmul.mubr.f32.gmra.mrb[52].mxu0 %v13119_v7  ;;  %v13132_v49 = vpop.permute.xlu0 %1754  ;;  %4770 = vmatprep.mubr.f32.mxu1 %v15263_v0  ;;  %v13165_v0 = vld [vmem:[#allocation3 + $0x668] sm:$0xff] }
 0x340   : > { %15262 = vst [vmem:[#allocation57_spill] sm:$0xff] %v13132_v49  ;;  %v1743_v57 = vpop.permute.xlu1 %1742  ;;  %3754 = vmatprep.mubr.f32.mxu0 %v13124_v39  ;;  %v1787_v33 = vsel %vm532_vm1, %v1753_v27, %v13132_v49  ;;  %v15268_v49 = vld [vmem:[#allocation45_spill] sm:$0xff] }
 0x341   : > { %v1783_v59 = vsel %vm532_vm1, %v1743_v57, %v1745_v47  ;;  %1857 = vrot.lane.b32.xlu0 %v12497_v51, %s10737_s21  ;;  %v8795_v34 = vpack.c.bf16 %v1787_v33, %v1784_v50  ;;  %v13158_v50 = vld [vmem:[#allocation3 + $0x670] sm:$0xff] }
 0x342   : > { %1865 = vrot.lane.b32.xlu1 %v12513_v16, %s10737_s21  ;;  %4771 = vmatmul.mubr.f32.gmra.mrb[18].mxu1 %v12823_v12 }
 0x343   : > { %3755 = vmatmul.mubr.f32.gmra.mrb[54].mxu0 %v13136_v42  ;;  %v1751_v5 = vpop.permute.xlu0 %1750  ;;  %8796 = vmatprep.subr.bf16.mxu0 %v8795_v34 }
 0x344   : > { %v1761_v29 = vpop.permute.xlu1 %1760  ;;  %4776 = vmatprep.mubr.f32.mxu1 %v12835_v25  ;;  %v1786_v47 = vsel %vm532_vm1, %v1751_v5, %v1753_v27  ;;  %3760 = vmatprep.mubr.f32.mxu0 %v13145_v58  ;;  %v15265_v27 = vld [vmem:[#allocation33_spill] sm:$0xff] }
 0x345   : > { %1873 = vrot.lane.b32.xlu0 %v12516_v3, %s10737_s21  ;;  %v8797_v12 = vpack.c.bf16 %v1786_v47, %v1783_v59  ;;  %v13170_v59 = vld [vmem:[#allocation3 + $0x6a8] sm:$0xff]  ;;  %v15267_v5 = vld [vmem:[#allocation37_spill] sm:$0xff] }
 0x346   : > { %1881 = vrot.lane.b32.xlu1 %v15254_v45, %s10737_s21  ;;  %4777 = vmatmul.mubr.f32.gmra.mrb[20].mxu1 %v12849_v10  ;;  %v13182_v47 = vld [vmem:[#allocation3 + $0x6a0] sm:$0xff] }
 0x347   : > { %3761 = vmatmul.mubr.f32.gmra.mrb[56].mxu0 %v13150_v56  ;;  %v13162_v25 = vpop.permute.xlu0 %1762  ;;  %4782 = vmatprep.mubr.f32.mxu1 %v15265_v27 }
 0x348   : > { %15264 = vst [vmem:[#allocation52_spill] sm:$0xff] %v13162_v25  ;;  %v1769_v57 = vpop.permute.xlu1 %1768  ;;  %8798 = vmatpush1.bf16.msra.mxu0 %v8797_v12  ;;  %v1790_v33 = vsel %vm532_vm1, %v1761_v29, %v13162_v25  ;;  %3766 = vmatprep.mubr.f32.mxu0 %v13158_v50  ;;  %v13191_v25 = vld [vmem:[#allocation3 + $0x6e0] sm:$0xff] }
 0x349   : > { %1889 = vrot.lane.b32.xlu0 %v15255_v15, %s10737_s21 }
 0x34a   : > { %1897 = vrot.lane.b32.xlu1 %v15259_v32, %s10737_s21  ;;  %4783 = vmatmul.mubr.f32.gmra.mrb[22].mxu1 %v12875_v61 }
 0x34b   : > { %3767 = vmatmul.mubr.f32.gmra.mrb[58].mxu0 %v13165_v0  ;;  %v13178_v10 = vpop.permute.xlu0 %1770  ;;  %4788 = vmatprep.mubr.f32.mxu1 %v15267_v5 }
 0x34c   : > { %15266 = vst [vmem:[#allocation55_spill] sm:$0xff] %v13178_v10  ;;  %v1759_v34 = vpop.permute.xlu1 %1758  ;;  %3772 = vmatprep.mubr.f32.mxu0 %v13170_v59  ;;  %v1793_v12 = vsel %vm532_vm1, %v1769_v57, %v13178_v10  ;;  %v13196_v10 = vld [vmem:[#allocation3 + $0x6d8] sm:$0xff] }
 0x34d   : > { %v1789_v27 = vsel %vm532_vm1, %v1759_v34, %v1761_v29  ;;  %1905 = vrot.lane.b32.xlu0 %v15260_v21, %s10737_s21  ;;  %v8799_v61 = vpack.c.bf16 %v1793_v12, %v1790_v33  ;;  %v13204_v33 = vld [vmem:[#allocation3 + $0x718] sm:$0xff]  ;;  %s8147_s21 = scalar_lea.sflag [#allocation5], %s381_s30 }
 0x34e   : > { %1990 = vrot.lane.b32.xlu1 %v12497_v51, %s10738_s3  ;;  %4789 = vmatmul.mubr.f32.gmra.mrb[24].mxu1 %v15268_v49 }
 0x34f   : > { %3773 = vmatmul.mubr.f32.gmra.mrb[60].mxu0 %v13182_v47  ;;  %v1767_v5 = vpop.permute.xlu0 %1766  ;;  %8800 = vmatprep.subr.bf16.mxu0 %v8799_v61  ;;  %v13228_v61 = vld [vmem:[#allocation3 + $0x748] sm:$0xff] }
 0x350   : > { %v1854_v55 = vpop.permute.xlu1 %1853  ;;  %4794 = vmatprep.mubr.f32.mxu1 %v15269_v24  ;;  %v1792_v29 = vsel %vm532_vm1, %v1767_v5, %v1769_v57  ;;  %3778 = vmatprep.mubr.f32.mxu0 %v13191_v25  ;;  %v13211_v57 = vld [vmem:[#allocation3 + $0x710] sm:$0xff] }
 0x351   : > { %1998 = vrot.lane.b32.xlu0 %v12513_v16, %s10738_s3  ;;  %v8801_v49 = vpack.c.bf16 %v1792_v29, %v1789_v27  ;;  %v13216_v27 = vld [vmem:[#allocation3 + $0x750] sm:$0xff] }
 0x352   : > { %2006 = vrot.lane.b32.xlu1 %v12516_v3, %s10738_s3  ;;  %4795 = vmatmul.mubr.f32.gmra.mrb[26].mxu1 %v12921_v31 }
 0x353   : > { %3779 = vmatmul.mubr.f32.gmra.mrb[62].mxu0 %v13196_v10  ;;  %v13208_v24 = vpop.permute.xlu0 %1855  ;;  %4800 = vmatprep.mubr.f32.mxu1 %v12933_v6 }
 0x354   : > { %15270 = vst [vmem:[#allocation58_spill] sm:$0xff] %v13208_v24  ;;  %v1862_v34 = vpop.permute.xlu1 %1861  ;;  %8802 = vmatpush1.bf16.msra.mxu0 %v8801_v49  ;;  %v1908_v12 = vsel %vm666_vm2, %v1854_v55, %v13208_v24  ;;  %3784 = vmatprep.mubr.f32.mxu0 %v13204_v33  ;;  %v15272_v49 = vld [vmem:[#allocation31_spill] sm:$0xff] }
 0x355   : > { %2014 = vrot.lane.b32.xlu0 %v15254_v45, %s10738_s3 }
 0x356   : > { %2022 = vrot.lane.b32.xlu1 %v15255_v15, %s10738_s3  ;;  %4801 = vmatmul.mubr.f32.gmra.mrb[28].mxu1 %v12936_v4  ;;  %v15273_v4 = vld [vmem:[#allocation34_spill] sm:$0xff] }
 0x357   : > { %3785 = vmatmul.mubr.f32.gmra.mrb[64].mxu0 %v13211_v57  ;;  %v13224_v31 = vpop.permute.xlu0 %1863  ;;  %4806 = vmatprep.mubr.f32.mxu1 %v12947_v48 }
 0x358   : > { %15271 = vst [vmem:[#allocation26_spill] sm:$0xff] %v13224_v31  ;;  %v1852_v6 = vpop.permute.xlu1 %1851  ;;  %3790 = vmatprep.mubr.f32.mxu0 %v13216_v27  ;;  %v1911_v5 = vsel %vm666_vm2, %v1862_v34, %v13224_v31  ;;  %v13242_v31 = vld [vmem:[#allocation3 + $0x780] sm:$0xff] }
 0x359   : > { %v1907_v29 = vsel %vm666_vm2, %v1852_v6, %v1854_v55  ;;  %2026 = vrot.lane.b32.xlu0 %v15272_v49, %s10738_s3  ;;  %v8803_v24 = vpack.c.bf16 %v1911_v5, %v1908_v12  ;;  %15275 = vst [vmem:[#allocation60_spill] sm:$0xff] %v13242_v31  ;;  %v15276_v6 = vld [vmem:[#allocation41_spill] sm:$0xff]  ;;  %v15277_v12 = vld [vmem:[#allocation48_spill] sm:$0xff] }
 0x35a   : > { %2028 = vrot.lane.b32.xlu1 %v15273_v4, %s10738_s3  ;;  %4807 = vmatmul.mubr.f32.gmra.mrb[30].mxu1 %v12952_v52  ;;  %v13250_v5 = vld [vmem:[#allocation3 + $0x7c0] sm:$0xff] }
 0x35b   : > { %3791 = vmatmul.mubr.f32.gmra.mrb[66].mxu0 %v13228_v61  ;;  %v1860_v48 = vpop.permute.xlu0 %1859  ;;  %8804 = vmatprep.subr.bf16.mxu0 %v8803_v24  ;;  %15278 = vst [vmem:[#allocation25_spill] sm:$0xff] %v13250_v5 }
 0x35c   : > { %v1870_v62 = vpop.permute.xlu1 %1869  ;;  %4812 = vmatprep.mubr.f32.mxu1 %v12957_v22  ;;  %v1910_v55 = vsel %vm666_vm2, %v1860_v48, %v1862_v34  ;;  %3796 = vmatprep.mubr.f32.mxu0 %v13237_v44  ;;  %v13257_v34 = vld [vmem:[#allocation3 + $0x7b8] sm:$0xff] }
 0x35d   : > { %2034 = vrot.lane.b32.xlu0 %v15276_v6, %s10738_s3  ;;  %v8805_v52 = vpack.c.bf16 %v1910_v55, %v1907_v29  ;;  %15280 = vst [vmem:[#allocation47_spill] sm:$0xff] %v13257_v34  ;;  %v13262_v29 = vld [vmem:[#allocation3 + $0x28] sm:$0xff] }
 0x35e   : > { %2036 = vrot.lane.b32.xlu1 %v15277_v12, %s10738_s3  ;;  %4813 = vmatmul.mubr.f32.gmra.mrb[32].mxu1 %v12969_v40  ;;  %15281 = vst [vmem:[#allocation51_spill] sm:$0xff] %v13262_v29  ;;  %v15282_v55 = vld [vmem:[#allocation38_spill] sm:$0xff]  ;;  %v15283_v40 = vld [vmem:[#allocation32_spill] sm:$0xff] }
 0x35f   : > { %3797 = vmatmul.mubr.f32.gmra.mrb[68].mxu0 %v13242_v31  ;;  %v13254_v22 = vpop.permute.xlu0 %1871  ;;  %4818 = vmatprep.mubr.f32.mxu1 %v12979_v11  ;;  %v10432_v31 = vld [vmem:[#allocation2 + $0x8c8] sm:$0xff] }
 0x360   : > { %15279 = vst [vmem:[#allocation27_spill] sm:$0xff] %v13254_v22  ;;  %v1878_v24 = vpop.permute.xlu1 %1877  ;;  %8806 = vmatpush1.bf16.msra.mxu0 %v8805_v52  ;;  %v1914_v48 = vsel %vm666_vm2, %v1870_v62, %v13254_v22  ;;  %3802 = vmatprep.mubr.f32.mxu0 %v13250_v5 }
 0x361   : > { %2024 = vrot.lane.b32.xlu0 %v15282_v55, %s10738_s3 }
 0x362   : > { %2032 = vrot.lane.b32.xlu1 %v15283_v40, %s10738_s3  ;;  %4819 = vmatmul.mubr.f32.gmra.mrb[34].mxu1 %v12982_v38 }
 0x363   : > { %3803 = vmatmul.mubr.f32.gmra.mrb[70].mxu0 %v13257_v34  ;;  %v13270_v11 = vpop.permute.xlu0 %1879  ;;  %4824 = vmatprep.mubr.f32.mxu1 %v12993_v35 }
 0x364   : > { %v1868_v52 = vpop.permute.xlu1 %1867  ;;  %3873 = vmatprep.mubr.f32.mxu0 %v13262_v29  ;;  %v1917_v22 = vsel %vm666_vm2, %v1878_v24, %v13270_v11  ;;  %v10434_v29 = vld [vmem:[#allocation2 + $0x8e8] sm:$0xff] }
 0x365   : > { %v1913_v5 = vsel %vm666_vm2, %v1868_v52, %v1870_v62  ;;  %2119 = vrot.lane.b32.xlu0 %v10432_v31, %s10739_s4  ;;  %v8807_v38 = vpack.c.bf16 %v1917_v22, %v1914_v48  ;;  %v10435_v62 = vld [vmem:[#allocation2 + $0x8f0] sm:$0xff]  ;;  %v10438_v48 = vld [vmem:[#allocation2 + $0x908] sm:$0xff] }
 0x366   : > { %2121 = vrot.lane.b32.xlu1 %v10433_v54, %s10739_s4  ;;  %4825 = vmatmul.mubr.f32.gmra.mrb[36].mxu1 %v12998_v41 }
 0x367   : > { %v1876_v34 = vpop.permute.xlu0 %1875  ;;  %8808 = vmatprep.subr.bf16.mxu0 %v8807_v38  ;;  %4830 = vmatprep.mubr.f32.mxu1 %v13003_v30  ;;  %v10436_v30 = vld [vmem:[#allocation2 + $0x8c0] sm:$0xff] }
 0x368   : > { %v1886_v44 = vpop.permute.xlu1 %1885  ;;  %v1916_v35 = vsel %vm666_vm2, %v1876_v34, %v1878_v24  ;;  %v10437_v24 = vld [vmem:[#allocation2 + $0x8e0] sm:$0xff] }
 0x369   : > { %2127 = vrot.lane.b32.xlu0 %v10434_v29, %s10739_s4  ;;  %v8809_v31 = vpack.c.bf16 %v1916_v35, %v1913_v5  ;;  %v10439_v29 = vld [vmem:[#allocation2 + $0x910] sm:$0xff]  ;;  %v10440_v35 = vld [vmem:[#allocation2 + $0x928] sm:$0xff] }
 0x36a   : > { %2129 = vrot.lane.b32.xlu1 %v10435_v62, %s10739_s4  ;;  %4831 = vmatmul.mubr.f32.gmra.mrb[38].mxu1 %v13015_v36 }
 0x36b   : > { %v13285_v54 = vpop.permute.xlu0 %1887  ;;  %8810 = vmatpush1.bf16.msra.mxu0 %v8809_v31  ;;  %4836 = vmatprep.mubr.f32.mxu1 %v13023_v43 }
 0x36c   : > { %v1894_v22 = vpop.permute.xlu1 %1893  ;;  %v1920_v41 = vsel %vm666_vm2, %v1886_v44, %v13285_v54 }
 0x36d   : > { %2117 = vrot.lane.b32.xlu0 %v10436_v30, %s10739_s4 }
 0x36e   : > { %2125 = vrot.lane.b32.xlu1 %v10437_v24, %s10739_s4  ;;  %4837 = vmatmul.mubr.f32.gmra.mrb[40].mxu1 %v13028_v60  ;;  %v10443_v24 = vld [vmem:[#allocation2 + $0x948] sm:$0xff] }
 0x36f   : > { %v13293_v5 = vpop.permute.xlu0 %1895  ;;  %4842 = vmatprep.mubr.f32.mxu1 %v13037_v19 }
 0x370   : > { %v1884_v36 = vpop.permute.xlu1 %1883  ;;  %v1923_v34 = vsel %vm666_vm2, %v1894_v22, %v13293_v5 }
 0x371   : > { %v1919_v43 = vsel %vm666_vm2, %v1884_v36, %v1886_v44  ;;  %2135 = vrot.lane.b32.xlu0 %v10438_v48, %s10739_s4  ;;  %v8811_v52 = vpack.c.bf16 %v1923_v34, %v1920_v41  ;;  %v10441_v44 = vld [vmem:[#allocation2 + $0x930] sm:$0xff] }
 0x372   : > { %2137 = vrot.lane.b32.xlu1 %v10439_v29, %s10739_s4  ;;  %4843 = vmatmul.mubr.f32.gmra.mrb[42].mxu1 %v13044_v18  ;;  %v15284_v29 = vld [vmem:[#allocation42_spill] sm:$0xff] }
 0x373   : > { %v1892_v60 = vpop.permute.xlu0 %1891  ;;  %8812 = vmatprep.subr.bf16.mxu0 %v8811_v52  ;;  %4848 = vmatprep.mubr.f32.mxu1 %v13053_v14  ;;  %v10442_v14 = vld [vmem:[#allocation2 + $0x900] sm:$0xff] }
 0x374   : > { %v1902_v38 = vpop.permute.xlu1 %1901  ;;  %v1922_v19 = vsel %vm666_vm2, %v1892_v60, %v1894_v22  ;;  %v15285_v60 = vld [vmem:[#allocation49_spill] sm:$0xff] }
 0x375   : > { %2143 = vrot.lane.b32.xlu0 %v10440_v35, %s10739_s4  ;;  %v8813_v62 = vpack.c.bf16 %v1922_v19, %v1919_v43  ;;  %v13410_v19 = vld [vmem:[#allocation3 + $0x58] sm:$0xff] }
 0x376   : > { %2145 = vrot.lane.b32.xlu1 %v10441_v44, %s10739_s4  ;;  %4849 = vmatmul.mubr.f32.gmra.mrb[44].mxu1 %v13058_v63 }
 0x377   : > { %v13307_v31 = vpop.permute.xlu0 %1903  ;;  %8814 = vmatpush1.bf16.msra.mxu0 %v8813_v62  ;;  %4854 = vmatprep.mubr.f32.mxu1 %v13066_v17  ;;  %v15286_v62 = vld [vmem:[#allocation59_spill] sm:$0xff] }
 0x378   : > { %v1987_v41 = vpop.permute.xlu1 %1986  ;;  %v1926_v18 = vsel %vm666_vm2, %v1902_v38, %v13307_v31 }
 0x379   : > { %2133 = vrot.lane.b32.xlu0 %v10442_v14, %s10739_s4 }
 0x37a   : > { %2141 = vrot.lane.b32.xlu1 %v12811_v2, %s10739_s4  ;;  %4855 = vmatmul.mubr.f32.gmra.mrb[46].mxu1 %v13073_v13 }
 0x37b   : > { %v13316_v22 = vpop.permute.xlu0 %1988  ;;  %4860 = vmatprep.mubr.f32.mxu1 %v13082_v9 }
 0x37c   : > { %v1900_v63 = vpop.permute.xlu1 %1899  ;;  %v2041_v30 = vsel %vm800_vm3, %v1987_v41, %v13316_v22 }
 0x37d   : > { %v1925_v17 = vsel %vm666_vm2, %v1900_v63, %v1902_v38  ;;  %2151 = vrot.lane.b32.xlu0 %v10443_v24, %s10739_s4  ;;  %v8815_v36 = vpack.c.bf16 %v2041_v30, %v1926_v18  ;;  %v15288_v18 = vld [vmem:[#allocation54_spill] sm:$0xff]  ;;  %v13437_v63 = vld [vmem:[#allocation3 + $0xd0] sm:$0xff] }
 0x37e   : > { %2153 = vrot.lane.b32.xlu1 %v12837_v26, %s10739_s4  ;;  %4861 = vmatmul.mubr.f32.gmra.mrb[48].mxu1 %v13089_v53 }
 0x37f   : > { %v1985_v2 = vpop.permute.xlu0 %1984  ;;  %8816 = vmatprep.subr.bf16.mxu0 %v8815_v36  ;;  %4866 = vmatprep.mubr.f32.mxu1 %v13099_v8 }
 0x380   : > { %v1995_v13 = vpop.permute.xlu1 %1994  ;;  %v2040_v9 = vsel %vm800_vm3, %v1985_v2, %v1987_v41 }
 0x381   : > { %2159 = vrot.lane.b32.xlu0 %v15272_v49, %s10739_s4  ;;  %v8817_v34 = vpack.c.bf16 %v2040_v9, %v1925_v17  ;;  %v15289_v9 = vld [vmem:[#allocation36_spill] sm:$0xff] }
 0x382   : > { %2161 = vrot.lane.b32.xlu1 %v15273_v4, %s10739_s4  ;;  %4867 = vmatmul.mubr.f32.gmra.mrb[50].mxu1 %v13104_v23 }
 0x383   : > { %v13333_v26 = vpop.permute.xlu0 %1996  ;;  %8818 = vmatpush1.bf16.msra.mxu0 %v8817_v34  ;;  %4872 = vmatprep.mubr.f32.mxu1 %v13112_v28 }
 0x384   : > { %v2003_v43 = vpop.permute.xlu1 %2002  ;;  %v2044_v53 = vsel %vm800_vm3, %v1995_v13, %v13333_v26 }
 0x385   : > { %2149 = vrot.lane.b32.xlu0 %v12867_v46, %s10739_s4 }
 0x386   : > { %2157 = vrot.lane.b32.xlu1 %v15282_v55, %s10739_s4  ;;  %4873 = vmatmul.mubr.f32.gmra.mrb[52].mxu1 %v13119_v7 }
 0x387   : > { %v13343_v8 = vpop.permute.xlu0 %2004  ;;  %4878 = vmatprep.mubr.f32.mxu1 %v13124_v39 }
 0x388   : > { %v1993_v23 = vpop.permute.xlu1 %1992  ;;  %v2047_v49 = vsel %vm800_vm3, %v2003_v43, %v13343_v8 }
 0x389   : > { %v2043_v28 = vsel %vm800_vm3, %v1993_v23, %v1995_v13  ;;  %2167 = vrot.lane.b32.xlu0 %v15276_v6, %s10739_s4  ;;  %v8819_v46 = vpack.c.bf16 %v2047_v49, %v2044_v53  ;;  %v13441_v13 = vld [vmem:[#allocation3 + $0xc8] sm:$0xff] }
 0x38a   : > { %2169 = vrot.lane.b32.xlu1 %v15277_v12, %s10739_s4  ;;  %4879 = vmatmul.mubr.f32.gmra.mrb[54].mxu1 %v13136_v42  ;;  %v13453_v49 = vld [vmem:[#allocation3 + $0x108] sm:$0xff] }
 0x38b   : > { %v2001_v7 = vpop.permute.xlu0 %2000  ;;  %8820 = vmatprep.subr.bf16.mxu0 %v8819_v46  ;;  %4884 = vmatprep.mubr.f32.mxu1 %v13145_v58 }
 0x38c   : > { %v2011_v4 = vpop.permute.xlu1 %2010  ;;  %v2046_v39 = vsel %vm800_vm3, %v2001_v7, %v2003_v43  ;;  %v15290_v43 = vld [vmem:[#allocation44_spill] sm:$0xff] }
 0x38d   : > { %2165 = vrot.lane.b32.xlu0 %v15283_v40, %s10739_s4  ;;  %v8821_v6 = vpack.c.bf16 %v2046_v39, %v2043_v28  ;;  %v15291_v28 = vld [vmem:[#allocation60_spill] sm:$0xff] }
 0x38e   : > { %2030 = vrot.lane.b32.xlu1 %v15259_v32, %s10738_s3  ;;  %4885 = vmatmul.mubr.f32.gmra.mrb[56].mxu1 %v13150_v56  ;;  %v2789_v39 = vld [vmem:[#allocation2 + $0x8f8] sm:$0xff] }
 0x38f   : > { %v13361_v12 = vpop.permute.xlu0 %2012  ;;  %8822 = vmatpush1.bf16.msra.mxu0 %v8821_v6  ;;  %4890 = vmatprep.mubr.f32.mxu1 %v13158_v50  ;;  %v15292_v6 = vld [vmem:[#allocation25_spill] sm:$0xff] }
 0x390   : > { %v2019_v55 = vpop.permute.xlu1 %2018  ;;  %v2050_v42 = vsel %vm800_vm3, %v2011_v4, %v13361_v12 }
 0x391   : > { %2038 = vrot.lane.b32.xlu0 %v15260_v21, %s10738_s3 }
 0x392   : > { %2123 = vrot.lane.b32.xlu1 %v12497_v51, %s10739_s4  ;;  %4891 = vmatmul.mubr.f32.gmra.mrb[58].mxu1 %v13165_v0 }
 0x393   : > { %v13371_v58 = vpop.permute.xlu0 %2020  ;;  %4896 = vmatprep.mubr.f32.mxu1 %v13170_v59 }
 0x394   : > { %v2009_v56 = vpop.permute.xlu1 %2008  ;;  %v2053_v40 = vsel %vm800_vm3, %v2019_v55, %v13371_v58 }
 0x395   : > { %v2049_v50 = vsel %vm800_vm3, %v2009_v56, %v2011_v4  ;;  %2131 = vrot.lane.b32.xlu0 %v12513_v16, %s10739_s4  ;;  %v8823_v48 = vpack.c.bf16 %v2053_v40, %v2050_v42  ;;  %v2785_v4 = vld [vmem:[#allocation2 + $0x8d8] sm:$0xff]  ;;  %v13459_v40 = vld [vmem:[#allocation3 + $0x100] sm:$0xff] }
 0x396   : > { %2139 = vrot.lane.b32.xlu1 %v12516_v3, %s10739_s4  ;;  %4897 = vmatmul.mubr.f32.gmra.mrb[60].mxu1 %v13182_v47 }
 0x397   : > { %v2017_v51 = vpop.permute.xlu0 %2016  ;;  %8824 = vmatprep.subr.bf16.mxu0 %v8823_v48  ;;  %4902 = vmatprep.mubr.f32.mxu1 %v13191_v25  ;;  %v13392_v25 = vld [vmem:[#allocation3 + $0x20] sm:$0xff] }
 0x398   : > { %v1513_v0 = vpop.permute.xlu1 %1512  ;;  %v2052_v59 = vsel %vm800_vm3, %v2017_v51, %v2019_v55  ;;  %v15294_v51 = vld [vmem:[#allocation57_spill] sm:$0xff] }
 0x399   : > { %v1559_v52 = vsel %vm934_vm4, %v15284_v29, %v1513_v0  ;;  %1610 = vst.msk [vmem:[#allocation2 + $0x818] sm:$0xff] %vm422_vm0, %v1513_v0  ;;  %2147 = vrot.lane.b32.xlu0 %v15254_v45, %s10739_s4  ;;  %v8825_v16 = vpack.c.bf16 %v2052_v59, %v2049_v50  ;;  %v15293_v50 = vld [vmem:[#allocation56_spill] sm:$0xff]  ;;  %v8983_v29 = vpack.c.bf16 %v2789_v39, %v2785_v4  ;;  %v2800_v4 = vld [vmem:[#allocation2 + $0x950] sm:$0xff] }
 0x39a   : > { %2155 = vrot.lane.b32.xlu1 %v15255_v15, %s10739_s4  ;;  %4903 = vmatmul.mubr.f32.gmra.mrb[62].mxu1 %v13196_v10  ;;  %v13401_v15 = vld [vmem:[#allocation3 + $0x60] sm:$0xff]  ;;  %v2804_v39 = vld [vmem:[#allocation2 + $0x970] sm:$0xff] }
 0x39b   : > { %v1521_v3 = vpop.permute.xlu0 %1520  ;;  %8826 = vmatpush1.bf16.msra.mxu0 %v8825_v16  ;;  %4908 = vmatprep.mubr.f32.mxu1 %v13204_v33  ;;  %v2788_v16 = vld [vmem:[#allocation2 + $0x8f0] sm:$0xff] }
 0x39c   : > { %v1529_v47 = vpop.permute.xlu1 %1528  ;;  %v1562_v38 = vsel %vm934_vm4, %v15285_v60, %v1521_v3  ;;  %1614 = vst.msk [vmem:[#allocation2 + $0x838] sm:$0xff] %vm422_vm0, %v1521_v3  ;;  %v13471_v3 = vld [vmem:[#allocation3 + $0x140] sm:$0xff] }
 0x39d   : > { %v1565_v45 = vsel %vm934_vm4, %v12950_v37, %v1529_v47  ;;  %1618 = vst.msk [vmem:[#allocation2 + $0x858] sm:$0xff] %vm422_vm0, %v1529_v47  ;;  %2163 = vrot.lane.b32.xlu0 %v15259_v32, %s10739_s4  ;;  %v8973_v30 = vpack.c.bf16 %v1562_v38, %v1559_v52  ;;  %v2784_v52 = vld [vmem:[#allocation2 + $0x8d0] sm:$0xff]  ;;  %v2793_v38 = vld [vmem:[#allocation2 + $0x918] sm:$0xff] }
 0x39e   : > { %2171 = vrot.lane.b32.xlu1 %v15260_v21, %s10739_s4  ;;  %3874 = vmatmul.mubr.f32.vlgmr.msra.gmra.mrb[0].mxu0 %v13392_v25  ;;  %v13421_v21 = vld [vmem:[#allocation3 + $0x98] sm:$0xff]  ;;  %v15295_v47 = vld [vmem:[#allocation47_spill] sm:$0xff] }
 0x39f   : > { %4909 = vmatmul.mubr.f32.gmra.mrb[64].mxu1 %v13211_v57  ;;  %v1537_v10 = vpop.permute.xlu0 %1536  ;;  %3879 = vmatprep.mubr.f32.mxu0 %v13401_v15 }
 0x3a0   : > { %v1545_v33 = vpop.permute.xlu1 %1544  ;;  %4914 = vmatprep.mubr.f32.mxu1 %v13216_v27  ;;  %v1568_v37 = vsel %vm934_vm4, %v12966_v20, %v1537_v10  ;;  %1622 = vst.msk [vmem:[#allocation2 + $0x878] sm:$0xff] %vm422_vm0, %v1537_v10  ;;  %v2761_v57 = vld [vmem:[#allocation2 + $0x818] sm:$0xff]  ;;  %v13426_v20 = vld [vmem:[#allocation3 + $0x90] sm:$0xff] }
 0x3a1   : > { %v13418_v32 = vsel %vm934_vm4, %v12996_v1, %v1545_v33  ;;  %1626 = vst.msk [vmem:[#allocation2 + $0x898] sm:$0xff] %vm422_vm0, %v1545_v33  ;;  %v15287_v1 = vld [vmem:[#allocation53_spill] sm:$0xff]  ;;  %v8977_v46 = vpack.c.bf16 %v1568_v37, %v1565_v45  ;;  %v2797_v45 = vld [vmem:[#allocation2 + $0x938] sm:$0xff]  ;;  %v15296_v10 = vld [vmem:[#allocation51_spill] sm:$0xff] }
 0x3a2   : > { %3880 = vmatmul.mubr.f32.gmra.mrb[2].mxu0 %v13410_v19 }
 0x3a3   : > { %4915 = vmatmul.mubr.f32.gmra.mrb[66].mxu1 %v13228_v61  ;;  %v1553_v35 = vpop.permute.xlu0 %1552  ;;  %v2765_v44 = vld [vmem:[#allocation2 + $0x838] sm:$0xff]  ;;  %3885 = vmatprep.mubr.f32.mxu0 %v13421_v21 }
 0x3a4   : > { %v1725_v27 = vpop.permute.xlu1 %1724  ;;  %4920 = vmatprep.mubr.f32.mxu1 %v15286_v62  ;;  %v1574_v41 = vsel %vm934_vm4, %v15287_v1, %v1553_v35  ;;  %1630 = vst.msk [vmem:[#allocation2 + $0x8b8] sm:$0xff] %vm422_vm0, %v1553_v35  ;;  %v8971_v61 = vpack.c.bf16 %v2765_v44, %v2761_v57  ;;  %v2769_v17 = vld [vmem:[#allocation2 + $0x858] sm:$0xff]  ;;  %v8985_v57 = vpack.c.bf16 %v2788_v16, %v2784_v52 }
 0x3a5   : > { %v13434_v14 = vsel %vm532_vm1, %v15288_v18, %v1725_v27  ;;  %1826 = vst.msk [vmem:[#allocation2 + $0x9b8] sm:$0xff] %vm422_vm0, %v1725_v27  ;;  %v8981_v60 = vpack.c.bf16 %v1574_v41, %v13418_v32  ;;  %v13478_v35 = vld [vmem:[#allocation3 + $0x138] sm:$0xff]  ;;  %v15298_v32 = vld [vmem:[#allocation55_spill] sm:$0xff]  ;;  %v8987_v1 = vpack.c.bf16 %v2797_v45, %v2793_v38 }
 0x3a6   : > { %8972 = vmatprep.subr.bf16.mxu1 %v8971_v61  ;;  %3886 = vmatmul.mubr.f32.gmra.mrb[4].mxu0 %v13426_v20  ;;  %v15297_v27 = vld [vmem:[#allocation52_spill] sm:$0xff]  ;;  %v2792_v41 = vld [vmem:[#allocation2 + $0x910] sm:$0xff] }
 0x3a7   : > { %v1733_v24 = vpop.permute.xlu0 %1732  ;;  %8974 = vmatpush1.bf16.msra.mxu1 %v8973_v30  ;;  %v2773_v2 = vld [vmem:[#allocation2 + $0x878] sm:$0xff]  ;;  %3891 = vmatprep.mubr.f32.mxu0 %v13437_v63  ;;  %v2796_v18 = vld [vmem:[#allocation2 + $0x930] sm:$0xff] }
 0x3a8   : > { %v1741_v36 = vpop.permute.xlu1 %1740  ;;  %v13445_v34 = vsel %vm532_vm1, %v15289_v9, %v1733_v24  ;;  %1830 = vst.msk [vmem:[#allocation2 + $0x9d8] sm:$0xff] %vm422_vm0, %v1733_v24  ;;  %v8975_v23 = vpack.c.bf16 %v2773_v2, %v2769_v17  ;;  %4921 = vmatmul.mubr.f32.gmra.mrb[68].mxu1 %v15291_v28  ;;  %v2777_v7 = vld [vmem:[#allocation2 + $0x898] sm:$0xff]  ;;  %v8989_v2 = vpack.c.bf16 %v2796_v18, %v2792_v41  ;;  %v13494_v9 = vld [vmem:[#allocation3 + $0x170] sm:$0xff]  ;;  %v15300_v28 = vld [vmem:[#allocation26_spill] sm:$0xff] }
 0x3a9   : > { %v13450_v53 = vsel %vm532_vm1, %v15290_v43, %v1741_v36  ;;  %1834 = vst.msk [vmem:[#allocation2 + $0x9f8] sm:$0xff] %vm422_vm0, %v1741_v36  ;;  %4926 = vmatprep.mubr.f32.mxu1 %v15292_v6  ;;  %v13490_v61 = vld [vmem:[#allocation3 + $0x178] sm:$0xff]  ;;  %v15299_v43 = vld [vmem:[#allocation58_spill] sm:$0xff]  ;;  %v13506_v6 = vld [vmem:[#allocation3 + $0x1b0] sm:$0xff] }
 0x3aa   : > { %8976 = vmatprep.subr.bf16.mxu1 %v8975_v23  ;;  %3892 = vmatmul.mubr.f32.gmra.mrb[6].mxu0 %v13441_v13  ;;  %v2801_v30 = vld [vmem:[#allocation2 + $0x958] sm:$0xff] }
 0x3ab   : > { %v1749_v55 = vpop.permute.xlu0 %1748  ;;  %8978 = vmatpush1.bf16.msra.mxu1 %v8977_v46  ;;  %v2781_v56 = vld [vmem:[#allocation2 + $0x8b8] sm:$0xff]  ;;  %3897 = vmatprep.mubr.f32.mxu0 %v13453_v49 }
 0x3ac   : > { %v1757_v42 = vpop.permute.xlu1 %1756  ;;  %v13463_v48 = vsel %vm532_vm1, %v15293_v50, %v1749_v55  ;;  %1838 = vst.msk [vmem:[#allocation2 + $0xa18] sm:$0xff] %vm422_vm0, %v1749_v55  ;;  %v8979_v59 = vpack.c.bf16 %v2781_v56, %v2777_v7  ;;  %4927 = vmatmul.mubr.f32.gmra.mrb[70].mxu1 %v15295_v47  ;;  %v2805_v17 = vld [vmem:[#allocation2 + $0x978] sm:$0xff] }
 0x3ad   : > { %v13468_v0 = vsel %vm532_vm1, %v15294_v51, %v1757_v42  ;;  %1842 = vst.msk [vmem:[#allocation2 + $0xa38] sm:$0xff] %vm422_vm0, %v1757_v42  ;;  %4997 = vmatprep.mubr.f32.mxu1 %v15296_v10  ;;  %v8991_v7 = vpack.c.bf16 %v2805_v17, %v2801_v30  ;;  %v2809_v55 = vld [vmem:[#allocation2 + $0x998] sm:$0xff]  ;;  %v8993_v51 = vpack.c.bf16 %v2804_v39, %v2800_v4  ;;  %v2808_v10 = vld [vmem:[#allocation2 + $0x990] sm:$0xff] }
 0x3ae   : > { %8980 = vmatprep.subr.bf16.mxu1 %v8979_v59  ;;  %3898 = vmatmul.mubr.f32.gmra.mrb[8].mxu0 %v13459_v40  ;;  %v2813_v42 = vld [vmem:[#allocation2 + $0x9b8] sm:$0xff]  ;;  %v13510_v59 = vld [vmem:[#allocation3 + $0x1a8] sm:$0xff]  ;;  %v8997_v41 = vpack.c.bf16 %v13434_v14, %v2808_v10 }
 0x3af   : > { %v1765_v33 = vpop.permute.xlu0 %1764  ;;  %8982 = vmatpush1.bf16.msra.mxu1 %v8981_v60  ;;  %3903 = vmatprep.mubr.f32.mxu0 %v13471_v3  ;;  %v8995_v47 = vpack.c.bf16 %v2813_v42, %v2809_v55  ;;  %v13522_v60 = vld [vmem:[#allocation3 + $0x1e8] sm:$0xff]  ;;  %v2817_v38 = vld [vmem:[#allocation2 + $0x9d8] sm:$0xff]  ;;  %v13564_v55 = vld [vmem:[#allocation3 + $0x250] sm:$0xff] }
 0x3b0   : > { %v1773_v37 = vpop.permute.xlu1 %1772  ;;  %v13482_v44 = vsel %vm532_vm1, %v15297_v27, %v1765_v33  ;;  %1846 = vst.msk [vmem:[#allocation2 + $0xa58] sm:$0xff] %vm422_vm0, %v1765_v33  ;;  %8984 = vmatprep.subr.bf16.mxu1 %v8983_v29  ;;  %v15301_v29 = vld [vmem:[#allocation27_spill] sm:$0xff]  ;;  %v2821_v45 = vld [vmem:[#allocation2 + $0x9f8] sm:$0xff] }
 0x3b1   : > { %v13487_v62 = vsel %vm532_vm1, %v15298_v32, %v1773_v37  ;;  %1850 = vst.msk [vmem:[#allocation2 + $0xa78] sm:$0xff] %vm422_vm0, %v1773_v37  ;;  %v8999_v32 = vpack.c.bf16 %v2821_v45, %v2817_v38  ;;  %v13588_v45 = vld [vmem:[#allocation3 + $0x288] sm:$0xff] }
 0x3b2   : > { %3904 = vmatmul.mubr.f32.gmra.mrb[10].mxu0 %v13478_v35 }
 0x3b3   : > { %v1858_v24 = vpop.permute.xlu0 %1857  ;;  %8986 = vmatpush1.bf16.msra.mxu1 %v8985_v57  ;;  %3909 = vmatprep.mubr.f32.mxu0 %v13490_v61  ;;  %v13526_v57 = vld [vmem:[#allocation3 + $0x1e0] sm:$0xff]  ;;  %v2825_v18 = vld [vmem:[#allocation2 + $0xa18] sm:$0xff] }
 0x3b4   : > { %v1866_v36 = vpop.permute.xlu1 %1865  ;;  %v13498_v23 = vsel %vm666_vm2, %v15299_v43, %v1858_v24  ;;  %1959 = vst.msk [vmem:[#allocation2 + $0xa98] sm:$0xff] %vm422_vm0, %v1858_v24  ;;  %8988 = vmatprep.subr.bf16.mxu1 %v8987_v1  ;;  %v13538_v1 = vld [vmem:[#allocation3 + $0x220] sm:$0xff]  ;;  %v2829_v30 = vld [vmem:[#allocation2 + $0xa38] sm:$0xff]  ;;  %v10740_v43 = vmov 0  }
 0x3b5   : > { %v13503_v46 = vsel %vm666_vm2, %v15300_v28, %v1866_v36  ;;  %1963 = vst.msk [vmem:[#allocation2 + $0xab8] sm:$0xff] %vm422_vm0, %v1866_v36  ;;  %v13543_v24 = vld [vmem:[#allocation3 + $0x218] sm:$0xff]  ;;  %v9003_v36 = vpack.c.bf16 %v2829_v30, %v2825_v18  ;;  %10388 = vset.pattern.permute.xlu0 %v10740_v43  ;;  %v2922_v28 = vld [vmem:[%s15302_s0] sm:$0xff]  ;;  %10389 = vset.pattern.permute.xlu1 %v10740_v43 }
 0x3b6   : > { %3910 = vmatmul.mubr.f32.gmra.mrb[12].mxu0 %v13494_v9  ;;  %2960 = vperm.xlu0 %10388, %v2922_v28   ;;  %v2926_v43 = vld [vmem:[%s15302_s0 + $0x20] sm:$0xff]  ;;  %v9013_v28 = vpack.c.bf16 %v13503_v46, %v13498_v23  ;;  %v13636_v23 = vld [vmem:[#allocation3 + $0x338] sm:$0xff]  ;;  %v2931_v46 = vld [vmem:[%s15302_s0 + $0x48] sm:$0xff] }
 0x3b7   : > { %v1874_v56 = vpop.permute.xlu0 %1873  ;;  %8990 = vmatpush1.bf16.msra.mxu1 %v8989_v2  ;;  %3915 = vmatprep.mubr.f32.mxu0 %v13506_v6  ;;  %v13555_v2 = vld [vmem:[#allocation3 + $0x258] sm:$0xff] }
 0x3b8   : > { %v1882_v50 = vpop.permute.xlu1 %1881  ;;  %v13514_v52 = vsel %vm666_vm2, %v15301_v29, %v1874_v56  ;;  %1967 = vst.msk [vmem:[#allocation2 + $0xad8] sm:$0xff] %vm422_vm0, %v1874_v56  ;;  %8992 = vmatprep.subr.bf16.mxu1 %v8991_v7  ;;  %v2833_v7 = vld [vmem:[#allocation2 + $0xa58] sm:$0xff]  ;;  %v13576_v56 = vld [vmem:[#allocation3 + $0x290] sm:$0xff] }
 0x3b9   : > { %v13519_v16 = vsel %vm666_vm2, %v13270_v11, %v1882_v50  ;;  %1971 = vst.msk [vmem:[#allocation2 + $0xaf8] sm:$0xff] %vm422_vm0, %v1882_v50  ;;  %v2837_v4 = vld [vmem:[#allocation2 + $0xa78] sm:$0xff] }
 0x3ba   : > { %3916 = vmatmul.mubr.f32.gmra.mrb[14].mxu0 %v13510_v59  ;;  %v2925_v50 = vld [vmem:[%s15302_s0 + $0x18] sm:$0xff] }
 0x3bb   : > { %v1890_v33 = vpop.permute.xlu0 %1889  ;;  %8994 = vmatpush1.bf16.msra.mxu1 %v8993_v51  ;;  %3921 = vmatprep.mubr.f32.mxu0 %v13522_v60  ;;  %v9005_v51 = vpack.c.bf16 %v13468_v0, %v13463_v48  ;;  %v2841_v29 = vld [vmem:[#allocation2 + $0xa98] sm:$0xff] }
 0x3bc   : > { %v1898_v37 = vpop.permute.xlu1 %1897  ;;  %v13530_v11 = vsel %vm666_vm2, %v13285_v54, %v1890_v33  ;;  %1975 = vst.msk [vmem:[#allocation2 + $0xb18] sm:$0xff] %vm422_vm0, %v1890_v33  ;;  %8996 = vmatprep.subr.bf16.mxu1 %v8995_v47  ;;  %2975 = vperm.xlu0 %10388, %v2925_v50   ;;  %v13600_v33 = vld [vmem:[#allocation3 + $0x2c8] sm:$0xff] }
 0x3bd   : > { %v13535_v27 = vsel %vm666_vm2, %v13293_v5, %v1898_v37  ;;  %1979 = vst.msk [vmem:[#allocation2 + $0xb38] sm:$0xff] %vm422_vm0, %v1898_v37  ;;  %v2927_v37 = vld [vmem:[%s15302_s0 + $0x28] sm:$0xff] }
 0x3be   : > { %3922 = vmatmul.mubr.f32.gmra.mrb[16].mxu0 %v13526_v57 }
 0x3bf   : > { %v1906_v54 = vpop.permute.xlu0 %1905  ;;  %8998 = vmatpush1.bf16.msra.mxu1 %v8997_v41  ;;  %3927 = vmatprep.mubr.f32.mxu0 %v13538_v1  ;;  %v2849_v41 = vld [vmem:[#allocation2 + $0xad8] sm:$0xff] }
 0x3c0   : > { %v1991_v17 = vpop.permute.xlu1 %1990  ;;  %v13547_v5 = vsel %vm666_vm2, %v13307_v31, %v1906_v54  ;;  %1983 = vst.msk [vmem:[#allocation2 + $0xb58] sm:$0xff] %vm422_vm0, %v1906_v54  ;;  %9000 = vmatprep.subr.bf16.mxu1 %v8999_v32  ;;  %v9001_v31 = vpack.c.bf16 %v13450_v53, %v13445_v34  ;;  %v9007_v53 = vpack.c.bf16 %v2837_v4, %v2833_v7  ;;  %v13614_v54 = vld [vmem:[#allocation3 + $0x2c0] sm:$0xff] }
 0x3c1   : > { %v13552_v14 = vsel %vm800_vm3, %v13316_v22, %v1991_v17  ;;  %2092 = vst.msk [vmem:[#allocation2 + $0xb78] sm:$0xff] %vm422_vm0, %v1991_v17  ;;  %v9009_v32 = vpack.c.bf16 %v13487_v62, %v13482_v44  ;;  %2985 = vperm.xlu0 %10388, %v2927_v37   ;;  %v13618_v44 = vld [vmem:[#allocation3 + $0x300] sm:$0xff]  ;;  %v2929_v62 = vld [vmem:[%s15302_s0 + $0x38] sm:$0xff]  ;;  %v13648_v37 = vld [vmem:[#allocation3 + $0x330] sm:$0xff] }
 0x3c2   : > { %3928 = vmatmul.mubr.f32.gmra.mrb[18].mxu0 %v13543_v24 }
 0x3c3   : > { %v1999_v22 = vpop.permute.xlu0 %1998  ;;  %9002 = vmatpush1.bf16.msra.mxu1 %v9001_v31  ;;  %3933 = vmatprep.mubr.f32.mxu0 %v13555_v2  ;;  %v2857_v31 = vld [vmem:[#allocation2 + $0xb18] sm:$0xff] }
 0x3c4   : > { %v2007_v39 = vpop.permute.xlu1 %2006  ;;  %v13568_v42 = vsel %vm800_vm3, %v13333_v26, %v1999_v22  ;;  %2096 = vst.msk [vmem:[#allocation2 + $0xb98] sm:$0xff] %vm422_vm0, %v1999_v22  ;;  %9004 = vmatprep.subr.bf16.mxu1 %v9003_v36  ;;  %v2923_v26 = vld [vmem:[%s15302_s0 + $0x8] sm:$0xff]  ;;  %v2861_v7 = vld [vmem:[#allocation2 + $0xb38] sm:$0xff] }
 0x3c5   : > { %v13573_v34 = vsel %vm800_vm3, %v13343_v8, %v2007_v39  ;;  %2100 = vst.msk [vmem:[#allocation2 + $0xbb8] sm:$0xff] %vm422_vm0, %v2007_v39  ;;  %v2845_v8 = vld [vmem:[#allocation2 + $0xab8] sm:$0xff]  ;;  %2965 = vperm.xlu1 %10389, %v2923_v26   ;;  %2995 = vperm.xlu0 %10388, %v2929_v62   ;;  %v9019_v50 = vpack.c.bf16 %v2861_v7, %v2857_v31  ;;  %v2928_v26 = vld [vmem:[%s15302_s0 + $0x30] sm:$0xff]  ;;  %v13666_v31 = vld [vmem:[#allocation3 + $0x368] sm:$0xff] }
 0x3c6   : > { %3934 = vmatmul.mubr.f32.gmra.mrb[20].mxu0 %v13564_v55  ;;  %v9011_v0 = vpack.c.bf16 %v2845_v8, %v2841_v29  ;;  %v13632_v39 = vld [vmem:[#allocation3 + $0x2f8] sm:$0xff] }
 0x3c7   : > { %v2015_v47 = vpop.permute.xlu0 %2014  ;;  %9006 = vmatpush1.bf16.msra.mxu1 %v9005_v51  ;;  %3939 = vmatprep.mubr.f32.mxu0 %v13576_v56  ;;  %v9017_v51 = vpack.c.bf16 %v13519_v16, %v13514_v52  ;;  %v2865_v29 = vld [vmem:[#allocation2 + $0xb58] sm:$0xff]  ;;  %v13652_v16 = vld [vmem:[#allocation3 + $0x370] sm:$0xff] }
 0x3c8   : > { %v2023_v38 = vpop.permute.xlu1 %2022  ;;  %v13592_v10 = vsel %vm800_vm3, %v13361_v12, %v2015_v47  ;;  %2104 = vst.msk [vmem:[#allocation2 + $0xbd8] sm:$0xff] %vm422_vm0, %v2015_v47  ;;  %9008 = vmatprep.subr.bf16.mxu1 %v9007_v53  ;;  %v2924_v12 = vld [vmem:[%s15302_s0 + $0x10] sm:$0xff]  ;;  %v2869_v8 = vld [vmem:[#allocation2 + $0xb78] sm:$0xff] }
 0x3c9   : > { %v13597_v48 = vsel %vm800_vm3, %v13371_v58, %v2023_v38  ;;  %2108 = vst.msk [vmem:[#allocation2 + $0xbf8] sm:$0xff] %vm422_vm0, %v2023_v38  ;;  %v2853_v58 = vld [vmem:[#allocation2 + $0xaf8] sm:$0xff]  ;;  %2970 = vperm.xlu1 %10389, %v2924_v12   ;;  %3005 = vperm.xlu0 %10388, %v2931_v46   ;;  %v9023_v52 = vpack.c.bf16 %v2869_v8, %v2865_v29  ;;  %v13684_v8 = vld [vmem:[#allocation3 + $0x3a0] sm:$0xff] }
 0x3ca   : > { %3940 = vmatmul.mubr.f32.gmra.mrb[22].mxu0 %v13588_v45  ;;  %v9015_v36 = vpack.c.bf16 %v2853_v58, %v2849_v41  ;;  %v2933_v41 = vld [vmem:[%s15302_s0 + $0x58] sm:$0xff]  ;;  %v2930_v58 = vld [vmem:[%s15302_s0 + $0x40] sm:$0xff] }
 0x3cb   : > { %v2027_v18 = vpop.permute.xlu0 %2026  ;;  %9010 = vmatpush1.bf16.msra.mxu1 %v9009_v32  ;;  %3945 = vmatprep.mubr.f32.mxu0 %v13600_v33 }
 0x3cc   : > { %v13611_v30 = vpop.permute.xlu1 %2028  ;;  %9012 = vmatprep.subr.bf16.mxu1 %v9011_v0 }
 0x3cd   : > { %v2056_v17 = vsel %vm800_vm3, %v2027_v18, %v13611_v30  ;;  %2980 = vperm.xlu1 %10389, %v2926_v43   ;;  %3015 = vperm.xlu0 %10388, %v2933_v41  }
 0x3ce   : > { %3946 = vmatmul.mubr.f32.gmra.mrb[24].mxu0 %v13614_v54 }
 0x3cf   : > { %v2035_v4 = vpop.permute.xlu0 %2034  ;;  %9014 = vmatpush1.bf16.msra.mxu1 %v9013_v28  ;;  %3951 = vmatprep.mubr.f32.mxu0 %v13618_v44  ;;  %v2881_v46 = vld [vmem:[#allocation2 + $0xbd8] sm:$0xff] }
 0x3d0   : > { %v13629_v22 = vpop.permute.xlu1 %2036  ;;  %9016 = vmatprep.subr.bf16.mxu1 %v9015_v36  ;;  %v2873_v36 = vld [vmem:[#allocation2 + $0xb98] sm:$0xff] }
 0x3d1   : > { %v2059_v53 = vsel %vm800_vm3, %v2035_v4, %v13629_v22  ;;  %2990 = vperm.xlu1 %10389, %v2928_v26   ;;  %v2885_v26 = vld [vmem:[#allocation2 + $0xbf8] sm:$0xff] }
 0x3d2   : > { %v8827_v47 = vpack.c.bf16 %v2059_v53, %v2056_v17  ;;  %3952 = vmatmul.mubr.f32.gmra.mrb[26].mxu0 %v13632_v39  ;;  %v9021_v17 = vpack.c.bf16 %v13535_v27, %v13530_v11  ;;  %v13670_v27 = vld [vmem:[#allocation3 + $0x3a8] sm:$0xff]  ;;  %v2932_v53 = vld [vmem:[%s15302_s0 + $0x50] sm:$0xff] }
 0x3d3   : > { %v2025_v38 = vpop.permute.xlu0 %2024  ;;  %9018 = vmatpush1.bf16.msra.mxu1 %v9017_v51  ;;  %3957 = vmatprep.mubr.f32.mxu0 %v13636_v23 }
 0x3d4   : > { %v2033_v0 = vpop.permute.xlu1 %2032  ;;  %v2055_v12 = vsel %vm800_vm3, %v2025_v38, %v2027_v18  ;;  %9020 = vmatprep.subr.bf16.mxu1 %v9019_v50  ;;  %8828 = vmatprep.subr.bf16.mxu0 %v8827_v47  ;;  %v2877_v18 = vld [vmem:[#allocation2 + $0xbb8] sm:$0xff]  ;;  %v9025_v50 = vpack.c.bf16 %v13552_v14, %v13547_v5  ;;  %v9031_v38 = vpack.c.bf16 %v2885_v26, %v2881_v46  ;;  %v13688_v5 = vld [vmem:[#allocation3 + $0x3e0] sm:$0xff] }
 0x3d5   : > { %v2058_v32 = vsel %vm800_vm3, %v2033_v0, %v2035_v4  ;;  %3000 = vperm.xlu1 %10389, %v2930_v58   ;;  %v9027_v11 = vpack.c.bf16 %v2877_v18, %v2873_v36  ;;  %v2935_v4 = vld [vmem:[%s15302_s0 + $0x68] sm:$0xff]  ;;  %v2937_v14 = vld [vmem:[%s15302_s0 + $0x78] sm:$0xff]  ;;  %v2934_v0 = vld [vmem:[%s15302_s0 + $0x60] sm:$0xff] }
 0x3d6   : > { %v8829_v62 = vpack.c.bf16 %v2058_v32, %v2055_v12  ;;  %3958 = vmatmul.mubr.f32.gmra.mrb[28].mxu0 %v13648_v37  ;;  %3025 = vperm.xlu0 %10388, %v2935_v4   ;;  %v9029_v12 = vpack.c.bf16 %v13573_v34, %v13568_v42  ;;  %v13700_v58 = vld [vmem:[#allocation3 + $0x3d8] sm:$0xff]  ;;  %v2939_v42 = vld [vmem:[%s15302_s0 + $0x88] sm:$0xff]  ;;  %v2936_v34 = vld [vmem:[%s15302_s0 + $0x70] sm:$0xff] }
 0x3d7   : > { %v2120_v43 = vpop.permute.xlu0 %2119  ;;  %9022 = vmatpush1.bf16.msra.mxu1 %v9021_v17  ;;  %3963 = vmatprep.mubr.f32.mxu0 %v13652_v16  ;;  %v13704_v18 = vld [vmem:[#allocation3 + $0x418] sm:$0xff]  ;;  %v13718_v4 = vld [vmem:[#allocation3 + $0x410] sm:$0xff] }
 0x3d8   : > { %v13663_v28 = vpop.permute.xlu1 %2121  ;;  %9024 = vmatprep.subr.bf16.mxu1 %v9023_v52  ;;  %8830 = vmatpush1.bf16.msra.mxu0 %v8829_v62  ;;  %v9033_v62 = vpack.c.bf16 %v13597_v48, %v13592_v10  ;;  %v2941_v10 = vld [vmem:[%s15302_s0 + $0x98] sm:$0xff]  ;;  %v2938_v48 = vld [vmem:[%s15302_s0 + $0x80] sm:$0xff] }
 0x3d9   : > { %v2174_v7 = vsel %vm934_vm4, %v2120_v43, %v13663_v28  ;;  %3010 = vperm.xlu1 %10389, %v2932_v53  }
 0x3da   : > { %3964 = vmatmul.mubr.f32.gmra.mrb[30].mxu0 %v13666_v31  ;;  %3035 = vperm.xlu0 %10388, %v2937_v14   ;;  %v2940_v14 = vld [vmem:[%s15302_s0 + $0x90] sm:$0xff] }
 0x3db   : > { %v2128_v51 = vpop.permute.xlu0 %2127  ;;  %9026 = vmatpush1.bf16.msra.mxu1 %v9025_v50  ;;  %3969 = vmatprep.mubr.f32.mxu0 %v13670_v27  ;;  %v13722_v50 = vld [vmem:[#allocation3 + $0x450] sm:$0xff] }
 0x3dc   : > { %v13681_v29 = vpop.permute.xlu1 %2129  ;;  %9028 = vmatprep.subr.bf16.mxu1 %v9027_v11 }
 0x3dd   : > { %v2177_v47 = vsel %vm934_vm4, %v2128_v51, %v13681_v29  ;;  %3020 = vperm.xlu1 %10389, %v2934_v0  }
 0x3de   : > { %v8831_v32 = vpack.c.bf16 %v2177_v47, %v2174_v7  ;;  %3970 = vmatmul.mubr.f32.gmra.mrb[32].mxu0 %v13684_v8  ;;  %3045 = vperm.xlu0 %10388, %v2939_v42  }
 0x3df   : > { %v2118_v52 = vpop.permute.xlu0 %2117  ;;  %9030 = vmatpush1.bf16.msra.mxu1 %v9029_v12  ;;  %3975 = vmatprep.mubr.f32.mxu0 %v13688_v5 }
 0x3e0   : > { %v2126_v41 = vpop.permute.xlu1 %2125  ;;  %v2173_v17 = vsel %vm934_vm4, %v2118_v52, %v2120_v43  ;;  %9032 = vmatprep.subr.bf16.mxu1 %v9031_v38  ;;  %8832 = vmatprep.subr.bf16.mxu0 %v8831_v32  ;;  %v13740_v38 = vld [vmem:[#allocation3 + $0x488] sm:$0xff]  ;;  %v13752_v32 = vld [vmem:[#allocation3 + $0x480] sm:$0xff] }
 0x3e1   : > { %v2176_v36 = vsel %vm934_vm4, %v2126_v41, %v2128_v51  ;;  %3030 = vperm.xlu1 %10389, %v2936_v34   ;;  %v13736_v51 = vld [vmem:[#allocation3 + $0x448] sm:$0xff] }
 0x3e2   : > { %v8833_v7 = vpack.c.bf16 %v2176_v36, %v2173_v17  ;;  %3976 = vmatmul.mubr.f32.gmra.mrb[34].mxu0 %v13700_v58  ;;  %3055 = vperm.xlu0 %10388, %v2941_v10   ;;  %v13756_v17 = vld [vmem:[#allocation3 + $0x4c0] sm:$0xff] }
 0x3e3   : > { %v2136_v43 = vpop.permute.xlu0 %2135  ;;  %9034 = vmatpush1.bf16.msra.mxu1 %v9033_v62  ;;  %3981 = vmatprep.mubr.f32.mxu0 %v13704_v18  ;;  %v2942_v36 = vld [vmem:[%s15302_s0 + $0xa0] sm:$0xff]  ;;  %v13770_v62 = vld [vmem:[#allocation3 + $0x4b8] sm:$0xff] }
 0x3e4   : > { %v13715_v11 = vpop.permute.xlu1 %2137  ;;  %8834 = vmatpush1.bf16.msra.mxu0 %v8833_v7 }
 0x3e5   : > { %v2180_v53 = vsel %vm934_vm4, %v2136_v43, %v13715_v11  ;;  %3040 = vperm.xlu1 %10389, %v2938_v48   ;;  %v13788_v48 = vld [vmem:[#allocation3 + $0x4f0] sm:$0xff] }
 0x3e6   : > { %4998 = vmatmul.mubr.f32.vlgmr.msra.gmra.mrb[0].mxu1 %v13392_v25  ;;  %3982 = vmatmul.mubr.f32.gmra.mrb[36].mxu0 %v13718_v4  ;;  %v2943_v25 = vld [vmem:[%s15302_s0 + $0xa8] sm:$0xff] }
 0x3e7   : > { %v2144_v46 = vpop.permute.xlu0 %2143  ;;  %5003 = vmatprep.mubr.f32.mxu1 %v13401_v15  ;;  %3987 = vmatprep.mubr.f32.mxu0 %v13722_v50 }
 0x3e8   : > { %v13732_v26 = vpop.permute.xlu1 %2145  ;;  %3065 = vperm.xlu0 %10388, %v2943_v25   ;;  %v2946_v25 = vld [vmem:[%s15302_s0 + $0xc0] sm:$0xff] }
 0x3e9   : > { %v2183_v47 = vsel %vm934_vm4, %v2144_v46, %v13732_v26  ;;  %3050 = vperm.xlu1 %10389, %v2940_v14  }
 0x3ea   : > { %v8835_v0 = vpack.c.bf16 %v2183_v47, %v2180_v53  ;;  %5004 = vmatmul.mubr.f32.gmra.mrb[2].mxu1 %v13410_v19  ;;  %3988 = vmatmul.mubr.f32.gmra.mrb[38].mxu0 %v13736_v51  ;;  %v2945_v19 = vld [vmem:[%s15302_s0 + $0xb8] sm:$0xff]  ;;  %v2944_v53 = vld [vmem:[%s15302_s0 + $0xb0] sm:$0xff] }
 0x3eb   : > { %v2134_v15 = vpop.permute.xlu0 %2133  ;;  %5009 = vmatprep.mubr.f32.mxu1 %v13421_v21  ;;  %3993 = vmatprep.mubr.f32.mxu0 %v13740_v38  ;;  %v13792_v47 = vld [vmem:[#allocation3 + $0x530] sm:$0xff] }
 0x3ec   : > { %v2142_v12 = vpop.permute.xlu1 %2141  ;;  %v2179_v52 = vsel %vm934_vm4, %v2134_v15, %v2136_v43  ;;  %8836 = vmatprep.subr.bf16.mxu0 %v8835_v0  ;;  %3075 = vperm.xlu0 %10388, %v2945_v19   ;;  %v13774_v43 = vld [vmem:[#allocation3 + $0x4f8] sm:$0xff]  ;;  %v13804_v15 = vld [vmem:[#allocation3 + $0x528] sm:$0xff]  ;;  %v2948_v19 = vld [vmem:[%s15302_s0 + $0xd0] sm:$0xff] }
 0x3ed   : > { %v2182_v41 = vsel %vm934_vm4, %v2142_v12, %v2144_v46  ;;  %3060 = vperm.xlu1 %10389, %v2942_v36  }
 0x3ee   : > { %v8837_v21 = vpack.c.bf16 %v2182_v41, %v2179_v52  ;;  %5010 = vmatmul.mubr.f32.gmra.mrb[4].mxu1 %v13426_v20  ;;  %3994 = vmatmul.mubr.f32.gmra.mrb[40].mxu0 %v13752_v32  ;;  %v2947_v20 = vld [vmem:[%s15302_s0 + $0xc8] sm:$0xff] }
 0x3ef   : > { %v2152_v42 = vpop.permute.xlu0 %2151  ;;  %5015 = vmatprep.mubr.f32.mxu1 %v13437_v63  ;;  %3999 = vmatprep.mubr.f32.mxu0 %v13756_v17  ;;  %v13808_v41 = vld [vmem:[#allocation3 + $0x568] sm:$0xff] }
 0x3f0   : > { %v13766_v34 = vpop.permute.xlu1 %2153  ;;  %8838 = vmatpush1.bf16.msra.mxu0 %v8837_v21  ;;  %3085 = vperm.xlu0 %10388, %v2947_v20   ;;  %v13826_v20 = vld [vmem:[#allocation3 + $0x5a0] sm:$0xff] }
 0x3f1   : > { %v2186_v7 = vsel %vm934_vm4, %v2152_v42, %v13766_v34  ;;  %3070 = vperm.xlu1 %10389, %v2944_v53  }
 0x3f2   : > { %5016 = vmatmul.mubr.f32.gmra.mrb[6].mxu1 %v13441_v13  ;;  %4000 = vmatmul.mubr.f32.gmra.mrb[42].mxu0 %v13770_v62  ;;  %v2949_v13 = vld [vmem:[%s15302_s0 + $0xd8] sm:$0xff] }
 0x3f3   : > { %v2160_v63 = vpop.permute.xlu0 %2159  ;;  %5021 = vmatprep.mubr.f32.mxu1 %v13453_v49  ;;  %4005 = vmatprep.mubr.f32.mxu0 %v13774_v43 }
 0x3f4   : > { %v13784_v10 = vpop.permute.xlu1 %2161  ;;  %3095 = vperm.xlu0 %10388, %v2949_v13  }
 0x3f5   : > { %v2189_v46 = vsel %vm934_vm4, %v2160_v63, %v13784_v10  ;;  %3080 = vperm.xlu1 %10389, %v2946_v25  }
 0x3f6   : > { %v8839_v14 = vpack.c.bf16 %v2189_v46, %v2186_v7  ;;  %5022 = vmatmul.mubr.f32.gmra.mrb[8].mxu1 %v13459_v40  ;;  %4006 = vmatmul.mubr.f32.gmra.mrb[44].mxu0 %v13788_v48  ;;  %v2951_v40 = vld [vmem:[%s15302_s0 + $0xe8] sm:$0xff]  ;;  %v13838_v46 = vld [vmem:[#allocation3 + $0x598] sm:$0xff] }
 0x3f7   : > { %v2150_v49 = vpop.permute.xlu0 %2149  ;;  %5027 = vmatprep.mubr.f32.mxu1 %v13471_v3  ;;  %4011 = vmatprep.mubr.f32.mxu0 %v13792_v47 }
 0x3f8   : > { %v2158_v0 = vpop.permute.xlu1 %2157  ;;  %v2185_v12 = vsel %vm934_vm4, %v2150_v49, %v2152_v42  ;;  %8840 = vmatprep.subr.bf16.mxu0 %v8839_v14  ;;  %3105 = vperm.xlu0 %10388, %v2951_v40   ;;  %v13822_v42 = vld [vmem:[#allocation3 + $0x560] sm:$0xff]  ;;  %v13844_v14 = vld [vmem:[#allocation3 + $0x5d8] sm:$0xff] }
 0x3f9   : > { %v2188_v52 = vsel %vm934_vm4, %v2158_v0, %v2160_v63  ;;  %3090 = vperm.xlu1 %10389, %v2948_v19   ;;  %v13856_v0 = vld [vmem:[#allocation3 + $0x5d0] sm:$0xff]  ;;  %v2954_v40 = vld [vmem:[%s15302_s0 + $0x100] sm:$0xff]  ;;  %v13876_v19 = vld [vmem:[#allocation3 + $0x608] sm:$0xff] }
 0x3fa   : > { %v8841_v3 = vpack.c.bf16 %v2188_v52, %v2185_v12  ;;  %5028 = vmatmul.mubr.f32.gmra.mrb[10].mxu1 %v13478_v35  ;;  %4012 = vmatmul.mubr.f32.gmra.mrb[46].mxu0 %v13804_v15  ;;  %v2953_v35 = vld [vmem:[%s15302_s0 + $0xf8] sm:$0xff] }
 0x3fb   : > { %v2168_v36 = vpop.permute.xlu0 %2167  ;;  %5033 = vmatprep.mubr.f32.mxu1 %v13490_v61  ;;  %4017 = vmatprep.mubr.f32.mxu0 %v13808_v41  ;;  %v2950_v61 = vld [vmem:[%s15302_s0 + $0xe0] sm:$0xff] }
 0x3fc   : > { %v13818_v21 = vpop.permute.xlu1 %2169  ;;  %8842 = vmatpush1.bf16.msra.mxu0 %v8841_v3  ;;  %3115 = vperm.xlu0 %10388, %v2953_v35  }
 0x3fd   : > { %v2192_v7 = vsel %vm934_vm4, %v2168_v36, %v13818_v21  ;;  %3100 = vperm.xlu1 %10389, %v2950_v61  }
 0x3fe   : > { %4106 = vmatprep.subr.mxu0 %v2192_v7  ;;  %5034 = vmatmul.mubr.f32.gmra.mrb[12].mxu1 %v13494_v9  ;;  %v2955_v9 = vld [vmem:[%s15302_s0 + $0x108] sm:$0xff] }
 0x3ff   : > { %4018 = vmatmul.mubr.f32.gmra.mrb[48].mxu0 %v13822_v42  ;;  %v2166_v53 = vpop.permute.xlu0 %2165  ;;  %5039 = vmatprep.mubr.f32.mxu1 %v13506_v6  ;;  %v2952_v6 = vld [vmem:[%s15302_s0 + $0xf0] sm:$0xff] }
 0x400   : > { %v2031_v63 = vpop.permute.xlu1 %2030  ;;  %4023 = vmatprep.mubr.f32.mxu0 %v13826_v20  ;;  %v2191_v13 = vsel %vm934_vm4, %v2166_v53, %v2168_v36  ;;  %3125 = vperm.xlu0 %10388, %v2955_v9   ;;  %v13902_v9 = vld [vmem:[#allocation3 + $0x680] sm:$0xff] }
 0x401   : > { %v2057_v25 = vsel %vm800_vm3, %v13611_v30, %v2031_v63  ;;  %2112 = vst.msk [vmem:[#allocation2 + $0xc18] sm:$0xff] %vm422_vm0, %v2031_v63  ;;  %4107 = vmatpush1.msra.mxu0 %v2191_v13  ;;  %3110 = vperm.xlu1 %10389, %v2952_v6  }
 0x402   : > { %5040 = vmatmul.mubr.f32.gmra.mrb[14].mxu1 %v13510_v59  ;;  %v13864_v59 = vld [vmem:[#allocation3 + $0x610] sm:$0xff] }
 0x403   : > { %4024 = vmatmul.mubr.f32.gmra.mrb[50].mxu0 %v13838_v46  ;;  %v2039_v30 = vpop.permute.xlu0 %2038  ;;  %5045 = vmatprep.mubr.f32.mxu1 %v13522_v60  ;;  %v2957_v60 = vld [vmem:[%s15302_s0 + $0x118] sm:$0xff] }
 0x404   : > { %v2124_v49 = vpop.permute.xlu1 %2123  ;;  %4029 = vmatprep.mubr.f32.mxu0 %v13844_v14  ;;  %v2060_v12 = vsel %vm800_vm3, %v13629_v22, %v2039_v30  ;;  %2116 = vst.msk [vmem:[#allocation2 + $0xc38] sm:$0xff] %vm422_vm0, %v2039_v30  ;;  %3135 = vperm.xlu0 %10388, %v2957_v60   ;;  %v13916_v60 = vld [vmem:[#allocation3 + $0x6b8] sm:$0xff] }
 0x405   : > { %v2175_v52 = vsel %vm934_vm4, %v13663_v28, %v2124_v49  ;;  %2225 = vst.msk [vmem:[#allocation2 + $0xc58] sm:$0xff] %vm422_vm0, %v2124_v49  ;;  %3120 = vperm.xlu1 %10389, %v2954_v40  }
 0x406   : > { %5046 = vmatmul.mubr.f32.gmra.mrb[16].mxu1 %v13526_v57  ;;  %v13884_v57 = vld [vmem:[#allocation3 + $0x648] sm:$0xff] }
 0x407   : > { %4030 = vmatmul.mubr.f32.gmra.mrb[52].mxu0 %v13856_v0  ;;  %v2132_v22 = vpop.permute.xlu0 %2131  ;;  %5051 = vmatprep.mubr.f32.mxu1 %v13538_v1  ;;  %v2956_v1 = vld [vmem:[%s15302_s0 + $0x110] sm:$0xff] }
 0x408   : > { %v2140_v28 = vpop.permute.xlu1 %2139  ;;  %4035 = vmatprep.mubr.f32.mxu0 %v13864_v59  ;;  %v2178_v3 = vsel %vm934_vm4, %v13681_v29, %v2132_v22  ;;  %2229 = vst.msk [vmem:[#allocation2 + $0xc78] sm:$0xff] %vm422_vm0, %v2132_v22  ;;  %v2889_v7 = vld [vmem:[#allocation2 + $0xc18] sm:$0xff] }
 0x409   : > { %v2181_v36 = vsel %vm934_vm4, %v13715_v11, %v2140_v28  ;;  %2233 = vst.msk [vmem:[#allocation2 + $0xc98] sm:$0xff] %vm422_vm0, %v2140_v28  ;;  %3130 = vperm.xlu1 %10389, %v2956_v1   ;;  %v13932_v1 = vld [vmem:[#allocation3 + $0x728] sm:$0xff] }
 0x40a   : > { %5052 = vmatmul.mubr.f32.gmra.mrb[18].mxu1 %v13543_v24  ;;  %v9037_v24 = vpack.c.bf16 %v2060_v12, %v2057_v25  ;;  %v9041_v25 = vpack.c.bf16 %v2178_v3, %v2175_v52  ;;  %v13921_v52 = vld [vmem:[#allocation3 + $0x6b0] sm:$0xff] }
 0x40b   : > { %4036 = vmatmul.mubr.f32.gmra.mrb[54].mxu0 %v13876_v19  ;;  %5057 = vmatprep.mubr.f32.mxu1 %v13555_v2  ;;  %v2893_v29 = vld [vmem:[#allocation2 + $0xc38] sm:$0xff]  ;;  %v2148_v35 = vpop.permute.xlu0 %2147  ;;  %v13899_v2 = vld [vmem:[#allocation3 + $0x640] sm:$0xff] }
 0x40c   : > { %4041 = vmatprep.mubr.f32.mxu0 %v13884_v57  ;;  %v2156_v11 = vpop.permute.xlu1 %2155  ;;  %v9035_v61 = vpack.c.bf16 %v2893_v29, %v2889_v7  ;;  %v2184_v53 = vsel %vm934_vm4, %v13732_v26, %v2148_v35  ;;  %2237 = vst.msk [vmem:[#allocation2 + $0xcb8] sm:$0xff] %vm422_vm0, %v2148_v35  ;;  %v2897_v13 = vld [vmem:[#allocation2 + $0xc58] sm:$0xff] }
 0x40d   : > { %v2187_v63 = vsel %vm934_vm4, %v13766_v34, %v2156_v11  ;;  %2241 = vst.msk [vmem:[#allocation2 + $0xcd8] sm:$0xff] %vm422_vm0, %v2156_v11  ;;  %v9045_v40 = vpack.c.bf16 %v2184_v53, %v2181_v36  ;;  %v13929_v36 = vld [vmem:[#allocation3 + $0x6e8] sm:$0xff]  ;;  %v14016_v29 = vld [vmem:[#allocation3 + $0x1b8] sm:$0xff]  ;;  %v5643_v11 = vld [vmem:[#allocation6 + $0x20] sm:$0xff] }
 0x40e   : > { %5058 = vmatmul.mubr.f32.gmra.mrb[20].mxu1 %v13564_v55  ;;  %9036 = vmatprep.subr.bf16.mxu1 %v9035_v61  ;;  %v5645_v61 = vld [vmem:[#allocation6 + $0x30] sm:$0xff] }
 0x40f   : > { %9038 = vmatpush1.bf16.msra.mxu1 %v9037_v24  ;;  %5063 = vmatprep.mubr.f32.mxu1 %v13576_v56  ;;  %v2901_v26 = vld [vmem:[#allocation2 + $0xc78] sm:$0xff]  ;;  %v2164_v6 = vpop.permute.xlu0 %2163  ;;  %v14023_v53 = vld [vmem:[#allocation3 + $0x1f0] sm:$0xff] }
 0x410   : > { %v2172_v30 = vpop.permute.xlu1 %2171  ;;  %v9039_v49 = vpack.c.bf16 %v2901_v26, %v2897_v13  ;;  %4042 = vmatmul.mubr.f32.gmra.mrb[56].mxu0 %v13899_v2  ;;  %v2190_v34 = vsel %vm934_vm4, %v13784_v10, %v2164_v6  ;;  %2245 = vst.msk [vmem:[#allocation2 + $0xcf8] sm:$0xff] %vm422_vm0, %v2164_v6  ;;  %v13913_v56 = vld [vmem:[#allocation3 + $0x678] sm:$0xff]  ;;  %v5647_v13 = vld [vmem:[#allocation6 + $0x40] sm:$0xff]  ;;  %v5649_v26 = vld [vmem:[#allocation6 + $0x50] sm:$0xff] }
 0x411   : > { %v2193_v55 = vsel %vm934_vm4, %v13818_v21, %v2172_v30  ;;  %2249 = vst.msk [vmem:[#allocation2 + $0xd18] sm:$0xff] %vm422_vm0, %v2172_v30  ;;  %4047 = vmatprep.mubr.f32.mxu0 %v13902_v9  ;;  %v2905_v12 = vld [vmem:[#allocation2 + $0xc98] sm:$0xff]  ;;  %v14030_v6 = vld [vmem:[#allocation3 + $0x228] sm:$0xff]  ;;  %v9061_v30 = vpack.c.bf16 %v5649_v26, %v5647_v13  ;;  %v5675_v13 = vld [vmem:[#allocation6 + $0x120] sm:$0xff] }
 0x412   : > { %5064 = vmatmul.mubr.f32.gmra.mrb[22].mxu1 %v13588_v45  ;;  %9040 = vmatprep.subr.bf16.mxu1 %v9039_v49  ;;  %v13924_v45 = vld [vmem:[#allocation3 + $0x6f0] sm:$0xff] }
 0x413   : > { %9042 = vmatpush1.bf16.msra.mxu1 %v9041_v25  ;;  %5069 = vmatprep.mubr.f32.mxu1 %v13600_v33  ;;  %v2909_v10 = vld [vmem:[#allocation2 + $0xcb8] sm:$0xff]  ;;  %v9049_v33 = vpack.c.bf16 %v2190_v34, %v2187_v63  ;;  %v9057_v63 = vpack.c.bf16 %v5645_v61, %v5643_v11  ;;  %v5651_v34 = vld [vmem:[#allocation6 + $0x60] sm:$0xff]  ;;  %v5677_v26 = vld [vmem:[#allocation6 + $0x130] sm:$0xff] }
 0x414   : > { %4048 = vmatmul.mubr.f32.gmra.mrb[58].mxu0 %v13913_v56  ;;  %v9043_v21 = vpack.c.bf16 %v2909_v10, %v2905_v12  ;;  %v2913_v22 = vld [vmem:[#allocation2 + $0xcd8] sm:$0xff]  ;;  %v14037_v25 = vld [vmem:[#allocation3 + $0x260] sm:$0xff] }
 0x415   : > { %4053 = vmatprep.mubr.f32.mxu0 %v13916_v60  ;;  %v5671_v61 = vld [vmem:[#allocation6 + $0x100] sm:$0xff] }
 0x416   : > { %5070 = vmatmul.mubr.f32.gmra.mrb[24].mxu1 %v13614_v54  ;;  %9044 = vmatprep.subr.bf16.mxu1 %v9043_v21  ;;  %v13937_v54 = vld [vmem:[#allocation3 + $0x720] sm:$0xff] }
 0x417   : > { %5075 = vmatprep.mubr.f32.mxu1 %v13618_v44  ;;  %9046 = vmatpush1.bf16.msra.mxu1 %v9045_v40  ;;  %v2917_v28 = vld [vmem:[#allocation2 + $0xcf8] sm:$0xff]  ;;  %v13940_v44 = vld [vmem:[#allocation3 + $0x760] sm:$0xff]  ;;  %v5657_v40 = vld [vmem:[#allocation6 + $0x90] sm:$0xff] }
 0x418   : > { %4054 = vmatmul.mubr.f32.gmra.mrb[60].mxu0 %v13921_v52  ;;  %v9047_v3 = vpack.c.bf16 %v2917_v28, %v2913_v22  ;;  %v2921_v7 = vld [vmem:[#allocation2 + $0xd18] sm:$0xff]  ;;  %v5655_v21 = vld [vmem:[#allocation6 + $0x80] sm:$0xff] }
 0x419   : > { %4059 = vmatprep.mubr.f32.mxu0 %v13924_v45  ;;  %v14044_v22 = vld [vmem:[#allocation3 + $0x298] sm:$0xff]  ;;  %v9069_v28 = vpack.c.bf16 %v5657_v40, %v5655_v21  ;;  %v6421_v21 = vld [vmem:[#allocation8 + $0x20] sm:$0xff]  ;;  %v6423_v40 = vld [vmem:[#allocation8 + $0x30] sm:$0xff] }
 0x41a   : > { %5076 = vmatmul.mubr.f32.gmra.mrb[26].mxu1 %v13632_v39  ;;  %9048 = vmatprep.subr.bf16.mxu1 %v9047_v3  ;;  %v13945_v39 = vld [vmem:[#allocation3 + $0x758] sm:$0xff]  ;;  %v5659_v3 = vld [vmem:[#allocation6 + $0xa0] sm:$0xff] }
 0x41b   : > { %5081 = vmatprep.mubr.f32.mxu1 %v13636_v23  ;;  %9050 = vmatpush1.bf16.msra.mxu1 %v9049_v33  ;;  %v13948_v23 = vld [vmem:[#allocation3 + $0x798] sm:$0xff] }
 0x41c   : > { %4060 = vmatmul.mubr.f32.gmra.mrb[62].mxu0 %v13929_v36  ;;  %5230 = vmatprep.subr.mxu1 %v2921_v7  ;;  %v5661_v7 = vld [vmem:[#allocation6 + $0xb0] sm:$0xff] }
 0x41d   : > { %4065 = vmatprep.mubr.f32.mxu0 %v13932_v1 }
 0x41e   : > { %5082 = vmatmul.mubr.f32.gmra.mrb[28].mxu1 %v13648_v37  ;;  %v13953_v37 = vld [vmem:[#allocation3 + $0x790] sm:$0xff] }
 0x41f   : > { %5087 = vmatprep.mubr.f32.mxu1 %v13652_v16  ;;  %5231 = vmatpush1.msra.mxu1 %v2193_v55  ;;  %v13956_v16 = vld [vmem:[#allocation3 + $0x7d0] sm:$0xff] }
 0x420   : > { %4066 = vmatmul.mubr.f32.gmra.mrb[64].mxu0 %v13937_v54  ;;  %v5653_v55 = vld [vmem:[#allocation6 + $0x70] sm:$0xff] }
 0x421   : > { %4071 = vmatprep.mubr.f32.mxu0 %v13940_v44  ;;  %v9065_v12 = vpack.c.bf16 %v5653_v55, %v5651_v34  ;;  %v5679_v55 = vld [vmem:[#allocation6 + $0x140] sm:$0xff] }
 0x422   : > { %5088 = vmatmul.mubr.f32.gmra.mrb[30].mxu1 %v13666_v31  ;;  %v13961_v31 = vld [vmem:[#allocation3 + $0x7c8] sm:$0xff] }
 0x423   : > { %5093 = vmatprep.mubr.f32.mxu1 %v13670_v27  ;;  %v15075_v27 = vmov 0.0  }
 0x424   : > { %4072 = vmatmul.mubr.f32.gmra.mrb[66].mxu0 %v13945_v39 }
 0x425   : > { %4077 = vmatprep.mubr.f32.mxu0 %v13948_v23 }
 0x426   : > { %5094 = vmatmul.mubr.f32.gmra.mrb[32].mxu1 %v13684_v8  ;;  %v13967_v8 = vld [vmem:[#allocation3 + $0x30] sm:$0xff] }
 0x427   : > { %5099 = vmatprep.mubr.f32.mxu1 %v13688_v5  ;;  %v13974_v5 = vld [vmem:[#allocation3 + $0x68] sm:$0xff] }
 0x428   : > { %4078 = vmatmul.mubr.f32.gmra.mrb[68].mxu0 %v13953_v37 }
 0x429   : > { %4083 = vmatprep.mubr.f32.mxu0 %v13956_v16 }
 0x42a   : > { %5100 = vmatmul.mubr.f32.gmra.mrb[34].mxu1 %v13700_v58  ;;  %v13981_v58 = vld [vmem:[#allocation3 + $0xa0] sm:$0xff] }
 0x42b   : > { %5105 = vmatprep.mubr.f32.mxu1 %v13704_v18  ;;  %v13988_v18 = vld [vmem:[#allocation3 + $0xd8] sm:$0xff] }
 0x42c   : > { %4084 = vmatmul.mubr.f32.gmra.mrb[70].mxu0 %v13961_v31 }
 0x42d   : > { %4154 = vmatprep.mubr.f32.mxu0 %v15075_v27 }
 0x42e   : > { %5106 = vmatmul.mubr.f32.gmra.mrb[36].mxu1 %v13718_v4  ;;  %v13995_v4 = vld [vmem:[#allocation3 + $0x110] sm:$0xff] }
 0x42f   : > { %5111 = vmatprep.mubr.f32.mxu1 %v13722_v50  ;;  %v14002_v50 = vld [vmem:[#allocation3 + $0x148] sm:$0xff] }
 0x430   : > { %8417 = vmatmul.mubr.msk.f32.vlgmr.msra.gmra.mrb[0].mxu0 %vm3138_vm5, %v13967_v8 }
 0x431   : > { %4160 = vmatprep.mubr.f32.mxu0 %v15075_v27 }
 0x432   : > { %5112 = vmatmul.mubr.f32.gmra.mrb[38].mxu1 %v13736_v51  ;;  %v14009_v51 = vld [vmem:[#allocation3 + $0x180] sm:$0xff] }
 0x433   : > { %5117 = vmatprep.mubr.f32.mxu1 %v13740_v38  ;;  %v5640_v38 = vld [vmem:[#allocation6 + $0x8] sm:$0xff] }
 0x434   : > { %8418 = vmatmul.mubr.msk.f32.gmra.mrb[2].mxu0 %vm3138_vm5, %v13974_v5 }
 0x435   : > { %4166 = vmatprep.mubr.f32.mxu0 %v15075_v27 }
 0x436   : > { %5118 = vmatmul.mubr.f32.gmra.mrb[40].mxu1 %v13752_v32  ;;  %v5642_v32 = vld [vmem:[#allocation6 + $0x18] sm:$0xff] }
 0x437   : > { %5123 = vmatprep.mubr.f32.mxu1 %v13756_v17  ;;  %v6418_v17 = vld [vmem:[#allocation8 + $0x8] sm:$0xff] }
 0x438   : > { %8419 = vmatmul.mubr.msk.f32.gmra.mrb[4].mxu0 %vm3138_vm5, %v13981_v58 }
 0x439   : > { %4172 = vmatprep.mubr.f32.mxu0 %v15075_v27 }
 0x43a   : > { %5124 = vmatmul.mubr.f32.gmra.mrb[42].mxu1 %v13770_v62  ;;  %v9051_v62 = vpack.c.bf16 %v5642_v32, %v5640_v38  ;;  %v14051_v38 = vld [vmem:[#allocation3 + $0x2d0] sm:$0xff]  ;;  %v9073_v32 = vpack.c.bf16 %v5661_v7, %v5659_v3  ;;  %v14093_v7 = vld [vmem:[#allocation3 + $0x420] sm:$0xff] }
 0x43b   : > { %5129 = vmatprep.mubr.f32.mxu1 %v13774_v43  ;;  %v6420_v43 = vld [vmem:[#allocation8 + $0x18] sm:$0xff]  ;;  %v5685_v3 = vld [vmem:[#allocation6 + $0x170] sm:$0xff] }
 0x43c   : > { %8420 = vmatmul.mubr.msk.f32.gmra.mrb[6].mxu0 %vm3138_vm5, %v13988_v18  ;;  %9052 = vmatprep.subr.bf16.mxu0 %v9051_v62  ;;  %v5663_v62 = vld [vmem:[#allocation6 + $0xc0] sm:$0xff] }
 0x43d   : > { %4178 = vmatprep.mubr.f32.mxu0 %v15075_v27 }
 0x43e   : > { %5130 = vmatmul.mubr.f32.gmra.mrb[44].mxu1 %v13788_v48  ;;  %v5639_v48 = vld [vmem:[#allocation6] sm:$0xff] }
 0x43f   : > { %5135 = vmatprep.mubr.f32.mxu1 %v13792_v47  ;;  %v5641_v47 = vld [vmem:[#allocation6 + $0x10] sm:$0xff] }
 0x440   : > { %8421 = vmatmul.mubr.msk.f32.gmra.mrb[8].mxu0 %vm3138_vm5, %v13995_v4 }
 0x441   : > { %4184 = vmatprep.mubr.f32.mxu0 %v15075_v27 }
 0x442   : > { %5136 = vmatmul.mubr.f32.gmra.mrb[46].mxu1 %v13804_v15  ;;  %v9159_v15 = vpack.c.bf16 %v6420_v43, %v6418_v17  ;;  %v5665_v43 = vld [vmem:[#allocation6 + $0xd0] sm:$0xff] }
 0x443   : > { %5141 = vmatprep.mubr.f32.mxu1 %v13808_v41  ;;  %v9053_v41 = vpack.c.bf16 %v5641_v47, %v5639_v48  ;;  %v14058_v48 = vld [vmem:[#allocation3 + $0x308] sm:$0xff]  ;;  %v9077_v47 = vpack.c.bf16 %v5665_v43, %v5663_v62  ;;  %v6425_v62 = vld [vmem:[#allocation8 + $0x40] sm:$0xff]  ;;  %v6427_v43 = vld [vmem:[#allocation8 + $0x50] sm:$0xff] }
 0x444   : > { %8422 = vmatmul.mubr.msk.f32.gmra.mrb[10].mxu0 %vm3138_vm5, %v14002_v50  ;;  %9160 = vmatprep.subr.bf16.mxu1 %v9159_v15 }
 0x445   : > { %4190 = vmatprep.mubr.f32.mxu0 %v15075_v27  ;;  %9054 = vmatpush1.bf16.msra.mxu0 %v9053_v41  ;;  %v5667_v41 = vld [vmem:[#allocation6 + $0xe0] sm:$0xff] }
 0x446   : > { %5142 = vmatmul.mubr.f32.gmra.mrb[48].mxu1 %v13822_v42  ;;  %v5644_v42 = vld [vmem:[#allocation6 + $0x28] sm:$0xff] }
 0x447   : > { %5147 = vmatprep.mubr.f32.mxu1 %v13826_v20  ;;  %v5646_v20 = vld [vmem:[#allocation6 + $0x38] sm:$0xff] }
 0x448   : > { %8423 = vmatmul.mubr.msk.f32.gmra.mrb[12].mxu0 %vm3138_vm5, %v14009_v51  ;;  %v9055_v35 = vpack.c.bf16 %v5646_v20, %v5644_v42  ;;  %v5669_v42 = vld [vmem:[#allocation6 + $0xf0] sm:$0xff]  ;;  %v14065_v20 = vld [vmem:[#allocation3 + $0x340] sm:$0xff] }
 0x449   : > { %4196 = vmatprep.mubr.f32.mxu0 %v15075_v27 }
 0x44a   : > { %5148 = vmatmul.mubr.f32.gmra.mrb[50].mxu1 %v13838_v46  ;;  %9056 = vmatprep.subr.bf16.mxu0 %v9055_v35  ;;  %v5648_v46 = vld [vmem:[#allocation6 + $0x48] sm:$0xff]  ;;  %v9081_v35 = vpack.c.bf16 %v5669_v42, %v5667_v41  ;;  %v5689_v41 = vld [vmem:[#allocation6 + $0x190] sm:$0xff]  ;;  %v14101_v42 = vld [vmem:[#allocation3 + $0x458] sm:$0xff] }
 0x44b   : > { %5153 = vmatprep.mubr.f32.mxu1 %v13844_v14  ;;  %9058 = vmatpush1.bf16.msra.mxu0 %v9057_v63  ;;  %v5650_v14 = vld [vmem:[#allocation6 + $0x58] sm:$0xff]  ;;  %v5673_v63 = vld [vmem:[#allocation6 + $0x110] sm:$0xff] }
 0x44c   : > { %8424 = vmatmul.mubr.msk.f32.gmra.mrb[14].mxu0 %vm3138_vm5, %v14016_v29  ;;  %v9059_v24 = vpack.c.bf16 %v5650_v14, %v5648_v46  ;;  %v14072_v46 = vld [vmem:[#allocation3 + $0x378] sm:$0xff]  ;;  %v9085_v14 = vpack.c.bf16 %v5673_v63, %v5671_v61  ;;  %v6429_v61 = vld [vmem:[#allocation8 + $0x60] sm:$0xff]  ;;  %v6431_v63 = vld [vmem:[#allocation8 + $0x70] sm:$0xff] }
 0x44d   : > { %4202 = vmatprep.mubr.f32.mxu0 %v15075_v27 }
 0x44e   : > { %5154 = vmatmul.mubr.f32.gmra.mrb[52].mxu1 %v13856_v0  ;;  %9060 = vmatprep.subr.bf16.mxu0 %v9059_v24  ;;  %v5652_v0 = vld [vmem:[#allocation6 + $0x68] sm:$0xff] }
 0x44f   : > { %5159 = vmatprep.mubr.f32.mxu1 %v13864_v59  ;;  %9062 = vmatpush1.bf16.msra.mxu0 %v9061_v30  ;;  %v5654_v59 = vld [vmem:[#allocation6 + $0x78] sm:$0xff]  ;;  %v14079_v30 = vld [vmem:[#allocation3 + $0x3b0] sm:$0xff] }
 0x450   : > { %8425 = vmatmul.mubr.msk.f32.gmra.mrb[16].mxu0 %vm3138_vm5, %v14023_v53  ;;  %v9063_v49 = vpack.c.bf16 %v5654_v59, %v5652_v0  ;;  %v9089_v0 = vpack.c.bf16 %v5677_v26, %v5675_v13  ;;  %v5682_v59 = vld [vmem:[#allocation6 + $0x158] sm:$0xff]  ;;  %v5693_v13 = vld [vmem:[#allocation6 + $0x1b0] sm:$0xff]  ;;  %v6434_v26 = vld [vmem:[#allocation8 + $0x88] sm:$0xff] }
 0x451   : > { %4208 = vmatprep.mubr.f32.mxu0 %v15075_v27 }
 0x452   : > { %5160 = vmatmul.mubr.f32.gmra.mrb[54].mxu1 %v13876_v19  ;;  %9064 = vmatprep.subr.bf16.mxu0 %v9063_v49  ;;  %v5656_v19 = vld [vmem:[#allocation6 + $0x88] sm:$0xff]  ;;  %v6419_v49 = vld [vmem:[#allocation8 + $0x10] sm:$0xff] }
 0x453   : > { %5165 = vmatprep.mubr.f32.mxu1 %v13884_v57  ;;  %9066 = vmatpush1.bf16.msra.mxu0 %v9065_v12  ;;  %v5658_v57 = vld [vmem:[#allocation6 + $0x98] sm:$0xff]  ;;  %v5681_v12 = vld [vmem:[#allocation6 + $0x150] sm:$0xff] }
 0x454   : > { %8426 = vmatmul.mubr.msk.f32.gmra.mrb[18].mxu0 %vm3138_vm5, %v14030_v6  ;;  %v9067_v10 = vpack.c.bf16 %v5658_v57, %v5656_v19  ;;  %v14086_v19 = vld [vmem:[#allocation3 + $0x3e8] sm:$0xff] }
 0x455   : > { %4214 = vmatprep.mubr.f32.mxu0 %v15075_v27  ;;  %v6422_v57 = vld [vmem:[#allocation8 + $0x28] sm:$0xff] }
 0x456   : > { %5166 = vmatmul.mubr.f32.gmra.mrb[56].mxu1 %v13899_v2  ;;  %9068 = vmatprep.subr.bf16.mxu0 %v9067_v10  ;;  %v5660_v2 = vld [vmem:[#allocation6 + $0xa8] sm:$0xff]  ;;  %v9093_v10 = vpack.c.bf16 %v5681_v12, %v5679_v55 }
 0x457   : > { %5171 = vmatprep.mubr.f32.mxu1 %v13902_v9  ;;  %9070 = vmatpush1.bf16.msra.mxu0 %v9069_v28  ;;  %v5662_v9 = vld [vmem:[#allocation6 + $0xb8] sm:$0xff]  ;;  %v5684_v28 = vld [vmem:[#allocation6 + $0x168] sm:$0xff] }
 0x458   : > { %8427 = vmatmul.mubr.msk.f32.gmra.mrb[20].mxu0 %vm3138_vm5, %v14037_v25  ;;  %v9071_v33 = vpack.c.bf16 %v5662_v9, %v5660_v2  ;;  %v5686_v9 = vld [vmem:[#allocation6 + $0x178] sm:$0xff]  ;;  %v5696_v55 = vld [vmem:[#allocation6 + $0x1c8] sm:$0xff] }
 0x459   : > { %4220 = vmatprep.mubr.f32.mxu0 %v15075_v27 }
 0x45a   : > { %5172 = vmatmul.mubr.f32.gmra.mrb[58].mxu1 %v13913_v56  ;;  %9072 = vmatprep.subr.bf16.mxu0 %v9071_v33  ;;  %v5664_v56 = vld [vmem:[#allocation6 + $0xc8] sm:$0xff]  ;;  %v5683_v33 = vld [vmem:[#allocation6 + $0x160] sm:$0xff] }
 0x45b   : > { %5177 = vmatprep.mubr.f32.mxu1 %v13916_v60  ;;  %9074 = vmatpush1.bf16.msra.mxu0 %v9073_v32  ;;  %v5666_v60 = vld [vmem:[#allocation6 + $0xd8] sm:$0xff] }
 0x45c   : > { %8428 = vmatmul.mubr.msk.f32.gmra.mrb[22].mxu0 %vm3138_vm5, %v14044_v22  ;;  %v9075_v17 = vpack.c.bf16 %v5666_v60, %v5664_v56  ;;  %v6428_v32 = vld [vmem:[#allocation8 + $0x58] sm:$0xff]  ;;  %v9095_v56 = vpack.c.bf16 %v5686_v9, %v5684_v28  ;;  %v9097_v60 = vpack.c.bf16 %v5685_v3, %v5683_v33  ;;  %v6437_v9 = vld [vmem:[#allocation8 + $0xa0] sm:$0xff]  ;;  %v6439_v33 = vld [vmem:[#allocation8 + $0xb0] sm:$0xff] }
 0x45d   : > { %4226 = vmatprep.mubr.f32.mxu0 %v15075_v27  ;;  %v5700_v3 = vld [vmem:[#allocation6 + $0x1e8] sm:$0xff] }
 0x45e   : > { %5178 = vmatmul.mubr.f32.gmra.mrb[60].mxu1 %v13921_v52  ;;  %9076 = vmatprep.subr.bf16.mxu0 %v9075_v17  ;;  %v5668_v52 = vld [vmem:[#allocation6 + $0xe8] sm:$0xff]  ;;  %v9165_v17 = vpack.c.bf16 %v6423_v40, %v6421_v21  ;;  %v6440_v21 = vld [vmem:[#allocation8 + $0xb8] sm:$0xff] }
 0x45f   : > { %5183 = vmatprep.mubr.f32.mxu1 %v13924_v45  ;;  %9078 = vmatpush1.bf16.msra.mxu0 %v9077_v47  ;;  %v5670_v45 = vld [vmem:[#allocation6 + $0xf8] sm:$0xff]  ;;  %v5688_v47 = vld [vmem:[#allocation6 + $0x188] sm:$0xff] }
 0x460   : > { %8429 = vmatmul.mubr.msk.f32.gmra.mrb[24].mxu0 %vm3138_vm5, %v14051_v38  ;;  %v9079_v15 = vpack.c.bf16 %v5670_v45, %v5668_v52  ;;  %v5690_v45 = vld [vmem:[#allocation6 + $0x198] sm:$0xff] }
 0x461   : > { %4232 = vmatprep.mubr.f32.mxu0 %v15075_v27 }
 0x462   : > { %5184 = vmatmul.mubr.f32.gmra.mrb[62].mxu1 %v13929_v36  ;;  %9080 = vmatprep.subr.bf16.mxu0 %v9079_v15  ;;  %v5672_v36 = vld [vmem:[#allocation6 + $0x108] sm:$0xff]  ;;  %v5687_v15 = vld [vmem:[#allocation6 + $0x180] sm:$0xff] }
 0x463   : > { %5189 = vmatprep.mubr.f32.mxu1 %v13932_v1  ;;  %9082 = vmatpush1.bf16.msra.mxu0 %v9081_v35  ;;  %v5674_v1 = vld [vmem:[#allocation6 + $0x118] sm:$0xff] }
 0x464   : > { %8430 = vmatmul.mubr.msk.f32.gmra.mrb[26].mxu0 %vm3138_vm5, %v14058_v48  ;;  %v9083_v11 = vpack.c.bf16 %v5674_v1, %v5672_v36  ;;  %v6432_v35 = vld [vmem:[#allocation8 + $0x78] sm:$0xff]  ;;  %v9099_v36 = vpack.c.bf16 %v5690_v45, %v5688_v47  ;;  %v9101_v1 = vpack.c.bf16 %v5689_v41, %v5687_v15  ;;  %v6441_v15 = vld [vmem:[#allocation8 + $0xc0] sm:$0xff]  ;;  %v6443_v41 = vld [vmem:[#allocation8 + $0xd0] sm:$0xff] }
 0x465   : > { %4238 = vmatprep.mubr.f32.mxu0 %v15075_v27 }
 0x466   : > { %5190 = vmatmul.mubr.f32.gmra.mrb[64].mxu1 %v13937_v54  ;;  %9084 = vmatprep.subr.bf16.mxu0 %v9083_v11  ;;  %v5676_v54 = vld [vmem:[#allocation6 + $0x128] sm:$0xff]  ;;  %v9169_v11 = vpack.c.bf16 %v6427_v43, %v6425_v62  ;;  %v6444_v62 = vld [vmem:[#allocation8 + $0xd8] sm:$0xff] }
 0x467   : > { %5195 = vmatprep.mubr.f32.mxu1 %v13940_v44  ;;  %9086 = vmatpush1.bf16.msra.mxu0 %v9085_v14  ;;  %v5678_v44 = vld [vmem:[#allocation6 + $0x138] sm:$0xff]  ;;  %v5692_v14 = vld [vmem:[#allocation6 + $0x1a8] sm:$0xff] }
 0x468   : > { %8431 = vmatmul.mubr.msk.f32.gmra.mrb[28].mxu0 %vm3138_vm5, %v14065_v20  ;;  %v9087_v24 = vpack.c.bf16 %v5678_v44, %v5676_v54  ;;  %v5694_v44 = vld [vmem:[#allocation6 + $0x1b8] sm:$0xff] }
 0x469   : > { %4244 = vmatprep.mubr.f32.mxu0 %v15075_v27 }
 0x46a   : > { %5196 = vmatmul.mubr.f32.gmra.mrb[66].mxu1 %v13945_v39  ;;  %9088 = vmatprep.subr.bf16.mxu0 %v9087_v24  ;;  %v6417_v39 = vld [vmem:[#allocation8] sm:$0xff] }
 0x46b   : > { %5201 = vmatprep.mubr.f32.mxu1 %v13948_v23  ;;  %9090 = vmatpush1.bf16.msra.mxu0 %v9089_v0  ;;  %v5680_v23 = vld [vmem:[#allocation6 + $0x148] sm:$0xff]  ;;  %v5691_v24 = vld [vmem:[#allocation6 + $0x1a0] sm:$0xff]  ;;  %v6436_v0 = vld [vmem:[#allocation8 + $0x98] sm:$0xff] }
 0x46c   : > { %8432 = vmatmul.mubr.msk.f32.gmra.mrb[30].mxu0 %vm3138_vm5, %v14072_v46  ;;  %v9091_v34 = vpack.c.bf16 %v5682_v59, %v5680_v23  ;;  %v9105_v23 = vpack.c.bf16 %v5693_v13, %v5691_v24  ;;  %v9173_v59 = vpack.c.bf16 %v6431_v63, %v6429_v61  ;;  %v9175_v12 = vpack.c.bf16 %v6436_v0, %v6434_v26  ;;  %v6447_v61 = vld [vmem:[#allocation8 + $0xf0] sm:$0xff]  ;;  %v6449_v24 = vld [vmem:[#allocation8 + $0x100] sm:$0xff]  ;;  %v14149_v26 = vld [vmem:[#allocation3 + $0x5a8] sm:$0xff] }
 0x46d   : > { %4250 = vmatprep.mubr.f32.mxu0 %v15075_v27  ;;  %v14141_v63 = vld [vmem:[#allocation3 + $0x570] sm:$0xff]  ;;  %v6454_v0 = vld [vmem:[#allocation8 + $0x128] sm:$0xff] }
 0x46e   : > { %5202 = vmatmul.mubr.f32.gmra.mrb[68].mxu1 %v13953_v37  ;;  %v6424_v37 = vld [vmem:[#allocation8 + $0x38] sm:$0xff]  ;;  %9092 = vmatprep.subr.bf16.mxu0 %v9091_v34  ;;  %v6435_v34 = vld [vmem:[#allocation8 + $0x90] sm:$0xff] }
 0x46f   : > { %5207 = vmatprep.mubr.f32.mxu1 %v13956_v16  ;;  %v9161_v16 = vpack.c.bf16 %v6419_v49, %v6417_v39  ;;  %9094 = vmatpush1.bf16.msra.mxu0 %v9093_v10  ;;  %v9163_v2 = vpack.c.bf16 %v6424_v37, %v6422_v57  ;;  %v9103_v39 = vpack.c.bf16 %v5694_v44, %v5692_v14  ;;  %v6433_v49 = vld [vmem:[#allocation8 + $0x80] sm:$0xff]  ;;  %v5698_v57 = vld [vmem:[#allocation6 + $0x1d8] sm:$0xff]  ;;  %v5697_v10 = vld [vmem:[#allocation6 + $0x1d0] sm:$0xff] }
 0x470   : > { %8433 = vmatmul.mubr.msk.f32.gmra.mrb[32].mxu0 %vm3138_vm5, %v14079_v30  ;;  %9096 = vmatprep.subr.bf16.mxu0 %v9095_v56  ;;  %v5695_v37 = vld [vmem:[#allocation6 + $0x1c0] sm:$0xff]  ;;  %v9107_v40 = vpack.c.bf16 %v5698_v57, %v5696_v55  ;;  %v6450_v14 = vld [vmem:[#allocation8 + $0x108] sm:$0xff]  ;;  %v6451_v13 = vld [vmem:[#allocation8 + $0x110] sm:$0xff] }
 0x471   : > { %4256 = vmatprep.mubr.f32.mxu0 %v15075_v27  ;;  %v9109_v28 = vpack.c.bf16 %v5697_v10, %v5695_v37  ;;  %v5699_v56 = vld [vmem:[#allocation6 + $0x1e0] sm:$0xff]  ;;  %v6458_v55 = vld [vmem:[#allocation8 + $0x148] sm:$0xff]  ;;  %v6459_v10 = vld [vmem:[#allocation8 + $0x150] sm:$0xff] }
 0x472   : > { %5208 = vmatmul.mubr.f32.gmra.mrb[70].mxu1 %v13961_v31  ;;  %v6426_v31 = vld [vmem:[#allocation8 + $0x48] sm:$0xff]  ;;  %v6457_v37 = vld [vmem:[#allocation8 + $0x140] sm:$0xff] }
 0x473   : > { %5278 = vmatprep.mubr.f32.mxu1 %v15075_v27  ;;  %v9167_v52 = vpack.c.bf16 %v6428_v32, %v6426_v31  ;;  %9098 = vmatpush1.bf16.msra.mxu0 %v9097_v60  ;;  %v5702_v32 = vld [vmem:[#allocation6 + $0x1f8] sm:$0xff]  ;;  %v5701_v60 = vld [vmem:[#allocation6 + $0x1f0] sm:$0xff] }
 0x474   : > { %8434 = vmatmul.mubr.msk.f32.gmra.mrb[34].mxu0 %vm3138_vm5, %v14086_v19  ;;  %9100 = vmatprep.subr.bf16.mxu0 %v9099_v36  ;;  %v9111_v43 = vpack.c.bf16 %v5702_v32, %v5700_v3  ;;  %v9113_v47 = vpack.c.bf16 %v5701_v60, %v5699_v56  ;;  %v6448_v36 = vld [vmem:[#allocation8 + $0xf8] sm:$0xff]  ;;  %v6466_v3 = vld [vmem:[#allocation8 + $0x188] sm:$0xff]  ;;  %v6465_v56 = vld [vmem:[#allocation8 + $0x180] sm:$0xff] }
 0x475   : > { %4262 = vmatprep.mubr.f32.mxu0 %v15075_v27  ;;  %v6467_v60 = vld [vmem:[#allocation8 + $0x190] sm:$0xff] }
 0x476   : > { %8453 = vmatmul.mubr.msk.f32.vlgmr.msra.gmra.mrb[0].mxu1 %vm3138_vm5, %v13967_v8  ;;  %v6430_v8 = vld [vmem:[#allocation8 + $0x68] sm:$0xff] }
 0x477   : > { %5284 = vmatprep.mubr.f32.mxu1 %v15075_v27  ;;  %9162 = vmatpush1.bf16.msra.mxu1 %v9161_v16  ;;  %v9171_v54 = vpack.c.bf16 %v6432_v35, %v6430_v8  ;;  %v6438_v16 = vld [vmem:[#allocation8 + $0xa8] sm:$0xff]  ;;  %v14133_v8 = vld [vmem:[#allocation3 + $0x538] sm:$0xff] }
 0x478   : > { %8435 = vmatmul.mubr.msk.f32.gmra.mrb[36].mxu0 %vm3138_vm5, %v14093_v7  ;;  %9164 = vmatprep.subr.bf16.mxu1 %v9163_v2  ;;  %v9177_v2 = vpack.c.bf16 %v6435_v34, %v6433_v49  ;;  %v9179_v31 = vpack.c.bf16 %v6440_v21, %v6438_v16  ;;  %v6446_v35 = vld [vmem:[#allocation8 + $0xe8] sm:$0xff]  ;;  %v6455_v49 = vld [vmem:[#allocation8 + $0x130] sm:$0xff]  ;;  %v14157_v34 = vld [vmem:[#allocation3 + $0x5e0] sm:$0xff] }
 0x479   : > { %4268 = vmatprep.mubr.f32.mxu0 %v15075_v27  ;;  %9102 = vmatpush1.bf16.msra.mxu0 %v9101_v1  ;;  %v9187_v1 = vpack.c.bf16 %v6448_v36, %v6446_v35  ;;  %v14165_v16 = vld [vmem:[#allocation3 + $0x618] sm:$0xff]  ;;  %v6462_v21 = vld [vmem:[#allocation8 + $0x168] sm:$0xff] }
 0x47a   : > { %8454 = vmatmul.mubr.msk.f32.gmra.mrb[2].mxu1 %vm3138_vm5, %v13974_v5  ;;  %v14109_v5 = vld [vmem:[#allocation3 + $0x490] sm:$0xff]  ;;  %9104 = vmatprep.subr.bf16.mxu0 %v9103_v39  ;;  %v6456_v39 = vld [vmem:[#allocation8 + $0x138] sm:$0xff] }
 0x47b   : > { %5290 = vmatprep.mubr.f32.mxu1 %v15075_v27  ;;  %9166 = vmatpush1.bf16.msra.mxu1 %v9165_v17  ;;  %v6442_v17 = vld [vmem:[#allocation8 + $0xc8] sm:$0xff]  ;;  %v6476_v35 = vld [vmem:[#allocation8 + $0x1d8] sm:$0xff] }
 0x47c   : > { %8436 = vmatmul.mubr.msk.f32.gmra.mrb[38].mxu0 %vm3138_vm5, %v14101_v42  ;;  %9168 = vmatprep.subr.bf16.mxu1 %v9167_v52  ;;  %v9181_v52 = vpack.c.bf16 %v6439_v33, %v6437_v9  ;;  %v9183_v45 = vpack.c.bf16 %v6444_v62, %v6442_v17  ;;  %v6463_v9 = vld [vmem:[#allocation8 + $0x170] sm:$0xff]  ;;  %v14181_v17 = vld [vmem:[#allocation3 + $0x688] sm:$0xff] }
 0x47d   : > { %4274 = vmatprep.mubr.f32.mxu0 %v15075_v27  ;;  %9106 = vmatpush1.bf16.msra.mxu0 %v9105_v23  ;;  %v9195_v23 = vpack.c.bf16 %v6456_v39, %v6454_v0  ;;  %v14173_v33 = vld [vmem:[#allocation3 + $0x650] sm:$0xff]  ;;  %v6470_v62 = vld [vmem:[#allocation8 + $0x1a8] sm:$0xff]  ;;  %v2501_v0 = vld [vmem:[#allocation3 + $0x7d8] sm:$0xff] }
 0x47e   : > { %8455 = vmatmul.mubr.msk.f32.gmra.mrb[4].mxu1 %vm3138_vm5, %v13981_v58  ;;  %v14117_v58 = vld [vmem:[#allocation3 + $0x4c8] sm:$0xff]  ;;  %9108 = vmatprep.subr.bf16.mxu0 %v9107_v40  ;;  %v6464_v40 = vld [vmem:[#allocation8 + $0x178] sm:$0xff] }
 0x47f   : > { %5296 = vmatprep.mubr.f32.mxu1 %v15075_v27  ;;  %9170 = vmatpush1.bf16.msra.mxu1 %v9169_v11  ;;  %v6445_v11 = vld [vmem:[#allocation8 + $0xe0] sm:$0xff] }
 0x480   : > { %8437 = vmatmul.mubr.msk.f32.gmra.mrb[40].mxu0 %vm3138_vm5, %v14109_v5  ;;  %9172 = vmatprep.subr.bf16.mxu1 %v9171_v54  ;;  %v6452_v54 = vld [vmem:[#allocation8 + $0x118] sm:$0xff] }
 0x481   : > { %4280 = vmatprep.mubr.f32.mxu0 %v15075_v27  ;;  %9110 = vmatpush1.bf16.msra.mxu0 %v9109_v28  ;;  %v9191_v44 = vpack.c.bf16 %v6452_v54, %v6450_v14  ;;  %v9203_v28 = vpack.c.bf16 %v6464_v40, %v6462_v21  ;;  %v6480_v14 = vld [vmem:[#allocation8 + $0x1f8] sm:$0xff]  ;;  %v5707_v21 = vld [vmem:[#allocation6 + $0x220] sm:$0xff]  ;;  %v5709_v40 = vld [vmem:[#allocation6 + $0x230] sm:$0xff] }
 0x482   : > { %8456 = vmatmul.mubr.msk.f32.gmra.mrb[6].mxu1 %vm3138_vm5, %v13988_v18  ;;  %v14125_v18 = vld [vmem:[#allocation3 + $0x500] sm:$0xff]  ;;  %9112 = vmatprep.subr.bf16.mxu0 %v9111_v43  ;;  %v6472_v43 = vld [vmem:[#allocation8 + $0x1b8] sm:$0xff] }
 0x483   : > { %5302 = vmatprep.mubr.f32.mxu1 %v15075_v27  ;;  %9174 = vmatpush1.bf16.msra.mxu1 %v9173_v59  ;;  %v6453_v59 = vld [vmem:[#allocation8 + $0x120] sm:$0xff] }
 0x484   : > { %8438 = vmatmul.mubr.msk.f32.gmra.mrb[42].mxu0 %vm3138_vm5, %v14117_v58  ;;  %9176 = vmatprep.subr.bf16.mxu1 %v9175_v12  ;;  %v6460_v12 = vld [vmem:[#allocation8 + $0x158] sm:$0xff] }
 0x485   : > { %4286 = vmatprep.mubr.f32.mxu0 %v15075_v27  ;;  %9114 = vmatpush1.bf16.msra.mxu0 %v9113_v47  ;;  %v9199_v57 = vpack.c.bf16 %v6460_v12, %v6458_v55  ;;  %v9211_v47 = vpack.c.bf16 %v6472_v43, %v6470_v62  ;;  %v5710_v55 = vld [vmem:[#allocation6 + $0x238] sm:$0xff]  ;;  %v6486_v12 = vld [vmem:[#allocation8 + $0x228] sm:$0xff] }
 0x486   : > { %8457 = vmatmul.mubr.msk.f32.gmra.mrb[8].mxu1 %vm3138_vm5, %v13995_v4  ;;  %v9185_v4 = vpack.c.bf16 %v6443_v41, %v6441_v15  ;;  %v14189_v15 = vld [vmem:[#allocation3 + $0x6c0] sm:$0xff]  ;;  %v6474_v41 = vld [vmem:[#allocation8 + $0x1c8] sm:$0xff] }
 0x487   : > { %5308 = vmatprep.mubr.f32.mxu1 %v15075_v27  ;;  %9178 = vmatpush1.bf16.msra.mxu1 %v9177_v2  ;;  %v6461_v2 = vld [vmem:[#allocation8 + $0x160] sm:$0xff]  ;;  %v9215_v36 = vpack.c.bf16 %v6476_v35, %v6474_v41 }
 0x488   : > { %8439 = vmatmul.mubr.msk.f32.gmra.mrb[44].mxu0 %vm3138_vm5, %v14125_v18  ;;  %9180 = vmatprep.subr.bf16.mxu1 %v9179_v31  ;;  %v6468_v31 = vld [vmem:[#allocation8 + $0x198] sm:$0xff] }
 0x489   : > { %4292 = vmatprep.mubr.f32.mxu0 %v15075_v27  ;;  %v9207_v32 = vpack.c.bf16 %v6468_v31, %v6466_v3  ;;  %v6485_v3 = vld [vmem:[#allocation8 + $0x220] sm:$0xff]  ;;  %v6487_v31 = vld [vmem:[#allocation8 + $0x230] sm:$0xff] }
 0x48a   : > { %8458 = vmatmul.mubr.msk.f32.gmra.mrb[10].mxu1 %vm3138_vm5, %v14002_v50  ;;  %v9189_v50 = vpack.c.bf16 %v6447_v61, %v6445_v11  ;;  %v14197_v11 = vld [vmem:[#allocation3 + $0x6f8] sm:$0xff]  ;;  %v6478_v61 = vld [vmem:[#allocation8 + $0x1e8] sm:$0xff] }
 0x48b   : > { %5314 = vmatprep.mubr.f32.mxu1 %v15075_v27  ;;  %9182 = vmatpush1.bf16.msra.mxu1 %v9181_v52  ;;  %v6469_v52 = vld [vmem:[#allocation8 + $0x1a0] sm:$0xff]  ;;  %v9219_v54 = vpack.c.bf16 %v6480_v14, %v6478_v61  ;;  %v5716_v61 = vld [vmem:[#allocation6 + $0x268] sm:$0xff] }
 0x48c   : > { %8440 = vmatmul.mubr.msk.f32.gmra.mrb[46].mxu0 %vm3138_vm5, %v14133_v8  ;;  %9184 = vmatprep.subr.bf16.mxu1 %v9183_v45  ;;  %v6471_v45 = vld [vmem:[#allocation8 + $0x1b0] sm:$0xff] }
 0x48d   : > { %4298 = vmatprep.mubr.f32.mxu0 %v15075_v27 }
 0x48e   : > { %8459 = vmatmul.mubr.msk.f32.gmra.mrb[12].mxu1 %vm3138_vm5, %v14009_v51  ;;  %v9193_v51 = vpack.c.bf16 %v6451_v13, %v6449_v24  ;;  %v2480_v24 = vld [vmem:[#allocation3 + $0x730] sm:$0xff]  ;;  %v2487_v13 = vld [vmem:[#allocation3 + $0x768] sm:$0xff] }
 0x48f   : > { %5320 = vmatprep.mubr.f32.mxu1 %v15075_v27  ;;  %9186 = vmatpush1.bf16.msra.mxu1 %v9185_v4  ;;  %v6473_v4 = vld [vmem:[#allocation8 + $0x1c0] sm:$0xff] }
 0x490   : > { %8441 = vmatmul.mubr.msk.f32.gmra.mrb[48].mxu0 %vm3138_vm5, %v14141_v63  ;;  %9188 = vmatprep.subr.bf16.mxu1 %v9187_v1  ;;  %v6475_v1 = vld [vmem:[#allocation8 + $0x1d0] sm:$0xff] }
 0x491   : > { %4304 = vmatprep.mubr.f32.mxu0 %v15075_v27 }
 0x492   : > { %8460 = vmatmul.mubr.msk.f32.gmra.mrb[14].mxu1 %vm3138_vm5, %v14016_v29  ;;  %v9197_v29 = vpack.c.bf16 %v6455_v49, %v6453_v59  ;;  %v5708_v59 = vld [vmem:[#allocation6 + $0x228] sm:$0xff]  ;;  %v14276_v49 = vpop.permute.xlu1 %2965 }
 0x493   : > { %5326 = vmatprep.mubr.f32.mxu1 %v15075_v27  ;;  %9190 = vmatpush1.bf16.msra.mxu1 %v9189_v50  ;;  %v6477_v50 = vld [vmem:[#allocation8 + $0x1e0] sm:$0xff] }
 0x494   : > { %8442 = vmatmul.mubr.msk.f32.gmra.mrb[50].mxu0 %vm3138_vm5, %v14149_v26  ;;  %9192 = vmatprep.subr.bf16.mxu1 %v9191_v44  ;;  %v6479_v44 = vld [vmem:[#allocation8 + $0x1f0] sm:$0xff] }
 0x495   : > { %4310 = vmatprep.mubr.f32.mxu0 %v15075_v27 }
 0x496   : > { %8461 = vmatmul.mubr.msk.f32.gmra.mrb[16].mxu1 %vm3138_vm5, %v14023_v53  ;;  %v9201_v53 = vpack.c.bf16 %v6459_v10, %v6457_v37  ;;  %v14281_v62 = vpop.permute.xlu1 %2970 }
 0x497   : > { %5332 = vmatprep.mubr.f32.mxu1 %v15075_v27  ;;  %9194 = vmatpush1.bf16.msra.mxu1 %v9193_v51  ;;  %v6481_v51 = vld [vmem:[#allocation8 + $0x200] sm:$0xff] }
 0x498   : > { %8443 = vmatmul.mubr.msk.f32.gmra.mrb[52].mxu0 %vm3138_vm5, %v14157_v34  ;;  %9196 = vmatprep.subr.bf16.mxu1 %v9195_v23  ;;  %v6483_v23 = vld [vmem:[#allocation8 + $0x210] sm:$0xff] }
 0x499   : > { %4316 = vmatprep.mubr.f32.mxu0 %v15075_v27 }
 0x49a   : > { %8462 = vmatmul.mubr.msk.f32.gmra.mrb[18].mxu1 %vm3138_vm5, %v14030_v6  ;;  %v9205_v6 = vpack.c.bf16 %v6463_v9, %v6461_v2  ;;  %v9119_v9 = vpack.c.bf16 %v5710_v55, %v5708_v59  ;;  %v14289_v59 = vpop.permute.xlu1 %2980 }
 0x49b   : > { %5338 = vmatprep.mubr.f32.mxu1 %v15075_v27  ;;  %9198 = vmatpush1.bf16.msra.mxu1 %v9197_v29  ;;  %v6488_v29 = vld [vmem:[#allocation8 + $0x238] sm:$0xff] }
 0x49c   : > { %8444 = vmatmul.mubr.msk.f32.gmra.mrb[54].mxu0 %vm3138_vm5, %v14165_v16  ;;  %9200 = vmatprep.subr.bf16.mxu1 %v9199_v57 }
 0x49d   : > { %4322 = vmatprep.mubr.f32.mxu0 %v15075_v27 }
 0x49e   : > { %8463 = vmatmul.mubr.msk.f32.gmra.mrb[20].mxu1 %vm3138_vm5, %v14037_v25  ;;  %v9209_v25 = vpack.c.bf16 %v6467_v60, %v6465_v56  ;;  %v5714_v56 = vld [vmem:[#allocation6 + $0x258] sm:$0xff]  ;;  %v6490_v60 = vld [vmem:[#allocation8 + $0x248] sm:$0xff] }
 0x49f   : > { %5344 = vmatprep.mubr.f32.mxu1 %v15075_v27  ;;  %9202 = vmatpush1.bf16.msra.mxu1 %v9201_v53 }
 0x4a0   : > { %8445 = vmatmul.mubr.msk.f32.gmra.mrb[56].mxu0 %vm3138_vm5, %v14173_v33  ;;  %9204 = vmatprep.subr.bf16.mxu1 %v9203_v28 }
 0x4a1   : > { %4328 = vmatprep.mubr.f32.mxu0 %v15075_v27 }
 0x4a2   : > { %8464 = vmatmul.mubr.msk.f32.gmra.mrb[22].mxu1 %vm3138_vm5, %v14044_v22  ;;  %v9213_v22 = vpack.c.bf16 %v6471_v45, %v6469_v52  ;;  %v9229_v52 = vpack.c.bf16 %v6487_v31, %v6485_v3  ;;  %v5711_v45 = vld [vmem:[#allocation6 + $0x240] sm:$0xff]  ;;  %v5726_v3 = vld [vmem:[#allocation6 + $0x2b8] sm:$0xff]  ;;  %v6502_v31 = vld [vmem:[#allocation8 + $0x2a8] sm:$0xff] }
 0x4a3   : > { %5350 = vmatprep.mubr.f32.mxu1 %v15075_v27  ;;  %9206 = vmatpush1.bf16.msra.mxu1 %v9205_v6  ;;  %v5712_v6 = vld [vmem:[#allocation6 + $0x248] sm:$0xff] }
 0x4a4   : > { %8446 = vmatmul.mubr.msk.f32.gmra.mrb[58].mxu0 %vm3138_vm5, %v14181_v17  ;;  %9208 = vmatprep.subr.bf16.mxu1 %v9207_v32 }
 0x4a5   : > { %4334 = vmatprep.mubr.f32.mxu0 %v15075_v27 }
 0x4a6   : > { %8465 = vmatmul.mubr.msk.f32.gmra.mrb[24].mxu1 %vm3138_vm5, %v14051_v38  ;;  %v9217_v38 = vpack.c.bf16 %v6475_v1, %v6473_v4  ;;  %v6489_v1 = vld [vmem:[#allocation8 + $0x240] sm:$0xff] }
 0x4a7   : > { %5356 = vmatprep.mubr.f32.mxu1 %v15075_v27  ;;  %9210 = vmatpush1.bf16.msra.mxu1 %v9209_v25 }
 0x4a8   : > { %8447 = vmatmul.mubr.msk.f32.gmra.mrb[60].mxu0 %vm3138_vm5, %v14189_v15  ;;  %9212 = vmatprep.subr.bf16.mxu1 %v9211_v47  ;;  %v9121_v47 = vpack.c.bf16 %v5709_v40, %v5707_v21 }
 0x4a9   : > { %4340 = vmatprep.mubr.f32.mxu0 %v15075_v27 }
 0x4aa   : > { %8466 = vmatmul.mubr.msk.f32.gmra.mrb[26].mxu1 %vm3138_vm5, %v14058_v48  ;;  %v9221_v48 = vpack.c.bf16 %v6479_v44, %v6477_v50  ;;  %v6496_v50 = vld [vmem:[#allocation8 + $0x278] sm:$0xff] }
 0x4ab   : > { %5362 = vmatprep.mubr.f32.mxu1 %v15075_v27  ;;  %9214 = vmatpush1.bf16.msra.mxu1 %v9213_v22 }
 0x4ac   : > { %8448 = vmatmul.mubr.msk.f32.gmra.mrb[62].mxu0 %vm3138_vm5, %v14197_v11  ;;  %9216 = vmatprep.subr.bf16.mxu1 %v9215_v36  ;;  %v9123_v36 = vpack.c.bf16 %v5714_v56, %v5712_v6  ;;  %v6504_v6 = vld [vmem:[#allocation8 + $0x2b8] sm:$0xff] }
 0x4ad   : > { %4346 = vmatprep.mubr.f32.mxu0 %v15075_v27 }
 0x4ae   : > { %8467 = vmatmul.mubr.msk.f32.gmra.mrb[28].mxu1 %vm3138_vm5, %v14065_v20  ;;  %v2494_v20 = vld [vmem:[#allocation3 + $0x7a0] sm:$0xff] }
 0x4af   : > { %5368 = vmatprep.mubr.f32.mxu1 %v15075_v27  ;;  %9218 = vmatpush1.bf16.msra.mxu1 %v9217_v38  ;;  %v5718_v38 = vld [vmem:[#allocation6 + $0x278] sm:$0xff] }
 0x4b0   : > { %8449 = vmatmul.mubr.msk.f32.gmra.mrb[64].mxu0 %vm3138_vm5, %v2480_v24  ;;  %9220 = vmatprep.subr.bf16.mxu1 %v9219_v54  ;;  %v6494_v54 = vld [vmem:[#allocation8 + $0x268] sm:$0xff] }
 0x4b1   : > { %4352 = vmatprep.mubr.f32.mxu0 %v15075_v27 }
 0x4b2   : > { %8468 = vmatmul.mubr.msk.f32.gmra.mrb[30].mxu1 %vm3138_vm5, %v14072_v46  ;;  %v5704_v46 = vld [vmem:[#allocation6 + $0x208] sm:$0xff] }
 0x4b3   : > { %5374 = vmatprep.mubr.f32.mxu1 %v15075_v27  ;;  %9222 = vmatpush1.bf16.msra.mxu1 %v9221_v48 }
 0x4b4   : > { %8450 = vmatmul.mubr.msk.f32.gmra.mrb[66].mxu0 %vm3138_vm5, %v2487_v13 }
 0x4b5   : > { %4358 = vmatprep.mubr.f32.mxu0 %v15075_v27 }
 0x4b6   : > { %8469 = vmatmul.mubr.msk.f32.gmra.mrb[32].mxu1 %vm3138_vm5, %v14079_v30  ;;  %v5706_v30 = vld [vmem:[#allocation6 + $0x218] sm:$0xff] }
 0x4b7   : > { %5380 = vmatprep.mubr.f32.mxu1 %v15075_v27 }
 0x4b8   : > { %8451 = vmatmul.mubr.msk.f32.gmra.mrb[68].mxu0 %vm3138_vm5, %v2494_v20 }
 0x4b9   : > { %4364 = vmatprep.mubr.f32.mxu0 %v15075_v27 }
 0x4ba   : > { %8470 = vmatmul.mubr.msk.f32.gmra.mrb[34].mxu1 %vm3138_vm5, %v14086_v19  ;;  %v6482_v19 = vld [vmem:[#allocation8 + $0x208] sm:$0xff] }
 0x4bb   : > { %5386 = vmatprep.mubr.f32.mxu1 %v15075_v27 }
 0x4bc   : > { %8452 = vmatmul.mubr.msk.f32.gmra.mrb[70].mxu0 %vm3138_vm5, %v2501_v0 }
 0x4be   : > { %8471 = vmatmul.mubr.msk.f32.gmra.mrb[36].mxu1 %vm3138_vm5, %v14093_v7  ;;  %v9115_v7 = vpack.c.bf16 %v5706_v30, %v5704_v46  ;;  %v5717_v46 = vld [vmem:[#allocation6 + $0x270] sm:$0xff] }
 0x4bf   : > { %5392 = vmatprep.mubr.f32.mxu1 %v15075_v27 }
 0x4c0   : > { %9116 = vmatprep.subr.bf16.mxu0 %v9115_v7 }
 0x4c2   : > { %8472 = vmatmul.mubr.msk.f32.gmra.mrb[38].mxu1 %vm3138_vm5, %v14101_v42  ;;  %v6484_v42 = vld [vmem:[#allocation8 + $0x218] sm:$0xff] }
 0x4c3   : > { %5398 = vmatprep.mubr.f32.mxu1 %v15075_v27 }
 0x4c6   : > { %8473 = vmatmul.mubr.msk.f32.gmra.mrb[40].mxu1 %vm3138_vm5, %v14109_v5  ;;  %v9223_v5 = vpack.c.bf16 %v6484_v42, %v6482_v19  ;;  %v9127_v42 = vpack.c.bf16 %v5718_v38, %v5716_v61  ;;  %v6506_v61 = vld [vmem:[#allocation8 + $0x2c8] sm:$0xff]  ;;  %v14297_v38 = vpop.permute.xlu1 %2990 }
 0x4c7   : > { %5404 = vmatprep.mubr.f32.mxu1 %v15075_v27 }
 0x4c8   : > { %9224 = vmatprep.subr.bf16.mxu1 %v9223_v5  ;;  %v9235_v5 = vpack.c.bf16 %v6496_v50, %v6494_v54 }
 0x4ca   : > { %8474 = vmatmul.mubr.msk.f32.gmra.mrb[42].mxu1 %vm3138_vm5, %v14117_v58  ;;  %v14273_v58 = vpop.permute.xlu0 %2960 }
 0x4cb   : > { %5410 = vmatprep.mubr.f32.mxu1 %v15075_v27 }
 0x4ce   : > { %8475 = vmatmul.mubr.msk.f32.gmra.mrb[44].mxu1 %vm3138_vm5, %v14125_v18  ;;  %v14285_v44 = vpop.permute.xlu0 %2975 }
 0x4cf   : > { %5416 = vmatprep.mubr.f32.mxu1 %v15075_v27 }
 0x4d2   : > { %8476 = vmatmul.mubr.msk.f32.gmra.mrb[46].mxu1 %vm3138_vm5, %v14133_v8  ;;  %v5703_v8 = vld [vmem:[#allocation6 + $0x200] sm:$0xff] }
 0x4d3   : > { %5422 = vmatprep.mubr.f32.mxu1 %v15075_v27 }
 0x4d6   : > { %8477 = vmatmul.mubr.msk.f32.gmra.mrb[48].mxu1 %vm3138_vm5, %v14141_v63  ;;  %v5705_v63 = vld [vmem:[#allocation6 + $0x210] sm:$0xff] }
 0x4d7   : > { %5428 = vmatprep.mubr.f32.mxu1 %v15075_v27  ;;  %v9117_v10 = vpack.c.bf16 %v5705_v63, %v5703_v8  ;;  %v6495_v8 = vld [vmem:[#allocation8 + $0x270] sm:$0xff]  ;;  %v5720_v63 = vld [vmem:[#allocation6 + $0x288] sm:$0xff] }
 0x4da   : > { %8478 = vmatmul.mubr.msk.f32.gmra.mrb[50].mxu1 %vm3138_vm5, %v14149_v26 }
 0x4db   : > { %5434 = vmatprep.mubr.f32.mxu1 %v15075_v27 }
 0x4de   : > { %8479 = vmatmul.mubr.msk.f32.gmra.mrb[52].mxu1 %vm3138_vm5, %v14157_v34 }
 0x4df   : > { %5440 = vmatprep.mubr.f32.mxu1 %v15075_v27 }
 0x4e2   : > { %8480 = vmatmul.mubr.msk.f32.gmra.mrb[54].mxu1 %vm3138_vm5, %v14165_v16  ;;  %v9225_v16 = vpack.c.bf16 %v6483_v23, %v6481_v51  ;;  %v6498_v51 = vld [vmem:[#allocation8 + $0x288] sm:$0xff]  ;;  %v6500_v23 = vld [vmem:[#allocation8 + $0x298] sm:$0xff] }
 0x4e3   : > { %5446 = vmatprep.mubr.f32.mxu1 %v15075_v27 }
 0x4e6   : > { %8481 = vmatmul.mubr.msk.f32.gmra.mrb[56].mxu1 %vm3138_vm5, %v14173_v33  ;;  %v9227_v33 = vpack.c.bf16 %v6488_v29, %v6486_v12 }
 0x4e7   : > { %5452 = vmatprep.mubr.f32.mxu1 %v15075_v27 }
 0x4ea   : > { %8482 = vmatmul.mubr.msk.f32.gmra.mrb[58].mxu1 %vm3138_vm5, %v14181_v17  ;;  %v6492_v17 = vld [vmem:[#allocation8 + $0x258] sm:$0xff] }
 0x4eb   : > { %5458 = vmatprep.mubr.f32.mxu1 %v15075_v27  ;;  %v9231_v4 = vpack.c.bf16 %v6492_v17, %v6490_v60 }
 0x4ee   : > { %8483 = vmatmul.mubr.msk.f32.gmra.mrb[60].mxu1 %vm3138_vm5, %v14189_v15  ;;  %v5713_v15 = vld [vmem:[#allocation6 + $0x250] sm:$0xff] }
 0x4ef   : > { %5464 = vmatprep.mubr.f32.mxu1 %v15075_v27 }
 0x4f2   : > { %8484 = vmatmul.mubr.msk.f32.gmra.mrb[62].mxu1 %vm3138_vm5, %v14197_v11  ;;  %v6491_v11 = vld [vmem:[#allocation8 + $0x250] sm:$0xff] }
 0x4f3   : > { %5470 = vmatprep.mubr.f32.mxu1 %v15075_v27 }
 0x4f6   : > { %8485 = vmatmul.mubr.msk.f32.gmra.mrb[64].mxu1 %vm3138_vm5, %v2480_v24 }
 0x4f7   : > { %5476 = vmatprep.mubr.f32.mxu1 %v15075_v27 }
 0x4fa   : > { %8486 = vmatmul.mubr.msk.f32.gmra.mrb[66].mxu1 %vm3138_vm5, %v2487_v13  ;;  %v9125_v13 = vpack.c.bf16 %v5713_v15, %v5711_v45 }
 0x4fb   : > { %5482 = vmatprep.mubr.f32.mxu1 %v15075_v27 }
 0x4fe   : > { %8487 = vmatmul.mubr.msk.f32.gmra.mrb[68].mxu1 %vm3138_vm5, %v2494_v20  ;;  %v9233_v20 = vpack.c.bf16 %v6491_v11, %v6489_v1  ;;  %v5730_v11 = vld [vmem:[#allocation6 + $0x2d8] sm:$0xff] }
 0x4ff   : > { %5488 = vmatprep.mubr.f32.mxu1 %v15075_v27 }
 0x502   : > { %8488 = vmatmul.mubr.msk.f32.gmra.mrb[70].mxu1 %vm3138_vm5, %v2501_v0  ;;  %v5715_v0 = vld [vmem:[#allocation6 + $0x260] sm:$0xff] }
 0x503   : > { %v4156_v18 = vpop.f32.mrb[0].mxu0  ;;  %v9129_v12 = vpack.c.bf16 %v5717_v46, %v5715_v0 }
 0x504   : > { %v9411_v26 = vadd.f32 %v4156_v18, %v14273_v58  ;;  %v4158_v39 = vpop.f32.mrb[1].mxu0  ;;  %v6493_v18 = vld [vmem:[#allocation8 + $0x260] sm:$0xff] }
 0x505   : > { %v9412_v34 = vadd.f32 %v4158_v39, %v14273_v58  ;;  %v5722_v39 = vld [vmem:[#allocation6 + $0x298] sm:$0xff]  ;;  %v9237_v29 = vpack.c.bf16 %v6495_v8, %v6493_v18  ;;  %v5732_v18 = vld [vmem:[#allocation6 + $0x2e8] sm:$0xff] }
 0x506   : > { %v5495_v53 = vmax.f32 %v9411_v26, 0.0  ;;  %v9131_v40 = vpack.c.bf16 %v5722_v39, %v5720_v63  ;;  %v5734_v63 = vld [vmem:[#allocation6 + $0x2f8] sm:$0xff] }
 0x507   : > { %v5496_v57 = vmax.f32 %v9412_v34, 0.0  ;;  %v4162_v37 = vpop.f32.mrb[2].mxu0  ;;  %v6512_v39 = vld [vmem:[#allocation8 + $0x2f8] sm:$0xff] }
 0x508   : > { %v9413_v28 = vadd.f32 %v4162_v37, %v14276_v49  ;;  %v4164_v2 = vpop.f32.mrb[3].mxu0  ;;  %v5721_v37 = vld [vmem:[#allocation6 + $0x290] sm:$0xff] }
 0x509   : > { %v9414_v32 = vadd.f32 %v4164_v2, %v14276_v49  ;;  %5919 = vmatprep.mubr.f32.mxu0 %v5496_v57  ;;  %6589 = vmatprep.mubr.f32.mxu1 %v5496_v57  ;;  %v5719_v57 = vld [vmem:[#allocation6 + $0x280] sm:$0xff]  ;;  %v6499_v2 = vld [vmem:[#allocation8 + $0x290] sm:$0xff] }
 0x50a   : > { %5920 = vmatmul.mubr.f32.vlgmr.msra.gmra.mrb[72].mxu0 %v5495_v53  ;;  %6590 = vmatmul.mubr.f32.vlgmr.msra.gmra.mrb[72].mxu1 %v5495_v53  ;;  %v5499_v41 = vmax.f32 %v9413_v28, 0.0  ;;  %v9239_v53 = vpack.c.bf16 %v6500_v23, %v6498_v51  ;;  %v6497_v28 = vld [vmem:[#allocation8 + $0x280] sm:$0xff]  ;;  %v9133_v17 = vpack.c.bf16 %v5721_v37, %v5719_v57  ;;  %v5733_v57 = vld [vmem:[#allocation6 + $0x2f0] sm:$0xff] }
 0x50b   : > { %v5500_v43 = vmax.f32 %v9414_v32, 0.0  ;;  %v4168_v25 = vpop.f32.mrb[4].mxu0  ;;  %9118 = vmatpush1.bf16.msra.mxu0 %v9117_v10  ;;  %9226 = vmatpush1.bf16.msra.mxu1 %v9225_v16  ;;  %v14293_v32 = vpop.permute.xlu0 %2985 }
 0x50c   : > { %v9415_v35 = vadd.f32 %v4168_v25, %v14281_v62  ;;  %v4170_v22 = vpop.f32.mrb[5].mxu0  ;;  %9120 = vmatprep.subr.bf16.mxu0 %v9119_v9  ;;  %9228 = vmatprep.subr.bf16.mxu1 %v9227_v33  ;;  %v5724_v9 = vld [vmem:[#allocation6 + $0x2a8] sm:$0xff]  ;;  %v5723_v25 = vld [vmem:[#allocation6 + $0x2a0] sm:$0xff] }
 0x50d   : > { %v9416_v14 = vadd.f32 %v4170_v22, %v14281_v62  ;;  %5925 = vmatprep.mubr.f32.mxu0 %v5500_v43  ;;  %6595 = vmatprep.mubr.f32.mxu1 %v5500_v43  ;;  %v9241_v43 = vpack.c.bf16 %v6499_v2, %v6497_v28  ;;  %v6501_v22 = vld [vmem:[#allocation8 + $0x2a0] sm:$0xff]  ;;  %v6511_v28 = vld [vmem:[#allocation8 + $0x2f0] sm:$0xff]  ;;  %v5736_v2 = vld [vmem:[#allocation6 + $0x308] sm:$0xff] }
 0x50e   : > { %5926 = vmatmul.mubr.f32.gmra.mrb[74].mxu0 %v5499_v41  ;;  %6596 = vmatmul.mubr.f32.gmra.mrb[74].mxu1 %v5499_v41  ;;  %v5503_v30 = vmax.f32 %v9415_v35, 0.0  ;;  %v9135_v41 = vpack.c.bf16 %v5726_v3, %v5724_v9  ;;  %v9243_v35 = vpack.c.bf16 %v6504_v6, %v6502_v31  ;;  %v6514_v3 = vld [vmem:[#allocation8 + $0x308] sm:$0xff]  ;;  %v6516_v31 = vld [vmem:[#allocation8 + $0x318] sm:$0xff]  ;;  %v14305_v6 = vpop.permute.xlu1 %3000 }
 0x50f   : > { %v5504_v24 = vmax.f32 %v9416_v14, 0.0  ;;  %v4174_v48 = vpop.f32.mrb[6].mxu0  ;;  %9122 = vmatpush1.bf16.msra.mxu0 %v9121_v47  ;;  %9230 = vmatpush1.bf16.msra.mxu1 %v9229_v52  ;;  %v5725_v47 = vld [vmem:[#allocation6 + $0x2b0] sm:$0xff]  ;;  %v6508_v14 = vld [vmem:[#allocation8 + $0x2d8] sm:$0xff]  ;;  %v14301_v51 = vpop.permute.xlu0 %2995 }
 0x510   : > { %v9417_v19 = vadd.f32 %v4174_v48, %v14285_v44  ;;  %v4176_v7 = vpop.f32.mrb[7].mxu0  ;;  %9124 = vmatprep.subr.bf16.mxu0 %v9123_v36  ;;  %9232 = vmatprep.subr.bf16.mxu1 %v9231_v4  ;;  %v6503_v36 = vld [vmem:[#allocation8 + $0x2b0] sm:$0xff]  ;;  %v5728_v4 = vld [vmem:[#allocation6 + $0x2c8] sm:$0xff] }
 0x511   : > { %v9418_v26 = vadd.f32 %v4176_v7, %v14285_v44  ;;  %5931 = vmatprep.mubr.f32.mxu0 %v5504_v24  ;;  %6601 = vmatprep.mubr.f32.mxu1 %v5504_v24  ;;  %v9137_v24 = vpack.c.bf16 %v5725_v47, %v5723_v25  ;;  %v9245_v48 = vpack.c.bf16 %v6503_v36, %v6501_v22  ;;  %v5735_v25 = vld [vmem:[#allocation6 + $0x300] sm:$0xff]  ;;  %v5737_v47 = vld [vmem:[#allocation6 + $0x310] sm:$0xff] }
 0x512   : > { %5932 = vmatmul.mubr.f32.gmra.mrb[76].mxu0 %v5503_v30  ;;  %6602 = vmatmul.mubr.f32.gmra.mrb[76].mxu1 %v5503_v30  ;;  %v5507_v10 = vmax.f32 %v9417_v19, 0.0  ;;  %v9139_v19 = vpack.c.bf16 %v5730_v11, %v5728_v4  ;;  %v9247_v7 = vpack.c.bf16 %v6508_v14, %v6506_v61  ;;  %v6513_v22 = vld [vmem:[#allocation8 + $0x300] sm:$0xff]  ;;  %v6515_v36 = vld [vmem:[#allocation8 + $0x310] sm:$0xff]  ;;  %v5740_v4 = vld [vmem:[#allocation6 + $0x328] sm:$0xff] }
 0x513   : > { %v5508_v34 = vmax.f32 %v9418_v26, 0.0  ;;  %v4180_v55 = vpop.f32.mrb[8].mxu0  ;;  %9126 = vmatpush1.bf16.msra.mxu0 %v9125_v13  ;;  %9234 = vmatpush1.bf16.msra.mxu1 %v9233_v20  ;;  %v5727_v13 = vld [vmem:[#allocation6 + $0x2c0] sm:$0xff]  ;;  %v5729_v20 = vld [vmem:[#allocation6 + $0x2d0] sm:$0xff]  ;;  %v6510_v26 = vld [vmem:[#allocation8 + $0x2e8] sm:$0xff] }
 0x514   : > { %v9419_v16 = vadd.f32 %v4180_v55, %v14289_v59  ;;  %v4182_v21 = vpop.f32.mrb[9].mxu0  ;;  %9128 = vmatprep.subr.bf16.mxu0 %v9127_v42  ;;  %9236 = vmatprep.subr.bf16.mxu1 %v9235_v5  ;;  %v6505_v42 = vld [vmem:[#allocation8 + $0x2c0] sm:$0xff]  ;;  %v6507_v5 = vld [vmem:[#allocation8 + $0x2d0] sm:$0xff]  ;;  %v9141_v55 = vpack.c.bf16 %v5729_v20, %v5727_v13  ;;  %v5742_v11 = vld [vmem:[#allocation6 + $0x338] sm:$0xff]  ;;  %v9257_v13 = vpack.c.bf16 %v6515_v36, %v6513_v22 }
 0x515   : > { %v9420_v33 = vadd.f32 %v4182_v21, %v14289_v59  ;;  %5937 = vmatprep.mubr.f32.mxu0 %v5508_v34  ;;  %6607 = vmatprep.mubr.f32.mxu1 %v5508_v34  ;;  %v9143_v21 = vpack.c.bf16 %v5734_v63, %v5732_v18  ;;  %v6518_v61 = vld [vmem:[#allocation8 + $0x328] sm:$0xff]  ;;  %v6520_v14 = vld [vmem:[#allocation8 + $0x338] sm:$0xff]  ;;  %v5739_v20 = vld [vmem:[#allocation6 + $0x320] sm:$0xff] }
 0x516   : > { %5938 = vmatmul.mubr.f32.gmra.mrb[78].mxu0 %v5507_v10  ;;  %6608 = vmatmul.mubr.f32.gmra.mrb[78].mxu1 %v5507_v10  ;;  %v5511_v52 = vmax.f32 %v9419_v16, 0.0  ;;  %v6519_v18 = vld [vmem:[#allocation8 + $0x330] sm:$0xff] }
 0x517   : > { %v5512_v56 = vmax.f32 %v9420_v33, 0.0  ;;  %v4186_v60 = vpop.f32.mrb[10].mxu0  ;;  %9130 = vmatpush1.bf16.msra.mxu0 %v9129_v12  ;;  %9238 = vmatpush1.bf16.msra.mxu1 %v9237_v29  ;;  %v9249_v12 = vpack.c.bf16 %v6507_v5, %v6505_v42  ;;  %v5731_v29 = vld [vmem:[#allocation6 + $0x2e0] sm:$0xff]  ;;  %v5738_v33 = vld [vmem:[#allocation6 + $0x318] sm:$0xff]  ;;  %v9259_v42 = vpack.c.bf16 %v6520_v14, %v6518_v61 }
 0x518   : > { %v9421_v45 = vadd.f32 %v4186_v60, %v14293_v32  ;;  %v4188_v15 = vpop.f32.mrb[11].mxu0  ;;  %9132 = vmatprep.subr.bf16.mxu0 %v9131_v40  ;;  %9240 = vmatprep.subr.bf16.mxu1 %v9239_v53  ;;  %v9251_v40 = vpack.c.bf16 %v6512_v39, %v6510_v26  ;;  %v6509_v53 = vld [vmem:[#allocation8 + $0x2e0] sm:$0xff]  ;;  %v5746_v26 = vld [vmem:[#allocation6 + $0x358] sm:$0xff]  ;;  %v6522_v39 = vld [vmem:[#allocation8 + $0x348] sm:$0xff] }
 0x519   : > { %v9422_v1 = vadd.f32 %v4188_v15, %v14293_v32  ;;  %5943 = vmatprep.mubr.f32.mxu0 %v5512_v56  ;;  %6613 = vmatprep.mubr.f32.mxu1 %v5512_v56  ;;  %v6517_v5 = vld [vmem:[#allocation8 + $0x320] sm:$0xff] }
 0x51a   : > { %5944 = vmatmul.mubr.f32.gmra.mrb[80].mxu0 %v5511_v52  ;;  %6614 = vmatmul.mubr.f32.gmra.mrb[80].mxu1 %v5511_v52  ;;  %v5515_v0 = vmax.f32 %v9421_v45, 0.0 }
 0x51b   : > { %v5516_v54 = vmax.f32 %v9422_v1, 0.0  ;;  %v4192_v50 = vpop.f32.mrb[12].mxu0  ;;  %9134 = vmatpush1.bf16.msra.mxu0 %v9133_v17  ;;  %9242 = vmatpush1.bf16.msra.mxu1 %v9241_v43  ;;  %v9145_v17 = vpack.c.bf16 %v5733_v57, %v5731_v29  ;;  %v9253_v43 = vpack.c.bf16 %v6511_v28, %v6509_v53  ;;  %v9261_v57 = vpack.c.bf16 %v6519_v18, %v6517_v5  ;;  %v5745_v28 = vld [vmem:[#allocation6 + $0x350] sm:$0xff] }
 0x51c   : > { %v9423_v46 = vadd.f32 %v4192_v50, %v14297_v38  ;;  %v4194_v30 = vpop.f32.mrb[13].mxu0  ;;  %9136 = vmatprep.subr.bf16.mxu0 %v9135_v41  ;;  %9244 = vmatprep.subr.bf16.mxu1 %v9243_v35  ;;  %v9147_v41 = vpack.c.bf16 %v5738_v33, %v5736_v2  ;;  %v9255_v35 = vpack.c.bf16 %v6516_v31, %v6514_v3  ;;  %v6521_v2 = vld [vmem:[#allocation8 + $0x340] sm:$0xff] }
 0x51d   : > { %v9424_v8 = vadd.f32 %v4194_v30, %v14297_v38  ;;  %5949 = vmatprep.mubr.f32.mxu0 %v5516_v54  ;;  %6619 = vmatprep.mubr.f32.mxu1 %v5516_v54  ;;  %v14309_v54 = vpop.permute.xlu0 %3005 }
 0x51e   : > { %5950 = vmatmul.mubr.f32.gmra.mrb[82].mxu0 %v5515_v0  ;;  %6620 = vmatmul.mubr.f32.gmra.mrb[82].mxu1 %v5515_v0  ;;  %v5519_v37 = vmax.f32 %v9423_v46, 0.0  ;;  %v5741_v0 = vld [vmem:[#allocation6 + $0x330] sm:$0xff] }
 0x51f   : > { %v5520_v23 = vmax.f32 %v9424_v8, 0.0  ;;  %v4198_v34 = vpop.f32.mrb[14].mxu0  ;;  %9138 = vmatpush1.bf16.msra.mxu0 %v9137_v24  ;;  %9246 = vmatpush1.bf16.msra.mxu1 %v9245_v48  ;;  %v9149_v48 = vpack.c.bf16 %v5737_v47, %v5735_v25  ;;  %v5744_v8 = vld [vmem:[#allocation6 + $0x348] sm:$0xff]  ;;  %v9153_v29 = vpack.c.bf16 %v5741_v0, %v5739_v20 }
 0x520   : > { %v9425_v10 = vadd.f32 %v4198_v34, %v14301_v51  ;;  %v4200_v16 = vpop.f32.mrb[15].mxu0  ;;  %9140 = vmatprep.subr.bf16.mxu0 %v9139_v19  ;;  %9248 = vmatprep.subr.bf16.mxu1 %v9247_v7  ;;  %v9151_v7 = vpack.c.bf16 %v5742_v11, %v5740_v4  ;;  %v14313_v34 = vpop.permute.xlu1 %3010 }
 0x521   : > { %v9426_v9 = vadd.f32 %v4200_v16, %v14301_v51  ;;  %5955 = vmatprep.mubr.f32.mxu0 %v5520_v23  ;;  %6625 = vmatprep.mubr.f32.mxu1 %v5520_v23  ;;  %v6524_v23 = vld [vmem:[#allocation8 + $0x358] sm:$0xff]  ;;  %v14317_v3 = vpop.permute.xlu0 %3015 }
 0x522   : > { %5956 = vmatmul.mubr.f32.gmra.mrb[84].mxu0 %v5519_v37  ;;  %6626 = vmatmul.mubr.f32.gmra.mrb[84].mxu1 %v5519_v37  ;;  %v5523_v52 = vmax.f32 %v9425_v10, 0.0  ;;  %v5743_v37 = vld [vmem:[#allocation6 + $0x340] sm:$0xff]  ;;  %v9263_v53 = vpack.c.bf16 %v6524_v23, %v6522_v39 }
 0x523   : > { %v5524_v56 = vmax.f32 %v9426_v9, 0.0  ;;  %v4204_v60 = vpop.f32.mrb[16].mxu0  ;;  %9142 = vmatpush1.bf16.msra.mxu0 %v9141_v55  ;;  %9250 = vmatpush1.bf16.msra.mxu1 %v9249_v12  ;;  %v6523_v9 = vld [vmem:[#allocation8 + $0x350] sm:$0xff] }
 0x524   : > { %v9427_v45 = vadd.f32 %v4204_v60, %v14305_v6  ;;  %v4206_v15 = vpop.f32.mrb[17].mxu0  ;;  %9144 = vmatprep.subr.bf16.mxu0 %v9143_v21  ;;  %9252 = vmatprep.subr.bf16.mxu1 %v9251_v40  ;;  %v9155_v40 = vpack.c.bf16 %v5746_v26, %v5744_v8  ;;  %v9157_v60 = vpack.c.bf16 %v5745_v28, %v5743_v37 }
 0x525   : > { %v9428_v1 = vadd.f32 %v4206_v15, %v14305_v6  ;;  %5961 = vmatprep.mubr.f32.mxu0 %v5524_v56  ;;  %6631 = vmatprep.mubr.f32.mxu1 %v5524_v56 }
 0x526   : > { %5962 = vmatmul.mubr.f32.gmra.mrb[86].mxu0 %v5523_v52  ;;  %6632 = vmatmul.mubr.f32.gmra.mrb[86].mxu1 %v5523_v52  ;;  %v5527_v46 = vmax.f32 %v9427_v45, 0.0  ;;  %v14321_v45 = vpop.permute.xlu1 %3020 }
 0x527   : > { %v5528_v50 = vmax.f32 %v9428_v1, 0.0  ;;  %v4210_v24 = vpop.f32.mrb[18].mxu0  ;;  %9146 = vmatpush1.bf16.msra.mxu0 %v9145_v17  ;;  %9254 = vmatpush1.bf16.msra.mxu1 %v9253_v43  ;;  %v9265_v17 = vpack.c.bf16 %v6523_v9, %v6521_v2  ;;  %v14325_v1 = vpop.permute.xlu0 %3025 }
 0x528   : > { %v9429_v30 = vadd.f32 %v4210_v24, %v14309_v54  ;;  %v4212_v19 = vpop.f32.mrb[19].mxu0  ;;  %9148 = vmatprep.subr.bf16.mxu0 %v9147_v41  ;;  %9256 = vmatprep.subr.bf16.mxu1 %v9255_v35 }
 0x529   : > { %v9430_v63 = vadd.f32 %v4212_v19, %v14309_v54  ;;  %5967 = vmatprep.mubr.f32.mxu0 %v5528_v50  ;;  %6637 = vmatprep.mubr.f32.mxu1 %v5528_v50 }
 0x52a   : > { %5968 = vmatmul.mubr.f32.gmra.mrb[88].mxu0 %v5527_v46  ;;  %6638 = vmatmul.mubr.f32.gmra.mrb[88].mxu1 %v5527_v46  ;;  %v5531_v10 = vmax.f32 %v9429_v30, 0.0 }
 0x52b   : > { %v5532_v55 = vmax.f32 %v9430_v63, 0.0  ;;  %v4216_v12 = vpop.f32.mrb[20].mxu0  ;;  %9150 = vmatpush1.bf16.msra.mxu0 %v9149_v48  ;;  %9258 = vmatpush1.bf16.msra.mxu1 %v9257_v13  ;;  %v14329_v13 = vpop.permute.xlu1 %3030 }
 0x52c   : > { %v9431_v16 = vadd.f32 %v4216_v12, %v14313_v34  ;;  %v4218_v21 = vpop.f32.mrb[21].mxu0  ;;  %9152 = vmatprep.subr.bf16.mxu0 %v9151_v7  ;;  %9260 = vmatprep.subr.bf16.mxu1 %v9259_v42  ;;  %v14333_v42 = vpop.permute.xlu0 %3035 }
 0x52d   : > { %v9432_v33 = vadd.f32 %v4218_v21, %v14313_v34  ;;  %5973 = vmatprep.mubr.f32.mxu0 %v5532_v55  ;;  %6643 = vmatprep.mubr.f32.mxu1 %v5532_v55 }
 0x52e   : > { %5974 = vmatmul.mubr.f32.gmra.mrb[90].mxu0 %v5531_v10  ;;  %6644 = vmatmul.mubr.f32.gmra.mrb[90].mxu1 %v5531_v10  ;;  %v5535_v43 = vmax.f32 %v9431_v16, 0.0 }
 0x52f   : > { %v5536_v31 = vmax.f32 %v9432_v33, 0.0  ;;  %v4222_v56 = vpop.f32.mrb[22].mxu0  ;;  %9154 = vmatpush1.bf16.msra.mxu0 %v9153_v29  ;;  %9262 = vmatpush1.bf16.msra.mxu1 %v9261_v57  ;;  %v14337_v23 = vpop.permute.xlu1 %3040 }
 0x530   : > { %v9433_v25 = vadd.f32 %v4222_v56, %v14317_v3  ;;  %v4224_v47 = vpop.f32.mrb[23].mxu0  ;;  %9156 = vmatprep.subr.bf16.mxu0 %v9155_v40  ;;  %9264 = vmatprep.subr.bf16.mxu1 %v9263_v53  ;;  %v14341_v16 = vpop.permute.xlu0 %3045 }
 0x531   : > { %v9434_v52 = vadd.f32 %v4224_v47, %v14317_v3  ;;  %5979 = vmatprep.mubr.f32.mxu0 %v5536_v31  ;;  %6649 = vmatprep.mubr.f32.mxu1 %v5536_v31  ;;  %15303 = vst [vmem:[#allocation40_spill] sm:$0xff] %v14341_v16 }
 0x532   : > { %5980 = vmatmul.mubr.f32.gmra.mrb[92].mxu0 %v5535_v43  ;;  %6650 = vmatmul.mubr.f32.gmra.mrb[92].mxu1 %v5535_v43  ;;  %v5539_v35 = vmax.f32 %v9433_v25, 0.0 }
 0x533   : > { %v5540_v15 = vmax.f32 %v9434_v52, 0.0  ;;  %v4228_v41 = vpop.f32.mrb[24].mxu0  ;;  %9158 = vmatpush1.bf16.msra.mxu0 %v9157_v60  ;;  %9266 = vmatpush1.bf16.msra.mxu1 %v9265_v17  ;;  %v14349_v56 = vpop.permute.xlu1 %3050 }
 0x534   : > { %v9435_v22 = vadd.f32 %v4228_v41, %v14321_v45  ;;  %v4230_v36 = vpop.f32.mrb[25].mxu0  ;;  %15304 = vst [vmem:[#allocation35_spill] sm:$0xff] %v14349_v56 }
 0x535   : > { %v9436_v4 = vadd.f32 %v4230_v36, %v14321_v45  ;;  %5985 = vmatprep.mubr.f32.mxu0 %v5540_v15  ;;  %6655 = vmatprep.mubr.f32.mxu1 %v5540_v15 }
 0x536   : > { %5986 = vmatmul.mubr.f32.gmra.mrb[94].mxu0 %v5539_v35  ;;  %6656 = vmatmul.mubr.f32.gmra.mrb[94].mxu1 %v5539_v35  ;;  %v5543_v14 = vmax.f32 %v9435_v22, 0.0  ;;  %v14357_v35 = vpop.permute.xlu0 %3055 }
 0x537   : > { %v5544_v11 = vmax.f32 %v9436_v4, 0.0  ;;  %v4234_v61 = vpop.f32.mrb[26].mxu0  ;;  %15305 = vst [vmem:[#allocation50_spill] sm:$0xff] %v14357_v35 }
 0x538   : > { %v9437_v50 = vadd.f32 %v4234_v61, %v14325_v1  ;;  %v4236_v24 = vpop.f32.mrb[27].mxu0 }
 0x539   : > { %v9438_v48 = vadd.f32 %v4236_v24, %v14325_v1  ;;  %5991 = vmatprep.mubr.f32.mxu0 %v5544_v11  ;;  %6661 = vmatprep.mubr.f32.mxu1 %v5544_v11 }
 0x53a   : > { %5992 = vmatmul.mubr.f32.gmra.mrb[96].mxu0 %v5543_v14  ;;  %6662 = vmatmul.mubr.f32.gmra.mrb[96].mxu1 %v5543_v14  ;;  %v5547_v46 = vmax.f32 %v9437_v50, 0.0 }
 0x53b   : > { %v5548_v20 = vmax.f32 %v9438_v48, 0.0  ;;  %v4240_v0 = vpop.f32.mrb[28].mxu0  ;;  %v14365_v48 = vpop.permute.xlu1 %3060 }
 0x53c   : > { %v9439_v30 = vadd.f32 %v4240_v0, %v14329_v13  ;;  %v4242_v19 = vpop.f32.mrb[29].mxu0  ;;  %15306 = vst [vmem:[#allocation28_spill] sm:$0xff] %v14365_v48 }
 0x53d   : > { %v9440_v7 = vadd.f32 %v4242_v19, %v14329_v13  ;;  %5997 = vmatprep.mubr.f32.mxu0 %v5548_v20  ;;  %6667 = vmatprep.mubr.f32.mxu1 %v5548_v20 }
 0x53e   : > { %5998 = vmatmul.mubr.f32.gmra.mrb[98].mxu0 %v5547_v46  ;;  %6668 = vmatmul.mubr.f32.gmra.mrb[98].mxu1 %v5547_v46  ;;  %v5551_v8 = vmax.f32 %v9439_v30, 0.0 }
 0x53f   : > { %v5552_v5 = vmax.f32 %v9440_v7, 0.0  ;;  %v4246_v18 = vpop.f32.mrb[30].mxu0 }
 0x540   : > { %v9441_v63 = vadd.f32 %v4246_v18, %v14333_v42  ;;  %v4248_v26 = vpop.f32.mrb[31].mxu0 }
 0x541   : > { %v9442_v39 = vadd.f32 %v4248_v26, %v14333_v42  ;;  %6003 = vmatprep.mubr.f32.mxu0 %v5552_v5  ;;  %6673 = vmatprep.mubr.f32.mxu1 %v5552_v5 }
 0x542   : > { %6004 = vmatmul.mubr.f32.gmra.mrb[100].mxu0 %v5551_v8  ;;  %6674 = vmatmul.mubr.f32.gmra.mrb[100].mxu1 %v5551_v8  ;;  %v5555_v29 = vmax.f32 %v9441_v63, 0.0  ;;  %v14373_v8 = vpop.permute.xlu0 %3065 }
 0x543   : > { %v5556_v55 = vmax.f32 %v9442_v39, 0.0  ;;  %v4252_v12 = vpop.f32.mrb[32].mxu0  ;;  %15307 = vst [vmem:[#allocation39_spill] sm:$0xff] %v14373_v8 }
 0x544   : > { %v9443_v57 = vadd.f32 %v4252_v12, %v14337_v23  ;;  %v4254_v37 = vpop.f32.mrb[33].mxu0 }
 0x545   : > { %v9444_v10 = vadd.f32 %v4254_v37, %v14337_v23  ;;  %6009 = vmatprep.mubr.f32.mxu0 %v5556_v55  ;;  %6679 = vmatprep.mubr.f32.mxu1 %v5556_v55 }
 0x546   : > { %6010 = vmatmul.mubr.f32.gmra.mrb[102].mxu0 %v5555_v29  ;;  %6680 = vmatmul.mubr.f32.gmra.mrb[102].mxu1 %v5555_v29  ;;  %v5559_v53 = vmax.f32 %v9443_v57, 0.0 }
 0x547   : > { %v5560_v21 = vmax.f32 %v9444_v10, 0.0  ;;  %v4258_v40 = vpop.f32.mrb[34].mxu0  ;;  %v14381_v10 = vpop.permute.xlu1 %3070 }
 0x548   : > { %v9445_v28 = vadd.f32 %v4258_v40, %v14341_v16  ;;  %v4260_v2 = vpop.f32.mrb[35].mxu0  ;;  %15308 = vst [vmem:[#allocation43_spill] sm:$0xff] %v14381_v10 }
 0x549   : > { %v14344_v9 = vpop.f32.mrb[0].mxu1  ;;  %v9446_v33 = vadd.f32 %v4260_v2, %v14341_v16  ;;  %6015 = vmatprep.mubr.f32.mxu0 %v5560_v21  ;;  %6685 = vmatprep.mubr.f32.mxu1 %v5560_v21 }
 0x54a   : > { %v14347_v31 = vpop.f32.mrb[1].mxu1  ;;  %6016 = vmatmul.mubr.f32.gmra.mrb[104].mxu0 %v5559_v53  ;;  %6686 = vmatmul.mubr.f32.gmra.mrb[104].mxu1 %v5559_v53  ;;  %v5563_v43 = vmax.f32 %v9445_v28, 0.0 }
 0x54b   : > { %v5564_v60 = vmax.f32 %v9446_v33, 0.0  ;;  %v4264_v17 = vpop.f32.mrb[36].mxu0 }
 0x54c   : > { %v9447_v25 = vadd.f32 %v4264_v17, %v14349_v56  ;;  %v4266_v47 = vpop.f32.mrb[37].mxu0 }
 0x54d   : > { %v14352_v52 = vpop.f32.mrb[2].mxu1  ;;  %v9448_v15 = vadd.f32 %v4266_v47, %v14349_v56  ;;  %6021 = vmatprep.mubr.f32.mxu0 %v5564_v60  ;;  %6691 = vmatprep.mubr.f32.mxu1 %v5564_v60 }
 0x54e   : > { %v14355_v41 = vpop.f32.mrb[3].mxu1  ;;  %6022 = vmatmul.mubr.f32.gmra.mrb[106].mxu0 %v5563_v43  ;;  %6692 = vmatmul.mubr.f32.gmra.mrb[106].mxu1 %v5563_v43  ;;  %v5567_v4 = vmax.f32 %v9447_v25, 0.0  ;;  %v14389_v43 = vpop.permute.xlu0 %3075 }
 0x54f   : > { %v5568_v22 = vmax.f32 %v9448_v15, 0.0  ;;  %v4270_v36 = vpop.f32.mrb[38].mxu0  ;;  %15309 = vst [vmem:[#allocation29_spill] sm:$0xff] %v14389_v43 }
 0x550   : > { %v9449_v11 = vadd.f32 %v4270_v36, %v14357_v35  ;;  %v4272_v61 = vpop.f32.mrb[39].mxu0 }
 0x551   : > { %v14360_v14 = vpop.f32.mrb[4].mxu1  ;;  %v9450_v50 = vadd.f32 %v4272_v61, %v14357_v35  ;;  %6027 = vmatprep.mubr.f32.mxu0 %v5568_v22  ;;  %6697 = vmatprep.mubr.f32.mxu1 %v5568_v22 }
 0x552   : > { %v14363_v24 = vpop.f32.mrb[5].mxu1  ;;  %6028 = vmatmul.mubr.f32.gmra.mrb[108].mxu0 %v5567_v4  ;;  %6698 = vmatmul.mubr.f32.gmra.mrb[108].mxu1 %v5567_v4  ;;  %v5571_v46 = vmax.f32 %v9449_v11, 0.0 }
 0x553   : > { %v5572_v20 = vmax.f32 %v9450_v50, 0.0  ;;  %v4276_v0 = vpop.f32.mrb[40].mxu0  ;;  %v14397_v50 = vpop.permute.xlu1 %3080 }
 0x554   : > { %v9451_v30 = vadd.f32 %v4276_v0, %v14365_v48  ;;  %v4278_v19 = vpop.f32.mrb[41].mxu0  ;;  %15310 = vst [vmem:[#allocation30_spill] sm:$0xff] %v14397_v50 }
 0x555   : > { %v14368_v7 = vpop.f32.mrb[6].mxu1  ;;  %v9452_v5 = vadd.f32 %v4278_v19, %v14365_v48  ;;  %6033 = vmatprep.mubr.f32.mxu0 %v5572_v20  ;;  %6703 = vmatprep.mubr.f32.mxu1 %v5572_v20 }
 0x556   : > { %v14371_v18 = vpop.f32.mrb[7].mxu1  ;;  %6034 = vmatmul.mubr.f32.gmra.mrb[110].mxu0 %v5571_v46  ;;  %6704 = vmatmul.mubr.f32.gmra.mrb[110].mxu1 %v5571_v46  ;;  %v5575_v39 = vmax.f32 %v9451_v30, 0.0 }
 0x557   : > { %v5576_v63 = vmax.f32 %v9452_v5, 0.0  ;;  %v4282_v26 = vpop.f32.mrb[42].mxu0 }
 0x558   : > { %v9453_v55 = vadd.f32 %v4282_v26, %v14373_v8  ;;  %v4284_v12 = vpop.f32.mrb[43].mxu0 }
 0x559   : > { %v14376_v29 = vpop.f32.mrb[8].mxu1  ;;  %v9454_v57 = vadd.f32 %v4284_v12, %v14373_v8  ;;  %6039 = vmatprep.mubr.f32.mxu0 %v5576_v63  ;;  %6709 = vmatprep.mubr.f32.mxu1 %v5576_v63 }
 0x55a   : > { %v14379_v37 = vpop.f32.mrb[9].mxu1  ;;  %6040 = vmatmul.mubr.f32.gmra.mrb[112].mxu0 %v5575_v39  ;;  %6710 = vmatmul.mubr.f32.gmra.mrb[112].mxu1 %v5575_v39  ;;  %v5579_v53 = vmax.f32 %v9453_v55, 0.0  ;;  %v14405_v39 = vpop.permute.xlu0 %3085 }
 0x55b   : > { %v5580_v21 = vmax.f32 %v9454_v57, 0.0  ;;  %v4288_v40 = vpop.f32.mrb[44].mxu0  ;;  %15311 = vst [vmem:[#allocation33_spill] sm:$0xff] %v14405_v39 }
 0x55c   : > { %v9455_v28 = vadd.f32 %v4288_v40, %v14381_v10  ;;  %v4290_v2 = vpop.f32.mrb[45].mxu0 }
 0x55d   : > { %v14384_v33 = vpop.f32.mrb[10].mxu1  ;;  %v9456_v60 = vadd.f32 %v4290_v2, %v14381_v10  ;;  %6045 = vmatprep.mubr.f32.mxu0 %v5580_v21  ;;  %6715 = vmatprep.mubr.f32.mxu1 %v5580_v21 }
 0x55e   : > { %v14387_v17 = vpop.f32.mrb[11].mxu1  ;;  %6046 = vmatmul.mubr.f32.gmra.mrb[114].mxu0 %v5579_v53  ;;  %6716 = vmatmul.mubr.f32.gmra.mrb[114].mxu1 %v5579_v53  ;;  %v5583_v15 = vmax.f32 %v9455_v28, 0.0 }
 0x55f   : > { %v5584_v25 = vmax.f32 %v9456_v60, 0.0  ;;  %v4294_v47 = vpop.f32.mrb[46].mxu0  ;;  %v14413_v60 = vpop.permute.xlu1 %3090 }
 0x560   : > { %v9457_v22 = vadd.f32 %v4294_v47, %v14389_v43  ;;  %v4296_v36 = vpop.f32.mrb[47].mxu0  ;;  %15312 = vst [vmem:[#allocation37_spill] sm:$0xff] %v14413_v60 }
 0x561   : > { %v14392_v4 = vpop.f32.mrb[12].mxu1  ;;  %v9458_v11 = vadd.f32 %v4296_v36, %v14389_v43  ;;  %6051 = vmatprep.mubr.f32.mxu0 %v5584_v25  ;;  %6721 = vmatprep.mubr.f32.mxu1 %v5584_v25 }
 0x562   : > { %v14395_v61 = vpop.f32.mrb[13].mxu1  ;;  %6052 = vmatmul.mubr.f32.gmra.mrb[116].mxu0 %v5583_v15  ;;  %6722 = vmatmul.mubr.f32.gmra.mrb[116].mxu1 %v5583_v15  ;;  %v5587_v46 = vmax.f32 %v9457_v22, 0.0 }
 0x563   : > { %v5588_v20 = vmax.f32 %v9458_v11, 0.0  ;;  %v4300_v0 = vpop.f32.mrb[48].mxu0 }
 0x564   : > { %v9459_v30 = vadd.f32 %v4300_v0, %v14397_v50  ;;  %v4302_v19 = vpop.f32.mrb[49].mxu0 }
 0x565   : > { %v14400_v5 = vpop.f32.mrb[14].mxu1  ;;  %v9460_v63 = vadd.f32 %v4302_v19, %v14397_v50  ;;  %6057 = vmatprep.mubr.f32.mxu0 %v5588_v20  ;;  %6727 = vmatprep.mubr.f32.mxu1 %v5588_v20 }
 0x566   : > { %v14403_v26 = vpop.f32.mrb[15].mxu1  ;;  %6058 = vmatmul.mubr.f32.gmra.mrb[118].mxu0 %v5587_v46  ;;  %6728 = vmatmul.mubr.f32.gmra.mrb[118].mxu1 %v5587_v46  ;;  %v5591_v57 = vmax.f32 %v9459_v30, 0.0  ;;  %v14421_v46 = vpop.permute.xlu0 %3095 }
 0x567   : > { %v5592_v55 = vmax.f32 %v9460_v63, 0.0  ;;  %v4306_v12 = vpop.f32.mrb[50].mxu0  ;;  %15313 = vst [vmem:[#allocation45_spill] sm:$0xff] %v14421_v46 }
 0x568   : > { %v9461_v21 = vadd.f32 %v4306_v12, %v14405_v39  ;;  %v4308_v40 = vpop.f32.mrb[51].mxu0 }
 0x569   : > { %v14408_v53 = vpop.f32.mrb[16].mxu1  ;;  %v9462_v28 = vadd.f32 %v4308_v40, %v14405_v39  ;;  %6063 = vmatprep.mubr.f32.mxu0 %v5592_v55  ;;  %6733 = vmatprep.mubr.f32.mxu1 %v5592_v55 }
 0x56a   : > { %v14411_v2 = vpop.f32.mrb[17].mxu1  ;;  %6064 = vmatmul.mubr.f32.gmra.mrb[120].mxu0 %v5591_v57  ;;  %6734 = vmatmul.mubr.f32.gmra.mrb[120].mxu1 %v5591_v57  ;;  %v5595_v15 = vmax.f32 %v9461_v21, 0.0 }
 0x56b   : > { %v5596_v25 = vmax.f32 %v9462_v28, 0.0  ;;  %v4312_v47 = vpop.f32.mrb[52].mxu0  ;;  %v14429_v28 = vpop.permute.xlu1 %3100 }
 0x56c   : > { %v9463_v22 = vadd.f32 %v4312_v47, %v14413_v60  ;;  %v4314_v36 = vpop.f32.mrb[53].mxu0  ;;  %15314 = vst [vmem:[#allocation46_spill] sm:$0xff] %v14429_v28 }
 0x56d   : > { %v14416_v11 = vpop.f32.mrb[18].mxu1  ;;  %v9464_v20 = vadd.f32 %v4314_v36, %v14413_v60  ;;  %6069 = vmatprep.mubr.f32.mxu0 %v5596_v25  ;;  %6739 = vmatprep.mubr.f32.mxu1 %v5596_v25 }
 0x56e   : > { %v14419_v0 = vpop.f32.mrb[19].mxu1  ;;  %6070 = vmatmul.mubr.f32.gmra.mrb[122].mxu0 %v5595_v15  ;;  %6740 = vmatmul.mubr.f32.gmra.mrb[122].mxu1 %v5595_v15  ;;  %v5599_v63 = vmax.f32 %v9463_v22, 0.0 }
 0x56f   : > { %v5600_v30 = vmax.f32 %v9464_v20, 0.0  ;;  %v4318_v19 = vpop.f32.mrb[54].mxu0 }
 0x570   : > { %v9465_v55 = vadd.f32 %v4318_v19, %v14421_v46  ;;  %v4320_v12 = vpop.f32.mrb[55].mxu0 }
 0x571   : > { %v14424_v57 = vpop.f32.mrb[20].mxu1  ;;  %v9466_v21 = vadd.f32 %v4320_v12, %v14421_v46  ;;  %6075 = vmatprep.mubr.f32.mxu0 %v5600_v30  ;;  %6745 = vmatprep.mubr.f32.mxu1 %v5600_v30  ;;  %v14437_v30 = vpop.permute.xlu0 %3105 }
 0x572   : > { %v14427_v40 = vpop.f32.mrb[21].mxu1  ;;  %6076 = vmatmul.mubr.f32.gmra.mrb[124].mxu0 %v5599_v63  ;;  %6746 = vmatmul.mubr.f32.gmra.mrb[124].mxu1 %v5599_v63  ;;  %v5603_v15 = vmax.f32 %v9465_v55, 0.0  ;;  %15315 = vst [vmem:[#allocation31_spill] sm:$0xff] %v14437_v30 }
 0x573   : > { %v5604_v25 = vmax.f32 %v9466_v21, 0.0  ;;  %v4324_v47 = vpop.f32.mrb[56].mxu0 }
 0x574   : > { %v9467_v22 = vadd.f32 %v4324_v47, %v14429_v28  ;;  %v4326_v36 = vpop.f32.mrb[57].mxu0 }
 0x575   : > { %v14432_v20 = vpop.f32.mrb[22].mxu1  ;;  %v9468_v19 = vadd.f32 %v4326_v36, %v14429_v28  ;;  %6081 = vmatprep.mubr.f32.mxu0 %v5604_v25  ;;  %6751 = vmatprep.mubr.f32.mxu1 %v5604_v25  ;;  %v14445_v25 = vpop.permute.xlu1 %3110 }
 0x576   : > { %v14435_v12 = vpop.f32.mrb[23].mxu1  ;;  %6082 = vmatmul.mubr.f32.gmra.mrb[126].mxu0 %v5603_v15  ;;  %6752 = vmatmul.mubr.f32.gmra.mrb[126].mxu1 %v5603_v15  ;;  %v5607_v21 = vmax.f32 %v9467_v22, 0.0  ;;  %15316 = vst [vmem:[#allocation34_spill] sm:$0xff] %v14445_v25 }
 0x577   : > { %v5608_v63 = vmax.f32 %v9468_v19, 0.0  ;;  %v4330_v27 = vpop.f32.mrb[58].mxu0 }
 0x578   : > { %v9469_v55 = vadd.f32 %v4330_v27, %v14437_v30  ;;  %v4332_v46 = vpop.f32.mrb[59].mxu0 }
 0x579   : > { %v14440_v47 = vpop.f32.mrb[24].mxu1  ;;  %v9470_v60 = vadd.f32 %v4332_v46, %v14437_v30  ;;  %6087 = vmatprep.mubr.f32.mxu0 %v5608_v63  ;;  %6757 = vmatprep.mubr.f32.mxu1 %v5608_v63  ;;  %v14453_v63 = vpop.permute.xlu0 %3115 }
 0x57a   : > { %v14443_v36 = vpop.f32.mrb[25].mxu1  ;;  %6088 = vmatmul.mubr.f32.gmra.mrb[128].mxu0 %v5607_v21  ;;  %6758 = vmatmul.mubr.f32.gmra.mrb[128].mxu1 %v5607_v21  ;;  %v5611_v19 = vmax.f32 %v9469_v55, 0.0  ;;  %15317 = vst [vmem:[#allocation41_spill] sm:$0xff] %v14453_v63 }
 0x57b   : > { %v5612_v15 = vmax.f32 %v9470_v60, 0.0  ;;  %v4336_v28 = vpop.f32.mrb[60].mxu0 }
 0x57c   : > { %v9471_v22 = vadd.f32 %v4336_v28, %v14445_v25  ;;  %v4338_v39 = vpop.f32.mrb[61].mxu0 }
 0x57d   : > { %v14448_v27 = vpop.f32.mrb[26].mxu1  ;;  %v9472_v50 = vadd.f32 %v4338_v39, %v14445_v25  ;;  %6093 = vmatprep.mubr.f32.mxu0 %v5612_v15  ;;  %6763 = vmatprep.mubr.f32.mxu1 %v5612_v15  ;;  %v14461_v15 = vpop.permute.xlu1 %3120 }
 0x57e   : > { %v14451_v46 = vpop.f32.mrb[27].mxu1  ;;  %6094 = vmatmul.mubr.f32.gmra.mrb[130].mxu0 %v5611_v19  ;;  %6764 = vmatmul.mubr.f32.gmra.mrb[130].mxu1 %v5611_v19  ;;  %v5615_v60 = vmax.f32 %v9471_v22, 0.0  ;;  %15318 = vst [vmem:[#allocation48_spill] sm:$0xff] %v14461_v15 }
 0x57f   : > { %v5616_v21 = vmax.f32 %v9472_v50, 0.0  ;;  %v4342_v30 = vpop.f32.mrb[62].mxu0 }
 0x580   : > { %v9473_v55 = vadd.f32 %v4342_v30, %v14453_v63  ;;  %v4344_v43 = vpop.f32.mrb[63].mxu0 }
 0x581   : > { %v14456_v28 = vpop.f32.mrb[28].mxu1  ;;  %v9474_v10 = vadd.f32 %v4344_v43, %v14453_v63  ;;  %6099 = vmatprep.mubr.f32.mxu0 %v5616_v21  ;;  %6769 = vmatprep.mubr.f32.mxu1 %v5616_v21  ;;  %v14469_v21 = vpop.permute.xlu0 %3125 }
 0x582   : > { %v14459_v39 = vpop.f32.mrb[29].mxu1  ;;  %6100 = vmatmul.mubr.f32.gmra.mrb[132].mxu0 %v5615_v60  ;;  %6770 = vmatmul.mubr.f32.gmra.mrb[132].mxu1 %v5615_v60  ;;  %v5619_v50 = vmax.f32 %v9473_v55, 0.0  ;;  %15319 = vst [vmem:[#allocation38_spill] sm:$0xff] %v14469_v21 }
 0x583   : > { %v5620_v19 = vmax.f32 %v9474_v10, 0.0  ;;  %v4348_v25 = vpop.f32.mrb[64].mxu0 }
 0x584   : > { %v9475_v22 = vadd.f32 %v4348_v25, %v14461_v15  ;;  %v4350_v8 = vpop.f32.mrb[65].mxu0 }
 0x585   : > { %v14464_v30 = vpop.f32.mrb[30].mxu1  ;;  %v9476_v48 = vadd.f32 %v4350_v8, %v14461_v15  ;;  %6105 = vmatprep.mubr.f32.mxu0 %v5620_v19  ;;  %6775 = vmatprep.mubr.f32.mxu1 %v5620_v19  ;;  %v14477_v19 = vpop.permute.xlu1 %3130 }
 0x586   : > { %v14467_v43 = vpop.f32.mrb[31].mxu1  ;;  %6106 = vmatmul.mubr.f32.gmra.mrb[134].mxu0 %v5619_v50  ;;  %6776 = vmatmul.mubr.f32.gmra.mrb[134].mxu1 %v5619_v50  ;;  %v5623_v10 = vmax.f32 %v9475_v22, 0.0  ;;  %15322 = vst [vmem:[#allocation49_spill] sm:$0xff] %v14477_v19 }
 0x587   : > { %v5624_v60 = vmax.f32 %v9476_v48, 0.0  ;;  %v4354_v63 = vpop.f32.mrb[66].mxu0 }
 0x588   : > { %v9477_v55 = vadd.f32 %v4354_v63, %v14469_v21  ;;  %v4356_v35 = vpop.f32.mrb[67].mxu0 }
 0x589   : > { %v14472_v25 = vpop.f32.mrb[32].mxu1  ;;  %v9478_v56 = vadd.f32 %v4356_v35, %v14469_v21  ;;  %6111 = vmatprep.mubr.f32.mxu0 %v5624_v60  ;;  %6781 = vmatprep.mubr.f32.mxu1 %v5624_v60  ;;  %v14485_v60 = vpop.permute.xlu0 %3135 }
 0x58a   : > { %15320 = vst [vmem:[#allocation32_spill] sm:$0xff] %v14472_v25  ;;  %v14475_v8 = vpop.f32.mrb[33].mxu1  ;;  %6112 = vmatmul.mubr.f32.gmra.mrb[136].mxu0 %v5623_v10  ;;  %6782 = vmatmul.mubr.f32.gmra.mrb[136].mxu1 %v5623_v10  ;;  %v5627_v48 = vmax.f32 %v9477_v55, 0.0 }
 0x58b   : > { %15321 = vst [vmem:[#allocation42_spill] sm:$0xff] %v14475_v8  ;;  %v5628_v50 = vmax.f32 %v9478_v56, 0.0  ;;  %v4360_v15 = vpop.f32.mrb[68].mxu0 }
 0x58c   : > { %v9479_v22 = vadd.f32 %v4360_v15, %v14477_v19  ;;  %v4362_v16 = vpop.f32.mrb[69].mxu0  ;;  %v9484_v15 = vadd.f32 %v14347_v31, %v14273_v58 }
 0x58d   : > { %v14480_v63 = vpop.f32.mrb[34].mxu1  ;;  %v9480_v25 = vadd.f32 %v4362_v16, %v14477_v19  ;;  %6117 = vmatprep.mubr.f32.mxu0 %v5628_v50  ;;  %6787 = vmatprep.mubr.f32.mxu1 %v5628_v50  ;;  %v9486_v19 = vadd.f32 %v14355_v41, %v14276_v49  ;;  %v9488_v41 = vadd.f32 %v14363_v24, %v14281_v62 }
 0x58e   : > { %15323 = vst [vmem:[#allocation59_spill] sm:$0xff] %v14480_v63  ;;  %v14483_v35 = vpop.f32.mrb[35].mxu1  ;;  %6118 = vmatmul.mubr.f32.gmra.mrb[138].mxu0 %v5627_v48  ;;  %6788 = vmatmul.mubr.f32.gmra.mrb[138].mxu1 %v5627_v48  ;;  %v5631_v56 = vmax.f32 %v9479_v22, 0.0 }
 0x58f   : > { %v5632_v10 = vmax.f32 %v9480_v25, 0.0  ;;  %v4366_v21 = vpop.f32.mrb[70].mxu0  ;;  %v9483_v25 = vadd.f32 %v14344_v9, %v14273_v58  ;;  %v9485_v58 = vadd.f32 %v14352_v52, %v14276_v49  ;;  %v5502_v9 = vmax.f32 %v9486_v19, 0.0 }
 0x590   : > { %v9481_v55 = vadd.f32 %v4366_v21, %v14485_v60  ;;  %v4368_v8 = vpop.f32.mrb[71].mxu0  ;;  %v5498_v21 = vmax.f32 %v9484_v15, 0.0  ;;  %v9490_v49 = vadd.f32 %v14371_v18, %v14285_v44 }
 0x591   : > { %v14490_v63 = vpop.f32.mrb[36].mxu1  ;;  %v9482_v16 = vadd.f32 %v4368_v8, %v14485_v60  ;;  %6123 = vmatprep.mubr.f32.mxu0 %v5632_v10  ;;  %6793 = vmatprep.mubr.f32.mxu1 %v5632_v10  ;;  %v5497_v10 = vmax.f32 %v9483_v25, 0.0  ;;  %v5501_v15 = vmax.f32 %v9485_v58, 0.0  ;;  %v9489_v25 = vadd.f32 %v14368_v7, %v14285_v44 }
 0x592   : > { %v14493_v50 = vpop.f32.mrb[37].mxu1  ;;  %6124 = vmatmul.mubr.f32.gmra.mrb[140].mxu0 %v5631_v56  ;;  %6794 = vmatmul.mubr.f32.gmra.mrb[140].mxu1 %v5631_v56  ;;  %v5635_v22 = vmax.f32 %v9481_v55, 0.0  ;;  %v9494_v44 = vadd.f32 %v14387_v17, %v14293_v32 }
 0x593   : > { %v5636_v48 = vmax.f32 %v9482_v16, 0.0  ;;  %v9487_v16 = vadd.f32 %v14360_v14, %v14281_v62  ;;  %v9492_v62 = vadd.f32 %v14379_v37, %v14289_v59 }
 0x595   : > { %v14499_v31 = vpop.f32.mrb[38].mxu1  ;;  %6129 = vmatprep.mubr.f32.mxu0 %v5636_v48  ;;  %6799 = vmatprep.mubr.f32.mxu1 %v5636_v48  ;;  %v5506_v48 = vmax.f32 %v9488_v41, 0.0  ;;  %v5505_v19 = vmax.f32 %v9487_v16, 0.0  ;;  %v5514_v58 = vmax.f32 %v9492_v62, 0.0  ;;  %v9493_v41 = vadd.f32 %v14384_v33, %v14293_v32 }
 0x596   : > { %v14501_v8 = vpop.f32.mrb[39].mxu1  ;;  %6130 = vmatmul.mubr.f32.gmra.mrb[142].mxu0 %v5635_v22  ;;  %6800 = vmatmul.mubr.f32.gmra.mrb[142].mxu1 %v5635_v22  ;;  %v5510_v22 = vmax.f32 %v9490_v49, 0.0  ;;  %v9498_v32 = vadd.f32 %v14403_v26, %v14301_v51 }
 0x597   : > { %8489 = vmatprep.mubr.msk.f32.mxu0 %vm422_vm0, %v5498_v21  ;;  %8525 = vmatprep.mubr.msk.f32.mxu1 %vm422_vm0, %v5498_v21  ;;  %v5509_v21 = vmax.f32 %v9489_v25, 0.0  ;;  %v5517_v16 = vmax.f32 %v9493_v41, 0.0  ;;  %v9497_v25 = vadd.f32 %v14400_v5, %v14301_v51  ;;  %v9502_v51 = vadd.f32 %v14419_v0, %v14309_v54 }
 0x599   : > { %v14509_v56 = vpop.f32.mrb[40].mxu1  ;;  %v5525_v62 = vmax.f32 %v9497_v25, 0.0 }
 0x59a   : > { %v14511_v55 = vpop.f32.mrb[41].mxu1  ;;  %6201 = vmatmul.mubr.f32.vlgmr.msra.gmra.mrb[72].mxu0 %v5497_v10  ;;  %6871 = vmatmul.mubr.f32.vlgmr.msra.gmra.mrb[72].mxu1 %v5497_v10  ;;  %v9491_v10 = vadd.f32 %v14376_v29, %v14289_v59  ;;  %v9496_v59 = vadd.f32 %v14395_v61, %v14297_v38 }
 0x59b   : > { %8490 = vmatprep.mubr.msk.f32.mxu0 %vm422_vm0, %v5502_v9  ;;  %8526 = vmatprep.mubr.msk.f32.mxu1 %vm422_vm0, %v5502_v9 }
 0x59c   : > { %v5513_v9 = vmax.f32 %v9491_v10, 0.0  ;;  %v5522_v49 = vmax.f32 %v9496_v59, 0.0 }
 0x59d   : > { %v14519_v52 = vpop.f32.mrb[42].mxu1 }
 0x59e   : > { %v14521_v24 = vpop.f32.mrb[43].mxu1  ;;  %6207 = vmatmul.mubr.f32.gmra.mrb[74].mxu0 %v5501_v15  ;;  %6877 = vmatmul.mubr.f32.gmra.mrb[74].mxu1 %v5501_v15  ;;  %v5518_v15 = vmax.f32 %v9494_v44, 0.0  ;;  %v9501_v44 = vadd.f32 %v14416_v11, %v14309_v54  ;;  %v9506_v54 = vadd.f32 %v14435_v12, %v14317_v3 }
 0x59f   : > { %8491 = vmatprep.mubr.msk.f32.mxu0 %vm422_vm0, %v5506_v48  ;;  %8527 = vmatprep.mubr.msk.f32.mxu1 %vm422_vm0, %v5506_v48  ;;  %v9495_v48 = vadd.f32 %v14392_v4, %v14297_v38  ;;  %v9500_v38 = vadd.f32 %v14411_v2, %v14305_v6 }
 0x5a0   : > { %v5533_v41 = vmax.f32 %v9501_v44, 0.0  ;;  %v9513_v44 = vadd.f32 %v14464_v30, %v14333_v42 }
 0x5a1   : > { %v14529_v14 = vpop.f32.mrb[44].mxu1  ;;  %v5530_v10 = vmax.f32 %v9500_v38, 0.0  ;;  %v9509_v38 = vadd.f32 %v14448_v27, %v14325_v1 }
 0x5a2   : > { %v14531_v18 = vpop.f32.mrb[45].mxu1  ;;  %6213 = vmatmul.mubr.f32.gmra.mrb[76].mxu0 %v5505_v19  ;;  %6883 = vmatmul.mubr.f32.gmra.mrb[76].mxu1 %v5505_v19  ;;  %v5521_v19 = vmax.f32 %v9495_v48, 0.0  ;;  %v9505_v48 = vadd.f32 %v14432_v20, %v14317_v3  ;;  %v9510_v3 = vadd.f32 %v14451_v46, %v14325_v1  ;;  %v9514_v1 = vadd.f32 %v14467_v43, %v14333_v42  ;;  %v15326_v42 = vld [vmem:[#allocation40_spill] sm:$0xff] }
 0x5a3   : > { %8492 = vmatprep.mubr.msk.f32.mxu0 %vm422_vm0, %v5510_v22  ;;  %8528 = vmatprep.mubr.msk.f32.mxu1 %vm422_vm0, %v5510_v22  ;;  %v5526_v22 = vmax.f32 %v9498_v32, 0.0  ;;  %v9518_v30 = vadd.f32 %v14483_v35, %v15326_v42 }
 0x5a4   : > { %v5541_v32 = vmax.f32 %v9505_v48, 0.0 }
 0x5a5   : > { %v14539_v7 = vpop.f32.mrb[46].mxu1 }
 0x5a6   : > { %v14541_v37 = vpop.f32.mrb[47].mxu1  ;;  %6219 = vmatmul.mubr.f32.gmra.mrb[78].mxu0 %v5509_v21  ;;  %6889 = vmatmul.mubr.f32.gmra.mrb[78].mxu1 %v5509_v21  ;;  %v9499_v21 = vadd.f32 %v14408_v53, %v14305_v6  ;;  %v9504_v6 = vadd.f32 %v14427_v40, %v14313_v34 }
 0x5a7   : > { %8493 = vmatprep.mubr.msk.f32.mxu0 %vm422_vm0, %v5514_v58  ;;  %8529 = vmatprep.mubr.msk.f32.mxu1 %vm422_vm0, %v5514_v58 }
 0x5a8   : > { %v5529_v58 = vmax.f32 %v9499_v21, 0.0  ;;  %v5538_v59 = vmax.f32 %v9504_v6, 0.0  ;;  %v5549_v21 = vmax.f32 %v9509_v38, 0.0  ;;  %v15329_v38 = vld [vmem:[#allocation50_spill] sm:$0xff] }
 0x5a9   : > { %v14549_v29 = vpop.f32.mrb[48].mxu1 }
 0x5aa   : > { %v14551_v17 = vpop.f32.mrb[49].mxu1  ;;  %6225 = vmatmul.mubr.f32.gmra.mrb[80].mxu0 %v5513_v9  ;;  %6895 = vmatmul.mubr.f32.gmra.mrb[80].mxu1 %v5513_v9  ;;  %v5534_v9 = vmax.f32 %v9502_v51, 0.0 }
 0x5ab   : > { %8494 = vmatprep.mubr.msk.f32.mxu0 %vm422_vm0, %v5518_v15  ;;  %8530 = vmatprep.mubr.msk.f32.mxu1 %vm422_vm0, %v5518_v15  ;;  %v9503_v15 = vadd.f32 %v14424_v57, %v14313_v34  ;;  %v9508_v34 = vadd.f32 %v14443_v36, %v14321_v45 }
 0x5ad   : > { %v14559_v33 = vpop.f32.mrb[50].mxu1  ;;  %v5546_v25 = vmax.f32 %v9508_v34, 0.0  ;;  %v15327_v34 = vld [vmem:[#allocation59_spill] sm:$0xff] }
 0x5ae   : > { %v14561_v61 = vpop.f32.mrb[51].mxu1  ;;  %6231 = vmatmul.mubr.f32.gmra.mrb[82].mxu0 %v5517_v16  ;;  %6901 = vmatmul.mubr.f32.gmra.mrb[82].mxu1 %v5517_v16  ;;  %v5537_v16 = vmax.f32 %v9503_v15, 0.0  ;;  %v15325_v15 = vld [vmem:[#allocation32_spill] sm:$0xff] }
 0x5af   : > { %8495 = vmatprep.mubr.msk.f32.mxu0 %vm422_vm0, %v5522_v49  ;;  %8531 = vmatprep.mubr.msk.f32.mxu1 %vm422_vm0, %v5522_v49  ;;  %v5542_v49 = vmax.f32 %v9506_v54, 0.0 }
 0x5b1   : > { %v14569_v4 = vpop.f32.mrb[52].mxu1 }
 0x5b2   : > { %v14571_v26 = vpop.f32.mrb[53].mxu1  ;;  %6237 = vmatmul.mubr.f32.gmra.mrb[84].mxu0 %v5521_v19  ;;  %6907 = vmatmul.mubr.f32.gmra.mrb[84].mxu1 %v5521_v19  ;;  %v9507_v19 = vadd.f32 %v14440_v47, %v14321_v45  ;;  %v9512_v45 = vadd.f32 %v14459_v39, %v14329_v13 }
 0x5b3   : > { %8496 = vmatprep.mubr.msk.f32.mxu0 %vm422_vm0, %v5526_v22  ;;  %8532 = vmatprep.mubr.msk.f32.mxu1 %vm422_vm0, %v5526_v22 }
 0x5b4   : > { %v5545_v22 = vmax.f32 %v9507_v19, 0.0  ;;  %v5554_v51 = vmax.f32 %v9512_v45, 0.0  ;;  %v5566_v19 = vmax.f32 %v9518_v30, 0.0  ;;  %v9521_v45 = vadd.f32 %v14499_v31, %v15329_v38 }
 0x5b5   : > { %v14579_v5 = vpop.f32.mrb[54].mxu1 }
 0x5b6   : > { %v14581_v2 = vpop.f32.mrb[55].mxu1  ;;  %6243 = vmatmul.mubr.f32.gmra.mrb[86].mxu0 %v5525_v62  ;;  %6913 = vmatmul.mubr.f32.gmra.mrb[86].mxu1 %v5525_v62  ;;  %v5550_v62 = vmax.f32 %v9510_v3, 0.0 }
 0x5b7   : > { %8497 = vmatprep.mubr.msk.f32.mxu0 %vm422_vm0, %v5530_v10  ;;  %8533 = vmatprep.mubr.msk.f32.mxu1 %vm422_vm0, %v5530_v10  ;;  %v9511_v10 = vadd.f32 %v14456_v28, %v14329_v13  ;;  %v15324_v13 = vld [vmem:[#allocation42_spill] sm:$0xff] }
 0x5b8   : > { %v9516_v28 = vadd.f32 %v15324_v13, %v14337_v23  ;;  %v15332_v13 = vld [vmem:[#allocation43_spill] sm:$0xff] }
 0x5b9   : > { %v14589_v53 = vpop.f32.mrb[56].mxu1 }
 0x5ba   : > { %v14591_v0 = vpop.f32.mrb[57].mxu1  ;;  %6249 = vmatmul.mubr.f32.gmra.mrb[88].mxu0 %v5529_v58  ;;  %6919 = vmatmul.mubr.f32.gmra.mrb[88].mxu1 %v5529_v58  ;;  %v5553_v58 = vmax.f32 %v9511_v10, 0.0  ;;  %v5562_v54 = vmax.f32 %v9516_v28, 0.0  ;;  %v15330_v10 = vld [vmem:[#allocation28_spill] sm:$0xff]  ;;  %v9528_v28 = vadd.f32 %v14531_v18, %v15332_v13 }
 0x5bb   : > { %8498 = vmatprep.mubr.msk.f32.mxu0 %vm422_vm0, %v5534_v9  ;;  %8534 = vmatprep.mubr.msk.f32.mxu1 %vm422_vm0, %v5534_v9  ;;  %v5558_v9 = vmax.f32 %v9514_v1, 0.0 }
 0x5bd   : > { %v14599_v11 = vpop.f32.mrb[58].mxu1 }
 0x5be   : > { %v14601_v40 = vpop.f32.mrb[59].mxu1  ;;  %6255 = vmatmul.mubr.f32.gmra.mrb[90].mxu0 %v5533_v41  ;;  %6925 = vmatmul.mubr.f32.gmra.mrb[90].mxu1 %v5533_v41  ;;  %v5557_v41 = vmax.f32 %v9513_v44, 0.0 }
 0x5bf   : > { %8499 = vmatprep.mubr.msk.f32.mxu0 %vm422_vm0, %v5538_v59  ;;  %8535 = vmatprep.mubr.msk.f32.mxu1 %vm422_vm0, %v5538_v59  ;;  %v9515_v59 = vadd.f32 %v15325_v15, %v14337_v23  ;;  %v15328_v23 = vld [vmem:[#allocation35_spill] sm:$0xff]  ;;  %v15333_v15 = vld [vmem:[#allocation29_spill] sm:$0xff] }
 0x5c0   : > { %v9519_v3 = vadd.f32 %v14490_v63, %v15328_v23  ;;  %v5573_v63 = vmax.f32 %v9521_v45, 0.0  ;;  %v9529_v18 = vadd.f32 %v14539_v7, %v15333_v15 }
 0x5c1   : > { %v14609_v57 = vpop.f32.mrb[60].mxu1 }
 0x5c2   : > { %v14611_v12 = vpop.f32.mrb[61].mxu1  ;;  %6261 = vmatmul.mubr.f32.gmra.mrb[92].mxu0 %v5537_v16  ;;  %6931 = vmatmul.mubr.f32.gmra.mrb[92].mxu1 %v5537_v16 }
 0x5c3   : > { %8500 = vmatprep.mubr.msk.f32.mxu0 %vm422_vm0, %v5542_v49  ;;  %8536 = vmatprep.mubr.msk.f32.mxu1 %vm422_vm0, %v5542_v49  ;;  %v5561_v49 = vmax.f32 %v9515_v59, 0.0  ;;  %v9530_v59 = vadd.f32 %v14541_v37, %v15333_v15 }
 0x5c5   : > { %v14619_v20 = vpop.f32.mrb[62].mxu1 }
 0x5c6   : > { %v14621_v36 = vpop.f32.mrb[63].mxu1  ;;  %6267 = vmatmul.mubr.f32.gmra.mrb[94].mxu0 %v5541_v32  ;;  %6937 = vmatmul.mubr.f32.gmra.mrb[94].mxu1 %v5541_v32  ;;  %v9517_v32 = vadd.f32 %v15327_v34, %v15326_v42  ;;  %v15334_v42 = vld [vmem:[#allocation30_spill] sm:$0xff]  ;;  %v15335_v34 = vld [vmem:[#allocation33_spill] sm:$0xff] }
 0x5c7   : > { %8501 = vmatprep.mubr.msk.f32.mxu0 %vm422_vm0, %v5546_v25  ;;  %8537 = vmatprep.mubr.msk.f32.mxu1 %vm422_vm0, %v5546_v25  ;;  %v9520_v25 = vadd.f32 %v14493_v50, %v15328_v23  ;;  %v5569_v50 = vmax.f32 %v9519_v3, 0.0  ;;  %v9532_v30 = vadd.f32 %v14551_v17, %v15334_v42  ;;  %v9531_v37 = vadd.f32 %v14549_v29, %v15334_v42  ;;  %v15336_v23 = vld [vmem:[#allocation37_spill] sm:$0xff] }
 0x5c8   : > { %v5565_v35 = vmax.f32 %v9517_v32, 0.0  ;;  %v9534_v32 = vadd.f32 %v14561_v61, %v15335_v34  ;;  %v9533_v17 = vadd.f32 %v14559_v33, %v15335_v34  ;;  %v9535_v61 = vadd.f32 %v14569_v4, %v15336_v23  ;;  %v15337_v3 = vld [vmem:[#allocation45_spill] sm:$0xff] }
 0x5c9   : > { %v14629_v47 = vpop.f32.mrb[64].mxu1  ;;  %v5593_v7 = vmax.f32 %v9531_v37, 0.0 }
 0x5ca   : > { %v14631_v46 = vpop.f32.mrb[65].mxu1  ;;  %6273 = vmatmul.mubr.f32.gmra.mrb[96].mxu0 %v5545_v22  ;;  %6943 = vmatmul.mubr.f32.gmra.mrb[96].mxu1 %v5545_v22  ;;  %v5570_v22 = vmax.f32 %v9520_v25, 0.0  ;;  %v9536_v25 = vadd.f32 %v14571_v26, %v15336_v23  ;;  %v5597_v29 = vmax.f32 %v9533_v17, 0.0  ;;  %v5601_v33 = vmax.f32 %v9535_v61, 0.0 }
 0x5cb   : > { %8502 = vmatprep.mubr.msk.f32.mxu0 %vm422_vm0, %v5550_v62  ;;  %8538 = vmatprep.mubr.msk.f32.mxu1 %vm422_vm0, %v5550_v62  ;;  %v9522_v62 = vadd.f32 %v14501_v8, %v15329_v38  ;;  %v9523_v8 = vadd.f32 %v14509_v56, %v15330_v10  ;;  %v9537_v26 = vadd.f32 %v14579_v5, %v15337_v3 }
 0x5cd   : > { %v14639_v27 = vpop.f32.mrb[66].mxu1  ;;  %v5577_v31 = vmax.f32 %v9523_v8, 0.0  ;;  %v5605_v4 = vmax.f32 %v9537_v26, 0.0 }
 0x5ce   : > { %v14641_v39 = vpop.f32.mrb[67].mxu1  ;;  %6279 = vmatmul.mubr.f32.gmra.mrb[98].mxu0 %v5549_v21  ;;  %6949 = vmatmul.mubr.f32.gmra.mrb[98].mxu1 %v5549_v21  ;;  %v5574_v21 = vmax.f32 %v9522_v62, 0.0  ;;  %v15338_v62 = vld [vmem:[#allocation46_spill] sm:$0xff] }
 0x5cf   : > { %8503 = vmatprep.mubr.msk.f32.mxu0 %vm422_vm0, %v5554_v51  ;;  %8539 = vmatprep.mubr.msk.f32.mxu1 %vm422_vm0, %v5554_v51  ;;  %v9524_v51 = vadd.f32 %v14511_v55, %v15330_v10 }
 0x5d1   : > { %v14649_v6 = vpop.f32.mrb[68].mxu1  ;;  %v5578_v1 = vmax.f32 %v9524_v51, 0.0 }
 0x5d2   : > { %v14651_v43 = vpop.f32.mrb[69].mxu1  ;;  %6285 = vmatmul.mubr.f32.gmra.mrb[100].mxu0 %v5553_v58  ;;  %6955 = vmatmul.mubr.f32.gmra.mrb[100].mxu1 %v5553_v58  ;;  %v15331_v58 = vld [vmem:[#allocation39_spill] sm:$0xff] }
 0x5d3   : > { %8504 = vmatprep.mubr.msk.f32.mxu0 %vm422_vm0, %v5558_v9  ;;  %8540 = vmatprep.mubr.msk.f32.mxu1 %vm422_vm0, %v5558_v9  ;;  %v9526_v44 = vadd.f32 %v14521_v24, %v15331_v58  ;;  %v9525_v55 = vadd.f32 %v14519_v52, %v15331_v58  ;;  %v9527_v24 = vadd.f32 %v14529_v14, %v15332_v13  ;;  %v5589_v14 = vmax.f32 %v9529_v18, 0.0  ;;  %v15341_v58 = vld [vmem:[#allocation41_spill] sm:$0xff] }
 0x5d5   : > { %v14659_v16 = vpop.f32.mrb[70].mxu1  ;;  %v5582_v9 = vmax.f32 %v9526_v44, 0.0  ;;  %v5581_v56 = vmax.f32 %v9525_v55, 0.0  ;;  %v5585_v52 = vmax.f32 %v9527_v24, 0.0  ;;  %v9546_v44 = vadd.f32 %v14621_v36, %v15341_v58  ;;  %v15342_v55 = vld [vmem:[#allocation48_spill] sm:$0xff] }
 0x5d6   : > { %v14661_v48 = vpop.f32.mrb[71].mxu1  ;;  %6291 = vmatmul.mubr.f32.gmra.mrb[102].mxu0 %v5557_v41  ;;  %6961 = vmatmul.mubr.f32.gmra.mrb[102].mxu1 %v5557_v41  ;;  %v5586_v41 = vmax.f32 %v9528_v28, 0.0  ;;  %v9547_v36 = vadd.f32 %v14629_v47, %v15342_v55  ;;  %v15343_v28 = vld [vmem:[#allocation38_spill] sm:$0xff] }
 0x5d7   : > { %8505 = vmatprep.mubr.msk.f32.mxu0 %vm422_vm0, %v5562_v54  ;;  %8541 = vmatprep.mubr.msk.f32.mxu1 %vm422_vm0, %v5562_v54  ;;  %v5590_v54 = vmax.f32 %v9530_v59, 0.0 }
 0x5da   : > { %6297 = vmatmul.mubr.f32.gmra.mrb[104].mxu0 %v5561_v49  ;;  %6967 = vmatmul.mubr.f32.gmra.mrb[104].mxu1 %v5561_v49  ;;  %v5594_v49 = vmax.f32 %v9532_v30, 0.0 }
 0x5db   : > { %8506 = vmatprep.mubr.msk.f32.mxu0 %vm422_vm0, %v5566_v19  ;;  %8542 = vmatprep.mubr.msk.f32.mxu1 %vm422_vm0, %v5566_v19  ;;  %v5598_v19 = vmax.f32 %v9534_v32, 0.0  ;;  %v7160_v32 = vld [vmem:[#allocation9 + $0x8] sm:$0xff] }
 0x5de   : > { %6303 = vmatmul.mubr.f32.gmra.mrb[106].mxu0 %v5565_v35  ;;  %6973 = vmatmul.mubr.f32.gmra.mrb[106].mxu1 %v5565_v35  ;;  %v5602_v35 = vmax.f32 %v9536_v25, 0.0 }
 0x5df   : > { %8507 = vmatprep.mubr.msk.f32.mxu0 %vm422_vm0, %v5570_v22  ;;  %8543 = vmatprep.mubr.msk.f32.mxu1 %vm422_vm0, %v5570_v22  ;;  %v9538_v22 = vadd.f32 %v14581_v2, %v15337_v3  ;;  %v9539_v2 = vadd.f32 %v14589_v53, %v15338_v62 }
 0x5e1   : > { %v5606_v38 = vmax.f32 %v9538_v22, 0.0  ;;  %v5609_v5 = vmax.f32 %v9539_v2, 0.0 }
 0x5e2   : > { %6309 = vmatmul.mubr.f32.gmra.mrb[108].mxu0 %v5569_v50  ;;  %6979 = vmatmul.mubr.f32.gmra.mrb[108].mxu1 %v5569_v50  ;;  %v9540_v50 = vadd.f32 %v14591_v0, %v15338_v62 }
 0x5e3   : > { %8508 = vmatprep.mubr.msk.f32.mxu0 %vm422_vm0, %v5574_v21  ;;  %8544 = vmatprep.mubr.msk.f32.mxu1 %vm422_vm0, %v5574_v21  ;;  %v15339_v21 = vld [vmem:[#allocation31_spill] sm:$0xff] }
 0x5e4   : > { %v5610_v45 = vmax.f32 %v9540_v50, 0.0  ;;  %v9542_v10 = vadd.f32 %v14601_v40, %v15339_v21  ;;  %v9541_v0 = vadd.f32 %v14599_v11, %v15339_v21 }
 0x5e6   : > { %6315 = vmatmul.mubr.f32.gmra.mrb[110].mxu0 %v5573_v63  ;;  %6985 = vmatmul.mubr.f32.gmra.mrb[110].mxu1 %v5573_v63  ;;  %v5614_v51 = vmax.f32 %v9542_v10, 0.0  ;;  %v15340_v63 = vld [vmem:[#allocation34_spill] sm:$0xff]  ;;  %v5613_v53 = vmax.f32 %v9541_v0, 0.0 }
 0x5e7   : > { %8509 = vmatprep.mubr.msk.f32.mxu0 %vm422_vm0, %v5578_v1  ;;  %8545 = vmatprep.mubr.msk.f32.mxu1 %vm422_vm0, %v5578_v1  ;;  %v9544_v8 = vadd.f32 %v14611_v12, %v15340_v63  ;;  %v9543_v40 = vadd.f32 %v14609_v57, %v15340_v63  ;;  %v9545_v12 = vadd.f32 %v14619_v20, %v15341_v58  ;;  %v5625_v20 = vmax.f32 %v9547_v36, 0.0 }
 0x5e9   : > { %v5618_v1 = vmax.f32 %v9544_v8, 0.0  ;;  %v5617_v11 = vmax.f32 %v9543_v40, 0.0  ;;  %v5621_v57 = vmax.f32 %v9545_v12, 0.0 }
 0x5ea   : > { %6321 = vmatmul.mubr.f32.gmra.mrb[112].mxu0 %v5577_v31  ;;  %6991 = vmatmul.mubr.f32.gmra.mrb[112].mxu1 %v5577_v31  ;;  %v5622_v31 = vmax.f32 %v9546_v44, 0.0 }
 0x5eb   : > { %8510 = vmatprep.mubr.msk.f32.mxu0 %vm422_vm0, %v5582_v9  ;;  %8546 = vmatprep.mubr.msk.f32.mxu1 %vm422_vm0, %v5582_v9  ;;  %v9548_v9 = vadd.f32 %v14631_v46, %v15342_v55  ;;  %v9549_v46 = vadd.f32 %v14639_v27, %v15343_v28 }
 0x5ed   : > { %v5626_v13 = vmax.f32 %v9548_v9, 0.0  ;;  %v5629_v47 = vmax.f32 %v9549_v46, 0.0 }
 0x5ee   : > { %6327 = vmatmul.mubr.f32.gmra.mrb[114].mxu0 %v5581_v56  ;;  %6997 = vmatmul.mubr.f32.gmra.mrb[114].mxu1 %v5581_v56  ;;  %v9550_v56 = vadd.f32 %v14641_v39, %v15343_v28 }
 0x5ef   : > { %8511 = vmatprep.mubr.msk.f32.mxu0 %vm422_vm0, %v5586_v41  ;;  %8547 = vmatprep.mubr.msk.f32.mxu1 %vm422_vm0, %v5586_v41  ;;  %v15344_v41 = vld [vmem:[#allocation49_spill] sm:$0xff] }
 0x5f0   : > { %v5630_v24 = vmax.f32 %v9550_v56, 0.0  ;;  %v9552_v15 = vadd.f32 %v14651_v43, %v15344_v41  ;;  %v9551_v39 = vadd.f32 %v14649_v6, %v15344_v41  ;;  %v9553_v43 = vadd.f32 %v14659_v16, %v14485_v60 }
 0x5f2   : > { %6333 = vmatmul.mubr.f32.gmra.mrb[116].mxu0 %v5585_v52  ;;  %7003 = vmatmul.mubr.f32.gmra.mrb[116].mxu1 %v5585_v52  ;;  %v5634_v59 = vmax.f32 %v9552_v15, 0.0  ;;  %v9554_v52 = vadd.f32 %v14661_v48, %v14485_v60  ;;  %v5633_v27 = vmax.f32 %v9551_v39, 0.0  ;;  %v5637_v6 = vmax.f32 %v9553_v43, 0.0  ;;  %v7615_v60 = vld [vmem:[#allocation11 + $0x8] sm:$0xff] }
 0x5f3   : > { %8512 = vmatprep.mubr.msk.f32.mxu0 %vm422_vm0, %v5590_v54  ;;  %8548 = vmatprep.mubr.msk.f32.mxu1 %vm422_vm0, %v5590_v54 }
 0x5f4   : > { %v5638_v18 = vmax.f32 %v9554_v52, 0.0 }
 0x5f6   : > { %6339 = vmatmul.mubr.f32.gmra.mrb[118].mxu0 %v5589_v14  ;;  %7009 = vmatmul.mubr.f32.gmra.mrb[118].mxu1 %v5589_v14 }
 0x5f7   : > { %8513 = vmatprep.mubr.msk.f32.mxu0 %vm422_vm0, %v5594_v49  ;;  %8549 = vmatprep.mubr.msk.f32.mxu1 %vm422_vm0, %v5594_v49 }
 0x5fa   : > { %6345 = vmatmul.mubr.f32.gmra.mrb[120].mxu0 %v5593_v7  ;;  %7015 = vmatmul.mubr.f32.gmra.mrb[120].mxu1 %v5593_v7 }
 0x5fb   : > { %8514 = vmatprep.mubr.msk.f32.mxu0 %vm422_vm0, %v5598_v19  ;;  %8550 = vmatprep.mubr.msk.f32.mxu1 %vm422_vm0, %v5598_v19 }
 0x5fe   : > { %6351 = vmatmul.mubr.f32.gmra.mrb[122].mxu0 %v5597_v29  ;;  %7021 = vmatmul.mubr.f32.gmra.mrb[122].mxu1 %v5597_v29 }
 0x5ff   : > { %8515 = vmatprep.mubr.msk.f32.mxu0 %vm422_vm0, %v5602_v35  ;;  %8551 = vmatprep.mubr.msk.f32.mxu1 %vm422_vm0, %v5602_v35 }
 0x602   : > { %6357 = vmatmul.mubr.f32.gmra.mrb[124].mxu0 %v5601_v33  ;;  %7027 = vmatmul.mubr.f32.gmra.mrb[124].mxu1 %v5601_v33 }
 0x603   : > { %8516 = vmatprep.mubr.msk.f32.mxu0 %vm422_vm0, %v5606_v38  ;;  %8552 = vmatprep.mubr.msk.f32.mxu1 %vm422_vm0, %v5606_v38 }
 0x606   : > { %6363 = vmatmul.mubr.f32.gmra.mrb[126].mxu0 %v5605_v4  ;;  %7033 = vmatmul.mubr.f32.gmra.mrb[126].mxu1 %v5605_v4 }
 0x607   : > { %8517 = vmatprep.mubr.msk.f32.mxu0 %vm422_vm0, %v5610_v45  ;;  %8553 = vmatprep.mubr.msk.f32.mxu1 %vm422_vm0, %v5610_v45 }
 0x60a   : > { %6369 = vmatmul.mubr.f32.gmra.mrb[128].mxu0 %v5609_v5  ;;  %7039 = vmatmul.mubr.f32.gmra.mrb[128].mxu1 %v5609_v5 }
 0x60b   : > { %8518 = vmatprep.mubr.msk.f32.mxu0 %vm422_vm0, %v5614_v51  ;;  %8554 = vmatprep.mubr.msk.f32.mxu1 %vm422_vm0, %v5614_v51 }
 0x60e   : > { %6375 = vmatmul.mubr.f32.gmra.mrb[130].mxu0 %v5613_v53  ;;  %7045 = vmatmul.mubr.f32.gmra.mrb[130].mxu1 %v5613_v53 }
 0x60f   : > { %8519 = vmatprep.mubr.msk.f32.mxu0 %vm422_vm0, %v5618_v1  ;;  %8555 = vmatprep.mubr.msk.f32.mxu1 %vm422_vm0, %v5618_v1 }
 0x612   : > { %6381 = vmatmul.mubr.f32.gmra.mrb[132].mxu0 %v5617_v11  ;;  %7051 = vmatmul.mubr.f32.gmra.mrb[132].mxu1 %v5617_v11 }
 0x613   : > { %8520 = vmatprep.mubr.msk.f32.mxu0 %vm422_vm0, %v5622_v31  ;;  %8556 = vmatprep.mubr.msk.f32.mxu1 %vm422_vm0, %v5622_v31 }
 0x616   : > { %6387 = vmatmul.mubr.f32.gmra.mrb[134].mxu0 %v5621_v57  ;;  %7057 = vmatmul.mubr.f32.gmra.mrb[134].mxu1 %v5621_v57 }
 0x617   : > { %8521 = vmatprep.mubr.msk.f32.mxu0 %vm422_vm0, %v5626_v13  ;;  %8557 = vmatprep.mubr.msk.f32.mxu1 %vm422_vm0, %v5626_v13 }
 0x61a   : > { %6393 = vmatmul.mubr.f32.gmra.mrb[136].mxu0 %v5625_v20  ;;  %7063 = vmatmul.mubr.f32.gmra.mrb[136].mxu1 %v5625_v20 }
 0x61b   : > { %8522 = vmatprep.mubr.msk.f32.mxu0 %vm422_vm0, %v5630_v24  ;;  %8558 = vmatprep.mubr.msk.f32.mxu1 %vm422_vm0, %v5630_v24 }
 0x61e   : > { %6399 = vmatmul.mubr.f32.gmra.mrb[138].mxu0 %v5629_v47  ;;  %7069 = vmatmul.mubr.f32.gmra.mrb[138].mxu1 %v5629_v47 }
 0x61f   : > { %8523 = vmatprep.mubr.msk.f32.mxu0 %vm422_vm0, %v5634_v59  ;;  %8559 = vmatprep.mubr.msk.f32.mxu1 %vm422_vm0, %v5634_v59 }
 0x622   : > { %6405 = vmatmul.mubr.f32.gmra.mrb[140].mxu0 %v5633_v27  ;;  %7075 = vmatmul.mubr.f32.gmra.mrb[140].mxu1 %v5633_v27 }
 0x623   : > { %8524 = vmatprep.mubr.msk.f32.mxu0 %vm422_vm0, %v5638_v18  ;;  %8560 = vmatprep.mubr.msk.f32.mxu1 %vm422_vm0, %v5638_v18 }
 0x626   : > { %6411 = vmatmul.mubr.f32.gmra.mrb[142].mxu0 %v5637_v6  ;;  %7081 = vmatmul.mubr.f32.gmra.mrb[142].mxu1 %v5637_v6 }
 0x627   : > { %7332 = vmatprep.mubr.f32.mxu0 %v7160_v32  ;;  %7786 = vmatprep.mubr.f32.mxu1 %v7615_v60 }
 0x66d   : > { %v6202_v48 = vpop.f32.mrb[72].mxu0  ;;  %v6872_v54 = vpop.f32.mrb[72].mxu1 }
 0x66e   : > { %v7087_v42 = vmax.f32 %v6202_v48, %v6872_v54  ;;  %v6204_v30 = vpop.f32.mrb[73].mxu0  ;;  %v6874_v14 = vpop.f32.mrb[73].mxu1 }
 0x66f   : > { %v7088_v37 = vmax.f32 %v6204_v30, %v6874_v14 }
 0x671   : > { %v6208_v49 = vpop.f32.mrb[74].mxu0  ;;  %v6878_v34 = vpop.f32.mrb[74].mxu1 }
 0x672   : > { %v7089_v16 = vmax.f32 %v6208_v49, %v6878_v34  ;;  %v6210_v7 = vpop.f32.mrb[75].mxu0  ;;  %v6880_v17 = vpop.f32.mrb[75].mxu1 }
 0x673   : > { %v7090_v19 = vmax.f32 %v6210_v7, %v6880_v17 }
 0x674   : > { %v9269_v23 = vpack.c.bf16 %v7089_v16, %v7087_v42 }
 0x675   : > { %v9267_v25 = vpack.c.bf16 %v7090_v19, %v7088_v37  ;;  %v6214_v29 = vpop.f32.mrb[76].mxu0  ;;  %v6884_v61 = vpop.f32.mrb[76].mxu1 }
 0x676   : > { %v7091_v35 = vmax.f32 %v6214_v29, %v6884_v61  ;;  %v6216_v3 = vpop.f32.mrb[77].mxu0  ;;  %v6886_v22 = vpop.f32.mrb[77].mxu1 }
 0x677   : > { %v7092_v33 = vmax.f32 %v6216_v3, %v6886_v22  ;;  %9268 = vmatprep.subr.bf16.mxu0 %v9267_v25  ;;  %9340 = vmatprep.subr.bf16.mxu1 %v9267_v25 }
 0x678   : > { %9270 = vmatpush1.bf16.msra.mxu0 %v9269_v23  ;;  %9342 = vmatpush1.bf16.msra.mxu1 %v9269_v23 }
 0x679   : > { %v6220_v26 = vpop.f32.mrb[78].mxu0  ;;  %v6890_v38 = vpop.f32.mrb[78].mxu1 }
 0x67a   : > { %v7093_v62 = vmax.f32 %v6220_v26, %v6890_v38  ;;  %v6222_v50 = vpop.f32.mrb[79].mxu0  ;;  %v6892_v4 = vpop.f32.mrb[79].mxu1 }
 0x67b   : > { %v7094_v2 = vmax.f32 %v6222_v50, %v6892_v4 }
 0x67c   : > { %v9273_v45 = vpack.c.bf16 %v7093_v62, %v7091_v35 }
 0x67d   : > { %v9271_v21 = vpack.c.bf16 %v7094_v2, %v7092_v33  ;;  %v6226_v10 = vpop.f32.mrb[80].mxu0  ;;  %v6896_v5 = vpop.f32.mrb[80].mxu1 }
 0x67e   : > { %v7095_v0 = vmax.f32 %v6226_v10, %v6896_v5  ;;  %v6228_v51 = vpop.f32.mrb[81].mxu0  ;;  %v6898_v63 = vpop.f32.mrb[81].mxu1 }
 0x67f   : > { %v7096_v8 = vmax.f32 %v6228_v51, %v6898_v63  ;;  %9272 = vmatprep.subr.bf16.mxu0 %v9271_v21  ;;  %9344 = vmatprep.subr.bf16.mxu1 %v9271_v21 }
 0x680   : > { %9274 = vmatpush1.bf16.msra.mxu0 %v9273_v45  ;;  %9346 = vmatpush1.bf16.msra.mxu1 %v9273_v45 }
 0x681   : > { %v6232_v53 = vpop.f32.mrb[82].mxu0  ;;  %v6902_v40 = vpop.f32.mrb[82].mxu1 }
 0x682   : > { %v7097_v1 = vmax.f32 %v6232_v53, %v6902_v40  ;;  %v6234_v58 = vpop.f32.mrb[83].mxu0  ;;  %v6904_v44 = vpop.f32.mrb[83].mxu1 }
 0x683   : > { %v7098_v11 = vmax.f32 %v6234_v58, %v6904_v44 }
 0x684   : > { %v9277_v12 = vpack.c.bf16 %v7097_v1, %v7095_v0 }
 0x685   : > { %v9275_v31 = vpack.c.bf16 %v7098_v11, %v7096_v8  ;;  %v6238_v55 = vpop.f32.mrb[84].mxu0  ;;  %v6908_v9 = vpop.f32.mrb[84].mxu1 }
 0x686   : > { %v7099_v57 = vmax.f32 %v6238_v55, %v6908_v9  ;;  %v6240_v36 = vpop.f32.mrb[85].mxu0  ;;  %v6910_v13 = vpop.f32.mrb[85].mxu1 }
 0x687   : > { %v7100_v28 = vmax.f32 %v6240_v36, %v6910_v13  ;;  %9276 = vmatprep.subr.bf16.mxu0 %v9275_v31  ;;  %9348 = vmatprep.subr.bf16.mxu1 %v9275_v31 }
 0x688   : > { %9278 = vmatpush1.bf16.msra.mxu0 %v9277_v12  ;;  %9350 = vmatpush1.bf16.msra.mxu1 %v9277_v12 }
 0x689   : > { %v6244_v56 = vpop.f32.mrb[86].mxu0  ;;  %v6914_v20 = vpop.f32.mrb[86].mxu1 }
 0x68a   : > { %v7101_v46 = vmax.f32 %v6244_v56, %v6914_v20  ;;  %v6246_v24 = vpop.f32.mrb[87].mxu0  ;;  %v6916_v41 = vpop.f32.mrb[87].mxu1 }
 0x68b   : > { %v7102_v15 = vmax.f32 %v6246_v24, %v6916_v41 }
 0x68c   : > { %v9281_v47 = vpack.c.bf16 %v7101_v46, %v7099_v57 }
 0x68d   : > { %v9279_v39 = vpack.c.bf16 %v7102_v15, %v7100_v28  ;;  %v6250_v59 = vpop.f32.mrb[88].mxu0  ;;  %v6920_v52 = vpop.f32.mrb[88].mxu1 }
 0x68e   : > { %v7103_v27 = vmax.f32 %v6250_v59, %v6920_v52  ;;  %v6252_v43 = vpop.f32.mrb[89].mxu0  ;;  %v6922_v18 = vpop.f32.mrb[89].mxu1 }
 0x68f   : > { %v7104_v6 = vmax.f32 %v6252_v43, %v6922_v18  ;;  %9280 = vmatprep.subr.bf16.mxu0 %v9279_v39  ;;  %9352 = vmatprep.subr.bf16.mxu1 %v9279_v39 }
 0x690   : > { %9282 = vmatpush1.bf16.msra.mxu0 %v9281_v47  ;;  %9354 = vmatpush1.bf16.msra.mxu1 %v9281_v47 }
 0x691   : > { %v6256_v48 = vpop.f32.mrb[90].mxu0  ;;  %v6926_v54 = vpop.f32.mrb[90].mxu1 }
 0x692   : > { %v7105_v42 = vmax.f32 %v6256_v48, %v6926_v54  ;;  %v6258_v30 = vpop.f32.mrb[91].mxu0  ;;  %v6928_v14 = vpop.f32.mrb[91].mxu1 }
 0x693   : > { %v7106_v37 = vmax.f32 %v6258_v30, %v6928_v14 }
 0x694   : > { %v9285_v49 = vpack.c.bf16 %v7105_v42, %v7103_v27 }
 0x695   : > { %v9283_v34 = vpack.c.bf16 %v7106_v37, %v7104_v6  ;;  %v6262_v32 = vpop.f32.mrb[92].mxu0  ;;  %v6932_v60 = vpop.f32.mrb[92].mxu1 }
 0x696   : > { %v7107_v16 = vmax.f32 %v6262_v32, %v6932_v60  ;;  %v6264_v7 = vpop.f32.mrb[93].mxu0  ;;  %v6934_v17 = vpop.f32.mrb[93].mxu1 }
 0x697   : > { %v7108_v19 = vmax.f32 %v6264_v7, %v6934_v17  ;;  %9284 = vmatprep.subr.bf16.mxu0 %v9283_v34  ;;  %9356 = vmatprep.subr.bf16.mxu1 %v9283_v34 }
 0x698   : > { %9286 = vmatpush1.bf16.msra.mxu0 %v9285_v49  ;;  %9358 = vmatpush1.bf16.msra.mxu1 %v9285_v49 }
 0x699   : > { %v6268_v23 = vpop.f32.mrb[94].mxu0  ;;  %v6938_v25 = vpop.f32.mrb[94].mxu1 }
 0x69a   : > { %v7109_v29 = vmax.f32 %v6268_v23, %v6938_v25  ;;  %v6270_v61 = vpop.f32.mrb[95].mxu0  ;;  %v6940_v35 = vpop.f32.mrb[95].mxu1 }
 0x69b   : > { %v7110_v3 = vmax.f32 %v6270_v61, %v6940_v35 }
 0x69c   : > { %v9289_v22 = vpack.c.bf16 %v7109_v29, %v7107_v16 }
 0x69d   : > { %v9287_v33 = vpack.c.bf16 %v7110_v3, %v7108_v19  ;;  %v6274_v26 = vpop.f32.mrb[96].mxu0  ;;  %v6944_v38 = vpop.f32.mrb[96].mxu1 }
 0x69e   : > { %v7111_v62 = vmax.f32 %v6274_v26, %v6944_v38  ;;  %v6276_v50 = vpop.f32.mrb[97].mxu0  ;;  %v6946_v4 = vpop.f32.mrb[97].mxu1 }
 0x69f   : > { %v7112_v2 = vmax.f32 %v6276_v50, %v6946_v4  ;;  %9288 = vmatprep.subr.bf16.mxu0 %v9287_v33  ;;  %9360 = vmatprep.subr.bf16.mxu1 %v9287_v33 }
 0x6a0   : > { %9290 = vmatpush1.bf16.msra.mxu0 %v9289_v22  ;;  %9362 = vmatpush1.bf16.msra.mxu1 %v9289_v22 }
 0x6a1   : > { %v6280_v45 = vpop.f32.mrb[98].mxu0  ;;  %v6950_v21 = vpop.f32.mrb[98].mxu1 }
 0x6a2   : > { %v7113_v10 = vmax.f32 %v6280_v45, %v6950_v21  ;;  %v6282_v5 = vpop.f32.mrb[99].mxu0  ;;  %v6952_v0 = vpop.f32.mrb[99].mxu1 }
 0x6a3   : > { %v7114_v51 = vmax.f32 %v6282_v5, %v6952_v0 }
 0x6a4   : > { %v9293_v63 = vpack.c.bf16 %v7113_v10, %v7111_v62 }
 0x6a5   : > { %v9291_v8 = vpack.c.bf16 %v7114_v51, %v7112_v2  ;;  %v6286_v53 = vpop.f32.mrb[100].mxu0  ;;  %v6956_v40 = vpop.f32.mrb[100].mxu1 }
 0x6a6   : > { %v7115_v1 = vmax.f32 %v6286_v53, %v6956_v40  ;;  %v6288_v58 = vpop.f32.mrb[101].mxu0  ;;  %v6958_v44 = vpop.f32.mrb[101].mxu1 }
 0x6a7   : > { %v7116_v11 = vmax.f32 %v6288_v58, %v6958_v44  ;;  %9292 = vmatprep.subr.bf16.mxu0 %v9291_v8  ;;  %9364 = vmatprep.subr.bf16.mxu1 %v9291_v8 }
 0x6a8   : > { %9294 = vmatpush1.bf16.msra.mxu0 %v9293_v63  ;;  %9366 = vmatpush1.bf16.msra.mxu1 %v9293_v63 }
 0x6a9   : > { %v6292_v12 = vpop.f32.mrb[102].mxu0  ;;  %v6962_v31 = vpop.f32.mrb[102].mxu1 }
 0x6aa   : > { %v7117_v55 = vmax.f32 %v6292_v12, %v6962_v31  ;;  %v6294_v9 = vpop.f32.mrb[103].mxu0  ;;  %v6964_v57 = vpop.f32.mrb[103].mxu1 }
 0x6ab   : > { %v7118_v36 = vmax.f32 %v6294_v9, %v6964_v57 }
 0x6ac   : > { %v9297_v13 = vpack.c.bf16 %v7117_v55, %v7115_v1 }
 0x6ad   : > { %v9295_v28 = vpack.c.bf16 %v7118_v36, %v7116_v11  ;;  %v6298_v56 = vpop.f32.mrb[104].mxu0  ;;  %v6968_v20 = vpop.f32.mrb[104].mxu1 }
 0x6ae   : > { %v7119_v46 = vmax.f32 %v6298_v56, %v6968_v20  ;;  %v6300_v24 = vpop.f32.mrb[105].mxu0  ;;  %v6970_v41 = vpop.f32.mrb[105].mxu1 }
 0x6af   : > { %v7120_v15 = vmax.f32 %v6300_v24, %v6970_v41  ;;  %9296 = vmatprep.subr.bf16.mxu0 %v9295_v28  ;;  %9368 = vmatprep.subr.bf16.mxu1 %v9295_v28 }
 0x6b0   : > { %9298 = vmatpush1.bf16.msra.mxu0 %v9297_v13  ;;  %9370 = vmatpush1.bf16.msra.mxu1 %v9297_v13 }
 0x6b1   : > { %v6304_v47 = vpop.f32.mrb[106].mxu0  ;;  %v6974_v39 = vpop.f32.mrb[106].mxu1 }
 0x6b2   : > { %v7121_v59 = vmax.f32 %v6304_v47, %v6974_v39  ;;  %v6306_v52 = vpop.f32.mrb[107].mxu0  ;;  %v6976_v27 = vpop.f32.mrb[107].mxu1 }
 0x6b3   : > { %v7122_v43 = vmax.f32 %v6306_v52, %v6976_v27 }
 0x6b4   : > { %v9301_v18 = vpack.c.bf16 %v7121_v59, %v7119_v46 }
 0x6b5   : > { %v9299_v6 = vpack.c.bf16 %v7122_v43, %v7120_v15  ;;  %v6310_v48 = vpop.f32.mrb[108].mxu0  ;;  %v6980_v54 = vpop.f32.mrb[108].mxu1 }
 0x6b6   : > { %v7123_v42 = vmax.f32 %v6310_v48, %v6980_v54  ;;  %v6312_v30 = vpop.f32.mrb[109].mxu0  ;;  %v6982_v14 = vpop.f32.mrb[109].mxu1 }
 0x6b7   : > { %v7124_v37 = vmax.f32 %v6312_v30, %v6982_v14  ;;  %9300 = vmatprep.subr.bf16.mxu0 %v9299_v6  ;;  %9372 = vmatprep.subr.bf16.mxu1 %v9299_v6 }
 0x6b8   : > { %9302 = vmatpush1.bf16.msra.mxu0 %v9301_v18  ;;  %9374 = vmatpush1.bf16.msra.mxu1 %v9301_v18 }
 0x6b9   : > { %v6316_v49 = vpop.f32.mrb[110].mxu0  ;;  %v6986_v34 = vpop.f32.mrb[110].mxu1 }
 0x6ba   : > { %v7125_v32 = vmax.f32 %v6316_v49, %v6986_v34  ;;  %v6318_v60 = vpop.f32.mrb[111].mxu0  ;;  %v6988_v16 = vpop.f32.mrb[111].mxu1 }
 0x6bb   : > { %v7126_v7 = vmax.f32 %v6318_v60, %v6988_v16 }
 0x6bc   : > { %v9305_v17 = vpack.c.bf16 %v7125_v32, %v7123_v42 }
 0x6bd   : > { %v9303_v19 = vpack.c.bf16 %v7126_v7, %v7124_v37  ;;  %v6322_v23 = vpop.f32.mrb[112].mxu0  ;;  %v6992_v25 = vpop.f32.mrb[112].mxu1 }
 0x6be   : > { %v7127_v29 = vmax.f32 %v6322_v23, %v6992_v25  ;;  %v6324_v61 = vpop.f32.mrb[113].mxu0  ;;  %v6994_v35 = vpop.f32.mrb[113].mxu1 }
 0x6bf   : > { %v7128_v3 = vmax.f32 %v6324_v61, %v6994_v35  ;;  %9304 = vmatprep.subr.bf16.mxu0 %v9303_v19  ;;  %9376 = vmatprep.subr.bf16.mxu1 %v9303_v19 }
 0x6c0   : > { %9306 = vmatpush1.bf16.msra.mxu0 %v9305_v17  ;;  %9378 = vmatpush1.bf16.msra.mxu1 %v9305_v17 }
 0x6c1   : > { %v6328_v22 = vpop.f32.mrb[114].mxu0  ;;  %v6998_v33 = vpop.f32.mrb[114].mxu1 }
 0x6c2   : > { %v7129_v26 = vmax.f32 %v6328_v22, %v6998_v33  ;;  %v6330_v38 = vpop.f32.mrb[115].mxu0  ;;  %v7000_v62 = vpop.f32.mrb[115].mxu1 }
 0x6c3   : > { %v7130_v50 = vmax.f32 %v6330_v38, %v7000_v62 }
 0x6c4   : > { %v9309_v4 = vpack.c.bf16 %v7129_v26, %v7127_v29 }
 0x6c5   : > { %v9307_v2 = vpack.c.bf16 %v7130_v50, %v7128_v3  ;;  %v6334_v45 = vpop.f32.mrb[116].mxu0  ;;  %v7004_v21 = vpop.f32.mrb[116].mxu1 }
 0x6c6   : > { %v7131_v10 = vmax.f32 %v6334_v45, %v7004_v21  ;;  %v6336_v5 = vpop.f32.mrb[117].mxu0  ;;  %v7006_v0 = vpop.f32.mrb[117].mxu1 }
 0x6c7   : > { %v7132_v51 = vmax.f32 %v6336_v5, %v7006_v0  ;;  %9308 = vmatprep.subr.bf16.mxu0 %v9307_v2  ;;  %9380 = vmatprep.subr.bf16.mxu1 %v9307_v2 }
 0x6c8   : > { %9310 = vmatpush1.bf16.msra.mxu0 %v9309_v4  ;;  %9382 = vmatpush1.bf16.msra.mxu1 %v9309_v4 }
 0x6c9   : > { %v6340_v63 = vpop.f32.mrb[118].mxu0  ;;  %v7010_v8 = vpop.f32.mrb[118].mxu1 }
 0x6ca   : > { %v7133_v53 = vmax.f32 %v6340_v63, %v7010_v8  ;;  %v6342_v40 = vpop.f32.mrb[119].mxu0  ;;  %v7012_v1 = vpop.f32.mrb[119].mxu1 }
 0x6cb   : > { %v7134_v58 = vmax.f32 %v6342_v40, %v7012_v1 }
 0x6cc   : > { %v9313_v44 = vpack.c.bf16 %v7133_v53, %v7131_v10 }
 0x6cd   : > { %v9311_v11 = vpack.c.bf16 %v7134_v58, %v7132_v51  ;;  %v6346_v12 = vpop.f32.mrb[120].mxu0  ;;  %v7016_v31 = vpop.f32.mrb[120].mxu1 }
 0x6ce   : > { %v7135_v55 = vmax.f32 %v6346_v12, %v7016_v31  ;;  %v6348_v9 = vpop.f32.mrb[121].mxu0  ;;  %v7018_v57 = vpop.f32.mrb[121].mxu1 }
 0x6cf   : > { %v7136_v36 = vmax.f32 %v6348_v9, %v7018_v57  ;;  %9312 = vmatprep.subr.bf16.mxu0 %v9311_v11  ;;  %9384 = vmatprep.subr.bf16.mxu1 %v9311_v11  ;;  %v7614_v11 = vld [vmem:[#allocation11] sm:$0xff] }
 0x6d0   : > { %9314 = vmatpush1.bf16.msra.mxu0 %v9313_v44  ;;  %9386 = vmatpush1.bf16.msra.mxu1 %v9313_v44  ;;  %v7159_v44 = vld [vmem:[#allocation9] sm:$0xff]  ;;  %v7618_v9 = vld [vmem:[#allocation11 + $0x20] sm:$0xff] }
 0x6d1   : > { %v6352_v13 = vpop.f32.mrb[122].mxu0  ;;  %v7022_v28 = vpop.f32.mrb[122].mxu1 }
 0x6d2   : > { %v7137_v56 = vmax.f32 %v6352_v13, %v7022_v28  ;;  %v6354_v20 = vpop.f32.mrb[123].mxu0  ;;  %v7024_v46 = vpop.f32.mrb[123].mxu1 }
 0x6d3   : > { %v7138_v24 = vmax.f32 %v6354_v20, %v7024_v46  ;;  %v7162_v20 = vld [vmem:[#allocation9 + $0x18] sm:$0xff] }
 0x6d4   : > { %v9317_v41 = vpack.c.bf16 %v7137_v56, %v7135_v55  ;;  %v7163_v55 = vld [vmem:[#allocation9 + $0x20] sm:$0xff] }
 0x6d5   : > { %v9315_v15 = vpack.c.bf16 %v7138_v24, %v7136_v36  ;;  %v6358_v47 = vpop.f32.mrb[124].mxu0  ;;  %v7028_v39 = vpop.f32.mrb[124].mxu1 }
 0x6d6   : > { %v7139_v59 = vmax.f32 %v6358_v47, %v7028_v39  ;;  %v6360_v52 = vpop.f32.mrb[125].mxu0  ;;  %v7030_v27 = vpop.f32.mrb[125].mxu1 }
 0x6d7   : > { %v7140_v43 = vmax.f32 %v6360_v52, %v7030_v27  ;;  %9316 = vmatprep.subr.bf16.mxu0 %v9315_v15  ;;  %9388 = vmatprep.subr.bf16.mxu1 %v9315_v15  ;;  %v7617_v15 = vld [vmem:[#allocation11 + $0x18] sm:$0xff]  ;;  %v7166_v27 = vld [vmem:[#allocation9 + $0x38] sm:$0xff] }
 0x6d8   : > { %9318 = vmatpush1.bf16.msra.mxu0 %v9317_v41  ;;  %9390 = vmatpush1.bf16.msra.mxu1 %v9317_v41 }
 0x6d9   : > { %v6364_v18 = vpop.f32.mrb[126].mxu0  ;;  %v7034_v6 = vpop.f32.mrb[126].mxu1 }
 0x6da   : > { %v7141_v48 = vmax.f32 %v6364_v18, %v7034_v6  ;;  %v6366_v54 = vpop.f32.mrb[127].mxu0  ;;  %v7036_v42 = vpop.f32.mrb[127].mxu1  ;;  %v7165_v18 = vld [vmem:[#allocation9 + $0x30] sm:$0xff] }
 0x6db   : > { %v7142_v30 = vmax.f32 %v6366_v54, %v7036_v42  ;;  %v7620_v54 = vld [vmem:[#allocation11 + $0x30] sm:$0xff]  ;;  %v7169_v42 = vld [vmem:[#allocation9 + $0x50] sm:$0xff] }
 0x6dc   : > { %v9321_v14 = vpack.c.bf16 %v7141_v48, %v7139_v59 }
 0x6dd   : > { %v9319_v37 = vpack.c.bf16 %v7142_v30, %v7140_v43  ;;  %v6370_v49 = vpop.f32.mrb[128].mxu0  ;;  %v7040_v34 = vpop.f32.mrb[128].mxu1  ;;  %v7621_v43 = vld [vmem:[#allocation11 + $0x38] sm:$0xff] }
 0x6de   : > { %v7143_v32 = vmax.f32 %v6370_v49, %v7040_v34  ;;  %v6372_v60 = vpop.f32.mrb[129].mxu0  ;;  %v7042_v16 = vpop.f32.mrb[129].mxu1  ;;  %v7624_v49 = vld [vmem:[#allocation11 + $0x50] sm:$0xff] }
 0x6df   : > { %v7144_v7 = vmax.f32 %v6372_v60, %v7042_v16  ;;  %9320 = vmatprep.subr.bf16.mxu0 %v9319_v37  ;;  %9392 = vmatprep.subr.bf16.mxu1 %v9319_v37  ;;  %v7168_v60 = vld [vmem:[#allocation9 + $0x48] sm:$0xff] }
 0x6e0   : > { %9322 = vmatpush1.bf16.msra.mxu0 %v9321_v14  ;;  %9394 = vmatpush1.bf16.msra.mxu1 %v9321_v14 }
 0x6e1   : > { %v6376_v17 = vpop.f32.mrb[130].mxu0  ;;  %v7046_v19 = vpop.f32.mrb[130].mxu1 }
 0x6e2   : > { %v7145_v23 = vmax.f32 %v6376_v17, %v7046_v19  ;;  %v6378_v25 = vpop.f32.mrb[131].mxu0  ;;  %v7048_v29 = vpop.f32.mrb[131].mxu1  ;;  %v7172_v17 = vld [vmem:[#allocation9 + $0x68] sm:$0xff]  ;;  %v7627_v19 = vld [vmem:[#allocation11 + $0x68] sm:$0xff] }
 0x6e3   : > { %v7146_v61 = vmax.f32 %v6378_v25, %v7048_v29  ;;  %v7626_v25 = vld [vmem:[#allocation11 + $0x60] sm:$0xff]  ;;  %v7175_v29 = vld [vmem:[#allocation9 + $0x80] sm:$0xff] }
 0x6e4   : > { %v9325_v35 = vpack.c.bf16 %v7145_v23, %v7143_v32  ;;  %v7171_v23 = vld [vmem:[#allocation9 + $0x60] sm:$0xff] }
 0x6e5   : > { %v9323_v3 = vpack.c.bf16 %v7146_v61, %v7144_v7  ;;  %v6382_v22 = vpop.f32.mrb[132].mxu0  ;;  %v7052_v33 = vpop.f32.mrb[132].mxu1  ;;  %v7623_v7 = vld [vmem:[#allocation11 + $0x48] sm:$0xff]  ;;  %v7630_v61 = vld [vmem:[#allocation11 + $0x80] sm:$0xff] }
 0x6e6   : > { %v7147_v26 = vmax.f32 %v6382_v22, %v7052_v33  ;;  %v6384_v38 = vpop.f32.mrb[133].mxu0  ;;  %v7054_v62 = vpop.f32.mrb[133].mxu1  ;;  %v7178_v22 = vld [vmem:[#allocation9 + $0x98] sm:$0xff]  ;;  %v7633_v33 = vld [vmem:[#allocation11 + $0x98] sm:$0xff] }
 0x6e7   : > { %v7148_v50 = vmax.f32 %v6384_v38, %v7054_v62  ;;  %9324 = vmatprep.subr.bf16.mxu0 %v9323_v3  ;;  %9396 = vmatprep.subr.bf16.mxu1 %v9323_v3  ;;  %v7629_v3 = vld [vmem:[#allocation11 + $0x78] sm:$0xff]  ;;  %v7632_v38 = vld [vmem:[#allocation11 + $0x90] sm:$0xff]  ;;  %v7181_v62 = vld [vmem:[#allocation9 + $0xb0] sm:$0xff] }
 0x6e8   : > { %9326 = vmatpush1.bf16.msra.mxu0 %v9325_v35  ;;  %9398 = vmatpush1.bf16.msra.mxu1 %v9325_v35  ;;  %v7174_v35 = vld [vmem:[#allocation9 + $0x78] sm:$0xff] }
 0x6e9   : > { %v6388_v4 = vpop.f32.mrb[134].mxu0  ;;  %v7058_v2 = vpop.f32.mrb[134].mxu1 }
 0x6ea   : > { %v7149_v45 = vmax.f32 %v6388_v4, %v7058_v2  ;;  %v6390_v21 = vpop.f32.mrb[135].mxu0  ;;  %v7060_v10 = vpop.f32.mrb[135].mxu1  ;;  %v7180_v4 = vld [vmem:[#allocation9 + $0xa8] sm:$0xff]  ;;  %v7635_v2 = vld [vmem:[#allocation11 + $0xa8] sm:$0xff] }
 0x6eb   : > { %v7150_v5 = vmax.f32 %v6390_v21, %v7060_v10  ;;  %v7639_v21 = vld [vmem:[#allocation11 + $0xc8] sm:$0xff]  ;;  %v7183_v10 = vld [vmem:[#allocation9 + $0xc0] sm:$0xff] }
 0x6ec   : > { %v9329_v0 = vpack.c.bf16 %v7149_v45, %v7147_v26  ;;  %v7177_v26 = vld [vmem:[#allocation9 + $0x90] sm:$0xff]  ;;  %v7184_v45 = vld [vmem:[#allocation9 + $0xc8] sm:$0xff] }
 0x6ed   : > { %v9327_v51 = vpack.c.bf16 %v7150_v5, %v7148_v50  ;;  %v6394_v63 = vpop.f32.mrb[136].mxu0  ;;  %v7064_v8 = vpop.f32.mrb[136].mxu1  ;;  %v7636_v50 = vld [vmem:[#allocation11 + $0xb0] sm:$0xff]  ;;  %v7638_v5 = vld [vmem:[#allocation11 + $0xc0] sm:$0xff] }
 0x6ee   : > { %v7151_v53 = vmax.f32 %v6394_v63, %v7064_v8  ;;  %v6396_v40 = vpop.f32.mrb[137].mxu0  ;;  %v7066_v1 = vpop.f32.mrb[137].mxu1  ;;  %v7186_v63 = vld [vmem:[#allocation9 + $0xd8] sm:$0xff]  ;;  %v7641_v8 = vld [vmem:[#allocation11 + $0xd8] sm:$0xff] }
 0x6ef   : > { %v7152_v58 = vmax.f32 %v6396_v40, %v7066_v1  ;;  %9328 = vmatprep.subr.bf16.mxu0 %v9327_v51  ;;  %9400 = vmatprep.subr.bf16.mxu1 %v9327_v51  ;;  %v7642_v51 = vld [vmem:[#allocation11 + $0xe0] sm:$0xff]  ;;  %v7645_v40 = vld [vmem:[#allocation11 + $0xf8] sm:$0xff] }
 0x6f0   : > { %9330 = vmatpush1.bf16.msra.mxu0 %v9329_v0  ;;  %9402 = vmatpush1.bf16.msra.mxu1 %v9329_v0  ;;  %v7187_v0 = vld [vmem:[#allocation9 + $0xe0] sm:$0xff]  ;;  %v7189_v1 = vld [vmem:[#allocation9 + $0xf0] sm:$0xff] }
 0x6f1   : > { %v6400_v12 = vpop.f32.mrb[138].mxu0  ;;  %v7070_v31 = vpop.f32.mrb[138].mxu1 }
 0x6f2   : > { %v7153_v57 = vmax.f32 %v6400_v12, %v7070_v31  ;;  %v6402_v36 = vpop.f32.mrb[139].mxu0  ;;  %v7072_v13 = vpop.f32.mrb[139].mxu1  ;;  %v7192_v12 = vld [vmem:[#allocation9 + $0x108] sm:$0xff]  ;;  %v7647_v31 = vld [vmem:[#allocation11 + $0x108] sm:$0xff] }
 0x6f3   : > { %v7154_v28 = vmax.f32 %v6402_v36, %v7072_v13  ;;  %7333 = vmatmul.mubr.f32.vlgmr.msra.gmra.mrb[144].mxu0 %v7159_v44  ;;  %7787 = vmatmul.mubr.f32.vlgmr.msra.gmra.mrb[144].mxu1 %v7614_v11  ;;  %v7193_v44 = vld [vmem:[#allocation9 + $0x110] sm:$0xff]  ;;  %v7648_v11 = vld [vmem:[#allocation11 + $0x110] sm:$0xff] }
 0x6f4   : > { %v9333_v56 = vpack.c.bf16 %v7153_v57, %v7151_v53  ;;  %7338 = vmatprep.mubr.f32.mxu0 %v7163_v55  ;;  %7792 = vmatprep.mubr.f32.mxu1 %v7618_v9  ;;  %v7190_v53 = vld [vmem:[#allocation9 + $0xf8] sm:$0xff]  ;;  %v7196_v55 = vld [vmem:[#allocation9 + $0x128] sm:$0xff]  ;;  %v7195_v57 = vld [vmem:[#allocation9 + $0x120] sm:$0xff] }
 0x6f5   : > { %v9331_v46 = vpack.c.bf16 %v7154_v28, %v7152_v58  ;;  %v6406_v24 = vpop.f32.mrb[140].mxu0  ;;  %v7076_v41 = vpop.f32.mrb[140].mxu1  ;;  %v7644_v58 = vld [vmem:[#allocation11 + $0xf0] sm:$0xff]  ;;  %v7651_v9 = vld [vmem:[#allocation11 + $0x128] sm:$0xff]  ;;  %v7650_v36 = vld [vmem:[#allocation11 + $0x120] sm:$0xff] }
 0x6f6   : > { %v7155_v47 = vmax.f32 %v6406_v24, %v7076_v41  ;;  %v6408_v39 = vpop.f32.mrb[141].mxu0  ;;  %v7078_v59 = vpop.f32.mrb[141].mxu1  ;;  %v7199_v13 = vld [vmem:[#allocation9 + $0x140] sm:$0xff]  ;;  %v7654_v28 = vld [vmem:[#allocation11 + $0x140] sm:$0xff]  ;;  %v7657_v24 = vld [vmem:[#allocation11 + $0x158] sm:$0xff] }
 0x6f7   : > { %v7156_v52 = vmax.f32 %v6408_v39, %v7078_v59  ;;  %7339 = vmatmul.mubr.f32.gmra.mrb[146].mxu0 %v7162_v20  ;;  %9332 = vmatprep.subr.bf16.mxu0 %v9331_v46  ;;  %v7653_v20 = vld [vmem:[#allocation11 + $0x138] sm:$0xff]  ;;  %v7201_v41 = vld [vmem:[#allocation9 + $0x150] sm:$0xff]  ;;  %v7660_v39 = vld [vmem:[#allocation11 + $0x170] sm:$0xff] }
 0x6f8   : > { %7793 = vmatmul.mubr.f32.gmra.mrb[146].mxu1 %v7617_v15  ;;  %9404 = vmatprep.subr.bf16.mxu1 %v9331_v46  ;;  %v7202_v46 = vld [vmem:[#allocation9 + $0x158] sm:$0xff]  ;;  %v7656_v15 = vld [vmem:[#allocation11 + $0x150] sm:$0xff]  ;;  %v7204_v59 = vld [vmem:[#allocation9 + $0x168] sm:$0xff] }
 0x6f9   : > { %9334 = vmatpush1.bf16.msra.mxu0 %v9333_v56  ;;  %9406 = vmatpush1.bf16.msra.mxu1 %v9333_v56  ;;  %v6412_v6 = vpop.f32.mrb[142].mxu0  ;;  %v7082_v48 = vpop.f32.mrb[142].mxu1  ;;  %v7198_v56 = vld [vmem:[#allocation9 + $0x138] sm:$0xff] }
 0x6fa   : > { %v7157_v30 = vmax.f32 %v6412_v6, %v7082_v48  ;;  %v6414_v14 = vpop.f32.mrb[143].mxu0  ;;  %v7084_v37 = vpop.f32.mrb[143].mxu1  ;;  %7344 = vmatprep.mubr.f32.mxu0 %v7166_v27  ;;  %7798 = vmatprep.mubr.f32.mxu1 %v7621_v43  ;;  %v7208_v27 = vld [vmem:[#allocation9 + $0x188] sm:$0xff]  ;;  %v7663_v43 = vld [vmem:[#allocation11 + $0x188] sm:$0xff]  ;;  %v7662_v6 = vld [vmem:[#allocation11 + $0x180] sm:$0xff] }
 0x6fb   : > { %v7158_v34 = vmax.f32 %v6414_v14, %v7084_v37  ;;  %7345 = vmatmul.mubr.f32.gmra.mrb[148].mxu0 %v7165_v18  ;;  %v7207_v18 = vld [vmem:[#allocation9 + $0x180] sm:$0xff]  ;;  %v15345_v14 = vmov 0.0   ;;  %v7161_v37 = vld [vmem:[#allocation9 + $0x10] sm:$0xff] }
 0x6fc   : > { %v9337_v32 = vpack.c.bf16 %v7157_v30, %v7155_v47  ;;  %7799 = vmatmul.mubr.f32.gmra.mrb[148].mxu1 %v7620_v54  ;;  %7350 = vmatprep.mubr.f32.mxu0 %v7169_v42  ;;  %v7205_v47 = vld [vmem:[#allocation9 + $0x170] sm:$0xff]  ;;  %v7211_v48 = vld [vmem:[#allocation9 + $0x1a0] sm:$0xff]  ;;  %v7210_v42 = vld [vmem:[#allocation9 + $0x198] sm:$0xff] }
 0x6fd   : > { %v9335_v16 = vpack.c.bf16 %v7158_v34, %v7156_v52  ;;  %7804 = vmatprep.mubr.f32.mxu1 %v7624_v49  ;;  %v7659_v52 = vld [vmem:[#allocation11 + $0x168] sm:$0xff]  ;;  %v7666_v54 = vld [vmem:[#allocation11 + $0x1a0] sm:$0xff]  ;;  %v7665_v30 = vld [vmem:[#allocation11 + $0x198] sm:$0xff] }
 0x6fe   : > { %v7616_v49 = vld [vmem:[#allocation11 + $0x10] sm:$0xff]  ;;  %v7164_v34 = vld [vmem:[#allocation9 + $0x28] sm:$0xff] }
 0x6ff   : > { %7351 = vmatmul.mubr.f32.gmra.mrb[150].mxu0 %v7168_v60  ;;  %9336 = vmatprep.subr.bf16.mxu0 %v9335_v16  ;;  %v7167_v60 = vld [vmem:[#allocation9 + $0x40] sm:$0xff] }
 0x700   : > { %7805 = vmatmul.mubr.f32.gmra.mrb[150].mxu1 %v7623_v7  ;;  %9408 = vmatprep.subr.bf16.mxu1 %v9335_v16  ;;  %v7622_v16 = vld [vmem:[#allocation11 + $0x40] sm:$0xff]  ;;  %v7170_v7 = vld [vmem:[#allocation9 + $0x58] sm:$0xff] }
 0x701   : > { %9338 = vmatpush1.bf16.msra.mxu0 %v9337_v32  ;;  %9410 = vmatpush1.bf16.msra.mxu1 %v9337_v32  ;;  %v7619_v32 = vld [vmem:[#allocation11 + $0x28] sm:$0xff] }
 0x702   : > { %7356 = vmatprep.mubr.f32.mxu0 %v7172_v17  ;;  %7810 = vmatprep.mubr.f32.mxu1 %v7627_v19  ;;  %v7625_v17 = vld [vmem:[#allocation11 + $0x58] sm:$0xff]  ;;  %v7173_v19 = vld [vmem:[#allocation9 + $0x70] sm:$0xff] }
 0x703   : > { %7357 = vmatmul.mubr.f32.gmra.mrb[152].mxu0 %v7171_v23  ;;  %v7628_v23 = vld [vmem:[#allocation11 + $0x70] sm:$0xff] }
 0x704   : > { %7811 = vmatmul.mubr.f32.gmra.mrb[152].mxu1 %v7626_v25  ;;  %7362 = vmatprep.mubr.f32.mxu0 %v7175_v29  ;;  %v7176_v25 = vld [vmem:[#allocation9 + $0x88] sm:$0xff]  ;;  %v7631_v29 = vld [vmem:[#allocation11 + $0x88] sm:$0xff] }
 0x705   : > { %7816 = vmatprep.mubr.f32.mxu1 %v7630_v61  ;;  %v7179_v61 = vld [vmem:[#allocation9 + $0xa0] sm:$0xff] }
 0x707   : > { %7363 = vmatmul.mubr.f32.gmra.mrb[154].mxu0 %v7174_v35  ;;  %v7634_v35 = vld [vmem:[#allocation11 + $0xa0] sm:$0xff] }
 0x708   : > { %7817 = vmatmul.mubr.f32.gmra.mrb[154].mxu1 %v7629_v3  ;;  %7368 = vmatprep.mubr.f32.mxu0 %v7178_v22  ;;  %v7182_v3 = vld [vmem:[#allocation9 + $0xb8] sm:$0xff]  ;;  %v7637_v22 = vld [vmem:[#allocation11 + $0xb8] sm:$0xff] }
 0x709   : > { %7822 = vmatprep.mubr.f32.mxu1 %v7633_v33  ;;  %v7185_v33 = vld [vmem:[#allocation9 + $0xd0] sm:$0xff] }
 0x70b   : > { %7369 = vmatmul.mubr.f32.gmra.mrb[156].mxu0 %v7177_v26  ;;  %v7640_v26 = vld [vmem:[#allocation11 + $0xd0] sm:$0xff] }
 0x70c   : > { %7823 = vmatmul.mubr.f32.gmra.mrb[156].mxu1 %v7632_v38  ;;  %7374 = vmatprep.mubr.f32.mxu0 %v7181_v62  ;;  %v7188_v38 = vld [vmem:[#allocation9 + $0xe8] sm:$0xff]  ;;  %v7643_v62 = vld [vmem:[#allocation11 + $0xe8] sm:$0xff] }
 0x70d   : > { %7828 = vmatprep.mubr.f32.mxu1 %v7636_v50  ;;  %v7191_v50 = vld [vmem:[#allocation9 + $0x100] sm:$0xff] }
 0x70f   : > { %7375 = vmatmul.mubr.f32.gmra.mrb[158].mxu0 %v7180_v4  ;;  %v7646_v4 = vld [vmem:[#allocation11 + $0x100] sm:$0xff] }
 0x710   : > { %7829 = vmatmul.mubr.f32.gmra.mrb[158].mxu1 %v7635_v2  ;;  %7380 = vmatprep.mubr.f32.mxu0 %v7184_v45  ;;  %v7194_v2 = vld [vmem:[#allocation9 + $0x118] sm:$0xff]  ;;  %v7649_v45 = vld [vmem:[#allocation11 + $0x118] sm:$0xff] }
 0x711   : > { %7834 = vmatprep.mubr.f32.mxu1 %v7639_v21  ;;  %v7197_v21 = vld [vmem:[#allocation9 + $0x130] sm:$0xff] }
 0x713   : > { %7381 = vmatmul.mubr.f32.gmra.mrb[160].mxu0 %v7183_v10  ;;  %v7652_v10 = vld [vmem:[#allocation11 + $0x130] sm:$0xff] }
 0x714   : > { %7835 = vmatmul.mubr.f32.gmra.mrb[160].mxu1 %v7638_v5  ;;  %7386 = vmatprep.mubr.f32.mxu0 %v7187_v0  ;;  %v7200_v5 = vld [vmem:[#allocation9 + $0x148] sm:$0xff]  ;;  %v7655_v0 = vld [vmem:[#allocation11 + $0x148] sm:$0xff] }
 0x715   : > { %7840 = vmatprep.mubr.f32.mxu1 %v7642_v51  ;;  %v7203_v51 = vld [vmem:[#allocation9 + $0x160] sm:$0xff] }
 0x717   : > { %7387 = vmatmul.mubr.f32.gmra.mrb[162].mxu0 %v7186_v63  ;;  %v7658_v63 = vld [vmem:[#allocation11 + $0x160] sm:$0xff] }
 0x718   : > { %7841 = vmatmul.mubr.f32.gmra.mrb[162].mxu1 %v7641_v8  ;;  %7392 = vmatprep.mubr.f32.mxu0 %v7190_v53  ;;  %v7206_v8 = vld [vmem:[#allocation9 + $0x178] sm:$0xff]  ;;  %v7661_v53 = vld [vmem:[#allocation11 + $0x178] sm:$0xff] }
 0x719   : > { %7846 = vmatprep.mubr.f32.mxu1 %v7645_v40  ;;  %v7209_v40 = vld [vmem:[#allocation9 + $0x190] sm:$0xff] }
 0x71b   : > { %7393 = vmatmul.mubr.f32.gmra.mrb[164].mxu0 %v7189_v1  ;;  %v7664_v1 = vld [vmem:[#allocation11 + $0x190] sm:$0xff] }
 0x71c   : > { %7847 = vmatmul.mubr.f32.gmra.mrb[164].mxu1 %v7644_v58  ;;  %7398 = vmatprep.mubr.f32.mxu0 %v7193_v44  ;;  %v7212_v58 = vld [vmem:[#allocation9 + $0x1a8] sm:$0xff]  ;;  %v7667_v44 = vld [vmem:[#allocation11 + $0x1a8] sm:$0xff] }
 0x71d   : > { %7852 = vmatprep.mubr.f32.mxu1 %v7648_v11 }
 0x71f   : > { %7399 = vmatmul.mubr.f32.gmra.mrb[166].mxu0 %v7192_v12 }
 0x720   : > { %7853 = vmatmul.mubr.f32.gmra.mrb[166].mxu1 %v7647_v31  ;;  %7404 = vmatprep.mubr.f32.mxu0 %v7196_v55 }
 0x721   : > { %7858 = vmatprep.mubr.f32.mxu1 %v7651_v9 }
 0x723   : > { %7405 = vmatmul.mubr.f32.gmra.mrb[168].mxu0 %v7195_v57 }
 0x724   : > { %7859 = vmatmul.mubr.f32.gmra.mrb[168].mxu1 %v7650_v36  ;;  %7410 = vmatprep.mubr.f32.mxu0 %v7199_v13 }
 0x725   : > { %7864 = vmatprep.mubr.f32.mxu1 %v7654_v28 }
 0x727   : > { %7411 = vmatmul.mubr.f32.gmra.mrb[170].mxu0 %v7198_v56 }
 0x728   : > { %7865 = vmatmul.mubr.f32.gmra.mrb[170].mxu1 %v7653_v20  ;;  %7416 = vmatprep.mubr.f32.mxu0 %v7202_v46 }
 0x729   : > { %7870 = vmatprep.mubr.f32.mxu1 %v7657_v24 }
 0x72b   : > { %7417 = vmatmul.mubr.f32.gmra.mrb[172].mxu0 %v7201_v41 }
 0x72c   : > { %7871 = vmatmul.mubr.f32.gmra.mrb[172].mxu1 %v7656_v15  ;;  %7422 = vmatprep.mubr.f32.mxu0 %v7205_v47 }
 0x72d   : > { %7876 = vmatprep.mubr.f32.mxu1 %v7660_v39 }
 0x72f   : > { %7423 = vmatmul.mubr.f32.gmra.mrb[174].mxu0 %v7204_v59 }
 0x730   : > { %7877 = vmatmul.mubr.f32.gmra.mrb[174].mxu1 %v7659_v52  ;;  %7428 = vmatprep.mubr.f32.mxu0 %v7208_v27 }
 0x731   : > { %7882 = vmatprep.mubr.f32.mxu1 %v7663_v43 }
 0x733   : > { %7429 = vmatmul.mubr.f32.gmra.mrb[176].mxu0 %v7207_v18 }
 0x734   : > { %7883 = vmatmul.mubr.f32.gmra.mrb[176].mxu1 %v7662_v6  ;;  %7434 = vmatprep.mubr.f32.mxu0 %v7211_v48 }
 0x735   : > { %7888 = vmatprep.mubr.f32.mxu1 %v7666_v54 }
 0x737   : > { %7435 = vmatmul.mubr.f32.gmra.mrb[178].mxu0 %v7210_v42 }
 0x738   : > { %7889 = vmatmul.mubr.f32.gmra.mrb[178].mxu1 %v7665_v30  ;;  %7505 = vmatprep.mubr.f32.mxu0 %v15345_v14 }
 0x739   : > { %7959 = vmatprep.mubr.f32.mxu1 %v15345_v14 }
 0x73b   : > { %8561 = vmatmul.mubr.msk.f32.vlgmr.msra.gmra.mrb[144].mxu0 %vm7213_vm6, %v7161_v37 }
 0x73c   : > { %8579 = vmatmul.mubr.msk.f32.vlgmr.msra.gmra.mrb[144].mxu1 %vm7213_vm6, %v7616_v49  ;;  %7511 = vmatprep.mubr.f32.mxu0 %v15345_v14 }
 0x73d   : > { %7965 = vmatprep.mubr.f32.mxu1 %v15345_v14 }
 0x73f   : > { %8562 = vmatmul.mubr.msk.f32.gmra.mrb[146].mxu0 %vm7213_vm6, %v7164_v34 }
 0x740   : > { %8580 = vmatmul.mubr.msk.f32.gmra.mrb[146].mxu1 %vm7213_vm6, %v7619_v32  ;;  %7517 = vmatprep.mubr.f32.mxu0 %v15345_v14 }
 0x741   : > { %7971 = vmatprep.mubr.f32.mxu1 %v15345_v14 }
 0x743   : > { %8563 = vmatmul.mubr.msk.f32.gmra.mrb[148].mxu0 %vm7213_vm6, %v7167_v60 }
 0x744   : > { %8581 = vmatmul.mubr.msk.f32.gmra.mrb[148].mxu1 %vm7213_vm6, %v7622_v16  ;;  %7523 = vmatprep.mubr.f32.mxu0 %v15345_v14 }
 0x745   : > { %7977 = vmatprep.mubr.f32.mxu1 %v15345_v14 }
 0x747   : > { %8564 = vmatmul.mubr.msk.f32.gmra.mrb[150].mxu0 %vm7213_vm6, %v7170_v7 }
 0x748   : > { %8582 = vmatmul.mubr.msk.f32.gmra.mrb[150].mxu1 %vm7213_vm6, %v7625_v17  ;;  %7529 = vmatprep.mubr.f32.mxu0 %v15345_v14 }
 0x749   : > { %7983 = vmatprep.mubr.f32.mxu1 %v15345_v14 }
 0x74b   : > { %8565 = vmatmul.mubr.msk.f32.gmra.mrb[152].mxu0 %vm7213_vm6, %v7173_v19 }
 0x74c   : > { %8583 = vmatmul.mubr.msk.f32.gmra.mrb[152].mxu1 %vm7213_vm6, %v7628_v23  ;;  %7535 = vmatprep.mubr.f32.mxu0 %v15345_v14 }
 0x74d   : > { %7989 = vmatprep.mubr.f32.mxu1 %v15345_v14 }
 0x74f   : > { %8566 = vmatmul.mubr.msk.f32.gmra.mrb[154].mxu0 %vm7213_vm6, %v7176_v25 }
 0x750   : > { %8584 = vmatmul.mubr.msk.f32.gmra.mrb[154].mxu1 %vm7213_vm6, %v7631_v29  ;;  %7541 = vmatprep.mubr.f32.mxu0 %v15345_v14 }
 0x751   : > { %7995 = vmatprep.mubr.f32.mxu1 %v15345_v14 }
 0x753   : > { %8567 = vmatmul.mubr.msk.f32.gmra.mrb[156].mxu0 %vm7213_vm6, %v7179_v61 }
 0x754   : > { %8585 = vmatmul.mubr.msk.f32.gmra.mrb[156].mxu1 %vm7213_vm6, %v7634_v35  ;;  %7547 = vmatprep.mubr.f32.mxu0 %v15345_v14 }
 0x755   : > { %8001 = vmatprep.mubr.f32.mxu1 %v15345_v14 }
 0x757   : > { %8568 = vmatmul.mubr.msk.f32.gmra.mrb[158].mxu0 %vm7213_vm6, %v7182_v3 }
 0x758   : > { %8586 = vmatmul.mubr.msk.f32.gmra.mrb[158].mxu1 %vm7213_vm6, %v7637_v22  ;;  %7553 = vmatprep.mubr.f32.mxu0 %v15345_v14 }
 0x759   : > { %8007 = vmatprep.mubr.f32.mxu1 %v15345_v14 }
 0x75b   : > { %8569 = vmatmul.mubr.msk.f32.gmra.mrb[160].mxu0 %vm7213_vm6, %v7185_v33 }
 0x75c   : > { %8587 = vmatmul.mubr.msk.f32.gmra.mrb[160].mxu1 %vm7213_vm6, %v7640_v26  ;;  %7559 = vmatprep.mubr.f32.mxu0 %v15345_v14 }
 0x75d   : > { %8013 = vmatprep.mubr.f32.mxu1 %v15345_v14 }
 0x75f   : > { %8570 = vmatmul.mubr.msk.f32.gmra.mrb[162].mxu0 %vm7213_vm6, %v7188_v38 }
 0x760   : > { %8588 = vmatmul.mubr.msk.f32.gmra.mrb[162].mxu1 %vm7213_vm6, %v7643_v62  ;;  %7565 = vmatprep.mubr.f32.mxu0 %v15345_v14 }
 0x761   : > { %8019 = vmatprep.mubr.f32.mxu1 %v15345_v14 }
 0x763   : > { %8571 = vmatmul.mubr.msk.f32.gmra.mrb[164].mxu0 %vm7213_vm6, %v7191_v50 }
 0x764   : > { %8589 = vmatmul.mubr.msk.f32.gmra.mrb[164].mxu1 %vm7213_vm6, %v7646_v4  ;;  %7571 = vmatprep.mubr.f32.mxu0 %v15345_v14 }
 0x765   : > { %8025 = vmatprep.mubr.f32.mxu1 %v15345_v14 }
 0x767   : > { %8572 = vmatmul.mubr.msk.f32.gmra.mrb[166].mxu0 %vm7213_vm6, %v7194_v2 }
 0x768   : > { %8590 = vmatmul.mubr.msk.f32.gmra.mrb[166].mxu1 %vm7213_vm6, %v7649_v45  ;;  %7577 = vmatprep.mubr.f32.mxu0 %v15345_v14 }
 0x769   : > { %8031 = vmatprep.mubr.f32.mxu1 %v15345_v14 }
 0x76b   : > { %8573 = vmatmul.mubr.msk.f32.gmra.mrb[168].mxu0 %vm7213_vm6, %v7197_v21 }
 0x76c   : > { %8591 = vmatmul.mubr.msk.f32.gmra.mrb[168].mxu1 %vm7213_vm6, %v7652_v10  ;;  %7583 = vmatprep.mubr.f32.mxu0 %v15345_v14 }
 0x76d   : > { %8037 = vmatprep.mubr.f32.mxu1 %v15345_v14 }
 0x76f   : > { %8574 = vmatmul.mubr.msk.f32.gmra.mrb[170].mxu0 %vm7213_vm6, %v7200_v5 }
 0x770   : > { %8592 = vmatmul.mubr.msk.f32.gmra.mrb[170].mxu1 %vm7213_vm6, %v7655_v0  ;;  %7589 = vmatprep.mubr.f32.mxu0 %v15345_v14 }
 0x771   : > { %8043 = vmatprep.mubr.f32.mxu1 %v15345_v14 }
 0x773   : > { %8575 = vmatmul.mubr.msk.f32.gmra.mrb[172].mxu0 %vm7213_vm6, %v7203_v51 }
 0x774   : > { %8593 = vmatmul.mubr.msk.f32.gmra.mrb[172].mxu1 %vm7213_vm6, %v7658_v63  ;;  %7595 = vmatprep.mubr.f32.mxu0 %v15345_v14 }
 0x775   : > { %8049 = vmatprep.mubr.f32.mxu1 %v15345_v14 }
 0x777   : > { %8576 = vmatmul.mubr.msk.f32.gmra.mrb[174].mxu0 %vm7213_vm6, %v7206_v8 }
 0x778   : > { %8594 = vmatmul.mubr.msk.f32.gmra.mrb[174].mxu1 %vm7213_vm6, %v7661_v53  ;;  %7601 = vmatprep.mubr.f32.mxu0 %v15345_v14 }
 0x779   : > { %8055 = vmatprep.mubr.f32.mxu1 %v15345_v14 }
 0x77b   : > { %8577 = vmatmul.mubr.msk.f32.gmra.mrb[176].mxu0 %vm7213_vm6, %v7209_v40 }
 0x77c   : > { %8595 = vmatmul.mubr.msk.f32.gmra.mrb[176].mxu1 %vm7213_vm6, %v7664_v1  ;;  %7607 = vmatprep.mubr.f32.mxu0 %v15345_v14 }
 0x77d   : > { %8061 = vmatprep.mubr.f32.mxu1 %v15345_v14 }
 0x77f   : > { %8578 = vmatmul.mubr.msk.f32.gmra.mrb[178].mxu0 %vm7213_vm6, %v7212_v58 }
 0x780   : > { %8596 = vmatmul.mubr.msk.f32.gmra.mrb[178].mxu1 %vm7213_vm6, %v7667_v44 }
 0x80e   : > { %v7507_v11 = vpop.f32.mrb[144].mxu0 }
 0x80f   : > { %v7961_v12 = vpop.f32.mrb[144].mxu1  ;;  %v7509_v31 = vpop.f32.mrb[145].mxu0 }
 0x810   : > { %v8068_v55 = vmax.f32 %v7507_v11, %v7961_v12  ;;  %v7963_v9 = vpop.f32.mrb[145].mxu1 }
 0x811   : > { %v8069_v57 = vmax.f32 %v7509_v31, %v7963_v9 }
 0x812   : > { %8104 = vst [vmem:[%s14852_s15] sm:$0xff] %v8068_v55  ;;  %v7513_v36 = vpop.f32.mrb[146].mxu0 }
 0x813   : > { %8106 = vst.msk [vmem:[%s14852_s15 + $0x8] sm:$0xff] %vm8105_vm7, %v8069_v57  ;;  %v7967_v13 = vpop.f32.mrb[146].mxu1  ;;  %v7515_v28 = vpop.f32.mrb[147].mxu0 }
 0x814   : > { %v8070_v56 = vmax.f32 %v7513_v36, %v7967_v13  ;;  %v7969_v20 = vpop.f32.mrb[147].mxu1 }
 0x815   : > { %v8071_v46 = vmax.f32 %v7515_v28, %v7969_v20 }
 0x816   : > { %8107 = vst [vmem:[%s14852_s15 + $0x10] sm:$0xff] %v8070_v56  ;;  %v7519_v24 = vpop.f32.mrb[148].mxu0 }
 0x817   : > { %8108 = vst.msk [vmem:[%s14852_s15 + $0x18] sm:$0xff] %vm8105_vm7, %v8071_v46  ;;  %v7973_v41 = vpop.f32.mrb[148].mxu1  ;;  %v7521_v15 = vpop.f32.mrb[149].mxu0 }
 0x818   : > { %v8072_v47 = vmax.f32 %v7519_v24, %v7973_v41  ;;  %v7975_v39 = vpop.f32.mrb[149].mxu1 }
 0x819   : > { %v8073_v59 = vmax.f32 %v7521_v15, %v7975_v39 }
 0x81a   : > { %8109 = vst [vmem:[%s14852_s15 + $0x20] sm:$0xff] %v8072_v47  ;;  %v7525_v52 = vpop.f32.mrb[150].mxu0 }
 0x81b   : > { %8110 = vst.msk [vmem:[%s14852_s15 + $0x28] sm:$0xff] %vm8105_vm7, %v8073_v59  ;;  %v7979_v27 = vpop.f32.mrb[150].mxu1  ;;  %v7527_v43 = vpop.f32.mrb[151].mxu0 }
 0x81c   : > { %v8074_v18 = vmax.f32 %v7525_v52, %v7979_v27  ;;  %v7981_v6 = vpop.f32.mrb[151].mxu1 }
 0x81d   : > { %v8075_v48 = vmax.f32 %v7527_v43, %v7981_v6 }
 0x81e   : > { %8597 = vst [vmem:[%s14852_s15 + $0x30] sm:$0xff] %v8074_v18  ;;  %v7531_v54 = vpop.f32.mrb[152].mxu0 }
 0x81f   : > { %8598 = vst.msk [vmem:[%s14852_s15 + $0x38] sm:$0xff] %vm8105_vm7, %v8075_v48  ;;  %v7985_v42 = vpop.f32.mrb[152].mxu1  ;;  %v7533_v30 = vpop.f32.mrb[153].mxu0 }
 0x820   : > { %v8076_v14 = vmax.f32 %v7531_v54, %v7985_v42  ;;  %v7987_v37 = vpop.f32.mrb[153].mxu1 }
 0x821   : > { %v8077_v49 = vmax.f32 %v7533_v30, %v7987_v37 }
 0x822   : > { %8599 = vst [vmem:[%s14852_s15 + $0x40] sm:$0xff] %v8076_v14  ;;  %v7537_v34 = vpop.f32.mrb[154].mxu0 }
 0x823   : > { %8600 = vst.msk [vmem:[%s14852_s15 + $0x48] sm:$0xff] %vm8105_vm7, %v8077_v49  ;;  %v7991_v32 = vpop.f32.mrb[154].mxu1  ;;  %v7539_v60 = vpop.f32.mrb[155].mxu0 }
 0x824   : > { %v8078_v16 = vmax.f32 %v7537_v34, %v7991_v32  ;;  %v7993_v7 = vpop.f32.mrb[155].mxu1 }
 0x825   : > { %v8079_v17 = vmax.f32 %v7539_v60, %v7993_v7 }
 0x826   : > { %8601 = vst [vmem:[%s14852_s15 + $0x50] sm:$0xff] %v8078_v16  ;;  %v7543_v19 = vpop.f32.mrb[156].mxu0 }
 0x827   : > { %8602 = vst.msk [vmem:[%s14852_s15 + $0x58] sm:$0xff] %vm8105_vm7, %v8079_v17  ;;  %v7997_v23 = vpop.f32.mrb[156].mxu1  ;;  %v7545_v25 = vpop.f32.mrb[157].mxu0 }
 0x828   : > { %v8080_v29 = vmax.f32 %v7543_v19, %v7997_v23  ;;  %v7999_v61 = vpop.f32.mrb[157].mxu1 }
 0x829   : > { %v8081_v35 = vmax.f32 %v7545_v25, %v7999_v61 }
 0x82a   : > { %8603 = vst [vmem:[%s14852_s15 + $0x60] sm:$0xff] %v8080_v29  ;;  %v7549_v3 = vpop.f32.mrb[158].mxu0 }
 0x82b   : > { %8604 = vst.msk [vmem:[%s14852_s15 + $0x68] sm:$0xff] %vm8105_vm7, %v8081_v35  ;;  %v8003_v22 = vpop.f32.mrb[158].mxu1  ;;  %v7551_v33 = vpop.f32.mrb[159].mxu0 }
 0x82c   : > { %v8082_v26 = vmax.f32 %v7549_v3, %v8003_v22  ;;  %v8005_v38 = vpop.f32.mrb[159].mxu1 }
 0x82d   : > { %v8083_v62 = vmax.f32 %v7551_v33, %v8005_v38 }
 0x82e   : > { %8605 = vst [vmem:[%s14852_s15 + $0x70] sm:$0xff] %v8082_v26  ;;  %v7555_v50 = vpop.f32.mrb[160].mxu0 }
 0x82f   : > { %8606 = vst.msk [vmem:[%s14852_s15 + $0x78] sm:$0xff] %vm8105_vm7, %v8083_v62  ;;  %v8009_v4 = vpop.f32.mrb[160].mxu1  ;;  %v7557_v2 = vpop.f32.mrb[161].mxu0 }
 0x830   : > { %v8084_v45 = vmax.f32 %v7555_v50, %v8009_v4  ;;  %v8011_v21 = vpop.f32.mrb[161].mxu1 }
 0x831   : > { %v8085_v10 = vmax.f32 %v7557_v2, %v8011_v21 }
 0x832   : > { %8607 = vst [vmem:[%s14852_s15 + $0x80] sm:$0xff] %v8084_v45  ;;  %v7561_v5 = vpop.f32.mrb[162].mxu0 }
 0x833   : > { %8608 = vst.msk [vmem:[%s14852_s15 + $0x88] sm:$0xff] %vm8105_vm7, %v8085_v10  ;;  %v8015_v0 = vpop.f32.mrb[162].mxu1  ;;  %v7563_v51 = vpop.f32.mrb[163].mxu0 }
 0x834   : > { %v8086_v63 = vmax.f32 %v7561_v5, %v8015_v0  ;;  %v8017_v8 = vpop.f32.mrb[163].mxu1 }
 0x835   : > { %v8087_v53 = vmax.f32 %v7563_v51, %v8017_v8 }
 0x836   : > { %8609 = vst [vmem:[%s14852_s15 + $0x90] sm:$0xff] %v8086_v63  ;;  %v7567_v40 = vpop.f32.mrb[164].mxu0 }
 0x837   : > { %8610 = vst.msk [vmem:[%s14852_s15 + $0x98] sm:$0xff] %vm8105_vm7, %v8087_v53  ;;  %v8021_v1 = vpop.f32.mrb[164].mxu1  ;;  %v7569_v58 = vpop.f32.mrb[165].mxu0 }
 0x838   : > { %v8088_v44 = vmax.f32 %v7567_v40, %v8021_v1  ;;  %v8023_v11 = vpop.f32.mrb[165].mxu1 }
 0x839   : > { %v8089_v12 = vmax.f32 %v7569_v58, %v8023_v11 }
 0x83a   : > { %8611 = vst [vmem:[%s14852_s15 + $0xa0] sm:$0xff] %v8088_v44  ;;  %v7573_v31 = vpop.f32.mrb[166].mxu0 }
 0x83b   : > { %8612 = vst.msk [vmem:[%s14852_s15 + $0xa8] sm:$0xff] %vm8105_vm7, %v8089_v12  ;;  %v8027_v55 = vpop.f32.mrb[166].mxu1  ;;  %v7575_v9 = vpop.f32.mrb[167].mxu0 }
 0x83c   : > { %v8090_v57 = vmax.f32 %v7573_v31, %v8027_v55  ;;  %v8029_v36 = vpop.f32.mrb[167].mxu1 }
 0x83d   : > { %v8091_v13 = vmax.f32 %v7575_v9, %v8029_v36 }
 0x83e   : > { %8613 = vst [vmem:[%s14852_s15 + $0xb0] sm:$0xff] %v8090_v57  ;;  %v7579_v28 = vpop.f32.mrb[168].mxu0 }
 0x83f   : > { %8614 = vst.msk [vmem:[%s14852_s15 + $0xb8] sm:$0xff] %vm8105_vm7, %v8091_v13  ;;  %v8033_v56 = vpop.f32.mrb[168].mxu1  ;;  %v7581_v20 = vpop.f32.mrb[169].mxu0 }
 0x840   : > { %v8092_v46 = vmax.f32 %v7579_v28, %v8033_v56  ;;  %v8035_v24 = vpop.f32.mrb[169].mxu1 }
 0x841   : > { %v8093_v41 = vmax.f32 %v7581_v20, %v8035_v24 }
 0x842   : > { %8615 = vst [vmem:[%s14852_s15 + $0xc0] sm:$0xff] %v8092_v46  ;;  %v7585_v15 = vpop.f32.mrb[170].mxu0 }
 0x843   : > { %8616 = vst.msk [vmem:[%s14852_s15 + $0xc8] sm:$0xff] %vm8105_vm7, %v8093_v41  ;;  %v8039_v47 = vpop.f32.mrb[170].mxu1  ;;  %v7587_v39 = vpop.f32.mrb[171].mxu0 }
 0x844   : > { %v8094_v59 = vmax.f32 %v7585_v15, %v8039_v47  ;;  %v8041_v52 = vpop.f32.mrb[171].mxu1 }
 0x845   : > { %v8095_v27 = vmax.f32 %v7587_v39, %v8041_v52 }
 0x846   : > { %8617 = vst [vmem:[%s14852_s15 + $0xd0] sm:$0xff] %v8094_v59  ;;  %v7591_v43 = vpop.f32.mrb[172].mxu0 }
 0x847   : > { %8618 = vst.msk [vmem:[%s14852_s15 + $0xd8] sm:$0xff] %vm8105_vm7, %v8095_v27  ;;  %v8045_v18 = vpop.f32.mrb[172].mxu1  ;;  %v7593_v6 = vpop.f32.mrb[173].mxu0 }
 0x848   : > { %v8096_v48 = vmax.f32 %v7591_v43, %v8045_v18  ;;  %v8047_v54 = vpop.f32.mrb[173].mxu1 }
 0x849   : > { %v8097_v42 = vmax.f32 %v7593_v6, %v8047_v54 }
 0x84a   : > { %8619 = vst [vmem:[%s14852_s15 + $0xe0] sm:$0xff] %v8096_v48  ;;  %v7597_v30 = vpop.f32.mrb[174].mxu0 }
 0x84b   : > { %8620 = vst.msk [vmem:[%s14852_s15 + $0xe8] sm:$0xff] %vm8105_vm7, %v8097_v42  ;;  %v8051_v14 = vpop.f32.mrb[174].mxu1  ;;  %v7599_v37 = vpop.f32.mrb[175].mxu0 }
 0x84c   : > { %v8098_v49 = vmax.f32 %v7597_v30, %v8051_v14  ;;  %v8053_v34 = vpop.f32.mrb[175].mxu1 }
 0x84d   : > { %v8099_v32 = vmax.f32 %v7599_v37, %v8053_v34 }
 0x84e   : > { %8621 = vst [vmem:[%s14852_s15 + $0xf0] sm:$0xff] %v8098_v49  ;;  %v7603_v60 = vpop.f32.mrb[176].mxu0 }
 0x84f   : > { %8622 = vst.msk [vmem:[%s14852_s15 + $0xf8] sm:$0xff] %vm8105_vm7, %v8099_v32  ;;  %v8057_v16 = vpop.f32.mrb[176].mxu1  ;;  %v7605_v7 = vpop.f32.mrb[177].mxu0 }
 0x850   : > { %v8100_v17 = vmax.f32 %v7603_v60, %v8057_v16  ;;  %v8059_v19 = vpop.f32.mrb[177].mxu1 }
 0x851   : > { %v8101_v23 = vmax.f32 %v7605_v7, %v8059_v19 }
 0x852   : > { %8623 = vst [vmem:[%s14852_s15 + $0x100] sm:$0xff] %v8100_v17  ;;  %v7609_v25 = vpop.f32.mrb[178].mxu0 }
 0x853   : > { %8624 = vst.msk [vmem:[%s14852_s15 + $0x108] sm:$0xff] %vm8105_vm7, %v8101_v23  ;;  %v8063_v29 = vpop.f32.mrb[178].mxu1  ;;  %v7611_v61 = vpop.f32.mrb[179].mxu0 }
 0x854   : > { %v8102_v35 = vmax.f32 %v7609_v25, %v8063_v29  ;;  %v8065_v3 = vpop.f32.mrb[179].mxu1 }
 0x855   : > { %v8103_v22 = vmax.f32 %v7611_v61, %v8065_v3 }
 0x856   : > { %8625 = vst [vmem:[%s14852_s15 + $0x110] sm:$0xff] %v8102_v35 }
 0x857   : > { %8626 = vst.msk [vmem:[%s14852_s15 + $0x118] sm:$0xff] %vm8105_vm7, %v8103_v22 }
 0x858   : > { %s15346_s3 = sld [smem:[#allocation23_spill]]  ;;  %s8634_s4 = smul.u32 6, %s15150_s1 }
 0x859   : > { %s8179_s18 = sshll.u32 %s14852_s15, 4  ;;  %s10742_s7 = smov 768   ;;  %s8180_s18 = int_to_ptr.vmem [resolvable:$true] %s8179_s18 }
 0x85a   : > { %p15347_p0 = scmp.ne.s32.totalorder %s15143_s2, 0  ;;  %s10743_s27 = smov 4608  }
 0x85b   : > { %s15348_s17 = sld [smem:[#allocation68_spill]]  ;;  %s10744_s5 = smov 3  }
 0x85c   : > { %10230 = sst [smem:[#allocation16]] (%p15347_p0), %s10742_s7  ;;  %s10745_s1 = smov 256  }
 0x85d   : > { %10231 = sst [smem:[#allocation16 + $0x1]] (%p15347_p0), %s10743_s27  ;;  %s10746_s15 = smov 16  }
 0x85e   : > { %s10207_s14 = smul.u32 216, %s15346_s3  ;;  %10232 = sst [smem:[#allocation16 + $0x2]] (%p15347_p0), %s10744_s5 }
 0x85f   : > { %10233 = sst [smem:[#allocation16 + $0x3]] (%p15347_p0), %s10745_s1  ;;  %s10747_s3 = smov [#allocation15]  }
 0x860   : > { %s8160_s19 = sadd.s32 %s10207_s14, %s8634_s4  ;;  %10234 = sst [smem:[#allocation16 + $0x4]] (%p15347_p0), %s10745_s1 }
 0x861   : > { %s8628_s13 = sshll.u32 %s8160_s19, 7  ;;  %10235 = sst [smem:[#allocation16 + $0x5]] (%p15347_p0), %s10746_s15 }
 0x862   : > { %s8162_s0 = scalar_lea.hbm %s15348_s17, %s8628_s13  ;;  %s10748_s4 = smov 0  }
 0x863   : > { %10236 = dma.general (%p15347_p0), %s8180_s18, 4608, %s8162_s0, %s8147_s21, %s10747_s3, [#allocation16], %s10748_s4, 0  }
 0x864 PF: > { %p10273_p10 = scmp.ge.s32.totalorder %s10720_s11, 2  ;;  %s8207_s14 = sand.u32 1, %s10680_s24  }
 0x865   : > { %p15349_p2 = scmp.ne.s32.totalorder %s15144_s6, 0  ;;  %s8208_s5 = scalar_lea.sflag [#allocation5], %s8207_s14 }
 0x867   : > { %p10259_p6 = pnand %p10273_p10, %p15349_p2 }
 0x869   : > { %10675 = dma.done.wait (!%p10259_p6), %s8208_s5, 4608  }
 0x86a   : > { %10677 = vsyncadd (!%p10259_p6), %s8208_s5, 4294962688  ;;  %s26_s11 = sadd.s32 1, %s10720_s11   ;;  %s15350_s2 = smov %s15366_s8 }
 0x86b   : > { %p23_p4 = scmp.ge.s32.totalorder %s26_s11, 14   ;;  %s15351_s24 = smov %s10684_s25 }
 0x86c   : > { %s15352_s25 = smov %s10688_s26  ;;  %s15353_s26 = smov %s11039_s23 }
 0x86d   : > { %s15354_s27 = smov %s10696_s28  ;;  %s15355_s28 = smov %s10700_s29 }
 0x86e   : > { %s15356_s29 = smov %s11036_s12  ;;  %s15357_s30 = smov %s10712_s9 }
 0x86f   : > { %s15358_s8 = smov %s10716_s10  ;;  %s15359_s9 = smov %s15362_s20 }
 0x870   : > { %s15360_s10 = smov %s15350_s2  ;;  %25 = sbr.rel (!%p23_p4) target bundleno = 21 (0x15), region = 127 }
 0x877   :  { %8213 = vsyncpa [#allocation4], 1 }
 0x878   :  { %8215 = vsyncpa [#allocation4 + $0x1], 1 }
 0x879   :  { %8216 = vsyncpa [#allocation7], 1 }
 0x87a   :  { %8217 = vsyncpa [#allocation10], 1 }
 0x87b   :  { %8218 = vsyncpa [#allocation13], 1 }
 0x87c   :  { %8220 = vsyncpa [#allocation13 + $0x1], 1 }
 0x87d   :  { %8221 = vsyncpa [#allocation5], 1 }
 0x87e   :  { %8223 = vsyncpa [#allocation5 + $0x1], 1 }

</bundles_post_ra>
